<compile_context>
chip_gen: v5e
topology: v5e:2x2
jax: 0.10.0
libtpu: 0.0.40
codegen_flags: <defaults>
</compile_context>

<pallas_src>
import math

import jax
import jax.numpy as jnp
from jax.experimental import pallas as pl
from jax.experimental.pallas import tpu as pltpu


# ----------------------------------------------------------------------------
# Kernel
# ----------------------------------------------------------------------------
def make_decoder_layer_kernel(nhead: int, d_model: int, d_ff: int,
                              tq: int, tkv_enc: int, n_enc_tiles: int,
                              ff_chunk: int):
    head_dim = d_model // nhead
    scale = 1.0 / math.sqrt(head_dim)
    eps = 1e-5
    bf16 = jnp.bfloat16

    def layer_norm(h, g, b):
        mu = jnp.mean(h, axis=-1, keepdims=True)
        var = jnp.mean(jnp.square(h - mu), axis=-1, keepdims=True)
        return (h - mu) * jax.lax.rsqrt(var + eps) * g + b

    def flash_attend(q, k_ref, v_ref, n_tiles, tkv, *, causal, q_start):
        """q: (tq, H, hd) bf16, softmax scale already folded in.
        k_ref / v_ref: (S_kv, D) bf16 VMEM refs (K/V precomputed outside).
        Online softmax over KV tiles; score/prob temporaries stay (H, tq, tkv).
        """
        m0 = jnp.full((nhead, tq, 1), -1e30, jnp.float32)
        l0 = jnp.zeros((nhead, tq, 1), jnp.float32)
        a0 = jnp.zeros((nhead, tq, head_dim), jnp.float32)

        def body(j, carry):
            m, l, acc = carry
            start = pl.multiple_of(j * tkv, tkv)
            k_t = k_ref[pl.ds(start, tkv), :].reshape(tkv, nhead, head_dim)
            v_t = v_ref[pl.ds(start, tkv), :].reshape(tkv, nhead, head_dim)
            s = jnp.einsum('qhd,khd->hqk', q, k_t,
                           preferred_element_type=jnp.float32)
            if causal:
                row = jax.lax.broadcasted_iota(jnp.int32, (tq, tkv), 0) + q_start
                col = jax.lax.broadcasted_iota(jnp.int32, (tq, tkv), 1) + start
                s = jnp.where((col <= row)[None, :, :], s, -1e30)
            m_new = jnp.maximum(m, jnp.max(s, axis=-1, keepdims=True))
            alpha = jnp.exp(m - m_new)
            p = jnp.exp(s - m_new)
            l_new = alpha * l + jnp.sum(p, axis=-1, keepdims=True)
            acc_new = alpha * acc + jnp.einsum(
                'hqk,khd->hqd', p.astype(bf16), v_t,
                preferred_element_type=jnp.float32)
            return m_new, l_new, acc_new

        m, l, acc = jax.lax.fori_loop(0, n_tiles, body, (m0, l0, a0))
        out = acc * pl.reciprocal(l, approx=True)          # (H, tq, hd)
        return out.transpose(1, 0, 2).reshape(tq, d_model)  # (tq, D) f32

    def kernel(x_ref, ks_ref, vs_ref, kc_ref, vc_ref,
               wq1_ref, bq1_ref, wo1_ref, bo1_ref,
               wq2_ref, bq2_ref, wo2_ref, bo2_ref,
               w1_ref, b1_ref, w2_ref, b2_ref,
               g1_ref, be1_ref, g2_ref, be2_ref, g3_ref, be3_ref,
               out_ref):
        qi = pl.program_id(1)
        q_start = pl.multiple_of(qi * tq, tq)

        x = x_ref[...].astype(jnp.float32)                 # (tq, D) residual

        # --- causal self-attention (K/V precomputed per layer) + add & norm1
        q = (jnp.dot(x.astype(bf16), wq1_ref[...],
                     preferred_element_type=jnp.float32) + bq1_ref[...]) * scale
        q = q.astype(bf16).reshape(tq, nhead, head_dim)
        ctx = flash_attend(q, ks_ref, vs_ref, qi + 1, tq,
                           causal=True, q_start=q_start)
        sa = jnp.dot(ctx.astype(bf16), wo1_ref[...],
                     preferred_element_type=jnp.float32) + bo1_ref[...]
        h = layer_norm(x + sa, g1_ref[...], be1_ref[...])

        # --- cross-attention over encoder memory + add & norm2 --------------
        q2 = (jnp.dot(h.astype(bf16), wq2_ref[...],
                      preferred_element_type=jnp.float32) + bq2_ref[...]) * scale
        q2 = q2.astype(bf16).reshape(tq, nhead, head_dim)
        ctx2 = flash_attend(q2, kc_ref, vc_ref, n_enc_tiles, tkv_enc,
                            causal=False, q_start=0)
        ca = jnp.dot(ctx2.astype(bf16), wo2_ref[...],
                     preferred_element_type=jnp.float32) + bo2_ref[...]
        h = layer_norm(h + ca, g2_ref[...], be2_ref[...])

        # --- FFN, streamed over dim_feedforward in chunks + add & norm3 -----
        hb = h.astype(bf16)
        n_fc = d_ff // ff_chunk

        def ffn_step(i, acc):
            fc = i * ff_chunk
            if not isinstance(fc, int):
                fc = pl.multiple_of(fc, ff_chunk)
            f = jnp.dot(hb, w1_ref[:, pl.ds(fc, ff_chunk)],
                        preferred_element_type=jnp.float32)
            f = jnp.maximum(f + b1_ref[:, pl.ds(fc, ff_chunk)], 0.0)  # ReLU
            return acc + jnp.dot(f.astype(bf16),
                                 w2_ref[pl.ds(fc, ff_chunk), :],
                                 preferred_element_type=jnp.float32)

        acc0 = jnp.zeros((tq, d_model), jnp.float32)
        if n_fc <= 4:                      # short: static unroll is fine
            ff = acc0
            for i in range(n_fc):
                ff = ffn_step(i, ff)
        else:                              # long: bound live ranges
            ff = jax.lax.fori_loop(0, n_fc, ffn_step, acc0)
        ff = ff + b2_ref[...]
        h = layer_norm(h + ff, g3_ref[...], be3_ref[...])

        out_ref[...] = h.astype(out_ref.dtype)

    return kernel


# ----------------------------------------------------------------------------
# Wrapper for one DecoderLayer
# ----------------------------------------------------------------------------
def decoder_layer(dec, enc, params, *, nhead, tq=None, ff_chunk=None):
    B, S_dec, D = dec.shape
    _, S_enc, _ = enc.shape
    F = params["w1"].shape[1]
    bf16 = jnp.bfloat16

    if tq is None:
        tq = next((c for c in (256, 128, 64, 32, 16, 8) if S_dec % c == 0),
                  S_dec)
    assert S_dec % tq == 0, "query tile must divide decoder sequence length"
    n_qt = S_dec // tq

    tkv_enc = next((c for c in (512, 256, 128, 64, 32, 16, 8)
                    if S_enc % c == 0), S_enc)
    n_enc_tiles = S_enc // tkv_enc

    if ff_chunk is None:
        ff_chunk = min(F, 1024)
    assert F % ff_chunk == 0

    # K/V projections hoisted out of the kernel: they only depend on the layer
    # inputs, so one plain XLA matmul per layer instead of once per query tile.
    k_self = (jnp.einsum('bsd,df->bsf', dec, params['wk1'])
              + params['bk1']).astype(bf16)
    v_self = (jnp.einsum('bsd,df->bsf', dec, params['wv1'])
              + params['bv1']).astype(bf16)
    k_cross = (jnp.einsum('bsd,df->bsf', enc, params['wk2'])
               + params['bk2']).astype(bf16)
    v_cross = (jnp.einsum('bsd,df->bsf', enc, params['wv2'])
               + params['bv2']).astype(bf16)

    kernel = make_decoder_layer_kernel(nhead, D, F, tq, tkv_enc, n_enc_tiles,
                                       ff_chunk)

    operands = [
        dec, k_self, v_self, k_cross, v_cross,
        params['wq1'].astype(bf16), params['bq1'],
        params['wo1'].astype(bf16), params['bo1'],
        params['wq2'].astype(bf16), params['bq2'],
        params['wo2'].astype(bf16), params['bo2'],
        params['w1'].astype(bf16), params['b1'],
        params['w2'].astype(bf16), params['b2'],
        params['g1'], params['be1'], params['g2'], params['be2'],
        params['g3'], params['be3'],
    ]

    def nbytes(shape, dt):
        return math.prod(shape) * jnp.dtype(dt).itemsize

    def build(single_buffer_weights):
        # Constant operands: block index never changes -> single-buffer them.
        kw = ({"pipeline_mode": pl.Buffered(1)}
              if single_buffer_weights else {})

        def const_spec(shape):
            nd = len(shape)
            return pl.BlockSpec(shape, lambda b, qi, _nd=nd: (0,) * _nd, **kw)

        in_specs = [
            pl.BlockSpec((None, tq, D), lambda b, qi: (b, qi, 0)),    # dec tile
            pl.BlockSpec((None, S_dec, D), lambda b, qi: (b, 0, 0)),  # k_self
            pl.BlockSpec((None, S_dec, D), lambda b, qi: (b, 0, 0)),  # v_self
            pl.BlockSpec((None, S_enc, D), lambda b, qi: (b, 0, 0)),  # k_cross
            pl.BlockSpec((None, S_enc, D), lambda b, qi: (b, 0, 0)),  # v_cross
            const_spec((D, D)), const_spec((1, D)),   # wq1, bq1
            const_spec((D, D)), const_spec((1, D)),   # wo1, bo1
            const_spec((D, D)), const_spec((1, D)),   # wq2, bq2
            const_spec((D, D)), const_spec((1, D)),   # wo2, bo2
            const_spec((D, F)), const_spec((1, F)),   # w1, b1
            const_spec((F, D)), const_spec((1, D)),   # w2, b2
            const_spec((1, D)), const_spec((1, D)),   # g1, be1
            const_spec((1, D)), const_spec((1, D)),   # g2, be2
            const_spec((1, D)), const_spec((1, D)),   # g3, be3
        ]

        # VMEM budget: pipeline blocks (weights x1 when single-buffered,
        # activations x2) plus the in-kernel f32 intermediates.
        wmult = 1 if single_buffer_weights else 2
        est = (
            2 * 2 * nbytes((tq, D), dec.dtype)                       # x + out
            + 2 * 2 * (nbytes((S_dec, D), bf16) + nbytes((S_enc, D), bf16))
            + wmult * (4 * nbytes((D, D), bf16)
                       + nbytes((D, F), bf16) + nbytes((F, D), bf16)
                       + nbytes((1, F), jnp.float32)
                       + 11 * nbytes((1, D), jnp.float32))
            + 4 * (8 * tq * D                                        # q/h/ff
                   + 4 * nhead * tq * max(tq, tkv_enc)               # s/p/acc
                   + 2 * tq * ff_chunk)
            + (4 << 20)
        )
        try:
            cap = int(pltpu.get_tpu_info().vmem_capacity_bytes)
        except Exception:
            cap = 64 << 20
        vmem_limit = int(min(max(est, 32 << 20), cap - (12 << 20)))

        return pl.pallas_call(
            kernel,
            out_shape=jax.ShapeDtypeStruct((B, S_dec, D), dec.dtype),
            grid_spec=pltpu.PrefetchScalarGridSpec(
                num_scalar_prefetch=0,
                grid=(B, n_qt),
                in_specs=in_specs,
                out_specs=pl.BlockSpec((None, tq, D), lambda b, qi: (b, qi, 0)),
            ),
            compiler_params=pltpu.CompilerParams(
                dimension_semantics=("parallel", "parallel"),
                vmem_limit_bytes=vmem_limit),
        )

    try:
        return build(True)(*operands)
    except Exception:
        # Fallback: default double buffering if Buffered(1) is unsupported.
        return build(False)(*operands)


# ----------------------------------------------------------------------------
# Decoder = positional encoding + n_layers x DecoderLayer
# ----------------------------------------------------------------------------
def sinusoidal_position_encoding(seq_len, d_model):
    pos = jnp.arange(seq_len, dtype=jnp.float32)[:, None]
    i = jnp.arange(0, d_model, 2, dtype=jnp.float32)[None, :]
    angle = pos * jnp.exp(-(math.log(10000.0) / d_model) * i)
    pe = jnp.zeros((seq_len, d_model), jnp.float32)
    pe = pe.at[:, 0::2].set(jnp.sin(angle))
    pe = pe.at[:, 1::2].set(jnp.cos(angle))
    return pe


def decoder_forward(trg, enc, layer_params, *, nhead, tq=None):
    B, S, D = trg.shape
    # PositionEncoding (dropout = identity at inference); trivial elementwise
    # add kept in plain JAX — XLA fuses it, no kernel needed.
    x = trg + sinusoidal_position_encoding(S, D)[None, :, :]
    for p in layer_params:
        x = decoder_layer(x, enc, p, nhead=nhead, tq=tq)
    return x


def init_decoder_params(key, n_layers, d_model, d_ff):
    std = 0.02

    def lin(k, din, dout):
        w = jax.random.normal(k, (din, dout), jnp.float32) * std
        b = jnp.zeros((1, dout), jnp.float32)
        return w, b

    layers = []
    for lk in jax.random.split(key, n_layers):
        ks = jax.random.split(lk, 10)
        p = {}
        for name, k in zip(("q1", "k1", "v1", "o1", "q2", "k2", "v2", "o2"),
                           ks[:8]):
            w, b = lin(k, d_model, d_model)
            p["w" + name] = w
            p["b" + name] = b
        p["w1"], p["b1"] = lin(ks[8], d_model, d_ff)
        p["w2"], p["b2"] = lin(ks[9], d_ff, d_model)
        for i in ("1", "2", "3"):
            p["g" + i] = jnp.ones((1, d_model), jnp.float32)
            p["be" + i] = jnp.zeros((1, d_model), jnp.float32)
        layers.append(p)
    return layers


if __name__ == "__main__":
    B, S_dec, S_enc = 2, 16, 16
    d_model, nhead, dim_ff, n_layers = 128, 4, 256, 2

    key = jax.random.PRNGKey(0)
    k_t, k_e, k_p = jax.random.split(key, 3)
    trg = jax.random.normal(k_t, (B, S_dec, d_model), jnp.float32)
    enc = jax.random.normal(k_e, (B, S_enc, d_model), jnp.float32)
    layer_params = init_decoder_params(k_p, n_layers, d_model, dim_ff)

    out = decoder_forward(trg, enc, layer_params, nhead=nhead, tq=8)
    jax.block_until_ready(out)
    assert out.shape == (B, S_dec, d_model)
    print("KERNEL_OK")
</pallas_src>

<mosaic_0001>
module attributes {stable_mosaic.version = 11 : i64} {
  func.func @kernel(%arg0: i32, %arg1: i32, %arg2: memref<1x8x128xf32, #tpu.memory_space<vmem>>, %arg3: memref<1x16x128xbf16, #tpu.memory_space<vmem>>, %arg4: memref<1x16x128xbf16, #tpu.memory_space<vmem>>, %arg5: memref<1x16x128xbf16, #tpu.memory_space<vmem>>, %arg6: memref<1x16x128xbf16, #tpu.memory_space<vmem>>, %arg7: memref<128x128xbf16, #tpu.memory_space<vmem>>, %arg8: memref<1x128xf32, #tpu.memory_space<vmem>>, %arg9: memref<128x128xbf16, #tpu.memory_space<vmem>>, %arg10: memref<1x128xf32, #tpu.memory_space<vmem>>, %arg11: memref<128x128xbf16, #tpu.memory_space<vmem>>, %arg12: memref<1x128xf32, #tpu.memory_space<vmem>>, %arg13: memref<128x128xbf16, #tpu.memory_space<vmem>>, %arg14: memref<1x128xf32, #tpu.memory_space<vmem>>, %arg15: memref<128x256xbf16, #tpu.memory_space<vmem>>, %arg16: memref<1x256xf32, #tpu.memory_space<vmem>>, %arg17: memref<256x128xbf16, #tpu.memory_space<vmem>>, %arg18: memref<1x128xf32, #tpu.memory_space<vmem>>, %arg19: memref<1x128xf32, #tpu.memory_space<vmem>>, %arg20: memref<1x128xf32, #tpu.memory_space<vmem>>, %arg21: memref<1x128xf32, #tpu.memory_space<vmem>>, %arg22: memref<1x128xf32, #tpu.memory_space<vmem>>, %arg23: memref<1x128xf32, #tpu.memory_space<vmem>>, %arg24: memref<1x128xf32, #tpu.memory_space<vmem>>, %arg25: memref<1x8x128xf32, #tpu.memory_space<vmem>>) attributes {dimension_semantics = [#tpu.dimension_semantics<parallel>, #tpu.dimension_semantics<parallel>], iteration_bounds = array<i64: 2, 2>, scalar_prefetch = 0 : i64, scratch_operands = 0 : i64, tpu.core_type = #tpu.core_type<tc>, window_params = [{transform_indices = @transform_0, window_bounds = array<i64: 1, 8, 128>}, {transform_indices = @transform_1, window_bounds = array<i64: 1, 16, 128>}, {transform_indices = @transform_2, window_bounds = array<i64: 1, 16, 128>}, {transform_indices = @transform_3, window_bounds = array<i64: 1, 16, 128>}, {transform_indices = @transform_4, window_bounds = array<i64: 1, 16, 128>}, {pipeline_mode = #tpu.pipeline_mode<synchronous>, transform_indices = @transform_5, window_bounds = array<i64: 128, 128>}, {pipeline_mode = #tpu.pipeline_mode<synchronous>, transform_indices = @transform_6, window_bounds = array<i64: 1, 128>}, {pipeline_mode = #tpu.pipeline_mode<synchronous>, transform_indices = @transform_7, window_bounds = array<i64: 128, 128>}, {pipeline_mode = #tpu.pipeline_mode<synchronous>, transform_indices = @transform_8, window_bounds = array<i64: 1, 128>}, {pipeline_mode = #tpu.pipeline_mode<synchronous>, transform_indices = @transform_9, window_bounds = array<i64: 128, 128>}, {pipeline_mode = #tpu.pipeline_mode<synchronous>, transform_indices = @transform_10, window_bounds = array<i64: 1, 128>}, {pipeline_mode = #tpu.pipeline_mode<synchronous>, transform_indices = @transform_11, window_bounds = array<i64: 128, 128>}, {pipeline_mode = #tpu.pipeline_mode<synchronous>, transform_indices = @transform_12, window_bounds = array<i64: 1, 128>}, {pipeline_mode = #tpu.pipeline_mode<synchronous>, transform_indices = @transform_13, window_bounds = array<i64: 128, 256>}, {pipeline_mode = #tpu.pipeline_mode<synchronous>, transform_indices = @transform_14, window_bounds = array<i64: 1, 256>}, {pipeline_mode = #tpu.pipeline_mode<synchronous>, transform_indices = @transform_15, window_bounds = array<i64: 256, 128>}, {pipeline_mode = #tpu.pipeline_mode<synchronous>, transform_indices = @transform_16, window_bounds = array<i64: 1, 128>}, {pipeline_mode = #tpu.pipeline_mode<synchronous>, transform_indices = @transform_17, window_bounds = array<i64: 1, 128>}, {pipeline_mode = #tpu.pipeline_mode<synchronous>, transform_indices = @transform_18, window_bounds = array<i64: 1, 128>}, {pipeline_mode = #tpu.pipeline_mode<synchronous>, transform_indices = @transform_19, window_bounds = array<i64: 1, 128>}, {pipeline_mode = #tpu.pipeline_mode<synchronous>, transform_indices = @transform_20, window_bounds = array<i64: 1, 128>}, {pipeline_mode = #tpu.pipeline_mode<synchronous>, transform_indices = @transform_21, window_bounds = array<i64: 1, 128>}, {pipeline_mode = #tpu.pipeline_mode<synchronous>, transform_indices = @transform_22, window_bounds = array<i64: 1, 128>}, {transform_indices = @transform_23, window_bounds = array<i64: 1, 8, 128>}]} {
    %c8_i32 = arith.constant 8 : i32
    %0 = arith.muli %arg1, %c8_i32 : i32
    %1 = tpu.assume_multiple %0, 8 : i32
    %c0 = arith.constant 0 : index
    %c0_0 = arith.constant 0 : index
    %c0_1 = arith.constant 0 : index
    %2 = vector.load %arg2[%c0, %c0_0, %c0_1] : memref<1x8x128xf32, #tpu.memory_space<vmem>>, vector<1x8x128xf32>
    %3 = vector.shape_cast %2 : vector<1x8x128xf32> to vector<8x128xf32>
    %4 = arith.truncf %3 : vector<8x128xf32> to vector<8x128xbf16>
    %c0_2 = arith.constant 0 : index
    %c0_3 = arith.constant 0 : index
    %5 = vector.load %arg7[%c0_2, %c0_3] : memref<128x128xbf16, #tpu.memory_space<vmem>>, vector<128x128xbf16>
    %cst = arith.constant dense<0.000000e+00> : vector<8x128xf32>
    %6 = tpu.matmul %4, %5, %cst {dimension_numbers = #tpu.dot_dimension_numbers<[1], [0], [0], [1], [0, 0, 1, 1], [], []>} : vector<8x128xbf16>, vector<128x128xbf16>, vector<8x128xf32> -> vector<8x128xf32>
    %c0_4 = arith.constant 0 : index
    %c0_5 = arith.constant 0 : index
    %7 = vector.load %arg8[%c0_4, %c0_5] : memref<1x128xf32, #tpu.memory_space<vmem>>, vector<1x128xf32>
    %8 = vector.broadcast %7 : vector<1x128xf32> to vector<8x128xf32>
    %9 = arith.addf %6, %8 : vector<8x128xf32>
    %cst_6 = arith.constant 0.176776692 : f32
    %10 = vector.broadcast %cst_6 : f32 to vector<8x128xf32>
    %11 = arith.mulf %9, %10 : vector<8x128xf32>
    %12 = arith.truncf %11 : vector<8x128xf32> to vector<8x128xbf16>
    %13 = vector.shape_cast %12 : vector<8x128xbf16> to vector<8x4x32xbf16>
    %c1_i32 = arith.constant 1 : i32
    %14 = arith.addi %arg1, %c1_i32 : i32
    %cst_7 = arith.constant -1.000000e+30 : f32
    %15 = vector.broadcast %cst_7 : f32 to vector<4x8x1xf32>
    %cst_8 = arith.constant 0.000000e+00 : f32
    %16 = vector.broadcast %cst_8 : f32 to vector<4x8x1xf32>
    %cst_9 = arith.constant 0.000000e+00 : f32
    %17 = vector.broadcast %cst_9 : f32 to vector<4x8x32xf32>
    %c0_i32 = arith.constant 0 : i32
    %18 = arith.subi %14, %c0_i32 : i32
    %19 = arith.addi %c0_i32, %18 : i32
    %c1_i32_10 = arith.constant 1 : i32
    %20:3 = scf.for %arg26 = %c0_i32 to %19 step %c1_i32_10 iter_args(%arg27 = %15, %arg28 = %16, %arg29 = %17) -> (vector<4x8x1xf32>, vector<4x8x1xf32>, vector<4x8x32xf32>)  : i32 {
      %c8_i32_82 = arith.constant 8 : i32
      %178 = arith.muli %arg26, %c8_i32_82 : i32
      %179 = tpu.assume_multiple %178, 8 : i32
      %c0_83 = arith.constant 0 : index
      %180 = arith.index_cast %179 : i32 to index
      %c0_84 = arith.constant 0 : index
      %181 = vector.load %arg3[%c0_83, %180, %c0_84] : memref<1x16x128xbf16, #tpu.memory_space<vmem>>, vector<1x8x128xbf16>
      %182 = vector.shape_cast %181 : vector<1x8x128xbf16> to vector<8x128xbf16>
      %183 = vector.shape_cast %182 : vector<8x128xbf16> to vector<8x4x32xbf16>
      %c0_85 = arith.constant 0 : index
      %184 = arith.index_cast %179 : i32 to index
      %c0_86 = arith.constant 0 : index
      %185 = vector.load %arg4[%c0_85, %184, %c0_86] : memref<1x16x128xbf16, #tpu.memory_space<vmem>>, vector<1x8x128xbf16>
      %186 = vector.shape_cast %185 : vector<1x8x128xbf16> to vector<8x128xbf16>
      %187 = vector.shape_cast %186 : vector<8x128xbf16> to vector<8x4x32xbf16>
      "tpu.trace_start"() <{level = 10 : i32, message = "qhd,khd->hqk"}> : () -> ()
      %cst_87 = arith.constant dense<0.000000e+00> : vector<4x8x8xf32>
      %188 = tpu.matmul %13, %183, %cst_87 {dimension_numbers = #tpu.dot_dimension_numbers<[2], [2], [0], [0], [0, 1, 0, 0, 1, 0], [1], [1]>} : vector<8x4x32xbf16>, vector<8x4x32xbf16>, vector<4x8x8xf32> -> vector<4x8x8xf32>
      "tpu.trace_stop"() : () -> ()
      %189 = tpu.iota {dimensions = array<i32: 0>} : vector<8x8xi32>
      %190 = vector.broadcast %1 : i32 to vector<8x8xi32>
      %191 = arith.addi %189, %190 : vector<8x8xi32>
      %192 = tpu.iota {dimensions = array<i32: 1>} : vector<8x8xi32>
      %193 = vector.broadcast %179 : i32 to vector<8x8xi32>
      %194 = arith.addi %192, %193 : vector<8x8xi32>
      %195 = arith.cmpi sle, %194, %191 : vector<8x8xi32>
      %196 = vector.shape_cast %195 : vector<8x8xi1> to vector<1x8x8xi1>
      %cst_88 = arith.constant -1.000000e+30 : f32
      %197 = vector.shape_cast %196 : vector<1x8x8xi1> to vector<1x8x8xi1>
      %198 = vector.broadcast %197 : vector<1x8x8xi1> to vector<4x8x8xi1>
      %199 = vector.broadcast %cst_88 : f32 to vector<4x8x8xf32>
      %200 = arith.select %198, %188, %199 : vector<4x8x8xi1>, vector<4x8x8xf32>
      %cst_89 = arith.constant dense<0xFF800000> : vector<4x8xf32>
      %201 = vector.multi_reduction <maximumf>, %200, %cst_89 [2] : vector<4x8x8xf32> to vector<4x8xf32>
      %202 = vector.shape_cast %201 : vector<4x8xf32> to vector<4x8x1xf32>
      %203 = arith.maximumf %arg27, %202 : vector<4x8x1xf32>
      %204 = arith.subf %arg27, %203 : vector<4x8x1xf32>
      %205 = math.exp %204 : vector<4x8x1xf32>
      %206 = vector.broadcast %203 : vector<4x8x1xf32> to vector<4x8x8xf32>
      %207 = arith.subf %200, %206 : vector<4x8x8xf32>
      %208 = math.exp %207 : vector<4x8x8xf32>
      %209 = arith.mulf %205, %arg28 : vector<4x8x1xf32>
      %cst_90 = arith.constant dense<0.000000e+00> : vector<4x8xf32>
      %210 = vector.multi_reduction <add>, %208, %cst_90 [2] : vector<4x8x8xf32> to vector<4x8xf32>
      %211 = vector.shape_cast %210 : vector<4x8xf32> to vector<4x8x1xf32>
      %212 = arith.addf %209, %211 : vector<4x8x1xf32>
      %213 = vector.broadcast %205 : vector<4x8x1xf32> to vector<4x8x32xf32>
      %214 = arith.mulf %213, %arg29 : vector<4x8x32xf32>
      %215 = arith.truncf %208 : vector<4x8x8xf32> to vector<4x8x8xbf16>
      "tpu.trace_start"() <{level = 10 : i32, message = "hqk,khd->hqd"}> : () -> ()
      %cst_91 = arith.constant dense<0.000000e+00> : vector<4x8x32xf32>
      %216 = tpu.matmul %215, %187, %cst_91 {dimension_numbers = #tpu.dot_dimension_numbers<[2], [0], [1], [2], [0, 0, 0, 1, 1, 2], [0], [1]>} : vector<4x8x8xbf16>, vector<8x4x32xbf16>, vector<4x8x32xf32> -> vector<4x8x32xf32>
      "tpu.trace_stop"() : () -> ()
      %217 = arith.addf %214, %216 : vector<4x8x32xf32>
      scf.yield %203, %212, %217 : vector<4x8x1xf32>, vector<4x8x1xf32>, vector<4x8x32xf32>
    }
    %21 = tpu.reciprocal %20#1 {approx = true} : vector<4x8x1xf32> -> vector<4x8x1xf32>
    %22 = vector.broadcast %21 : vector<4x8x1xf32> to vector<4x8x32xf32>
    %23 = arith.mulf %20#2, %22 : vector<4x8x32xf32>
    %24 = tpu.transpose %23, [1, 0, 2] : vector<4x8x32xf32> -> vector<8x4x32xf32>
    %25 = vector.shape_cast %24 : vector<8x4x32xf32> to vector<8x128xf32>
    %26 = arith.truncf %25 : vector<8x128xf32> to vector<8x128xbf16>
    %c0_11 = arith.constant 0 : index
    %c0_12 = arith.constant 0 : index
    %27 = vector.load %arg9[%c0_11, %c0_12] : memref<128x128xbf16, #tpu.memory_space<vmem>>, vector<128x128xbf16>
    %cst_13 = arith.constant dense<0.000000e+00> : vector<8x128xf32>
    %28 = tpu.matmul %26, %27, %cst_13 {dimension_numbers = #tpu.dot_dimension_numbers<[1], [0], [0], [1], [0, 0, 1, 1], [], []>} : vector<8x128xbf16>, vector<128x128xbf16>, vector<8x128xf32> -> vector<8x128xf32>
    %c0_14 = arith.constant 0 : index
    %c0_15 = arith.constant 0 : index
    %29 = vector.load %arg10[%c0_14, %c0_15] : memref<1x128xf32, #tpu.memory_space<vmem>>, vector<1x128xf32>
    %30 = vector.broadcast %29 : vector<1x128xf32> to vector<8x128xf32>
    %31 = arith.addf %28, %30 : vector<8x128xf32>
    %32 = arith.addf %3, %31 : vector<8x128xf32>
    %c0_16 = arith.constant 0 : index
    %c0_17 = arith.constant 0 : index
    %33 = vector.load %arg19[%c0_16, %c0_17] : memref<1x128xf32, #tpu.memory_space<vmem>>, vector<1x128xf32>
    %c0_18 = arith.constant 0 : index
    %c0_19 = arith.constant 0 : index
    %34 = vector.load %arg20[%c0_18, %c0_19] : memref<1x128xf32, #tpu.memory_space<vmem>>, vector<1x128xf32>
    %cst_20 = arith.constant dense<0.000000e+00> : vector<8xf32>
    %35 = vector.multi_reduction <add>, %32, %cst_20 [1] : vector<8x128xf32> to vector<8xf32>
    %36 = vector.shape_cast %35 : vector<8xf32> to vector<8x1xf32>
    %cst_21 = arith.constant 1.280000e+02 : f32
    %37 = vector.broadcast %cst_21 : f32 to vector<8x1xf32>
    %38 = arith.divf %36, %37 : vector<8x1xf32>
    %39 = vector.broadcast %38 : vector<8x1xf32> to vector<8x128xf32>
    %40 = arith.subf %32, %39 : vector<8x128xf32>
    %41 = arith.mulf %40, %40 : vector<8x128xf32>
    %cst_22 = arith.constant dense<0.000000e+00> : vector<8xf32>
    %42 = vector.multi_reduction <add>, %41, %cst_22 [1] : vector<8x128xf32> to vector<8xf32>
    %43 = vector.shape_cast %42 : vector<8xf32> to vector<8x1xf32>
    %cst_23 = arith.constant 1.280000e+02 : f32
    %44 = vector.broadcast %cst_23 : f32 to vector<8x1xf32>
    %45 = arith.divf %43, %44 : vector<8x1xf32>
    %46 = vector.broadcast %38 : vector<8x1xf32> to vector<8x128xf32>
    %47 = arith.subf %32, %46 : vector<8x128xf32>
    %cst_24 = arith.constant 9.99999974E-6 : f32
    %48 = vector.broadcast %cst_24 : f32 to vector<8x1xf32>
    %49 = arith.addf %45, %48 : vector<8x1xf32>
    %50 = math.rsqrt %49 : vector<8x1xf32>
    %51 = vector.broadcast %50 : vector<8x1xf32> to vector<8x128xf32>
    %52 = arith.mulf %47, %51 : vector<8x128xf32>
    %53 = vector.broadcast %33 : vector<1x128xf32> to vector<8x128xf32>
    %54 = arith.mulf %52, %53 : vector<8x128xf32>
    %55 = vector.broadcast %34 : vector<1x128xf32> to vector<8x128xf32>
    %56 = arith.addf %54, %55 : vector<8x128xf32>
    %57 = arith.truncf %56 : vector<8x128xf32> to vector<8x128xbf16>
    %c0_25 = arith.constant 0 : index
    %c0_26 = arith.constant 0 : index
    %58 = vector.load %arg11[%c0_25, %c0_26] : memref<128x128xbf16, #tpu.memory_space<vmem>>, vector<128x128xbf16>
    %cst_27 = arith.constant dense<0.000000e+00> : vector<8x128xf32>
    %59 = tpu.matmul %57, %58, %cst_27 {dimension_numbers = #tpu.dot_dimension_numbers<[1], [0], [0], [1], [0, 0, 1, 1], [], []>} : vector<8x128xbf16>, vector<128x128xbf16>, vector<8x128xf32> -> vector<8x128xf32>
    %c0_28 = arith.constant 0 : index
    %c0_29 = arith.constant 0 : index
    %60 = vector.load %arg12[%c0_28, %c0_29] : memref<1x128xf32, #tpu.memory_space<vmem>>, vector<1x128xf32>
    %61 = vector.broadcast %60 : vector<1x128xf32> to vector<8x128xf32>
    %62 = arith.addf %59, %61 : vector<8x128xf32>
    %cst_30 = arith.constant 0.176776692 : f32
    %63 = vector.broadcast %cst_30 : f32 to vector<8x128xf32>
    %64 = arith.mulf %62, %63 : vector<8x128xf32>
    %65 = arith.truncf %64 : vector<8x128xf32> to vector<8x128xbf16>
    %66 = vector.shape_cast %65 : vector<8x128xbf16> to vector<8x4x32xbf16>
    %cst_31 = arith.constant -1.000000e+30 : f32
    %67 = vector.broadcast %cst_31 : f32 to vector<4x8x1xf32>
    %cst_32 = arith.constant 0.000000e+00 : f32
    %68 = vector.broadcast %cst_32 : f32 to vector<4x8x1xf32>
    %cst_33 = arith.constant 0.000000e+00 : f32
    %69 = vector.broadcast %cst_33 : f32 to vector<4x8x32xf32>
    %c0_i32_34 = arith.constant 0 : i32
    %c16_i32 = arith.constant 16 : i32
    %70 = arith.muli %c0_i32_34, %c16_i32 : i32
    %71 = tpu.assume_multiple %70, 16 : i32
    %c0_35 = arith.constant 0 : index
    %72 = arith.index_cast %71 : i32 to index
    %c0_36 = arith.constant 0 : index
    %73 = vector.load %arg5[%c0_35, %72, %c0_36] : memref<1x16x128xbf16, #tpu.memory_space<vmem>>, vector<1x16x128xbf16>
    %74 = vector.shape_cast %73 : vector<1x16x128xbf16> to vector<16x128xbf16>
    %75 = vector.shape_cast %74 : vector<16x128xbf16> to vector<16x4x32xbf16>
    %c0_37 = arith.constant 0 : index
    %76 = arith.index_cast %71 : i32 to index
    %c0_38 = arith.constant 0 : index
    %77 = vector.load %arg6[%c0_37, %76, %c0_38] : memref<1x16x128xbf16, #tpu.memory_space<vmem>>, vector<1x16x128xbf16>
    %78 = vector.shape_cast %77 : vector<1x16x128xbf16> to vector<16x128xbf16>
    %79 = vector.shape_cast %78 : vector<16x128xbf16> to vector<16x4x32xbf16>
    "tpu.trace_start"() <{level = 10 : i32, message = "qhd,khd->hqk"}> : () -> ()
    %cst_39 = arith.constant dense<0.000000e+00> : vector<4x8x16xf32>
    %80 = tpu.matmul %66, %75, %cst_39 {dimension_numbers = #tpu.dot_dimension_numbers<[2], [2], [0], [0], [0, 1, 0, 0, 1, 0], [1], [1]>} : vector<8x4x32xbf16>, vector<16x4x32xbf16>, vector<4x8x16xf32> -> vector<4x8x16xf32>
    "tpu.trace_stop"() : () -> ()
    %cst_40 = arith.constant dense<0xFF800000> : vector<4x8xf32>
    %81 = vector.multi_reduction <maximumf>, %80, %cst_40 [2] : vector<4x8x16xf32> to vector<4x8xf32>
    %82 = vector.shape_cast %81 : vector<4x8xf32> to vector<4x8x1xf32>
    %83 = arith.maximumf %67, %82 : vector<4x8x1xf32>
    %84 = arith.subf %67, %83 : vector<4x8x1xf32>
    %85 = math.exp %84 : vector<4x8x1xf32>
    %86 = vector.broadcast %83 : vector<4x8x1xf32> to vector<4x8x16xf32>
    %87 = arith.subf %80, %86 : vector<4x8x16xf32>
    %88 = math.exp %87 : vector<4x8x16xf32>
    %89 = arith.mulf %85, %68 : vector<4x8x1xf32>
    %cst_41 = arith.constant dense<0.000000e+00> : vector<4x8xf32>
    %90 = vector.multi_reduction <add>, %88, %cst_41 [2] : vector<4x8x16xf32> to vector<4x8xf32>
    %91 = vector.shape_cast %90 : vector<4x8xf32> to vector<4x8x1xf32>
    %92 = arith.addf %89, %91 : vector<4x8x1xf32>
    %93 = vector.broadcast %85 : vector<4x8x1xf32> to vector<4x8x32xf32>
    %94 = arith.mulf %93, %69 : vector<4x8x32xf32>
    %95 = arith.truncf %88 : vector<4x8x16xf32> to vector<4x8x16xbf16>
    "tpu.trace_start"() <{level = 10 : i32, message = "hqk,khd->hqd"}> : () -> ()
    %cst_42 = arith.constant dense<0.000000e+00> : vector<4x8x32xf32>
    %96 = tpu.matmul %95, %79, %cst_42 {dimension_numbers = #tpu.dot_dimension_numbers<[2], [0], [1], [2], [0, 0, 0, 1, 1, 2], [0], [1]>} : vector<4x8x16xbf16>, vector<16x4x32xbf16>, vector<4x8x32xf32> -> vector<4x8x32xf32>
    "tpu.trace_stop"() : () -> ()
    %97 = arith.addf %94, %96 : vector<4x8x32xf32>
    %c1_i32_43 = arith.constant 1 : i32
    %98 = tpu.reciprocal %92 {approx = true} : vector<4x8x1xf32> -> vector<4x8x1xf32>
    %99 = vector.broadcast %98 : vector<4x8x1xf32> to vector<4x8x32xf32>
    %100 = arith.mulf %97, %99 : vector<4x8x32xf32>
    %101 = tpu.transpose %100, [1, 0, 2] : vector<4x8x32xf32> -> vector<8x4x32xf32>
    %102 = vector.shape_cast %101 : vector<8x4x32xf32> to vector<8x128xf32>
    %103 = arith.truncf %102 : vector<8x128xf32> to vector<8x128xbf16>
    %c0_44 = arith.constant 0 : index
    %c0_45 = arith.constant 0 : index
    %104 = vector.load %arg13[%c0_44, %c0_45] : memref<128x128xbf16, #tpu.memory_space<vmem>>, vector<128x128xbf16>
    %cst_46 = arith.constant dense<0.000000e+00> : vector<8x128xf32>
    %105 = tpu.matmul %103, %104, %cst_46 {dimension_numbers = #tpu.dot_dimension_numbers<[1], [0], [0], [1], [0, 0, 1, 1], [], []>} : vector<8x128xbf16>, vector<128x128xbf16>, vector<8x128xf32> -> vector<8x128xf32>
    %c0_47 = arith.constant 0 : index
    %c0_48 = arith.constant 0 : index
    %106 = vector.load %arg14[%c0_47, %c0_48] : memref<1x128xf32, #tpu.memory_space<vmem>>, vector<1x128xf32>
    %107 = vector.broadcast %106 : vector<1x128xf32> to vector<8x128xf32>
    %108 = arith.addf %105, %107 : vector<8x128xf32>
    %109 = arith.addf %56, %108 : vector<8x128xf32>
    %c0_49 = arith.constant 0 : index
    %c0_50 = arith.constant 0 : index
    %110 = vector.load %arg21[%c0_49, %c0_50] : memref<1x128xf32, #tpu.memory_space<vmem>>, vector<1x128xf32>
    %c0_51 = arith.constant 0 : index
    %c0_52 = arith.constant 0 : index
    %111 = vector.load %arg22[%c0_51, %c0_52] : memref<1x128xf32, #tpu.memory_space<vmem>>, vector<1x128xf32>
    %cst_53 = arith.constant dense<0.000000e+00> : vector<8xf32>
    %112 = vector.multi_reduction <add>, %109, %cst_53 [1] : vector<8x128xf32> to vector<8xf32>
    %113 = vector.shape_cast %112 : vector<8xf32> to vector<8x1xf32>
    %cst_54 = arith.constant 1.280000e+02 : f32
    %114 = vector.broadcast %cst_54 : f32 to vector<8x1xf32>
    %115 = arith.divf %113, %114 : vector<8x1xf32>
    %116 = vector.broadcast %115 : vector<8x1xf32> to vector<8x128xf32>
    %117 = arith.subf %109, %116 : vector<8x128xf32>
    %118 = arith.mulf %117, %117 : vector<8x128xf32>
    %cst_55 = arith.constant dense<0.000000e+00> : vector<8xf32>
    %119 = vector.multi_reduction <add>, %118, %cst_55 [1] : vector<8x128xf32> to vector<8xf32>
    %120 = vector.shape_cast %119 : vector<8xf32> to vector<8x1xf32>
    %cst_56 = arith.constant 1.280000e+02 : f32
    %121 = vector.broadcast %cst_56 : f32 to vector<8x1xf32>
    %122 = arith.divf %120, %121 : vector<8x1xf32>
    %123 = vector.broadcast %115 : vector<8x1xf32> to vector<8x128xf32>
    %124 = arith.subf %109, %123 : vector<8x128xf32>
    %cst_57 = arith.constant 9.99999974E-6 : f32
    %125 = vector.broadcast %cst_57 : f32 to vector<8x1xf32>
    %126 = arith.addf %122, %125 : vector<8x1xf32>
    %127 = math.rsqrt %126 : vector<8x1xf32>
    %128 = vector.broadcast %127 : vector<8x1xf32> to vector<8x128xf32>
    %129 = arith.mulf %124, %128 : vector<8x128xf32>
    %130 = vector.broadcast %110 : vector<1x128xf32> to vector<8x128xf32>
    %131 = arith.mulf %129, %130 : vector<8x128xf32>
    %132 = vector.broadcast %111 : vector<1x128xf32> to vector<8x128xf32>
    %133 = arith.addf %131, %132 : vector<8x128xf32>
    %134 = arith.truncf %133 : vector<8x128xf32> to vector<8x128xbf16>
    %cst_58 = arith.constant 0.000000e+00 : f32
    %135 = vector.broadcast %cst_58 : f32 to vector<8x128xf32>
    %c0_59 = arith.constant 0 : index
    %c0_60 = arith.constant 0 : index
    %136 = vector.load %arg15[%c0_59, %c0_60] : memref<128x256xbf16, #tpu.memory_space<vmem>>, vector<128x256xbf16>
    %cst_61 = arith.constant dense<0.000000e+00> : vector<8x256xf32>
    %137 = tpu.matmul %134, %136, %cst_61 {dimension_numbers = #tpu.dot_dimension_numbers<[1], [0], [0], [1], [0, 0, 1, 1], [], []>} : vector<8x128xbf16>, vector<128x256xbf16>, vector<8x256xf32> -> vector<8x256xf32>
    %c0_62 = arith.constant 0 : index
    %c0_63 = arith.constant 0 : index
    %138 = vector.load %arg16[%c0_62, %c0_63] : memref<1x256xf32, #tpu.memory_space<vmem>>, vector<1x256xf32>
    %139 = vector.broadcast %138 : vector<1x256xf32> to vector<8x256xf32>
    %140 = arith.addf %137, %139 : vector<8x256xf32>
    %cst_64 = arith.constant 0.000000e+00 : f32
    %141 = vector.broadcast %cst_64 : f32 to vector<8x256xf32>
    %142 = arith.maximumf %140, %141 : vector<8x256xf32>
    %143 = arith.truncf %142 : vector<8x256xf32> to vector<8x256xbf16>
    %c0_65 = arith.constant 0 : index
    %c0_66 = arith.constant 0 : index
    %144 = vector.load %arg17[%c0_65, %c0_66] : memref<256x128xbf16, #tpu.memory_space<vmem>>, vector<256x128xbf16>
    %cst_67 = arith.constant dense<0.000000e+00> : vector<8x128xf32>
    %145 = tpu.matmul %143, %144, %cst_67 {dimension_numbers = #tpu.dot_dimension_numbers<[1], [0], [0], [1], [0, 0, 1, 1], [], []>} : vector<8x256xbf16>, vector<256x128xbf16>, vector<8x128xf32> -> vector<8x128xf32>
    %146 = arith.addf %135, %145 : vector<8x128xf32>
    %c0_68 = arith.constant 0 : index
    %c0_69 = arith.constant 0 : index
    %147 = vector.load %arg18[%c0_68, %c0_69] : memref<1x128xf32, #tpu.memory_space<vmem>>, vector<1x128xf32>
    %148 = vector.broadcast %147 : vector<1x128xf32> to vector<8x128xf32>
    %149 = arith.addf %146, %148 : vector<8x128xf32>
    %150 = arith.addf %133, %149 : vector<8x128xf32>
    %c0_70 = arith.constant 0 : index
    %c0_71 = arith.constant 0 : index
    %151 = vector.load %arg23[%c0_70, %c0_71] : memref<1x128xf32, #tpu.memory_space<vmem>>, vector<1x128xf32>
    %c0_72 = arith.constant 0 : index
    %c0_73 = arith.constant 0 : index
    %152 = vector.load %arg24[%c0_72, %c0_73] : memref<1x128xf32, #tpu.memory_space<vmem>>, vector<1x128xf32>
    %cst_74 = arith.constant dense<0.000000e+00> : vector<8xf32>
    %153 = vector.multi_reduction <add>, %150, %cst_74 [1] : vector<8x128xf32> to vector<8xf32>
    %154 = vector.shape_cast %153 : vector<8xf32> to vector<8x1xf32>
    %cst_75 = arith.constant 1.280000e+02 : f32
    %155 = vector.broadcast %cst_75 : f32 to vector<8x1xf32>
    %156 = arith.divf %154, %155 : vector<8x1xf32>
    %157 = vector.broadcast %156 : vector<8x1xf32> to vector<8x128xf32>
    %158 = arith.subf %150, %157 : vector<8x128xf32>
    %159 = arith.mulf %158, %158 : vector<8x128xf32>
    %cst_76 = arith.constant dense<0.000000e+00> : vector<8xf32>
    %160 = vector.multi_reduction <add>, %159, %cst_76 [1] : vector<8x128xf32> to vector<8xf32>
    %161 = vector.shape_cast %160 : vector<8xf32> to vector<8x1xf32>
    %cst_77 = arith.constant 1.280000e+02 : f32
    %162 = vector.broadcast %cst_77 : f32 to vector<8x1xf32>
    %163 = arith.divf %161, %162 : vector<8x1xf32>
    %164 = vector.broadcast %156 : vector<8x1xf32> to vector<8x128xf32>
    %165 = arith.subf %150, %164 : vector<8x128xf32>
    %cst_78 = arith.constant 9.99999974E-6 : f32
    %166 = vector.broadcast %cst_78 : f32 to vector<8x1xf32>
    %167 = arith.addf %163, %166 : vector<8x1xf32>
    %168 = math.rsqrt %167 : vector<8x1xf32>
    %169 = vector.broadcast %168 : vector<8x1xf32> to vector<8x128xf32>
    %170 = arith.mulf %165, %169 : vector<8x128xf32>
    %171 = vector.broadcast %151 : vector<1x128xf32> to vector<8x128xf32>
    %172 = arith.mulf %170, %171 : vector<8x128xf32>
    %173 = vector.broadcast %152 : vector<1x128xf32> to vector<8x128xf32>
    %174 = arith.addf %172, %173 : vector<8x128xf32>
    %c0_79 = arith.constant 0 : index
    %c0_80 = arith.constant 0 : index
    %c0_81 = arith.constant 0 : index
    %175 = vector.load %arg25[%c0_79, %c0_80, %c0_81] : memref<1x8x128xf32, #tpu.memory_space<vmem>>, vector<1x8x128xf32>
    %176 = vector.shape_cast %175 : vector<1x8x128xf32> to vector<8x128xf32>
    %177 = vector.shape_cast %174 : vector<8x128xf32> to vector<1x8x128xf32>
    tpu.vector_store %arg25[%c0_79, %c0_80, %c0_81], %177 {strides = array<i32>} : memref<1x8x128xf32, #tpu.memory_space<vmem>>, vector<1x8x128xf32>,
    return
  }
  func.func @transform_0(%arg0: i32, %arg1: i32) -> (i32, i32, i32) {
    %c0_i32 = arith.constant 0 : i32
    %c0_i32_0 = arith.constant 0 : i32
    return %arg0, %arg1, %c0_i32 : i32, i32, i32
  }
  func.func @transform_1(%arg0: i32, %arg1: i32) -> (i32, i32, i32) {
    %c0_i32 = arith.constant 0 : i32
    %c0_i32_0 = arith.constant 0 : i32
    %c0_i32_1 = arith.constant 0 : i32
    return %arg0, %c0_i32, %c0_i32_0 : i32, i32, i32
  }
  func.func @transform_2(%arg0: i32, %arg1: i32) -> (i32, i32, i32) {
    %c0_i32 = arith.constant 0 : i32
    %c0_i32_0 = arith.constant 0 : i32
    %c0_i32_1 = arith.constant 0 : i32
    return %arg0, %c0_i32, %c0_i32_0 : i32, i32, i32
  }
  func.func @transform_3(%arg0: i32, %arg1: i32) -> (i32, i32, i32) {
    %c0_i32 = arith.constant 0 : i32
    %c0_i32_0 = arith.constant 0 : i32
    %c0_i32_1 = arith.constant 0 : i32
    return %arg0, %c0_i32, %c0_i32_0 : i32, i32, i32
  }
  func.func @transform_4(%arg0: i32, %arg1: i32) -> (i32, i32, i32) {
    %c0_i32 = arith.constant 0 : i32
    %c0_i32_0 = arith.constant 0 : i32
    %c0_i32_1 = arith.constant 0 : i32
    return %arg0, %c0_i32, %c0_i32_0 : i32, i32, i32
  }
  func.func @transform_5(%arg0: i32, %arg1: i32) -> (i32, i32) {
    %c0_i32 = arith.constant 0 : i32
    %c0_i32_0 = arith.constant 0 : i32
    %c0_i32_1 = arith.constant 0 : i32
    return %c0_i32, %c0_i32_0 : i32, i32
  }
  func.func @transform_6(%arg0: i32, %arg1: i32) -> (i32, i32) {
    %c0_i32 = arith.constant 0 : i32
    %c0_i32_0 = arith.constant 0 : i32
    %c0_i32_1 = arith.constant 0 : i32
    return %c0_i32, %c0_i32_0 : i32, i32
  }
  func.func @transform_7(%arg0: i32, %arg1: i32) -> (i32, i32) {
    %c0_i32 = arith.constant 0 : i32
    %c0_i32_0 = arith.constant 0 : i32
    %c0_i32_1 = arith.constant 0 : i32
    return %c0_i32, %c0_i32_0 : i32, i32
  }
  func.func @transform_8(%arg0: i32, %arg1: i32) -> (i32, i32) {
    %c0_i32 = arith.constant 0 : i32
    %c0_i32_0 = arith.constant 0 : i32
    %c0_i32_1 = arith.constant 0 : i32
    return %c0_i32, %c0_i32_0 : i32, i32
  }
  func.func @transform_9(%arg0: i32, %arg1: i32) -> (i32, i32) {
    %c0_i32 = arith.constant 0 : i32
    %c0_i32_0 = arith.constant 0 : i32
    %c0_i32_1 = arith.constant 0 : i32
    return %c0_i32, %c0_i32_0 : i32, i32
  }
  func.func @transform_10(%arg0: i32, %arg1: i32) -> (i32, i32) {
    %c0_i32 = arith.constant 0 : i32
    %c0_i32_0 = arith.constant 0 : i32
    %c0_i32_1 = arith.constant 0 : i32
    return %c0_i32, %c0_i32_0 : i32, i32
  }
  func.func @transform_11(%arg0: i32, %arg1: i32) -> (i32, i32) {
    %c0_i32 = arith.constant 0 : i32
    %c0_i32_0 = arith.constant 0 : i32
    %c0_i32_1 = arith.constant 0 : i32
    return %c0_i32, %c0_i32_0 : i32, i32
  }
  func.func @transform_12(%arg0: i32, %arg1: i32) -> (i32, i32) {
    %c0_i32 = arith.constant 0 : i32
    %c0_i32_0 = arith.constant 0 : i32
    %c0_i32_1 = arith.constant 0 : i32
    return %c0_i32, %c0_i32_0 : i32, i32
  }
  func.func @transform_13(%arg0: i32, %arg1: i32) -> (i32, i32) {
    %c0_i32 = arith.constant 0 : i32
    %c0_i32_0 = arith.constant 0 : i32
    %c0_i32_1 = arith.constant 0 : i32
    return %c0_i32, %c0_i32_0 : i32, i32
  }
  func.func @transform_14(%arg0: i32, %arg1: i32) -> (i32, i32) {
    %c0_i32 = arith.constant 0 : i32
    %c0_i32_0 = arith.constant 0 : i32
    %c0_i32_1 = arith.constant 0 : i32
    return %c0_i32, %c0_i32_0 : i32, i32
  }
  func.func @transform_15(%arg0: i32, %arg1: i32) -> (i32, i32) {
    %c0_i32 = arith.constant 0 : i32
    %c0_i32_0 = arith.constant 0 : i32
    %c0_i32_1 = arith.constant 0 : i32
    return %c0_i32, %c0_i32_0 : i32, i32
  }
  func.func @transform_16(%arg0: i32, %arg1: i32) -> (i32, i32) {
    %c0_i32 = arith.constant 0 : i32
    %c0_i32_0 = arith.constant 0 : i32
    %c0_i32_1 = arith.constant 0 : i32
    return %c0_i32, %c0_i32_0 : i32, i32
  }
  func.func @transform_17(%arg0: i32, %arg1: i32) -> (i32, i32) {
    %c0_i32 = arith.constant 0 : i32
    %c0_i32_0 = arith.constant 0 : i32
    %c0_i32_1 = arith.constant 0 : i32
    return %c0_i32, %c0_i32_0 : i32, i32
  }
  func.func @transform_18(%arg0: i32, %arg1: i32) -> (i32, i32) {
    %c0_i32 = arith.constant 0 : i32
    %c0_i32_0 = arith.constant 0 : i32
    %c0_i32_1 = arith.constant 0 : i32
    return %c0_i32, %c0_i32_0 : i32, i32
  }
  func.func @transform_19(%arg0: i32, %arg1: i32) -> (i32, i32) {
    %c0_i32 = arith.constant 0 : i32
    %c0_i32_0 = arith.constant 0 : i32
    %c0_i32_1 = arith.constant 0 : i32
    return %c0_i32, %c0_i32_0 : i32, i32
  }
  func.func @transform_20(%arg0: i32, %arg1: i32) -> (i32, i32) {
    %c0_i32 = arith.constant 0 : i32
    %c0_i32_0 = arith.constant 0 : i32
    %c0_i32_1 = arith.constant 0 : i32
    return %c0_i32, %c0_i32_0 : i32, i32
  }
  func.func @transform_21(%arg0: i32, %arg1: i32) -> (i32, i32) {
    %c0_i32 = arith.constant 0 : i32
    %c0_i32_0 = arith.constant 0 : i32
    %c0_i32_1 = arith.constant 0 : i32
    return %c0_i32, %c0_i32_0 : i32, i32
  }
  func.func @transform_22(%arg0: i32, %arg1: i32) -> (i32, i32) {
    %c0_i32 = arith.constant 0 : i32
    %c0_i32_0 = arith.constant 0 : i32
    %c0_i32_1 = arith.constant 0 : i32
    return %c0_i32, %c0_i32_0 : i32, i32
  }
  func.func @transform_23(%arg0: i32, %arg1: i32) -> (i32, i32, i32) {
    %c0_i32 = arith.constant 0 : i32
    %c0_i32_0 = arith.constant 0 : i32
    return %arg0, %arg1, %c0_i32 : i32, i32, i32
  }
}

module attributes {stable_mosaic.version = 11 : i64} {
  func.func @kernel(%arg0: i32, %arg1: i32, %arg2: memref<1x8x128xf32, #tpu.memory_space<vmem>>, %arg3: memref<1x16x128xbf16, #tpu.memory_space<vmem>>, %arg4: memref<1x16x128xbf16, #tpu.memory_space<vmem>>, %arg5: memref<1x16x128xbf16, #tpu.memory_space<vmem>>, %arg6: memref<1x16x128xbf16, #tpu.memory_space<vmem>>, %arg7: memref<128x128xbf16, #tpu.memory_space<vmem>>, %arg8: memref<1x128xf32, #tpu.memory_space<vmem>>, %arg9: memref<128x128xbf16, #tpu.memory_space<vmem>>, %arg10: memref<1x128xf32, #tpu.memory_space<vmem>>, %arg11: memref<128x128xbf16, #tpu.memory_space<vmem>>, %arg12: memref<1x128xf32, #tpu.memory_space<vmem>>, %arg13: memref<128x128xbf16, #tpu.memory_space<vmem>>, %arg14: memref<1x128xf32, #tpu.memory_space<vmem>>, %arg15: memref<128x256xbf16, #tpu.memory_space<vmem>>, %arg16: memref<1x256xf32, #tpu.memory_space<vmem>>, %arg17: memref<256x128xbf16, #tpu.memory_space<vmem>>, %arg18: memref<1x128xf32, #tpu.memory_space<vmem>>, %arg19: memref<1x128xf32, #tpu.memory_space<vmem>>, %arg20: memref<1x128xf32, #tpu.memory_space<vmem>>, %arg21: memref<1x128xf32, #tpu.memory_space<vmem>>, %arg22: memref<1x128xf32, #tpu.memory_space<vmem>>, %arg23: memref<1x128xf32, #tpu.memory_space<vmem>>, %arg24: memref<1x128xf32, #tpu.memory_space<vmem>>, %arg25: memref<1x8x128xf32, #tpu.memory_space<vmem>>) attributes {dimension_semantics = [#tpu.dimension_semantics<parallel>, #tpu.dimension_semantics<parallel>], iteration_bounds = array<i64: 2, 2>, scalar_prefetch = 0 : i64, scratch_operands = 0 : i64, tpu.core_type = #tpu.core_type<tc>, window_params = [{transform_indices = @transform_0, window_bounds = array<i64: 1, 8, 128>}, {transform_indices = @transform_1, window_bounds = array<i64: 1, 16, 128>}, {transform_indices = @transform_2, window_bounds = array<i64: 1, 16, 128>}, {transform_indices = @transform_3, window_bounds = array<i64: 1, 16, 128>}, {transform_indices = @transform_4, window_bounds = array<i64: 1, 16, 128>}, {pipeline_mode = #tpu.pipeline_mode<synchronous>, transform_indices = @transform_5, window_bounds = array<i64: 128, 128>}, {pipeline_mode = #tpu.pipeline_mode<synchronous>, transform_indices = @transform_6, window_bounds = array<i64: 1, 128>}, {pipeline_mode = #tpu.pipeline_mode<synchronous>, transform_indices = @transform_7, window_bounds = array<i64: 128, 128>}, {pipeline_mode = #tpu.pipeline_mode<synchronous>, transform_indices = @transform_8, window_bounds = array<i64: 1, 128>}, {pipeline_mode = #tpu.pipeline_mode<synchronous>, transform_indices = @transform_9, window_bounds = array<i64: 128, 128>}, {pipeline_mode = #tpu.pipeline_mode<synchronous>, transform_indices = @transform_10, window_bounds = array<i64: 1, 128>}, {pipeline_mode = #tpu.pipeline_mode<synchronous>, transform_indices = @transform_11, window_bounds = array<i64: 128, 128>}, {pipeline_mode = #tpu.pipeline_mode<synchronous>, transform_indices = @transform_12, window_bounds = array<i64: 1, 128>}, {pipeline_mode = #tpu.pipeline_mode<synchronous>, transform_indices = @transform_13, window_bounds = array<i64: 128, 256>}, {pipeline_mode = #tpu.pipeline_mode<synchronous>, transform_indices = @transform_14, window_bounds = array<i64: 1, 256>}, {pipeline_mode = #tpu.pipeline_mode<synchronous>, transform_indices = @transform_15, window_bounds = array<i64: 256, 128>}, {pipeline_mode = #tpu.pipeline_mode<synchronous>, transform_indices = @transform_16, window_bounds = array<i64: 1, 128>}, {pipeline_mode = #tpu.pipeline_mode<synchronous>, transform_indices = @transform_17, window_bounds = array<i64: 1, 128>}, {pipeline_mode = #tpu.pipeline_mode<synchronous>, transform_indices = @transform_18, window_bounds = array<i64: 1, 128>}, {pipeline_mode = #tpu.pipeline_mode<synchronous>, transform_indices = @transform_19, window_bounds = array<i64: 1, 128>}, {pipeline_mode = #tpu.pipeline_mode<synchronous>, transform_indices = @transform_20, window_bounds = array<i64: 1, 128>}, {pipeline_mode = #tpu.pipeline_mode<synchronous>, transform_indices = @transform_21, window_bounds = array<i64: 1, 128>}, {pipeline_mode = #tpu.pipeline_mode<synchronous>, transform_indices = @transform_22, window_bounds = array<i64: 1, 128>}, {transform_indices = @transform_23, window_bounds = array<i64: 1, 8, 128>}]} {
    %c8_i32 = arith.constant 8 : i32
    %0 = arith.muli %arg1, %c8_i32 : i32
    %1 = tpu.assume_multiple %0, 8 : i32
    %c0 = arith.constant 0 : index
    %c0_0 = arith.constant 0 : index
    %c0_1 = arith.constant 0 : index
    %2 = vector.load %arg2[%c0, %c0_0, %c0_1] : memref<1x8x128xf32, #tpu.memory_space<vmem>>, vector<1x8x128xf32>
    %3 = vector.shape_cast %2 : vector<1x8x128xf32> to vector<8x128xf32>
    %4 = arith.truncf %3 : vector<8x128xf32> to vector<8x128xbf16>
    %c0_2 = arith.constant 0 : index
    %c0_3 = arith.constant 0 : index
    %5 = vector.load %arg7[%c0_2, %c0_3] : memref<128x128xbf16, #tpu.memory_space<vmem>>, vector<128x128xbf16>
    %cst = arith.constant dense<0.000000e+00> : vector<8x128xf32>
    %6 = tpu.matmul %4, %5, %cst {dimension_numbers = #tpu.dot_dimension_numbers<[1], [0], [0], [1], [0, 0, 1, 1], [], []>} : vector<8x128xbf16>, vector<128x128xbf16>, vector<8x128xf32> -> vector<8x128xf32>
    %c0_4 = arith.constant 0 : index
    %c0_5 = arith.constant 0 : index
    %7 = vector.load %arg8[%c0_4, %c0_5] : memref<1x128xf32, #tpu.memory_space<vmem>>, vector<1x128xf32>
    %8 = vector.broadcast %7 : vector<1x128xf32> to vector<8x128xf32>
    %9 = arith.addf %6, %8 : vector<8x128xf32>
    %cst_6 = arith.constant 0.176776692 : f32
    %10 = vector.broadcast %cst_6 : f32 to vector<8x128xf32>
    %11 = arith.mulf %9, %10 : vector<8x128xf32>
    %12 = arith.truncf %11 : vector<8x128xf32> to vector<8x128xbf16>
    %13 = vector.shape_cast %12 : vector<8x128xbf16> to vector<8x4x32xbf16>
    %c1_i32 = arith.constant 1 : i32
    %14 = arith.addi %arg1, %c1_i32 : i32
    %cst_7 = arith.constant -1.000000e+30 : f32
    %15 = vector.broadcast %cst_7 : f32 to vector<4x8x1xf32>
    %cst_8 = arith.constant 0.000000e+00 : f32
    %16 = vector.broadcast %cst_8 : f32 to vector<4x8x1xf32>
    %cst_9 = arith.constant 0.000000e+00 : f32
    %17 = vector.broadcast %cst_9 : f32 to vector<4x8x32xf32>
    %c0_i32 = arith.constant 0 : i32
    %18 = arith.subi %14, %c0_i32 : i32
    %19 = arith.addi %c0_i32, %18 : i32
    %c1_i32_10 = arith.constant 1 : i32
    %20:3 = scf.for %arg26 = %c0_i32 to %19 step %c1_i32_10 iter_args(%arg27 = %15, %arg28 = %16, %arg29 = %17) -> (vector<4x8x1xf32>, vector<4x8x1xf32>, vector<4x8x32xf32>)  : i32 {
      %c8_i32_82 = arith.constant 8 : i32
      %178 = arith.muli %arg26, %c8_i32_82 : i32
      %179 = tpu.assume_multiple %178, 8 : i32
      %c0_83 = arith.constant 0 : index
      %180 = arith.index_cast %179 : i32 to index
      %c0_84 = arith.constant 0 : index
      %181 = vector.load %arg3[%c0_83, %180, %c0_84] : memref<1x16x128xbf16, #tpu.memory_space<vmem>>, vector<1x8x128xbf16>
      %182 = vector.shape_cast %181 : vector<1x8x128xbf16> to vector<8x128xbf16>
      %183 = vector.shape_cast %182 : vector<8x128xbf16> to vector<8x4x32xbf16>
      %c0_85 = arith.constant 0 : index
      %184 = arith.index_cast %179 : i32 to index
      %c0_86 = arith.constant 0 : index
      %185 = vector.load %arg4[%c0_85, %184, %c0_86] : memref<1x16x128xbf16, #tpu.memory_space<vmem>>, vector<1x8x128xbf16>
      %186 = vector.shape_cast %185 : vector<1x8x128xbf16> to vector<8x128xbf16>
      %187 = vector.shape_cast %186 : vector<8x128xbf16> to vector<8x4x32xbf16>
      "tpu.trace_start"() <{level = 10 : i32, message = "qhd,khd->hqk"}> : () -> ()
      %cst_87 = arith.constant dense<0.000000e+00> : vector<4x8x8xf32>
      %188 = tpu.matmul %13, %183, %cst_87 {dimension_numbers = #tpu.dot_dimension_numbers<[2], [2], [0], [0], [0, 1, 0, 0, 1, 0], [1], [1]>} : vector<8x4x32xbf16>, vector<8x4x32xbf16>, vector<4x8x8xf32> -> vector<4x8x8xf32>
      "tpu.trace_stop"() : () -> ()
      %189 = tpu.iota {dimensions = array<i32: 0>} : vector<8x8xi32>
      %190 = vector.broadcast %1 : i32 to vector<8x8xi32>
      %191 = arith.addi %189, %190 : vector<8x8xi32>
      %192 = tpu.iota {dimensions = array<i32: 1>} : vector<8x8xi32>
      %193 = vector.broadcast %179 : i32 to vector<8x8xi32>
      %194 = arith.addi %192, %193 : vector<8x8xi32>
      %195 = arith.cmpi sle, %194, %191 : vector<8x8xi32>
      %196 = vector.shape_cast %195 : vector<8x8xi1> to vector<1x8x8xi1>
      %cst_88 = arith.constant -1.000000e+30 : f32
      %197 = vector.shape_cast %196 : vector<1x8x8xi1> to vector<1x8x8xi1>
      %198 = vector.broadcast %197 : vector<1x8x8xi1> to vector<4x8x8xi1>
      %199 = vector.broadcast %cst_88 : f32 to vector<4x8x8xf32>
      %200 = arith.select %198, %188, %199 : vector<4x8x8xi1>, vector<4x8x8xf32>
      %cst_89 = arith.constant dense<0xFF800000> : vector<4x8xf32>
      %201 = vector.multi_reduction <maximumf>, %200, %cst_89 [2] : vector<4x8x8xf32> to vector<4x8xf32>
      %202 = vector.shape_cast %201 : vector<4x8xf32> to vector<4x8x1xf32>
      %203 = arith.maximumf %arg27, %202 : vector<4x8x1xf32>
      %204 = arith.subf %arg27, %203 : vector<4x8x1xf32>
      %205 = math.exp %204 : vector<4x8x1xf32>
      %206 = vector.broadcast %203 : vector<4x8x1xf32> to vector<4x8x8xf32>
      %207 = arith.subf %200, %206 : vector<4x8x8xf32>
      %208 = math.exp %207 : vector<4x8x8xf32>
      %209 = arith.mulf %205, %arg28 : vector<4x8x1xf32>
      %cst_90 = arith.constant dense<0.000000e+00> : vector<4x8xf32>
      %210 = vector.multi_reduction <add>, %208, %cst_90 [2] : vector<4x8x8xf32> to vector<4x8xf32>
      %211 = vector.shape_cast %210 : vector<4x8xf32> to vector<4x8x1xf32>
      %212 = arith.addf %209, %211 : vector<4x8x1xf32>
      %213 = vector.broadcast %205 : vector<4x8x1xf32> to vector<4x8x32xf32>
      %214 = arith.mulf %213, %arg29 : vector<4x8x32xf32>
      %215 = arith.truncf %208 : vector<4x8x8xf32> to vector<4x8x8xbf16>
      "tpu.trace_start"() <{level = 10 : i32, message = "hqk,khd->hqd"}> : () -> ()
      %cst_91 = arith.constant dense<0.000000e+00> : vector<4x8x32xf32>
      %216 = tpu.matmul %215, %187, %cst_91 {dimension_numbers = #tpu.dot_dimension_numbers<[2], [0], [1], [2], [0, 0, 0, 1, 1, 2], [0], [1]>} : vector<4x8x8xbf16>, vector<8x4x32xbf16>, vector<4x8x32xf32> -> vector<4x8x32xf32>
      "tpu.trace_stop"() : () -> ()
      %217 = arith.addf %214, %216 : vector<4x8x32xf32>
      scf.yield %203, %212, %217 : vector<4x8x1xf32>, vector<4x8x1xf32>, vector<4x8x32xf32>
    }
    %21 = tpu.reciprocal %20#1 {approx = true} : vector<4x8x1xf32> -> vector<4x8x1xf32>
    %22 = vector.broadcast %21 : vector<4x8x1xf32> to vector<4x8x32xf32>
    %23 = arith.mulf %20#2, %22 : vector<4x8x32xf32>
    %24 = tpu.transpose %23, [1, 0, 2] : vector<4x8x32xf32> -> vector<8x4x32xf32>
    %25 = vector.shape_cast %24 : vector<8x4x32xf32> to vector<8x128xf32>
    %26 = arith.truncf %25 : vector<8x128xf32> to vector<8x128xbf16>
    %c0_11 = arith.constant 0 : index
    %c0_12 = arith.constant 0 : index
    %27 = vector.load %arg9[%c0_11, %c0_12] : memref<128x128xbf16, #tpu.memory_space<vmem>>, vector<128x128xbf16>
    %cst_13 = arith.constant dense<0.000000e+00> : vector<8x128xf32>
    %28 = tpu.matmul %26, %27, %cst_13 {dimension_numbers = #tpu.dot_dimension_numbers<[1], [0], [0], [1], [0, 0, 1, 1], [], []>} : vector<8x128xbf16>, vector<128x128xbf16>, vector<8x128xf32> -> vector<8x128xf32>
    %c0_14 = arith.constant 0 : index
    %c0_15 = arith.constant 0 : index
    %29 = vector.load %arg10[%c0_14, %c0_15] : memref<1x128xf32, #tpu.memory_space<vmem>>, vector<1x128xf32>
    %30 = vector.broadcast %29 : vector<1x128xf32> to vector<8x128xf32>
    %31 = arith.addf %28, %30 : vector<8x128xf32>
    %32 = arith.addf %3, %31 : vector<8x128xf32>
    %c0_16 = arith.constant 0 : index
    %c0_17 = arith.constant 0 : index
    %33 = vector.load %arg19[%c0_16, %c0_17] : memref<1x128xf32, #tpu.memory_space<vmem>>, vector<1x128xf32>
    %c0_18 = arith.constant 0 : index
    %c0_19 = arith.constant 0 : index
    %34 = vector.load %arg20[%c0_18, %c0_19] : memref<1x128xf32, #tpu.memory_space<vmem>>, vector<1x128xf32>
    %cst_20 = arith.constant dense<0.000000e+00> : vector<8xf32>
    %35 = vector.multi_reduction <add>, %32, %cst_20 [1] : vector<8x128xf32> to vector<8xf32>
    %36 = vector.shape_cast %35 : vector<8xf32> to vector<8x1xf32>
    %cst_21 = arith.constant 1.280000e+02 : f32
    %37 = vector.broadcast %cst_21 : f32 to vector<8x1xf32>
    %38 = arith.divf %36, %37 : vector<8x1xf32>
    %39 = vector.broadcast %38 : vector<8x1xf32> to vector<8x128xf32>
    %40 = arith.subf %32, %39 : vector<8x128xf32>
    %41 = arith.mulf %40, %40 : vector<8x128xf32>
    %cst_22 = arith.constant dense<0.000000e+00> : vector<8xf32>
    %42 = vector.multi_reduction <add>, %41, %cst_22 [1] : vector<8x128xf32> to vector<8xf32>
    %43 = vector.shape_cast %42 : vector<8xf32> to vector<8x1xf32>
    %cst_23 = arith.constant 1.280000e+02 : f32
    %44 = vector.broadcast %cst_23 : f32 to vector<8x1xf32>
    %45 = arith.divf %43, %44 : vector<8x1xf32>
    %46 = vector.broadcast %38 : vector<8x1xf32> to vector<8x128xf32>
    %47 = arith.subf %32, %46 : vector<8x128xf32>
    %cst_24 = arith.constant 9.99999974E-6 : f32
    %48 = vector.broadcast %cst_24 : f32 to vector<8x1xf32>
    %49 = arith.addf %45, %48 : vector<8x1xf32>
    %50 = math.rsqrt %49 : vector<8x1xf32>
    %51 = vector.broadcast %50 : vector<8x1xf32> to vector<8x128xf32>
    %52 = arith.mulf %47, %51 : vector<8x128xf32>
    %53 = vector.broadcast %33 : vector<1x128xf32> to vector<8x128xf32>
    %54 = arith.mulf %52, %53 : vector<8x128xf32>
    %55 = vector.broadcast %34 : vector<1x128xf32> to vector<8x128xf32>
    %56 = arith.addf %54, %55 : vector<8x128xf32>
    %57 = arith.truncf %56 : vector<8x128xf32> to vector<8x128xbf16>
    %c0_25 = arith.constant 0 : index
    %c0_26 = arith.constant 0 : index
    %58 = vector.load %arg11[%c0_25, %c0_26] : memref<128x128xbf16, #tpu.memory_space<vmem>>, vector<128x128xbf16>
    %cst_27 = arith.constant dense<0.000000e+00> : vector<8x128xf32>
    %59 = tpu.matmul %57, %58, %cst_27 {dimension_numbers = #tpu.dot_dimension_numbers<[1], [0], [0], [1], [0, 0, 1, 1], [], []>} : vector<8x128xbf16>, vector<128x128xbf16>, vector<8x128xf32> -> vector<8x128xf32>
    %c0_28 = arith.constant 0 : index
    %c0_29 = arith.constant 0 : index
    %60 = vector.load %arg12[%c0_28, %c0_29] : memref<1x128xf32, #tpu.memory_space<vmem>>, vector<1x128xf32>
    %61 = vector.broadcast %60 : vector<1x128xf32> to vector<8x128xf32>
    %62 = arith.addf %59, %61 : vector<8x128xf32>
    %cst_30 = arith.constant 0.176776692 : f32
    %63 = vector.broadcast %cst_30 : f32 to vector<8x128xf32>
    %64 = arith.mulf %62, %63 : vector<8x128xf32>
    %65 = arith.truncf %64 : vector<8x128xf32> to vector<8x128xbf16>
    %66 = vector.shape_cast %65 : vector<8x128xbf16> to vector<8x4x32xbf16>
    %cst_31 = arith.constant -1.000000e+30 : f32
    %67 = vector.broadcast %cst_31 : f32 to vector<4x8x1xf32>
    %cst_32 = arith.constant 0.000000e+00 : f32
    %68 = vector.broadcast %cst_32 : f32 to vector<4x8x1xf32>
    %cst_33 = arith.constant 0.000000e+00 : f32
    %69 = vector.broadcast %cst_33 : f32 to vector<4x8x32xf32>
    %c0_i32_34 = arith.constant 0 : i32
    %c16_i32 = arith.constant 16 : i32
    %70 = arith.muli %c0_i32_34, %c16_i32 : i32
    %71 = tpu.assume_multiple %70, 16 : i32
    %c0_35 = arith.constant 0 : index
    %72 = arith.index_cast %71 : i32 to index
    %c0_36 = arith.constant 0 : index
    %73 = vector.load %arg5[%c0_35, %72, %c0_36] : memref<1x16x128xbf16, #tpu.memory_space<vmem>>, vector<1x16x128xbf16>
    %74 = vector.shape_cast %73 : vector<1x16x128xbf16> to vector<16x128xbf16>
    %75 = vector.shape_cast %74 : vector<16x128xbf16> to vector<16x4x32xbf16>
    %c0_37 = arith.constant 0 : index
    %76 = arith.index_cast %71 : i32 to index
    %c0_38 = arith.constant 0 : index
    %77 = vector.load %arg6[%c0_37, %76, %c0_38] : memref<1x16x128xbf16, #tpu.memory_space<vmem>>, vector<1x16x128xbf16>
    %78 = vector.shape_cast %77 : vector<1x16x128xbf16> to vector<16x128xbf16>
    %79 = vector.shape_cast %78 : vector<16x128xbf16> to vector<16x4x32xbf16>
    "tpu.trace_start"() <{level = 10 : i32, message = "qhd,khd->hqk"}> : () -> ()
    %cst_39 = arith.constant dense<0.000000e+00> : vector<4x8x16xf32>
    %80 = tpu.matmul %66, %75, %cst_39 {dimension_numbers = #tpu.dot_dimension_numbers<[2], [2], [0], [0], [0, 1, 0, 0, 1, 0], [1], [1]>} : vector<8x4x32xbf16>, vector<16x4x32xbf16>, vector<4x8x16xf32> -> vector<4x8x16xf32>
    "tpu.trace_stop"() : () -> ()
    %cst_40 = arith.constant dense<0xFF800000> : vector<4x8xf32>
    %81 = vector.multi_reduction <maximumf>, %80, %cst_40 [2] : vector<4x8x16xf32> to vector<4x8xf32>
    %82 = vector.shape_cast %81 : vector<4x8xf32> to vector<4x8x1xf32>
    %83 = arith.maximumf %67, %82 : vector<4x8x1xf32>
    %84 = arith.subf %67, %83 : vector<4x8x1xf32>
    %85 = math.exp %84 : vector<4x8x1xf32>
    %86 = vector.broadcast %83 : vector<4x8x1xf32> to vector<4x8x16xf32>
    %87 = arith.subf %80, %86 : vector<4x8x16xf32>
    %88 = math.exp %87 : vector<4x8x16xf32>
    %89 = arith.mulf %85, %68 : vector<4x8x1xf32>
    %cst_41 = arith.constant dense<0.000000e+00> : vector<4x8xf32>
    %90 = vector.multi_reduction <add>, %88, %cst_41 [2] : vector<4x8x16xf32> to vector<4x8xf32>
    %91 = vector.shape_cast %90 : vector<4x8xf32> to vector<4x8x1xf32>
    %92 = arith.addf %89, %91 : vector<4x8x1xf32>
    %93 = vector.broadcast %85 : vector<4x8x1xf32> to vector<4x8x32xf32>
    %94 = arith.mulf %93, %69 : vector<4x8x32xf32>
    %95 = arith.truncf %88 : vector<4x8x16xf32> to vector<4x8x16xbf16>
    "tpu.trace_start"() <{level = 10 : i32, message = "hqk,khd->hqd"}> : () -> ()
    %cst_42 = arith.constant dense<0.000000e+00> : vector<4x8x32xf32>
    %96 = tpu.matmul %95, %79, %cst_42 {dimension_numbers = #tpu.dot_dimension_numbers<[2], [0], [1], [2], [0, 0, 0, 1, 1, 2], [0], [1]>} : vector<4x8x16xbf16>, vector<16x4x32xbf16>, vector<4x8x32xf32> -> vector<4x8x32xf32>
    "tpu.trace_stop"() : () -> ()
    %97 = arith.addf %94, %96 : vector<4x8x32xf32>
    %c1_i32_43 = arith.constant 1 : i32
    %98 = tpu.reciprocal %92 {approx = true} : vector<4x8x1xf32> -> vector<4x8x1xf32>
    %99 = vector.broadcast %98 : vector<4x8x1xf32> to vector<4x8x32xf32>
    %100 = arith.mulf %97, %99 : vector<4x8x32xf32>
    %101 = tpu.transpose %100, [1, 0, 2] : vector<4x8x32xf32> -> vector<8x4x32xf32>
    %102 = vector.shape_cast %101 : vector<8x4x32xf32> to vector<8x128xf32>
    %103 = arith.truncf %102 : vector<8x128xf32> to vector<8x128xbf16>
    %c0_44 = arith.constant 0 : index
    %c0_45 = arith.constant 0 : index
    %104 = vector.load %arg13[%c0_44, %c0_45] : memref<128x128xbf16, #tpu.memory_space<vmem>>, vector<128x128xbf16>
    %cst_46 = arith.constant dense<0.000000e+00> : vector<8x128xf32>
    %105 = tpu.matmul %103, %104, %cst_46 {dimension_numbers = #tpu.dot_dimension_numbers<[1], [0], [0], [1], [0, 0, 1, 1], [], []>} : vector<8x128xbf16>, vector<128x128xbf16>, vector<8x128xf32> -> vector<8x128xf32>
    %c0_47 = arith.constant 0 : index
    %c0_48 = arith.constant 0 : index
    %106 = vector.load %arg14[%c0_47, %c0_48] : memref<1x128xf32, #tpu.memory_space<vmem>>, vector<1x128xf32>
    %107 = vector.broadcast %106 : vector<1x128xf32> to vector<8x128xf32>
    %108 = arith.addf %105, %107 : vector<8x128xf32>
    %109 = arith.addf %56, %108 : vector<8x128xf32>
    %c0_49 = arith.constant 0 : index
    %c0_50 = arith.constant 0 : index
    %110 = vector.load %arg21[%c0_49, %c0_50] : memref<1x128xf32, #tpu.memory_space<vmem>>, vector<1x128xf32>
    %c0_51 = arith.constant 0 : index
    %c0_52 = arith.constant 0 : index
    %111 = vector.load %arg22[%c0_51, %c0_52] : memref<1x128xf32, #tpu.memory_space<vmem>>, vector<1x128xf32>
    %cst_53 = arith.constant dense<0.000000e+00> : vector<8xf32>
    %112 = vector.multi_reduction <add>, %109, %cst_53 [1] : vector<8x128xf32> to vector<8xf32>
    %113 = vector.shape_cast %112 : vector<8xf32> to vector<8x1xf32>
    %cst_54 = arith.constant 1.280000e+02 : f32
    %114 = vector.broadcast %cst_54 : f32 to vector<8x1xf32>
    %115 = arith.divf %113, %114 : vector<8x1xf32>
    %116 = vector.broadcast %115 : vector<8x1xf32> to vector<8x128xf32>
    %117 = arith.subf %109, %116 : vector<8x128xf32>
    %118 = arith.mulf %117, %117 : vector<8x128xf32>
    %cst_55 = arith.constant dense<0.000000e+00> : vector<8xf32>
    %119 = vector.multi_reduction <add>, %118, %cst_55 [1] : vector<8x128xf32> to vector<8xf32>
    %120 = vector.shape_cast %119 : vector<8xf32> to vector<8x1xf32>
    %cst_56 = arith.constant 1.280000e+02 : f32
    %121 = vector.broadcast %cst_56 : f32 to vector<8x1xf32>
    %122 = arith.divf %120, %121 : vector<8x1xf32>
    %123 = vector.broadcast %115 : vector<8x1xf32> to vector<8x128xf32>
    %124 = arith.subf %109, %123 : vector<8x128xf32>
    %cst_57 = arith.constant 9.99999974E-6 : f32
    %125 = vector.broadcast %cst_57 : f32 to vector<8x1xf32>
    %126 = arith.addf %122, %125 : vector<8x1xf32>
    %127 = math.rsqrt %126 : vector<8x1xf32>
    %128 = vector.broadcast %127 : vector<8x1xf32> to vector<8x128xf32>
    %129 = arith.mulf %124, %128 : vector<8x128xf32>
    %130 = vector.broadcast %110 : vector<1x128xf32> to vector<8x128xf32>
    %131 = arith.mulf %129, %130 : vector<8x128xf32>
    %132 = vector.broadcast %111 : vector<1x128xf32> to vector<8x128xf32>
    %133 = arith.addf %131, %132 : vector<8x128xf32>
    %134 = arith.truncf %133 : vector<8x128xf32> to vector<8x128xbf16>
    %cst_58 = arith.constant 0.000000e+00 : f32
    %135 = vector.broadcast %cst_58 : f32 to vector<8x128xf32>
    %c0_59 = arith.constant 0 : index
    %c0_60 = arith.constant 0 : index
    %136 = vector.load %arg15[%c0_59, %c0_60] : memref<128x256xbf16, #tpu.memory_space<vmem>>, vector<128x256xbf16>
    %cst_61 = arith.constant dense<0.000000e+00> : vector<8x256xf32>
    %137 = tpu.matmul %134, %136, %cst_61 {dimension_numbers = #tpu.dot_dimension_numbers<[1], [0], [0], [1], [0, 0, 1, 1], [], []>} : vector<8x128xbf16>, vector<128x256xbf16>, vector<8x256xf32> -> vector<8x256xf32>
    %c0_62 = arith.constant 0 : index
    %c0_63 = arith.constant 0 : index
    %138 = vector.load %arg16[%c0_62, %c0_63] : memref<1x256xf32, #tpu.memory_space<vmem>>, vector<1x256xf32>
    %139 = vector.broadcast %138 : vector<1x256xf32> to vector<8x256xf32>
    %140 = arith.addf %137, %139 : vector<8x256xf32>
    %cst_64 = arith.constant 0.000000e+00 : f32
    %141 = vector.broadcast %cst_64 : f32 to vector<8x256xf32>
    %142 = arith.maximumf %140, %141 : vector<8x256xf32>
    %143 = arith.truncf %142 : vector<8x256xf32> to vector<8x256xbf16>
    %c0_65 = arith.constant 0 : index
    %c0_66 = arith.constant 0 : index
    %144 = vector.load %arg17[%c0_65, %c0_66] : memref<256x128xbf16, #tpu.memory_space<vmem>>, vector<256x128xbf16>
    %cst_67 = arith.constant dense<0.000000e+00> : vector<8x128xf32>
    %145 = tpu.matmul %143, %144, %cst_67 {dimension_numbers = #tpu.dot_dimension_numbers<[1], [0], [0], [1], [0, 0, 1, 1], [], []>} : vector<8x256xbf16>, vector<256x128xbf16>, vector<8x128xf32> -> vector<8x128xf32>
    %146 = arith.addf %135, %145 : vector<8x128xf32>
    %c0_68 = arith.constant 0 : index
    %c0_69 = arith.constant 0 : index
    %147 = vector.load %arg18[%c0_68, %c0_69] : memref<1x128xf32, #tpu.memory_space<vmem>>, vector<1x128xf32>
    %148 = vector.broadcast %147 : vector<1x128xf32> to vector<8x128xf32>
    %149 = arith.addf %146, %148 : vector<8x128xf32>
    %150 = arith.addf %133, %149 : vector<8x128xf32>
    %c0_70 = arith.constant 0 : index
    %c0_71 = arith.constant 0 : index
    %151 = vector.load %arg23[%c0_70, %c0_71] : memref<1x128xf32, #tpu.memory_space<vmem>>, vector<1x128xf32>
    %c0_72 = arith.constant 0 : index
    %c0_73 = arith.constant 0 : index
    %152 = vector.load %arg24[%c0_72, %c0_73] : memref<1x128xf32, #tpu.memory_space<vmem>>, vector<1x128xf32>
    %cst_74 = arith.constant dense<0.000000e+00> : vector<8xf32>
    %153 = vector.multi_reduction <add>, %150, %cst_74 [1] : vector<8x128xf32> to vector<8xf32>
    %154 = vector.shape_cast %153 : vector<8xf32> to vector<8x1xf32>
    %cst_75 = arith.constant 1.280000e+02 : f32
    %155 = vector.broadcast %cst_75 : f32 to vector<8x1xf32>
    %156 = arith.divf %154, %155 : vector<8x1xf32>
    %157 = vector.broadcast %156 : vector<8x1xf32> to vector<8x128xf32>
    %158 = arith.subf %150, %157 : vector<8x128xf32>
    %159 = arith.mulf %158, %158 : vector<8x128xf32>
    %cst_76 = arith.constant dense<0.000000e+00> : vector<8xf32>
    %160 = vector.multi_reduction <add>, %159, %cst_76 [1] : vector<8x128xf32> to vector<8xf32>
    %161 = vector.shape_cast %160 : vector<8xf32> to vector<8x1xf32>
    %cst_77 = arith.constant 1.280000e+02 : f32
    %162 = vector.broadcast %cst_77 : f32 to vector<8x1xf32>
    %163 = arith.divf %161, %162 : vector<8x1xf32>
    %164 = vector.broadcast %156 : vector<8x1xf32> to vector<8x128xf32>
    %165 = arith.subf %150, %164 : vector<8x128xf32>
    %cst_78 = arith.constant 9.99999974E-6 : f32
    %166 = vector.broadcast %cst_78 : f32 to vector<8x1xf32>
    %167 = arith.addf %163, %166 : vector<8x1xf32>
    %168 = math.rsqrt %167 : vector<8x1xf32>
    %169 = vector.broadcast %168 : vector<8x1xf32> to vector<8x128xf32>
    %170 = arith.mulf %165, %169 : vector<8x128xf32>
    %171 = vector.broadcast %151 : vector<1x128xf32> to vector<8x128xf32>
    %172 = arith.mulf %170, %171 : vector<8x128xf32>
    %173 = vector.broadcast %152 : vector<1x128xf32> to vector<8x128xf32>
    %174 = arith.addf %172, %173 : vector<8x128xf32>
    %c0_79 = arith.constant 0 : index
    %c0_80 = arith.constant 0 : index
    %c0_81 = arith.constant 0 : index
    %175 = vector.load %arg25[%c0_79, %c0_80, %c0_81] : memref<1x8x128xf32, #tpu.memory_space<vmem>>, vector<1x8x128xf32>
    %176 = vector.shape_cast %175 : vector<1x8x128xf32> to vector<8x128xf32>
    %177 = vector.shape_cast %174 : vector<8x128xf32> to vector<1x8x128xf32>
    tpu.vector_store %arg25[%c0_79, %c0_80, %c0_81], %177 {strides = array<i32>} : memref<1x8x128xf32, #tpu.memory_space<vmem>>, vector<1x8x128xf32>,
    return
  }
  func.func @transform_0(%arg0: i32, %arg1: i32) -> (i32, i32, i32) {
    %c0_i32 = arith.constant 0 : i32
    %c0_i32_0 = arith.constant 0 : i32
    return %arg0, %arg1, %c0_i32 : i32, i32, i32
  }
  func.func @transform_1(%arg0: i32, %arg1: i32) -> (i32, i32, i32) {
    %c0_i32 = arith.constant 0 : i32
    %c0_i32_0 = arith.constant 0 : i32
    %c0_i32_1 = arith.constant 0 : i32
    return %arg0, %c0_i32, %c0_i32_0 : i32, i32, i32
  }
  func.func @transform_2(%arg0: i32, %arg1: i32) -> (i32, i32, i32) {
    %c0_i32 = arith.constant 0 : i32
    %c0_i32_0 = arith.constant 0 : i32
    %c0_i32_1 = arith.constant 0 : i32
    return %arg0, %c0_i32, %c0_i32_0 : i32, i32, i32
  }
  func.func @transform_3(%arg0: i32, %arg1: i32) -> (i32, i32, i32) {
    %c0_i32 = arith.constant 0 : i32
    %c0_i32_0 = arith.constant 0 : i32
    %c0_i32_1 = arith.constant 0 : i32
    return %arg0, %c0_i32, %c0_i32_0 : i32, i32, i32
  }
  func.func @transform_4(%arg0: i32, %arg1: i32) -> (i32, i32, i32) {
    %c0_i32 = arith.constant 0 : i32
    %c0_i32_0 = arith.constant 0 : i32
    %c0_i32_1 = arith.constant 0 : i32
    return %arg0, %c0_i32, %c0_i32_0 : i32, i32, i32
  }
  func.func @transform_5(%arg0: i32, %arg1: i32) -> (i32, i32) {
    %c0_i32 = arith.constant 0 : i32
    %c0_i32_0 = arith.constant 0 : i32
    %c0_i32_1 = arith.constant 0 : i32
    return %c0_i32, %c0_i32_0 : i32, i32
  }
  func.func @transform_6(%arg0: i32, %arg1: i32) -> (i32, i32) {
    %c0_i32 = arith.constant 0 : i32
    %c0_i32_0 = arith.constant 0 : i32
    %c0_i32_1 = arith.constant 0 : i32
    return %c0_i32, %c0_i32_0 : i32, i32
  }
  func.func @transform_7(%arg0: i32, %arg1: i32) -> (i32, i32) {
    %c0_i32 = arith.constant 0 : i32
    %c0_i32_0 = arith.constant 0 : i32
    %c0_i32_1 = arith.constant 0 : i32
    return %c0_i32, %c0_i32_0 : i32, i32
  }
  func.func @transform_8(%arg0: i32, %arg1: i32) -> (i32, i32) {
    %c0_i32 = arith.constant 0 : i32
    %c0_i32_0 = arith.constant 0 : i32
    %c0_i32_1 = arith.constant 0 : i32
    return %c0_i32, %c0_i32_0 : i32, i32
  }
  func.func @transform_9(%arg0: i32, %arg1: i32) -> (i32, i32) {
    %c0_i32 = arith.constant 0 : i32
    %c0_i32_0 = arith.constant 0 : i32
    %c0_i32_1 = arith.constant 0 : i32
    return %c0_i32, %c0_i32_0 : i32, i32
  }
  func.func @transform_10(%arg0: i32, %arg1: i32) -> (i32, i32) {
    %c0_i32 = arith.constant 0 : i32
    %c0_i32_0 = arith.constant 0 : i32
    %c0_i32_1 = arith.constant 0 : i32
    return %c0_i32, %c0_i32_0 : i32, i32
  }
  func.func @transform_11(%arg0: i32, %arg1: i32) -> (i32, i32) {
    %c0_i32 = arith.constant 0 : i32
    %c0_i32_0 = arith.constant 0 : i32
    %c0_i32_1 = arith.constant 0 : i32
    return %c0_i32, %c0_i32_0 : i32, i32
  }
  func.func @transform_12(%arg0: i32, %arg1: i32) -> (i32, i32) {
    %c0_i32 = arith.constant 0 : i32
    %c0_i32_0 = arith.constant 0 : i32
    %c0_i32_1 = arith.constant 0 : i32
    return %c0_i32, %c0_i32_0 : i32, i32
  }
  func.func @transform_13(%arg0: i32, %arg1: i32) -> (i32, i32) {
    %c0_i32 = arith.constant 0 : i32
    %c0_i32_0 = arith.constant 0 : i32
    %c0_i32_1 = arith.constant 0 : i32
    return %c0_i32, %c0_i32_0 : i32, i32
  }
  func.func @transform_14(%arg0: i32, %arg1: i32) -> (i32, i32) {
    %c0_i32 = arith.constant 0 : i32
    %c0_i32_0 = arith.constant 0 : i32
    %c0_i32_1 = arith.constant 0 : i32
    return %c0_i32, %c0_i32_0 : i32, i32
  }
  func.func @transform_15(%arg0: i32, %arg1: i32) -> (i32, i32) {
    %c0_i32 = arith.constant 0 : i32
    %c0_i32_0 = arith.constant 0 : i32
    %c0_i32_1 = arith.constant 0 : i32
    return %c0_i32, %c0_i32_0 : i32, i32
  }
  func.func @transform_16(%arg0: i32, %arg1: i32) -> (i32, i32) {
    %c0_i32 = arith.constant 0 : i32
    %c0_i32_0 = arith.constant 0 : i32
    %c0_i32_1 = arith.constant 0 : i32
    return %c0_i32, %c0_i32_0 : i32, i32
  }
  func.func @transform_17(%arg0: i32, %arg1: i32) -> (i32, i32) {
    %c0_i32 = arith.constant 0 : i32
    %c0_i32_0 = arith.constant 0 : i32
    %c0_i32_1 = arith.constant 0 : i32
    return %c0_i32, %c0_i32_0 : i32, i32
  }
  func.func @transform_18(%arg0: i32, %arg1: i32) -> (i32, i32) {
    %c0_i32 = arith.constant 0 : i32
    %c0_i32_0 = arith.constant 0 : i32
    %c0_i32_1 = arith.constant 0 : i32
    return %c0_i32, %c0_i32_0 : i32, i32
  }
  func.func @transform_19(%arg0: i32, %arg1: i32) -> (i32, i32) {
    %c0_i32 = arith.constant 0 : i32
    %c0_i32_0 = arith.constant 0 : i32
    %c0_i32_1 = arith.constant 0 : i32
    return %c0_i32, %c0_i32_0 : i32, i32
  }
  func.func @transform_20(%arg0: i32, %arg1: i32) -> (i32, i32) {
    %c0_i32 = arith.constant 0 : i32
    %c0_i32_0 = arith.constant 0 : i32
    %c0_i32_1 = arith.constant 0 : i32
    return %c0_i32, %c0_i32_0 : i32, i32
  }
  func.func @transform_21(%arg0: i32, %arg1: i32) -> (i32, i32) {
    %c0_i32 = arith.constant 0 : i32
    %c0_i32_0 = arith.constant 0 : i32
    %c0_i32_1 = arith.constant 0 : i32
    return %c0_i32, %c0_i32_0 : i32, i32
  }
  func.func @transform_22(%arg0: i32, %arg1: i32) -> (i32, i32) {
    %c0_i32 = arith.constant 0 : i32
    %c0_i32_0 = arith.constant 0 : i32
    %c0_i32_1 = arith.constant 0 : i32
    return %c0_i32, %c0_i32_0 : i32, i32
  }
  func.func @transform_23(%arg0: i32, %arg1: i32) -> (i32, i32, i32) {
    %c0_i32 = arith.constant 0 : i32
    %c0_i32_0 = arith.constant 0 : i32
    return %arg0, %arg1, %c0_i32 : i32, i32, i32
  }
}

</mosaic_0001>

<bundles_post_ra>
// kernel: tpu_custom_call.1
= control target key start
LH: loop header
LB: loop body
LE: loop exit
PB: predicated region body
PF: predicated region fallthrough
CT: control target
= control target key end

     0   :  { %s9532_s0 = inlined_call_operand.hbm [shape: f32[2,16,128], index: 0, kind: input, shape index: {}]   ;;  %s9533_s1 = inlined_call_operand.hbm [shape: bf16[2,16,128], index: 1, kind: input, shape index: {}]   ;;  %s9534_s2 = inlined_call_operand.hbm [shape: bf16[2,16,128], index: 2, kind: input, shape index: {}]   ;;  %s9535_s3 = inlined_call_operand.hbm [shape: bf16[2,16,128], index: 3, kind: input, shape index: {}]   ;;  %s9536_s4 = inlined_call_operand.hbm [shape: bf16[2,16,128], index: 4, kind: input, shape index: {}]   ;;  %s9537_s5 = inlined_call_operand.hbm [shape: bf16[128,128], index: 5, kind: input, shape index: {}]   ;;  %s9538_s6 = inlined_call_operand.vmem [shape: f32[1,128], index: 6, kind: input, shape index: {}]   ;;  %s9539_s7 = inlined_call_operand.hbm [shape: bf16[128,128], index: 7, kind: input, shape index: {}]   ;;  %s9540_s8 = inlined_call_operand.vmem [shape: f32[1,128], index: 8, kind: input, shape index: {}]   ;;  %s9541_s9 = inlined_call_operand.hbm [shape: bf16[128,128], index: 9, kind: input, shape index: {}]   ;;  %s9542_s10 = inlined_call_operand.vmem [shape: f32[1,128], index: 10, kind: input, shape index: {}]   ;;  %s9543_s11 = inlined_call_operand.hbm [shape: bf16[128,128], index: 11, kind: input, shape index: {}]   ;;  %s9544_s12 = inlined_call_operand.vmem [shape: f32[1,128], index: 12, kind: input, shape index: {}]   ;;  %s9545_s13 = inlined_call_operand.hbm [shape: bf16[128,256], index: 13, kind: input, shape index: {}]   ;;  %s9546_s14 = inlined_call_operand.vmem [shape: f32[1,256], index: 14, kind: input, shape index: {}]   ;;  %s9547_s15 = inlined_call_operand.hbm [shape: bf16[256,128], index: 15, kind: input, shape index: {}]   ;;  %s9548_s16 = inlined_call_operand.vmem [shape: f32[1,128], index: 16, kind: input, shape index: {}]   ;;  %s9549_s17 = inlined_call_operand.vmem [shape: f32[1,128], index: 17, kind: input, shape index: {}]   ;;  %s9550_s18 = inlined_call_operand.vmem [shape: f32[1,128], index: 18, kind: input, shape index: {}]   ;;  %s9551_s19 = inlined_call_operand.vmem [shape: f32[1,128], index: 19, kind: input, shape index: {}]   ;;  %s9552_s20 = inlined_call_operand.vmem [shape: f32[1,128], index: 20, kind: input, shape index: {}]   ;;  %s9553_s21 = inlined_call_operand.vmem [shape: f32[1,128], index: 21, kind: input, shape index: {}]   ;;  %s9554_s22 = inlined_call_operand.vmem [shape: f32[1,128], index: 22, kind: input, shape index: {}]   ;;  %s9555_s23 = inlined_call_operand.hbm [shape: f32[2,16,128], index: 23, kind: output, shape index: {}]  }
   0x1   :  { %9580 = sst [smem:[#allocation42_spill]] %s9532_s0 }
   0x2   :  { %9581 = sst [smem:[#allocation43_spill]] %s9533_s1 }
   0x3   :  { %9582 = sst [smem:[#allocation44_spill]] %s9534_s2 }
   0x4   :  { %9583 = sst [smem:[#allocation45_spill]] %s9535_s3 }
   0x5   :  { %9584 = sst [smem:[#allocation46_spill]] %s9536_s4 }
   0x6   :  { %9585 = sst [smem:[#allocation47_spill]] %s9537_s5 }
   0x7   :  { %9586 = sst [smem:[#allocation48_spill]] %s9538_s6 }
   0x8   :  { %9587 = sst [smem:[#allocation49_spill]] %s9539_s7 }
   0x9   :  { %9588 = sst [smem:[#allocation50_spill]] %s9540_s8 }
   0xa   :  { %9589 = sst [smem:[#allocation51_spill]] %s9541_s9 }
   0xb   :  { %9590 = sst [smem:[#allocation52_spill]] %s9542_s10 }
   0xc   :  { %9591 = sst [smem:[#allocation53_spill]] %s9543_s11 }
   0xd   :  { %9592 = sst [smem:[#allocation54_spill]] %s9544_s12 }
   0xe   :  { %9593 = sst [smem:[#allocation55_spill]] %s9545_s13 }
   0xf   :  { %9594 = sst [smem:[#allocation56_spill]] %s9546_s14 }
  0x10   :  { %9595 = sst [smem:[#allocation57_spill]] %s9547_s15 }
  0x11   :  { %9596 = sst [smem:[#allocation58_spill]] %s9548_s16 }
  0x12   :  { %9597 = sst [smem:[#allocation59_spill]] %s9549_s17 }
  0x13   :  { %9598 = sst [smem:[#allocation60_spill]] %s9550_s18 }
  0x14   :  { %9599 = sst [smem:[#allocation61_spill]] %s9551_s19 }
  0x15   :  { %9600 = sst [smem:[#allocation62_spill]] %s9552_s20 }
  0x16   :  { %9601 = sst [smem:[#allocation63_spill]] %s9553_s21 }
  0x17   :  { %9602 = sst [smem:[#allocation64_spill]] %s9554_s22 }
  0x18   :  { %9603 = sst [smem:[#allocation65_spill]] %s9555_s23 }
  0x19   :  { %28 = vsyncpa [#allocation3], 0 }
  0x1a   :  { %30 = vsyncpa [#allocation3 + $0x1], 0 }
  0x1b   :  { %31 = vsyncpa [#allocation6], 0 }
  0x1c   :  { %33 = vsyncpa [#allocation6 + $0x1], 0 }
  0x1d   :  { %34 = vsyncpa [#allocation9], 0 }
  0x1e   :  { %36 = vsyncpa [#allocation9 + $0x1], 0 }
  0x1f   :  { %37 = vsyncpa [#allocation12], 0 }
  0x20   :  { %38 = vsyncpa [#allocation15], 0 }
  0x21   :  { %39 = vsyncpa [#allocation18], 0 }
  0x22   :  { %40 = vsyncpa [#allocation4], 0 }
  0x23   :  { %42 = vsyncpa [#allocation4 + $0x1], 0  ;;  %s7780_s4 = smov 0   ;;  %s7782_s30 = smov 0  }
  0x24   :  { %s7784_s24 = smov 0   ;;  %s7786_s25 = smov 0  }
  0x25   :  { %s7788_s5 = smov 0   ;;  %s7790_s1 = smov 0  }
  0x26   :  { %s7792_s26 = smov 0   ;;  %s7794_s2 = smov 0  }
  0x27   :  { %s7796_s6 = smov 0   ;;  %s7798_s27 = smov 0  }
  0x28   :  { %s7800_s7 = smov 0  }
  0x29 LB: > { %9604 = sst [smem:[#allocation28_spill]] %s7517_s30  ;;  %s7836_s28 = sadd.s32 4294967295, %s7553_s7   ;;  %s7553_s7 = sphi %s7800_s7, %s48_s7   ;;  %s7549_s27 = sphi %s7798_s27, %s9702_s27   ;;  %s7545_s6 = sphi %s7796_s6, %s9701_s6   ;;  %s7541_s2 = sphi %s7794_s2, %s9700_s2   ;;  %s7537_s26 = sphi %s7792_s26, %s9699_s26   ;;  %s7533_s1 = sphi %s7790_s1, %s9707_s1   ;;  %s7529_s5 = sphi %s7788_s5, %s9706_s5   ;;  %s7525_s25 = sphi %s7786_s25, %s9705_s25   ;;  %s7521_s24 = sphi %s7784_s24, %s9704_s24   ;;  %s7517_s30 = sphi %s7782_s30, %s9703_s30   ;;  %s7513_s4 = sphi %s7780_s4, %s9697_s4  }
  0x2a   : > { %9605 = sst [smem:[#allocation29_spill]] %s7525_s25  ;;  %p6020_p0 = scmp.ge.s32.totalorder %s7553_s7, 1 }
  0x2b   : > { %9606 = sst [smem:[#allocation30_spill]] %s7537_s26  ;;  %p83_p1 = scmp.eq.s32.totalorder %s7836_s28, 0 }
  0x2c   : > { %9607 = sst [smem:[#allocation31_spill]] %s7541_s2  ;;  %p603_p2 = scmp.lt.s32.totalorder %s7553_s7, 5 }
  0x2d   : > { %9608 = sst [smem:[#allocation32_spill]] %s7545_s6  ;;  %s7639_s21 = smov [#allocation11]  }
  0x2e   : > { %9609 = sst [smem:[#allocation33_spill]] %s7549_s27  ;;  %p7844_p3 = pnand %p6020_p0, %p603_p2 }
  0x2f   : > { %9610 = sst [smem:[#allocation34_spill]] %s7836_s28  ;;  %s616_s2 = sshll.u32 %s7639_s21, 4  ;;  %s617_s2 = int_to_ptr.vmem [resolvable:$true] %s616_s2 }
  0x30   : > { %s9611_s0 = sld [smem:[#allocation47_spill]]  ;;  %p6442_p4 = pneg %p7844_p3 }
  0x31   : > { %s9614_s9 = sld [smem:[#allocation51_spill]]  ;;  %s9557_s3 = smov 64  }
  0x32   : > { %p7852_p5 = pnand %p6442_p4, %p83_p1  ;;  %s7642_s21 = smov [#allocation14]  }
  0x33   : > { %s650_s14 = sshll.u32 %s7642_s21, 4  ;;  %s9615_s13 = sld [smem:[#allocation55_spill]]  ;;  %s651_s14 = int_to_ptr.vmem [resolvable:$true] %s650_s14 }
  0x34   : > { %s7644_s12 = smov 128   ;;  %s7645_s21 = smov 8  }
  0x35   : > { %p77_p6 = scmp.eq.s32.totalorder %s7553_s7, 0  ;;  %p102_p7 = scmp.ne.s32.totalorder %s7521_s24, %s7517_s30 }
  0x36   : > { %s614_s22 = sshll.u32 %s9611_s0, 4  ;;  %s9559_s0 = smov 4   ;;  %s615_s22 = int_to_ptr.hbm [resolvable:$true] %s614_s22 }
  0x37   : > { %s648_s29 = sshll.u32 %s9614_s9, 4  ;;  %p108_p8 = scmp.ne.s32.totalorder %s7517_s30, %s7513_s4  ;;  %s649_s29 = int_to_ptr.hbm [resolvable:$true] %s648_s29 }
  0x38   : > { %6445 = dma.hbm_to_vmem [thread:$0]  (!%p7852_p5), %s615_s22, 1024, %s617_s2, [#allocation12], %s9557_s3, %s9557_s3, %s9559_s0  }
  0x39   : > { %s682_s19 = sshll.u32 %s9615_s13, 4  ;;  %s7643_s22 = smov [#allocation17]   ;;  %s683_s19 = int_to_ptr.hbm [resolvable:$true] %s682_s19 }
  0x3a   : > { %6451 = dma.hbm_to_vmem [thread:$0]  (!%p7852_p5), %s649_s29, 1024, %s651_s14, [#allocation15], %s9557_s3, %s9557_s3, %s9559_s0  }
  0x3b   : > { %s684_s2 = sshll.u32 %s7643_s22, 4  ;;  %p9565_p9 = scmp.lt.s32.totalorder %s7553_s7, 4  ;;  %s685_s2 = int_to_ptr.vmem [resolvable:$true] %s684_s2 }
  0x3c   : > { %6457 = dma.hbm_to_vmem [thread:$0]  (!%p7852_p5), %s683_s19, 2048, %s685_s2, [#allocation18], %s7644_s12, %s7644_s12, %s7645_s21  }
  0x3d   : > { %s757_s9 = sand.u32 1, %s7553_s7   ;;  %p104_p10 = por %p102_p7, %p77_p6 }
  0x3e   : > { %p7885_p11 = por %p108_p8, %p83_p1  ;;  %s759_s29 = sand.u32 1, %s7521_s24  }
  0x3f   : > { %s7890_s14 = sshll.u32 %s759_s29, 3  ;;  %s7893_s22 = sshll.u32 %s7549_s27, 3 }
  0x40   : > { %s9616_s20 = scalar_select %p7885_p11, 1, 0 }
  0x41   : > { %s9618_s4 = sld [smem:[#allocation43_spill]]  ;;  %s761_s3 = scalar_lea.vmem [#allocation5], %s7890_s14 }
  0x42   : > { %9617 = sst [smem:[#allocation35_spill]] %s9616_s20  ;;  %s769_s0 = sshll.u32 %s761_s3, 4  ;;  %s770_s0 = int_to_ptr.vmem [resolvable:$true] %s769_s0 }
  0x43   : > { %p7902_p12 = pnand %p9565_p9, %p104_p10  ;;  %s9620_s18 = sld [smem:[#allocation45_spill]] }
  0x44   : > { %s7910_s12 = scalar_lea.sflag [#allocation6], %s757_s9  ;;  %s9621_s19 = smov 4  }
  0x45   : > { %s9622_s3 = smov 64   ;;  %s9623_s10 = sld [smem:[#allocation49_spill]] }
  0x46   : > { %s9624_s11 = sld [smem:[#allocation53_spill]]  ;;  %p76_p0 = scmp.ne.s32.totalorder %s7533_s1, %s7529_s5 }
  0x47   : > { %s766_s2 = scalar_lea.hbm %s9618_s4, %s7893_s22  ;;  %s805_s4 = scalar_lea.vmem [#allocation8], %s7890_s14 }
  0x48   : > { %s767_s21 = sshll.u32 %s766_s2, 4  ;;  %s813_s2 = sshll.u32 %s805_s4, 4  ;;  %s768_s21 = int_to_ptr.hbm [resolvable:$true] %s767_s21  ;;  %s814_s2 = int_to_ptr.vmem [resolvable:$true] %s813_s2 }
  0x49   : > { %s810_s17 = scalar_lea.hbm %s9620_s18, %s7893_s22  ;;  %s7922_s18 = scalar_lea.sflag [#allocation9], %s757_s9 }
  0x4a   : > { %s811_s8 = sshll.u32 %s810_s17, 4  ;;  %s7646_s17 = smov [#allocation13]   ;;  %s812_s8 = int_to_ptr.hbm [resolvable:$true] %s811_s8 }
  0x4b   : > { %6467 = dma.hbm_to_vmem [thread:$0]  (!%p7902_p12), %s768_s21, 128, %s770_s0, %s7910_s12, %s9622_s3, %s9622_s3, %s9621_s19  }
  0x4c   : > { %s631_s29 = sshll.u32 %s9623_s10, 4  ;;  %s633_s0 = sshll.u32 %s7646_s17, 4  ;;  %s632_s29 = int_to_ptr.hbm [resolvable:$true] %s631_s29  ;;  %s634_s0 = int_to_ptr.vmem [resolvable:$true] %s633_s0 }
  0x4d   : > { %6473 = dma.hbm_to_vmem [thread:$0]  (!%p7902_p12), %s812_s8, 128, %s814_s2, %s7922_s18, %s9622_s3, %s9622_s3, %s9621_s19  }
  0x4e   : > { %s665_s26 = sshll.u32 %s9624_s11, 4  ;;  %s9625_s15 = sld [smem:[#allocation57_spill]]  ;;  %s666_s26 = int_to_ptr.hbm [resolvable:$true] %s665_s26 }
  0x4f   : > { %6448 = dma.hbm_to_vmem [thread:$0]  (!%p7852_p5), %s632_s29, 1024, %s634_s0, [#allocation12], %s9622_s3, %s9622_s3, %s9621_s19  }
  0x50   : > { %s7647_s2 = smov [#allocation16]   ;;  %s7648_s29 = smov [#allocation19]  }
  0x51   : > { %s667_s10 = sshll.u32 %s7647_s2, 4  ;;  %s701_s17 = sshll.u32 %s7648_s29, 4  ;;  %s668_s10 = int_to_ptr.vmem [resolvable:$true] %s667_s10  ;;  %s702_s17 = int_to_ptr.vmem [resolvable:$true] %s701_s17 }
  0x52   : > { %6454 = dma.hbm_to_vmem [thread:$0]  (!%p7852_p5), %s666_s26, 1024, %s668_s10, [#allocation15], %s9622_s3, %s9622_s3, %s9621_s19  }
  0x53   : > { %s6019_s0 = sadd.s32 4294967294, %s7553_s7   ;;  %s57_s21 = sadd.s32 1, %s7545_s6 }
  0x54   : > { %s699_s20 = sshll.u32 %s9625_s15, 4  ;;  %p58_p13 = scmp.ge.s32.totalorder %s57_s21, 2  ;;  %s700_s20 = int_to_ptr.hbm [resolvable:$true] %s699_s20 }
  0x55   : > { %6460 = dma.hbm_to_vmem [thread:$0]  (!%p7852_p5), %s700_s20, 2048, %s702_s17, [#allocation18], %s9622_s3, %s9622_s3, %s9621_s19  }
  0x56   : > { %s60_s4 = sadd.s32 1, %s7549_s27  ;;  %s69_s8 = sadd.s32 1, %s7533_s1 }
  0x57   : > { %s9709_s21 = smov (%p58_p13, %s57_s21), 0  ;;  %s9711_s4 = smov (!%p58_p13, %s60_s4), %s7549_s27 }
  0x58   : > { %9626 = sst [smem:[#allocation36_spill]] %s9709_s21  ;;  %s65_s26 = ssub.s32 %s7545_s6, %s9709_s21 }
  0x59   : > { %p7964_p2 = por %p77_p6, %p76_p0  ;;  %p62_p4 = scmp.ge.s32.totalorder %s9711_s4, 2 }
  0x5a   : > { %p82_p5 = scmp.ne.s32.totalorder %s7529_s5, %s7525_s25  ;;  %s95_s9 = sadd.s32 1, %s7521_s24 }
  0x5b   : > { %p590_p7 = scmp.eq.s32.totalorder %s7836_s28, 3  ;;  %s9713_s4 = smov (%p62_p4, %s9711_s4), 0 }
  0x5c   : > { %9628 = sst [smem:[#allocation37_spill]] %s9713_s4  ;;  %p7976_p8 = por %p83_p1, %p82_p5 }
  0x5d   : > { %p7980_p10 = por %p590_p7, %p76_p0  ;;  %s64_s10 = ssub.s32 %s7549_s27, %s9713_s4 }
  0x5e   : > { %s9629_s20 = scalar_select %p7976_p8, 1, 0 }
  0x5f   : > { %s9631_s2 = scalar_select %p7980_p10, 1, 0 }
  0x60   : > { %9630 = sst [smem:[#allocation38_spill]] %s9629_s20  ;;  %p596_p6 = scmp.eq.s32.totalorder %s6019_s0, 3 }
  0x61   : > { %9632 = sst [smem:[#allocation39_spill]] %s9631_s2  ;;  %s66_s29 = sor.u32 %s65_s26, %s64_s10 }
  0x62   : > { %p93_p13 = scmp.eq.s32.totalorder %s64_s10, 0  ;;  %p67_p9 = scmp.eq.s32.totalorder %s66_s29, 0 }
  0x63   : > { %p7986_p4 = por %p596_p6, %p82_p5  ;;  %s736_s21 = sand.u32 1, %s7533_s1  }
  0x64   : > { %s7991_s11 = scalar_select %p93_p13, %s7521_s24, %s95_s9  }
  0x65   : > { %s7994_s15 = scalar_select %p67_p9, %s7533_s1, %s69_s8  }
  0x66   : > { %s6029_s25 = sshll.u32 %s7549_s27, 1  ;;  %s6028_s2 = sshll.u32 %s736_s21, 3 }
  0x67   : > { %9634 = sst [smem:[#allocation40_spill]] %s7994_s15  ;;  %s744_s4 = sadd.s32 %s7545_s6, %s6029_s25 }
  0x68   : > { %s6030_s0 = sshll.u32 %s744_s4, 3  ;;  %s740_s26 = scalar_lea.vmem [#allocation2], %s6028_s2 }
  0x69   : > { %s750_s10 = sshll.u32 %s740_s26, 4  ;;  %s9635_s28 = sld [smem:[#allocation42_spill]]  ;;  %s751_s10 = int_to_ptr.vmem [resolvable:$true] %s750_s10 }
  0x6a   : > { %p9636_p9 = scmp.lt.s32.totalorder %s7553_s7, 4  ;;  %s9637_s25 = sld [smem:[#allocation44_spill]] }
  0x6b   : > { %s737_s2 = scalar_lea.sflag [#allocation3], %s736_s21  ;;  %s783_s6 = scalar_lea.vmem [#allocation7], %s7890_s14 }
  0x6c   : > { %p6462_p0 = pnand %p9636_p9, %p7964_p2  ;;  %s791_s15 = sshll.u32 %s783_s6, 4  ;;  %s792_s15 = int_to_ptr.vmem [resolvable:$true] %s791_s15 }
  0x6d   : > { %s9638_s16 = sld [smem:[#allocation46_spill]] }
  0x6f   : > { %s746_s20 = scalar_lea.hbm %s9635_s28, %s6030_s0  ;;  %s827_s0 = scalar_lea.vmem [#allocation10], %s7890_s14 }
  0x70   : > { %s748_s9 = sshll.u32 %s746_s20, 4  ;;  %s788_s4 = scalar_lea.hbm %s9637_s25, %s7893_s22  ;;  %s749_s9 = int_to_ptr.hbm [resolvable:$true] %s748_s9 }
  0x71   : > { %6464 = dma.hbm_to_vmem [thread:$0]  (!%p6462_p0), %s749_s9, 128, %s751_s10, %s737_s2  }
  0x72   : > { %s789_s26 = sshll.u32 %s788_s4, 4  ;;  %s835_s29 = sshll.u32 %s827_s0, 4  ;;  %s790_s26 = int_to_ptr.hbm [resolvable:$true] %s789_s26  ;;  %s836_s29 = int_to_ptr.vmem [resolvable:$true] %s835_s29 }
  0x73   : > { %6470 = dma.hbm_to_vmem [thread:$0]  (!%p7902_p12), %s790_s26, 128, %s792_s15, %s7910_s12, %s9622_s3, %s9622_s3, %s9621_s19  }
  0x74   : > { %s832_s20 = scalar_lea.hbm %s9638_s16, %s7893_s22  ;;  %847 = sbr.rel (%p7844_p3) target bundleno = 3848 (0xf08), region = 112 }
  0x75   : > { %s833_s27 = sshll.u32 %s832_s20, 4  ;;  %s834_s27 = int_to_ptr.hbm [resolvable:$true] %s833_s27 }
  0x76   : > { %6476 = dma.hbm_to_vmem [thread:$0]  (!%p7902_p12), %s834_s27, 128, %s836_s29, %s7922_s18, %s9622_s3, %s9622_s3, %s9621_s19  }
  0x79   : > { %s8031_s15 = sand.u32 1, %s7529_s5  }
  0x7a   : > { %s6044_s22 = sshll.u32 %s8031_s15, 3  ;;  %s850_s14 = scalar_lea.sflag [#allocation3], %s8031_s15 }
  0x7b   : > { %s8037_s12 = scalar_lea.vmem [#allocation2], %s6044_s22 }
  0x7c   : > { %7484 = dma.done.wait (%p7976_p8), %s850_s14, 128  }
  0x7d   : > { %7486 = vsyncadd (%p7976_p8), %s850_s14, 4294967168  ;;  %s9640_s13 = sld [smem:[#allocation34_spill]] }
  0x7e   : > { %s9641_s23 = sld [smem:[#allocation28_spill]] }
  0x83   : > { %s859_s3 = sand.u32 1, %s9640_s13  }
  0x84   : > { %s861_s18 = sand.u32 1, %s9641_s23   ;;  %s860_s10 = scalar_lea.sflag [#allocation6], %s859_s3 }
  0x85   : > { %s8045_s21 = sshll.u32 %s861_s18, 3 }
  0x86   : > { %s863_s9 = scalar_lea.vmem [#allocation5], %s8045_s21 }
  0x87   : > { %7488 = dma.done.wait (%p7885_p11), %s860_s10, 256  }
  0x88   : > { %7490 = vsyncadd (%p7885_p11), %s860_s10, 4294967040  ;;  %s873_s8 = scalar_lea.vmem [#allocation7], %s8045_s21  ;;  %s880_s25 = scalar_lea.sflag [#allocation9], %s859_s3 }
  0x89   : > { %s883_s4 = scalar_lea.vmem [#allocation8], %s8045_s21 }
  0x8a   : > { %7492 = dma.done.wait (%p7885_p11), %s880_s25, 256  }
  0x8b   : > { %7494 = vsyncadd (%p7885_p11), %s880_s25, 4294967040  ;;  %s893_s2 = scalar_lea.vmem [#allocation10], %s8045_s21 }
  0x8c   : > { %7496 = dma.done.wait (%p83_p1), [#allocation12], 2048  }
  0x8d   : > { %7498 = vsyncadd (%p83_p1), [#allocation12], 4294965248 }
  0x8e   : > { %7500 = dma.done.wait (%p83_p1), [#allocation15], 2048  }
  0x8f   : > { %7502 = vsyncadd (%p83_p1), [#allocation15], 4294965248 }
  0x90   : > { %7504 = dma.done.wait (%p83_p1), [#allocation18], 4096  }
  0x91   : > { %7506 = vsyncadd (%p83_p1), [#allocation18], 4294963200  ;;  %s9643_s26 = sld [smem:[#allocation30_spill]]  ;;  %v6349_v0 = vld [vmem:[#allocation11 + $0x38] sm:$0xff]  ;;  %v6348_v1 = vld [vmem:[#allocation11 + $0x30] sm:$0xff]  ;;  %s7649_s0 = smov 32  }
  0x92   : > { %1079 = vmatpush.bf16.msra.mxu0 %v6349_v0  ;;  %v6347_v2 = vld [vmem:[#allocation11 + $0x28] sm:$0xff]  ;;  %v6346_v3 = vld [vmem:[#allocation11 + $0x20] sm:$0xff]  ;;  %v6345_v4 = vld [vmem:[#allocation11 + $0x18] sm:$0xff]  ;;  %s9644_s20 = sld [smem:[#allocation48_spill]]  ;;  %s7650_s29 = smov 96   ;;  %v8101_v19 = vmov 0.0  }
  0x93   : > { %v6344_v5 = vld [vmem:[#allocation11 + $0x10] sm:$0xff]  ;;  %v6343_v6 = vld [vmem:[#allocation11 + $0x8] sm:$0xff]  ;;  %v6342_v7 = vld [vmem:[#allocation11] sm:$0xff]  ;;  %s7651_s6 = smov 64   ;;  %s8097_s14 = scalar_lea.vmem [#allocation20], %s6044_s22  ;;  %v8103_v20 = vmov 0.0  }
  0x94   : > { %v8073_v8 = vld [vmem:[%s8037_s12] sm:$0xff]  ;;  %v8105_v21 = vmov 0.0   ;;  %v8107_v22 = vmov 0.0   ;;  %v8109_v23 = vmov 0.0   ;;  %v8111_v24 = vmov 0.0  }
  0x95   : > { %v1010_v9 = vpack.c.bf16 %v8073_v8, %v8073_v8  ;;  %v8113_v25 = vmov 0.0   ;;  %v8115_v26 = vmov 0.0  }
  0x96   : > { %1080 = vmatpush.bf16.msra.mxu0 %v6348_v1 }
  0x97   : > { %s6056_s30 = sshll.u32 %s9643_s26, 3  ;;  %s1101_s27 = sadd.s32 1, %s9643_s26 }
  0x98   : > { %v6774_v10 = vld [vmem:[%s9644_s20] ss:$0 sm:$0xff]  ;;  %p6089_p1 = scmp.le.s32.totalorder %s1101_s27, 0 }
  0x99   : > { %s8141_s22 = smov (!%p6089_p1), 0  }
  0x9a   : > { %1081 = vmatpush.bf16.msra.mxu0 %v6347_v2 }
  0x9e   : > { %1082 = vmatpush.bf16.msra.mxu0 %v6346_v3 }
  0xa2   : > { %1083 = vmatpush.bf16.msra.mxu0 %v6345_v4 }
  0xa6   : > { %1084 = vmatpush.bf16.msra.mxu0 %v6344_v5 }
  0xaa   : > { %1085 = vmatpush.bf16.msra.mxu0 %v6343_v6 }
  0xae   : > { %1086 = vmatpush.bf16.msra.mxu0 %v6342_v7 }
  0xb1   : > { %1087 = vmatmul.bf16.vlgmr.msra.gmra.mxu0 %v1010_v9 }
 0x12e   : > { %v1088_v11 = vpop.f32.mrf.mxu0 }
 0x12f   : > { %v1089_v12 = vadd.f32 %v6774_v10, %v1088_v11 }
 0x131   : > { %v1092_v13 = vmul.f32 0.17677669, %v1089_v12 }
 0x133   : > { %v8081_v14 = vpack.c.bf16 %v1092_v13, %v1092_v13 }
 0x135   : > { %1099 = vrot.lane.b32.xlu1 %v8081_v14, %s7649_s0  ;;  %1095 = vrot.lane.b32.xlu0 %v8081_v14, %s7650_s29 }
 0x136   : > { %v1090_v15 = vpop.f32.mrf.mxu0 }
 0x13d   : > { %1097 = vrot.lane.b32.xlu0 %v8081_v14, %s7651_s6 }
 0x1a7   : > { %v8089_v16 = vpop.permute.xlu1 %1099  ;;  %v8091_v17 = vpop.permute.xlu0 %1095 }
 0x1ab   : > { %5866 = sbr.rel (%p6089_p1) target bundleno = 1466 (0x5ba), region = 232 }
 0x1af   : > { %v8093_v18 = vpop.permute.xlu0 %1097 }
 0x1b0   : > { %v8117_v27 = vmov 0.0   ;;  %v8119_v28 = vmov 0.0   ;;  %v8121_v29 = vmov 0.0   ;;  %v8123_v30 = vmov 0.0  }
 0x1b1   : > { %v8125_v31 = vmov 0.0   ;;  %v8127_v32 = vmov 0.0   ;;  %v8129_v33 = vmov 0.0   ;;  %v8131_v34 = vmov 0.0  }
 0x1b2   : > { %v8133_v35 = vmov -1e+30   ;;  %v8135_v36 = vmov -1e+30   ;;  %v8137_v37 = vmov -1e+30  }
 0x1b3   : > { %v8139_v38 = vmov -1e+30  }
 0x1b4 LB: >> { %s6090_s12 = sshll.u32 %s7605_s22, 3  ;;  %s7652_s3 = smov 96   ;;  %v7655_v40 = vmov 1983009808   ;;  %v7656_v52 = vmov 1934713408   ;;  %s7605_s22 = sphi %s8141_s22, %s1105_s22   ;;  %v7601_v38 = vphi %v8139_v38, %v9658_v38   ;;  %v7597_v37 = vphi %v8137_v37, %v9657_v37   ;;  %v7593_v36 = vphi %v8135_v36, %v9656_v36   ;;  %v7589_v35 = vphi %v8133_v35, %v9655_v35   ;;  %v7585_v34 = vphi %v8131_v34, %v9654_v34   ;;  %v7581_v33 = vphi %v8129_v33, %v9653_v33   ;;  %v7577_v32 = vphi %v8127_v32, %v9652_v32   ;;  %v7573_v31 = vphi %v8125_v31, %v9651_v31   ;;  %v7569_v30 = vphi %v8123_v30, %v9650_v30   ;;  %v7565_v29 = vphi %v8121_v29, %v9649_v29   ;;  %v7561_v28 = vphi %v8119_v28, %v9648_v28   ;;  %v7557_v27 = vphi %v8117_v27, %v9647_v27  }
 0x1b5   : >> { %s8185_s13 = sshra.s32 %s6090_s12, 3  ;;  %s7653_s18 = smov 32   ;;  %v1147_v41 = vunpack.c.l.s4 %v7655_v40  ;;  %v1161_v53 = vunpack.c.l.s4 %v7656_v52  ;;  %vm1156_vm0 = vcmask 1047556   ;;  %vm2392_vm1 = vcmask 261120  }
 0x1b6   : >> { %s6091_s23 = sshll.u32 %s8185_s13, 2  ;;  %s7654_s10 = smov 64   ;;  %vm2472_vm3 = vcmask 64512   ;;  %vm2594_vm4 = vcmask 1043456  }
 0x1b7   : >> { %s1124_s19 = scalar_lea.vmem %s863_s9, %s6091_s23 [#allocation5]  ;;  %v8195_v45 = vunpack.c.0.s8 %v1147_v41  ;;  %v8200_v60 = vunpack.c.0.s8 %v1161_v53  ;;  %s1199_s25 = scalar_lea.vmem %s873_s8, %s6091_s23 [#allocation7] }
 0x1b8   : >> { %v1125_v39 = vld [vmem:[%s1124_s19] sm:$0xf]  ;;  %s1105_s22 = sadd.s32 1, %s7605_s22  }
 0x1b9   : >> { %1127 = vrot.lane.b32.xlu0 %v1125_v39, %s7652_s3  ;;  %1131 = vrot.lane.b32.xlu1 %v1125_v39, %s7653_s18  ;;  %v1136_v43 = vshrl.u32 %v1125_v39, 16  ;;  %p8512_p3 = scmp.ge.s32.totalorder %s1105_s22, %s1101_s27 }
 0x1c1   : >> { %1129 = vrot.lane.b32.xlu0 %v1125_v39, %s7654_s10 }
 0x22b   : >> { %v1128_v42 = vpop.permute.xlu0 %1127  ;;  %v1132_v47 = vpop.permute.xlu1 %1131 }
 0x22c   : >> { %v1137_v44 = vshrl.u32 %v1128_v42, 16  ;;  %v1135_v46 = vpack.i.b16 %v1128_v42, %v1125_v39  ;;  %v1143_v50 = vshrl.u32 %v1132_v47, 16 }
 0x22e   : >> { %v1138_v48 = vpack.i.b16 %v1137_v44, %v1136_v43  ;;  %v1149_v49 = vperm.slane %v1135_v46, %v8195_v45 }
 0x230   : >> { %v1176_v54 = vperm.slane %v1138_v48, %v8195_v45  ;;  %v1158_v57 = vrot.slane %v1149_v49, 4 }
 0x232   : >> { %v1184_v61 = vrot.slane %v1176_v54, 4 }
 0x233   : >> { %v1130_v51 = vpop.permute.xlu0 %1129 }
 0x234   : >> { %v1141_v55 = vpack.i.b16 %v1132_v47, %v1130_v51  ;;  %v1142_v56 = vshrl.u32 %v1130_v51, 16 }
 0x236   : >> { %v1144_v58 = vpack.i.b16 %v1143_v50, %v1142_v56  ;;  %v1154_v59 = vperm.slane %v1141_v55, %v8195_v45 }
 0x238   : >> { %v1155_v62 = vrot.slane %v1154_v59, 4  ;;  %v1181_v63 = vperm.slane %v1144_v58, %v8195_v45  ;;  %v1159_v0 = vsel %vm1156_vm0, %v1154_v59, %v1158_v57 }
 0x239   : >> { %v1167_v4 = vperm.slane %v1159_v0, %v8200_v60 }
 0x23a   : >> { %v1185_v1 = vsel %vm1156_vm0, %v1181_v63, %v1184_v61  ;;  %v1157_v2 = vsel %vm1156_vm0, %v1155_v62, %v1149_v49  ;;  %v1182_v3 = vrot.slane %v1181_v63, 4 }
 0x23b   : >> { %v1193_v5 = vperm.slane %v1185_v1, %v8200_v60  ;;  %v1163_v6 = vperm.slane %v1157_v2, %v8200_v60  ;;  %v1170_v15 = vrot.slane %v1167_v4, 4 }
 0x23c   : >> { %v1183_v7 = vsel %vm1156_vm0, %v1182_v3, %v1176_v54 }
 0x23d   : >> { %6775 = vxpose.binary.xlu1.c.b16.start.end [1/2] (short) (narrow) %v1193_v5, %v1167_v4, 32  ;;  %v1168_v9 = vrot.slane %v1163_v6, 4  ;;  %v1189_v10 = vperm.slane %v1183_v7, %v8200_v60  ;;  %v1196_v19 = vrot.slane %v1193_v5, 4  ;;  %v1171_v20 = vsel %vm1156_vm0, 0, %v1170_v15 }
 0x23f   : >> { %6780 = vxpose.binary.xlu2.c.b16.start.end [1/2] (short) (narrow) %v1189_v10, %v1163_v6, 32  ;;  %v1194_v11 = vrot.slane %v1189_v10, 4  ;;  %v1169_v12 = vsel %vm1156_vm0, 0, %v1168_v9  ;;  %v1197_v21 = vsel %vm1156_vm0, 0, %v1196_v19 }
 0x241   : >> { %v1195_v13 = vsel %vm1156_vm0, 0, %v1194_v11 }
 0x242   : >> { %6790 = vxpose.binary.xlu0.c.b16.start.end [1/2] (short) (narrow) %v1195_v13, %v1169_v12, 32 }
 0x25f   : >> { %6785 = vxpose.binary.xlu2.c.b16.start.end [1/2] (short) (narrow) %v1197_v21, %v1171_v20, 32 }
 0x2e0   : >> { %v6781_v22 = vpop.trf.xlu2 }
 0x2e1   : >> { %v1404_v50 = vshrl.u32 %v6781_v22, 16 }
 0x2e8   : >> { %v6782_v23 = vpop.trf.xlu2 }
 0x2e9   : >> { %v6776_v24 = vpop.trf.xlu1  ;;  %v1405_v47 = vshrl.u32 %v6782_v23, 16  ;;  %v1402_v52 = vpack.i.b16 %v6782_v23, %v6781_v22 }
 0x2ea   : >> { %v1420_v41 = vshrl.u32 %v6776_v24, 16 }
 0x2eb   : >> { %v1406_v53 = vpack.i.b16 %v1405_v47, %v1404_v50  ;;  %v1466_v6 = vrot.slane %v1402_v52, 4 }
 0x2ed   : >> { %v1522_v13 = vrot.slane %v1406_v53, 4 }
 0x2ee   : >> { %v6791_v40 = vpop.trf.xlu0 }
 0x2ef   : >> { %v1412_v57 = vshrl.u32 %v6791_v40, 16 }
 0x2f0   : >> { %v8215_v25 = vpop.trf.xlu2 }
 0x2f1   : >> { %v6777_v39 = vpop.trf.xlu1 }
 0x2f2   : >> { %v1421_v42 = vshrl.u32 %v6777_v39, 16  ;;  %v1418_v43 = vpack.i.b16 %v6777_v39, %v6776_v24 }
 0x2f4   : >> { %v1422_v44 = vpack.i.b16 %v1421_v42, %v1420_v41  ;;  %v1464_v48 = vrot.slane %v1418_v43, 4  ;;  %v1467_v15 = vsel %vm1156_vm0, %v1418_v43, %v1466_v6 }
 0x2f6   : >> { %v6792_v49 = vpop.trf.xlu0  ;;  %v1520_v51 = vrot.slane %v1422_v44, 4  ;;  %v1465_v55 = vsel %vm1156_vm0, %v1464_v48, %v1402_v52 }
 0x2f7   : >> { %v1413_v61 = vshrl.u32 %v6792_v49, 16  ;;  %v1471_v0 = vperm.slane %v1465_v55, %v8195_v45  ;;  %v1410_v1 = vpack.i.b16 %v6792_v49, %v6791_v40  ;;  %v1523_v40 = vsel %vm1156_vm0, %v1422_v44, %v1522_v13 }
 0x2f8   : >> { %v8217_v26 = vpop.trf.xlu2  ;;  %v1521_v56 = vsel %vm1156_vm0, %v1520_v51, %v1406_v53 }
 0x2f9   : >> { %v6778_v54 = vpop.trf.xlu1  ;;  %v1527_v5 = vperm.slane %v1521_v56, %v8195_v45  ;;  %v1414_v7 = vpack.i.b16 %v1413_v61, %v1412_v57  ;;  %v1490_v12 = vrot.slane %v1471_v0, 4  ;;  %v1478_v42 = vrot.slane %v1410_v1, 4 }
 0x2fa   : >> { %v1452_v41 = vshrl.u32 %v6778_v54, 16 }
 0x2fb   : >> { %v1546_v24 = vrot.slane %v1527_v5, 4  ;;  %v1534_v47 = vrot.slane %v1414_v7, 4 }
 0x2fe   : >> { %v8222_v4 = vpop.trf.xlu0 }
 0x300   : >> { %v6786_v46 = vpop.trf.xlu2 }
 0x301   : >> { %v1428_v59 = vshrl.u32 %v6786_v46, 16  ;;  %v6779_v20 = vpop.trf.xlu1 }
 0x302   : >> { %v1453_v50 = vshrl.u32 %v6779_v20, 16 }
 0x306   : >> { %v6794_v57 = vpop.trf.xlu0 }
 0x308   : >> { %v6787_v58 = vpop.trf.xlu2 }
 0x309   : >> { %v1426_v62 = vpack.i.b16 %v6787_v58, %v6786_v46  ;;  %v1429_v63 = vshrl.u32 %v6787_v58, 16 }
 0x30b   : >> { %v1430_v2 = vpack.i.b16 %v1429_v63, %v1428_v59  ;;  %v1476_v3 = vrot.slane %v1426_v62, 4  ;;  %v1479_v55 = vsel %vm1156_vm0, %v1426_v62, %v1478_v42  ;;  %v8242_v63 = vperm.slane %v1467_v15, %v8195_v45 }
 0x30c   : >> { %v1454_v62 = vpack.i.b16 %v1453_v50, %v1452_v41  ;;  %v1434_v50 = vpack.i.b16 %v8217_v26, %v8215_v25 }
 0x30d   : >> { %v1477_v9 = vsel %vm1156_vm0, %v1476_v3, %v1410_v1  ;;  %v1532_v10 = vrot.slane %v1430_v2, 4  ;;  %v1535_v56 = vsel %vm1156_vm0, %v1430_v2, %v1534_v47  ;;  %v1450_v1 = vpack.i.b16 %v6779_v20, %v6778_v54 }
 0x30e   : >> { %v1483_v11 = vperm.slane %v1477_v9, %v8195_v45  ;;  %v1444_v3 = vshrl.u32 %v8222_v4, 16  ;;  %v8254_v9 = vperm.slane %v1535_v56, %v8195_v45  ;;  %v1502_v20 = vrot.slane %v8242_v63, 4 }
 0x30f   : >> { %v1533_v19 = vsel %vm1156_vm0, %v1532_v10, %v1414_v7  ;;  %v8251_v7 = vperm.slane %v1479_v55, %v8195_v45  ;;  %v1576_v42 = vrot.slane %v1450_v1, 4 }
 0x310   : >> { %v6788_v21 = vpop.trf.xlu2  ;;  %v1491_v22 = vsel %vm1156_vm0, %v1483_v11, %v1490_v12  ;;  %v1539_v23 = vperm.slane %v1533_v19, %v8195_v45  ;;  %v1488_v39 = vrot.slane %v1483_v11, 4  ;;  %v1445_v11 = vshrl.u32 %v6794_v57, 16 }
 0x311   : >> { %v1499_v46 = vperm.slane %v1491_v22, %v8200_v60  ;;  %v1460_v10 = vshrl.u32 %v6788_v21, 16  ;;  %v1437_v22 = vshrl.u32 %v8217_v26, 16  ;;  %v1577_v56 = vsel %vm1156_vm0, %v1576_v42, %v1434_v50 }
 0x312   : >> { %v1547_v48 = vsel %vm1156_vm0, %v1539_v23, %v1546_v24  ;;  %v1489_v43 = vsel %vm1156_vm0, %v1488_v39, %v1471_v0  ;;  %v1544_v49 = vrot.slane %v1539_v23, 4  ;;  %v8245_v0 = vperm.slane %v1523_v40, %v8195_v45 }
 0x313   : >> { %v1555_v51 = vperm.slane %v1547_v48, %v8200_v60  ;;  %v1514_v52 = vrot.slane %v1499_v46, 4  ;;  %v1495_v53 = vperm.slane %v1489_v43, %v8200_v60  ;;  %v1436_v24 = vshrl.u32 %v8215_v25, 16 }
 0x314   : >> { %v1545_v44 = vsel %vm1156_vm0, %v1544_v49, %v1527_v5  ;;  %v1558_v23 = vrot.slane %v8245_v0, 4  ;;  %v1442_v39 = vpack.i.b16 %v6794_v57, %v8222_v4  ;;  %v1446_v48 = vpack.i.b16 %v1445_v11, %v1444_v3 }
 0x315   : >> { %6795 = vxpose.binary.xlu1.c.b16.start.end [1/2] (short) (narrow) %v1555_v51, %v1499_v46, 16  ;;  %v1570_v58 = vrot.slane %v1555_v51, 4  ;;  %v1512_v59 = vrot.slane %v1495_v53, 4  ;;  %v1551_v61 = vperm.slane %v1545_v44, %v8200_v60  ;;  %v1515_v5 = vsel %vm1156_vm0, 0, %v1514_v52 }
 0x316   : >> { %v1503_v46 = vsel %vm1156_vm0, %v8251_v7, %v1502_v20  ;;  %v1559_v47 = vsel %vm1156_vm0, %v8254_v9, %v1558_v23  ;;  %v1438_v51 = vpack.i.b16 %v1437_v22, %v1436_v24  ;;  %v1583_v25 = vperm.slane %v1577_v56, %v8195_v45 }
 0x317   : >> { %v1571_v2 = vsel %vm1156_vm0, 0, %v1570_v58  ;;  %v1568_v6 = vrot.slane %v1551_v61, 4  ;;  %v1513_v15 = vsel %vm1156_vm0, 0, %v1512_v59  ;;  %v8273_v55 = vperm.slane %v1503_v46, %v8200_v60 }
 0x318   : >> { %v6789_v12 = vpop.trf.xlu2  ;;  %6801 = vxpose.binary.xlu0.c.b16.start.end [1/2] (short) (narrow) %v1571_v2, %v1515_v5, 16  ;;  %v8276_v44 = vperm.slane %v1559_v47, %v8200_v60  ;;  %v1590_v11 = vrot.slane %v1442_v39, 4  ;;  %v1634_v20 = vrot.slane %v1438_v51, 4  ;;  %v1602_v47 = vrot.slane %v1583_v25, 4 }
 0x319   : >> { %v1458_v13 = vpack.i.b16 %v6789_v12, %v6788_v21  ;;  %v1461_v54 = vshrl.u32 %v6789_v12, 16  ;;  %v1569_v19 = vsel %vm1156_vm0, 0, %v1568_v6  ;;  %v1632_v21 = vrot.slane %v1454_v62, 4 }
 0x31a   : >> { %6807 = vxpose.binary.xlu2.c.b16.start.end [1/2] (short) (narrow) %v1569_v19, %v1513_v15, 16  ;;  %v1518_v26 = vrot.slane %v8273_v55, 4  ;;  %v1574_v5 = vrot.slane %v8276_v44, 4  ;;  %v1646_v12 = vrot.slane %v1446_v48, 4 }
 0x31b   : >> { %v1462_v40 = vpack.i.b16 %v1461_v54, %v1460_v10  ;;  %v1588_v41 = vrot.slane %v1458_v13, 4  ;;  %v1633_v57 = vsel %vm1156_vm0, %v1632_v21, %v1438_v51  ;;  %v1578_v54 = vrot.slane %v1434_v50, 4 }
 0x31c   : >> { %v1639_v2 = vperm.slane %v1633_v57, %v8195_v45  ;;  %v1519_v15 = vsel %vm1156_vm0, 0, %v1518_v26  ;;  %v1575_v19 = vsel %vm1156_vm0, 0, %v1574_v5 }
 0x31d   : >> { %v1589_v43 = vsel %vm1156_vm0, %v1588_v41, %v1442_v39  ;;  %v1644_v49 = vrot.slane %v1462_v40, 4  ;;  %v1579_v24 = vsel %vm1156_vm0, %v1450_v1, %v1578_v54  ;;  %v1647_v39 = vsel %vm1156_vm0, %v1462_v40, %v1646_v12 }
 0x31e   : >> { %v1595_v4 = vperm.slane %v1589_v43, %v8195_v45  ;;  %v1587_v41 = vperm.slane %v1579_v24, %v8195_v45  ;;  %v1655_v46 = vperm.slane %v1647_v39, %v8195_v45  ;;  %v1556_v24 = vrot.slane %v8254_v9, 4 }
 0x31f   : >> { %v1645_v52 = vsel %vm1156_vm0, %v1644_v49, %v1446_v48  ;;  %v1658_v48 = vrot.slane %v1639_v2, 4 }
 0x320   : >> { %v1651_v58 = vperm.slane %v1645_v52, %v8195_v45  ;;  %v1600_v59 = vrot.slane %v1595_v4, 4  ;;  %v1603_v43 = vsel %vm1156_vm0, %v1595_v4, %v1602_v47  ;;  %v1668_v50 = vrot.slane %v1655_v46, 4 }
 0x321   : >> { %v1611_v40 = vperm.slane %v1603_v43, %v8200_v60 }
 0x322   : >> { %v1656_v3 = vrot.slane %v1651_v58, 4  ;;  %v1601_v6 = vsel %vm1156_vm0, %v1600_v59, %v1583_v25  ;;  %v1659_v1 = vsel %vm1156_vm0, %v1651_v58, %v1658_v48 }
 0x323   : >> { %v1607_v22 = vperm.slane %v1601_v6, %v8200_v60  ;;  %v1667_v51 = vperm.slane %v1659_v1, %v8200_v60  ;;  %v1626_v12 = vrot.slane %v1611_v40, 4 }
 0x324   : >> { %v1657_v10 = vsel %vm1156_vm0, %v1656_v3, %v1639_v2 }
 0x325   : >> { %6798 = vxpose.binary.xlu1.c.b16.start.end [1/2] (short) (narrow) %v1551_v61, %v1495_v53, 16  ;;  %v1663_v23 = vperm.slane %v1657_v10, %v8200_v60  ;;  %v1635_v53 = vsel %vm1156_vm0, %v1454_v62, %v1634_v20  ;;  %v1591_v61 = vsel %vm1156_vm0, %v1458_v13, %v1590_v11  ;;  %v1614_v62 = vrot.slane %v1587_v41, 4 }
 0x326   : >> { %v1643_v42 = vperm.slane %v1635_v53, %v8195_v45  ;;  %v1599_v21 = vperm.slane %v1591_v61, %v8195_v45  ;;  %v1624_v2 = vrot.slane %v1607_v22, 4  ;;  %v1682_v54 = vrot.slane %v1667_v51, 4 }
 0x327   : >> { %v1680_v6 = vrot.slane %v1663_v23, 4  ;;  %v1500_v20 = vrot.slane %v8251_v7, 4  ;;  %v1627_v53 = vsel %vm1156_vm0, 0, %v1626_v12  ;;  %v1557_v61 = vsel %vm1156_vm0, %v1556_v24, %v8245_v0 }
 0x328   : >> { %6804 = vxpose.binary.xlu0.c.b16.start.end [1/2] (short) (narrow) %v1575_v19, %v1519_v15, 16  ;;  %v1612_v49 = vrot.slane %v1599_v21, 4  ;;  %v1670_v13 = vrot.slane %v1643_v42, 4  ;;  %v1615_v52 = vsel %vm1156_vm0, %v1599_v21, %v1614_v62  ;;  %v1669_v59 = vsel %vm1156_vm0, %v1668_v50, %v1643_v42 }
 0x329   : >> { %v1623_v4 = vperm.slane %v1615_v52, %v8200_v60  ;;  %v1675_v25 = vperm.slane %v1669_v59, %v8200_v60  ;;  %v1625_v15 = vsel %vm1156_vm0, 0, %v1624_v2  ;;  %v1681_v19 = vsel %vm1156_vm0, 0, %v1680_v6 }
 0x32a   : >> { %6816 = vxpose.binary.xlu2.c.b16.start.end [1/2] (short) (narrow) %v1663_v23, %v1607_v22, 16  ;;  %v1671_v56 = vsel %vm1156_vm0, %v1655_v46, %v1670_v13  ;;  %v1613_v57 = vsel %vm1156_vm0, %v1612_v49, %v1587_v41  ;;  %v1683_v22 = vsel %vm1156_vm0, 0, %v1682_v54  ;;  %v1501_v23 = vsel %vm1156_vm0, %v1500_v20, %v8242_v63 }
 0x32b   : >> { %v1679_v58 = vperm.slane %v1671_v56, %v8200_v60  ;;  %v1619_v3 = vperm.slane %v1613_v57, %v8200_v60  ;;  %v1684_v5 = vrot.slane %v1675_v25, 4  ;;  %v1507_v39 = vperm.slane %v1501_v23, %v8200_v60 }
 0x32c   : >> { %v1563_v41 = vperm.slane %v1557_v61, %v8200_v60  ;;  %v1630_v21 = vrot.slane %v1623_v4, 4 }
 0x32d   : >> { %v1628_v26 = vrot.slane %v1619_v3, 4  ;;  %v1685_v11 = vsel %vm1156_vm0, 0, %v1684_v5  ;;  %v1516_v42 = vrot.slane %v1507_v39, 4  ;;  %v1686_v9 = vrot.slane %v1679_v58, 4 }
 0x32e   : >> { %v1572_v7 = vrot.slane %v1563_v41, 4  ;;  %v1631_v48 = vsel %vm1156_vm0, 0, %v1630_v21 }
 0x32f   : >> { %v1629_v10 = vsel %vm1156_vm0, 0, %v1628_v26  ;;  %v1517_v46 = vsel %vm1156_vm0, 0, %v1516_v42  ;;  %v1687_v63 = vsel %vm1156_vm0, 0, %v1686_v9 }
 0x330   : >> { %v1573_v47 = vsel %vm1156_vm0, 0, %v1572_v7 }
 0x335   : >> { %6810 = vxpose.binary.xlu1.c.b16.start.end [1/2] (short) (narrow) %v1667_v51, %v1611_v40, 16 }
 0x338   : >> { %6813 = vxpose.binary.xlu0.c.b16.start.end [1/2] (short) (narrow) %v1679_v58, %v1623_v4, 16 }
 0x33a   : >> { %6819 = vxpose.binary.xlu2.c.b16.start.end [1/2] (short) (narrow) %v1675_v25, %v1619_v3, 16 }
 0x345   : >> { %6837 = vxpose.binary.xlu1.c.b16.start.end [1/2] (short) (narrow) %v1685_v11, %v1629_v10, 16 }
 0x348   : >> { %6828 = vxpose.binary.xlu0.c.b16.start.end [1/2] (short) (narrow) %v1681_v19, %v1625_v15, 16 }
 0x34a   : >> { %6822 = vxpose.binary.xlu2.c.b16.start.end [1/2] (short) (narrow) %v1683_v22, %v1627_v53, 16 }
 0x355   : >> { %6840 = vxpose.binary.xlu1.c.b16.start.end [1/2] (short) (narrow) %v1563_v41, %v1507_v39, 16 }
 0x358   : >> { %6831 = vxpose.binary.xlu0.c.b16.start.end [1/2] (short) (narrow) %v1573_v47, %v1517_v46, 16 }
 0x35a   : >> { %6825 = vxpose.binary.xlu2.c.b16.start.end [1/2] (short) (narrow) %v1687_v63, %v1631_v48, 16 }
 0x36a   : >> { %6834 = vxpose.binary.xlu2.c.b16.start.end [1/2] (short) (narrow) %v8276_v44, %v8273_v55, 16 }
 0x3bb   : >> { %v6808_v0 = vpop.trf.xlu2 }
 0x3c1   : >> { %v6796_v43 = vpop.trf.xlu1 }
 0x3c2   : >> { %v2200_v56 = vrot.slane %v6796_v43, 4 }
 0x3c3   : >> { %v8331_v1 = vpop.trf.xlu2 }
 0x3c4   : >> { %v6802_v62 = vpop.trf.xlu0 }
 0x3c5   : >> { %v2206_v49 = vrot.slane %v6802_v62, 4 }
 0x3c7   : >> { %v2207_v13 = vsel %vm1156_vm0, %v2206_v49, %v6808_v0 }
 0x3c8   : >> { %v2211_v52 = vperm.slane %v2207_v13, %v8195_v45 }
 0x3c9   : >> { %v8334_v50 = vpop.trf.xlu1 }
 0x3ca   : >> { %v2224_v55 = vrot.slane %v2211_v52, 4 }
 0x3cb   : >> { %v6817_v40 = vpop.trf.xlu2 }
 0x3cc   : >> { %v8336_v51 = vpop.trf.xlu0 }
 0x3d1   : >> { %v6799_v57 = vpop.trf.xlu1 }
 0x3d2   : >> { %v2201_v59 = vsel %vm1156_vm0, %v2200_v56, %v6799_v57 }
 0x3d3   : >> { %v2205_v44 = vperm.slane %v2201_v59, %v8195_v45  ;;  %v6818_v4 = vpop.trf.xlu2 }
 0x3d4   : >> { %v6805_v58 = vpop.trf.xlu0 }
 0x3d5   : >> { %v8342_v3 = vsel %vm1156_vm0, %v2224_v55, %v2205_v44 }
 0x3d9   : >> { %v8344_v25 = vpop.trf.xlu1 }
 0x3db   : >> { %v6820_v26 = vpop.trf.xlu2 }
 0x3dc   : >> { %v8346_v5 = vpop.trf.xlu0 }
 0x3e1   : >> { %v6811_v2 = vpop.trf.xlu1 }
 0x3e2   : >> { %v2280_v22 = vrot.slane %v6811_v2, 4  ;;  %v2246_v2 = vrot.slane %v8336_v51, 4  ;;  %v2240_v51 = vrot.slane %v8334_v50, 4 }
 0x3e3   : >> { %v6821_v6 = vpop.trf.xlu2 }
 0x3e4   : >> { %v6814_v10 = vpop.trf.xlu0  ;;  %v2281_v9 = vsel %vm1156_vm0, %v2280_v22, %v6817_v40  ;;  %v2247_v22 = vsel %vm1156_vm0, %v2246_v2, %v8331_v1 }
 0x3e5   : >> { %v2292_v23 = vrot.slane %v6814_v10, 4  ;;  %v2285_v49 = vperm.slane %v2281_v9, %v8195_v45 }
 0x3e7   : >> { %v2293_v47 = vsel %vm1156_vm0, %v2292_v23, %v6820_v26 }
 0x3e8   : >> { %v2297_v40 = vperm.slane %v2293_v47, %v8195_v45 }
 0x3e9   : >> { %v6812_v54 = vpop.trf.xlu1 }
 0x3ea   : >> { %v2320_v42 = vrot.slane %v6812_v54, 4 }
 0x3eb   : >> { %v6823_v11 = vpop.trf.xlu2 }
 0x3ec   : >> { %v6815_v12 = vpop.trf.xlu0  ;;  %v2286_v20 = vrot.slane %v6823_v11, 4  ;;  %v2321_v13 = vsel %vm1156_vm0, %v2320_v42, %v6818_v4 }
 0x3ed   : >> { %v2332_v57 = vrot.slane %v6815_v12, 4  ;;  %v2325_v55 = vperm.slane %v2321_v13, %v8195_v45 }
 0x3f1   : >> { %v6838_v24 = vpop.trf.xlu1 }
 0x3f3   : >> { %v6824_v15 = vpop.trf.xlu2 }
 0x3f4   : >> { %v6829_v19 = vpop.trf.xlu0  ;;  %v2326_v39 = vrot.slane %v6824_v15, 4  ;;  %v2218_v15 = vrot.slane %v6805_v58, 4 }
 0x3f5   : >> { %v2287_v53 = vsel %vm1156_vm0, %v2286_v20, %v6829_v19  ;;  %v2333_v19 = vsel %vm1156_vm0, %v2332_v57, %v6821_v6 }
 0x3f6   : >> { %v2291_v61 = vperm.slane %v2287_v53, %v8195_v45  ;;  %v2337_v23 = vperm.slane %v2333_v19, %v8195_v45 }
 0x3f8   : >> { %v2304_v48 = vrot.slane %v2291_v61, 4 }
 0x3f9   : >> { %v6839_v62 = vpop.trf.xlu1 }
 0x3fa   : >> { %v2305_v59 = vsel %vm1156_vm0, %v2304_v48, %v2285_v49 }
 0x3fb   : >> { %v6826_v41 = vpop.trf.xlu2  ;;  %v2309_v54 = vperm.slane %v2305_v59, %v8200_v60 }
 0x3fc   : >> { %v2298_v7 = vrot.slane %v6826_v41, 4  ;;  %v6830_v21 = vpop.trf.xlu0 }
 0x3fd   : >> { %v2327_v46 = vsel %vm1156_vm0, %v2326_v39, %v6830_v21  ;;  %v2318_v41 = vrot.slane %v2309_v54, 4 }
 0x3fe   : >> { %v2331_v63 = vperm.slane %v2327_v46, %v8195_v45  ;;  %v2299_v0 = vsel %vm1156_vm0, %v2298_v7, %v6838_v24  ;;  %v8372_v24 = vld [vmem:[%s1199_s25] sm:$0xf]  ;;  %v2241_v7 = vsel %vm1156_vm0, %v2240_v51, %v8344_v25  ;;  %v2251_v46 = vperm.slane %v2247_v22, %v8195_v45 }
 0x3ff   : >> { %v2303_v43 = vperm.slane %v2299_v0, %v8195_v45  ;;  %1202 = vrot.lane.b32.xlu0 %v8372_v24, %s7652_s3  ;;  %1206 = vrot.lane.b32.xlu1 %v8372_v24, %s7653_s18  ;;  %v2245_v0 = vperm.slane %v2241_v7, %v8195_v45  ;;  %v2229_v51 = vperm.slane %v8342_v3, %v8200_v60 }
 0x400   : >> { %v2344_v52 = vrot.slane %v2331_v63, 4  ;;  %1204 = vrot.lane.b32.xlu2 %v8372_v24, %s7654_s10 }
 0x401   : >> { %v2310_v56 = vrot.slane %v2303_v43, 4  ;;  %v6841_v39 = vpop.trf.xlu1  ;;  %v2258_v43 = vrot.slane %v8346_v5, 4 }
 0x402   : >> { %v2345_v4 = vsel %vm1156_vm0, %v2344_v52, %v2325_v55 }
 0x403   : >> { %v6827_v44 = vpop.trf.xlu2  ;;  %v2311_v26 = vsel %vm1156_vm0, %v2310_v56, %v2297_v40  ;;  %v2349_v6 = vperm.slane %v2345_v4, %v8200_v60 }
 0x404   : >> { %v2338_v10 = vrot.slane %v6827_v44, 4  ;;  %v6832_v11 = vpop.trf.xlu0  ;;  %v2315_v12 = vperm.slane %v2311_v26, %v8200_v60  ;;  %v2264_v44 = vrot.slane %v2251_v46, 4 }
 0x405   : >> { %v2219_v58 = vsel %vm1156_vm0, %v2218_v15, %v6832_v11  ;;  %v2358_v63 = vrot.slane %v2349_v6, 4 }
 0x406   : >> { %v2339_v20 = vsel %vm1156_vm0, %v2338_v10, %v6839_v62  ;;  %v2316_v42 = vrot.slane %v2315_v12, 4  ;;  %v2223_v50 = vperm.slane %v2219_v58, %v8195_v45  ;;  %v2319_v1 = vsel %vm1156_vm0, %v2315_v12, %v2318_v41 }
 0x407   : >> { %v2343_v53 = vperm.slane %v2339_v20, %v8195_v45  ;;  %v2388_v52 = vshrl.u32 %v2319_v1, 16  ;;  %v2265_v12 = vsel %vm1156_vm0, %v2264_v44, %v2245_v0  ;;  %v2238_v41 = vrot.slane %v2229_v51, 4 }
 0x408   : >> { %v2317_v25 = vsel %vm1156_vm0, %v2316_v42, %v2309_v54  ;;  %v2230_v56 = vrot.slane %v2223_v50, 4 }
 0x409   : >> { %v2350_v61 = vrot.slane %v2343_v53, 4  ;;  %v2380_v5 = vshrl.u32 %v2317_v25, 16  ;;  %v6842_v20 = vpop.trf.xlu1 }
 0x40b   : >> { %v6835_v21 = vpop.trf.xlu2  ;;  %v2351_v9 = vsel %vm1156_vm0, %v2350_v61, %v2337_v23 }
 0x40c   : >> { %v2212_v47 = vrot.slane %v6835_v21, 4  ;;  %v2355_v48 = vperm.slane %v2351_v9, %v8200_v60  ;;  %v6833_v62 = vpop.trf.xlu0 }
 0x40d   : >> { %v2259_v26 = vsel %vm1156_vm0, %v2258_v43, %v6833_v62 }
 0x40e   : >> { %v2213_v49 = vsel %vm1156_vm0, %v2212_v47, %v6841_v39  ;;  %v2359_v13 = vsel %vm1156_vm0, %v2355_v48, %v2358_v63  ;;  %v2356_v40 = vrot.slane %v2355_v48, 4  ;;  %v2263_v15 = vperm.slane %v2259_v26, %v8195_v45 }
 0x40f   : >> { %v2217_v57 = vperm.slane %v2213_v49, %v8195_v45  ;;  %v2386_v59 = vpack.i.b16 %v2359_v13, %v2319_v1  ;;  %v2389_v55 = vshrl.u32 %v2359_v13, 16 }
 0x410   : >> { %v2357_v2 = vsel %vm1156_vm0, %v2356_v40, %v2349_v6  ;;  %v2269_v6 = vperm.slane %v2265_v12, %v8200_v60  ;;  %v2270_v61 = vrot.slane %v2263_v15, 4  ;;  %v1211_v40 = vshrl.u32 %v8372_v24, 16 }
 0x411   : >> { %v2231_v10 = vsel %vm1156_vm0, %v2230_v56, %v2217_v57  ;;  %2434 = vmatpush.bf16.msra.mxu2 %v2386_v59  ;;  %v2378_v11 = vpack.i.b16 %v2357_v2, %v2317_v25  ;;  %v2390_v4 = vpack.i.b16 %v2389_v55, %v2388_v52  ;;  %v2381_v54 = vshrl.u32 %v2357_v2, 16 }
 0x412   : >> { %v2235_v58 = vperm.slane %v2231_v10, %v8200_v60  ;;  %v2278_v3 = vrot.slane %v2269_v6, 4  ;;  %v2457_v57 = vlaneseq }
 0x413   : >> { %v6836_v19 = vpop.trf.xlu2  ;;  %2402 = vmatpush.bf16.msra.mxu0 %v2378_v11  ;;  %2450 = vmatpush.bf16.msra.mxu3 %v2390_v4  ;;  %v2382_v53 = vpack.i.b16 %v2381_v54, %v2380_v5 }
 0x414   : >> { %v2252_v22 = vrot.slane %v6836_v19, 4  ;;  %v2236_v42 = vrot.slane %v2235_v58, 4  ;;  %v2239_v50 = vsel %vm1156_vm0, %v2235_v58, %v2238_v41  ;;  %v2458_v12 = vshrl.u32 %v2457_v57, 7 }
 0x415   : >> { %2418 = vmatpush.bf16.msra.mxu1 %v2382_v53  ;;  %v2372_v48 = vshrl.u32 %v2239_v50, 16  ;;  %v2462_v53 = vand.u32 127, %v2457_v57 }
 0x416   : >> { %v2253_v23 = vsel %vm1156_vm0, %v2252_v22, %v6842_v20  ;;  %v2237_v9 = vsel %vm1156_vm0, %v2236_v42, %v2229_v51  ;;  %v2459_v20 = vstv %s6056_s30  ;;  %v2463_v22 = vstv %s6090_s12 }
 0x417   : >> { %v2257_v39 = vperm.slane %v2253_v23, %v8195_v45  ;;  %v2364_v25 = vshrl.u32 %v2237_v9, 16  ;;  %v2460_v41 = vadd.s32 %v2459_v20, %v2458_v12 }
 0x419   : >> { %v2271_v7 = vsel %vm1156_vm0, %v2270_v61, %v2257_v39 }
 0x41a   : >> { %v2275_v21 = vperm.slane %v2271_v7, %v8200_v60 }
 0x41c   : >> { %v2279_v1 = vsel %vm1156_vm0, %v2275_v21, %v2278_v3  ;;  %v2276_v46 = vrot.slane %v2275_v21, 4 }
 0x41d   : >> { %v2370_v47 = vpack.i.b16 %v2279_v1, %v2239_v50  ;;  %v2373_v63 = vshrl.u32 %v2279_v1, 16  ;;  %v2464_v50 = vadd.s32 %v2463_v22, %v2462_v53 }
 0x41e   : >> { %v2277_v0 = vsel %vm1156_vm0, %v2276_v46, %v2269_v6 }
 0x41f   : >> { %2435 = vmatpush.bf16.msra.mxu2 %v2370_v47  ;;  %v2362_v43 = vpack.i.b16 %v2277_v0, %v2237_v9  ;;  %v2374_v62 = vpack.i.b16 %v2373_v63, %v2372_v48  ;;  %v2365_v49 = vshrl.u32 %v2277_v0, 16  ;;  %vm2465_vm2 = vcmp.le.s32.totalorder %v2464_v50, %v2460_v41 }
 0x421   : >> { %2403 = vmatpush.bf16.msra.mxu0 %v2362_v43  ;;  %2451 = vmatpush.bf16.msra.mxu3 %v2374_v62  ;;  %v2366_v13 = vpack.i.b16 %v2365_v49, %v2364_v25 }
 0x422   : >> { %6095 = vmatmul.msk.bf16.vlgmr.msra.gmra.mxu2 %vm2392_vm1, %v8093_v18 }
 0x423   : >> { %2419 = vmatpush.bf16.msra.mxu1 %v2366_v13 }
 0x424   : >> { %6093 = vmatmul.msk.bf16.vlgmr.msra.gmra.mxu0 %vm2392_vm1, %v8081_v14  ;;  %6096 = vmatmul.msk.bf16.vlgmr.msra.gmra.mxu3 %vm2392_vm1, %v8089_v16 }
 0x426   : >> { %6094 = vmatmul.msk.bf16.vlgmr.msra.gmra.mxu1 %vm2392_vm1, %v8091_v17 }
 0x45a   : >> { %v1205_v26 = vpop.permute.xlu2 %1204 }
 0x45b   : >> { %v1217_v5 = vshrl.u32 %v1205_v26, 16 }
 0x471   : >> { %v1203_v52 = vpop.permute.xlu0 %1202  ;;  %v1207_v56 = vpop.permute.xlu1 %1206 }
 0x472   : >> { %v1210_v59 = vpack.i.b16 %v1203_v52, %v8372_v24  ;;  %v1212_v55 = vshrl.u32 %v1203_v52, 16  ;;  %v1218_v44 = vshrl.u32 %v1207_v56, 16  ;;  %v1216_v2 = vpack.i.b16 %v1207_v56, %v1205_v26 }
 0x474   : >> { %v1213_v10 = vpack.i.b16 %v1212_v55, %v1211_v40  ;;  %v1224_v11 = vperm.slane %v1210_v59, %v8195_v45  ;;  %v1219_v4 = vpack.i.b16 %v1218_v44, %v1217_v5  ;;  %v1229_v54 = vperm.slane %v1216_v2, %v8195_v45 }
 0x476   : >> { %v1232_v15 = vrot.slane %v1224_v11, 4  ;;  %v1250_v19 = vperm.slane %v1213_v10, %v8195_v45  ;;  %v1230_v24 = vrot.slane %v1229_v54, 4  ;;  %v1255_v51 = vperm.slane %v1219_v4, %v8195_v45 }
 0x478   : >> { %v1258_v58 = vrot.slane %v1250_v19, 4  ;;  %v1233_v6 = vsel %vm1156_vm0, %v1229_v54, %v1232_v15  ;;  %v1231_v23 = vsel %vm1156_vm0, %v1230_v24, %v1224_v11  ;;  %v1256_v39 = vrot.slane %v1255_v51, 4 }
 0x479   : >> { %v1241_v61 = vperm.slane %v1233_v6, %v8200_v60  ;;  %v1237_v42 = vperm.slane %v1231_v23, %v8200_v60 }
 0x47a   : >> { %v1259_v7 = vsel %vm1156_vm0, %v1255_v51, %v1258_v58  ;;  %v1257_v3 = vsel %vm1156_vm0, %v1256_v39, %v1250_v19 }
 0x47b   : >> { %v1244_v21 = vrot.slane %v1241_v61, 4  ;;  %v1267_v1 = vperm.slane %v1259_v7, %v8200_v60  ;;  %v1242_v9 = vrot.slane %v1237_v42, 4  ;;  %v1263_v46 = vperm.slane %v1257_v3, %v8200_v60 }
 0x47d   : >> { %v1245_v47 = vsel %vm1156_vm0, 0, %v1244_v21  ;;  %v1270_v48 = vrot.slane %v1267_v1, 4  ;;  %v1243_v63 = vsel %vm1156_vm0, 0, %v1242_v9  ;;  %v1268_v0 = vrot.slane %v1263_v46, 4 }
 0x47e   : >> { %v2546_v43 = vrot.slane %v1245_v47, 4  ;;  %v2541_v62 = vsel %vm1156_vm0, %v1244_v21, %v1237_v42 }
 0x47f   : >> { %v1271_v25 = vsel %vm1156_vm0, 0, %v1270_v48  ;;  %v1269_v13 = vsel %vm1156_vm0, 0, %v1268_v0  ;;  %v2560_v52 = vsel %vm1156_vm0, %v1270_v48, %v1263_v46  ;;  %v2545_v56 = vperm.slane %v2541_v62, %v8195_v45 }
 0x480   : >> { %v2565_v49 = vrot.slane %v1271_v25, 4  ;;  %v2547_v40 = vsel %vm1156_vm0, %v2546_v43, %v1243_v63  ;;  %v2564_v2 = vperm.slane %v2560_v52, %v8195_v45 }
 0x481   : >> { %v2551_v57 = vperm.slane %v2547_v40, %v8195_v45 }
 0x482   : >> { %v2566_v55 = vsel %vm1156_vm0, %v2565_v49, %v1269_v13 }
 0x483   : >> { %v2552_v26 = vrot.slane %v2551_v57, 4  ;;  %v2570_v5 = vperm.slane %v2566_v55, %v8195_v45 }
 0x485   : >> { %v2553_v4 = vsel %vm1156_vm0, %v2552_v26, %v2545_v56  ;;  %v2571_v54 = vrot.slane %v2570_v5, 4 }
 0x486   : >> { %v2557_v15 = vperm.slane %v2553_v4, %v8200_v60 }
 0x487   : >> { %v2572_v20 = vsel %vm1156_vm0, %v2571_v54, %v2564_v2 }
 0x488   : >> { %v2576_v51 = vperm.slane %v2572_v20, %v8200_v60  ;;  %v2582_v45 = vshrl.u32 %v2557_v15, 16  ;;  %v2558_v22 = vrot.slane %v2557_v15, 4 }
 0x48a   : >> { %v2581_v61 = vpack.i.b16 %v2576_v51, %v2557_v15  ;;  %v2583_v39 = vshrl.u32 %v2576_v51, 16  ;;  %v2559_v42 = vsel %vm1156_vm0, 0, %v2558_v22  ;;  %v2577_v21 = vrot.slane %v2576_v51, 4 }
 0x48b   : >> { %v2588_v9 = vshrl.u32 %v2559_v42, 16 }
 0x48c   : >> { %v2596_v60 = vsel %vm2594_vm4, %v2581_v61, 0  ;;  %v2584_v1 = vpack.i.b16 %v2583_v39, %v2582_v45  ;;  %v2578_v46 = vsel %vm1156_vm0, 0, %v2577_v21 }
 0x48d   : >> { %2605 = vmatpush.bf16.msrb.mxu0 %v2596_v60  ;;  %v2587_v0 = vpack.i.b16 %v2578_v46, %v2559_v42  ;;  %v2589_v43 = vshrl.u32 %v2578_v46, 16 }
 0x48e   : >> { %v2615_v63 = vsel %vm2594_vm4, %v2584_v1, 0 }
 0x48f   : >> { %2624 = vmatpush.bf16.msrb.mxu1 %v2615_v63  ;;  %v2634_v50 = vsel %vm2594_vm4, %v2587_v0, 0  ;;  %v2590_v62 = vpack.i.b16 %v2589_v43, %v2588_v9 }
 0x490   : >> { %2643 = vmatpush.bf16.msrb.mxu2 %v2634_v50 }
 0x491   : >> { %v2653_v25 = vsel %vm2594_vm4, %v2590_v62, 0 }
 0x492   : >> { %2662 = vmatpush.bf16.msrb.mxu3 %v2653_v25 }
 0x4a1   : >> { %v2405_v59 = vpop.f32.mrf.mxu0 }
 0x4a2   : >> { %v2468_v44 = vsel %vm2465_vm2, %v2405_v59, -1e+30 }
 0x4a3   : >> { %v2473_v10 = vsel %vm2472_vm3, %v2468_v44, -inf  ;;  %v2421_v11 = vpop.f32.mrf.mxu1 }
 0x4a4   : >> { %2474 = vmax.xlane.f32.xlu2 %v2473_v10  ;;  %v2469_v7 = vsel %vm2465_vm2, %v2421_v11, -1e+30 }
 0x4a5   : >> { %v2437_v12 = vpop.f32.mrf.mxu2  ;;  %v2476_v48 = vsel %vm2472_vm3, %v2469_v7, -inf }
 0x4a6   : >> { %v2470_v19 = vsel %vm2465_vm2, %v2437_v12, -1e+30 }
 0x4a7   : >> { %v2453_v53 = vpop.f32.mrf.mxu3  ;;  %v2479_v24 = vsel %vm2472_vm3, %v2470_v19, -inf }
 0x4a8   : >> { %v2471_v58 = vsel %vm2465_vm2, %v2453_v53, -1e+30  ;;  %2480 = vmax.xlane.f32.xlu1 %v2479_v24 }
 0x4a9   : >> { %v2482_v6 = vsel %vm2472_vm3, %v2471_v58, -inf  ;;  %v2407_v23 = vpop.f32.mrf.mxu0 }
 0x4aa   : >> { %2483 = vmax.xlane.f32.xlu0 %v2482_v6 }
 0x4ab   : >> { %v2423_v3 = vpop.f32.mrf.mxu1 }
 0x4ad   : >> { %v2439_v47 = vpop.f32.mrf.mxu2 }
 0x4af   : >> { %v2455_v41 = vpop.f32.mrf.mxu3 }
 0x4b0   : >> { %2477 = vmax.xlane.f32.xlu1 %v2476_v48 }
 0x517   : >> { %v2475_v49 = vpop.xlane.xlu2 %2474 }
 0x518   : >> { %v8470_v13 = vmax.f32 %v7601_v38, %v2475_v49  }
 0x51a   : >> { %v2489_v40 = vsub.f32 %v7601_v38, %v8470_v13  ;;  %v2501_v52 = vsub.f32 %v2468_v44, %v8470_v13 }
 0x51b   : >> { %v2481_v56 = vpop.xlane.xlu1 %2480 }
 0x51c   : >> { %v2505_v57 = vmul.f32 1.442695, %v2501_v52  ;;  %v8476_v59 = vmax.f32 %v7593_v36, %v2481_v56   ;;  %v2493_v61 = vmul.f32 1.442695, %v2489_v40 }
 0x51d   : >> { %v2484_v55 = vpop.xlane.xlu0 %2483 }
 0x51e   : >> { %v2491_v26 = vsub.f32 %v7593_v36, %v8476_v59  ;;  %v2503_v2 = vsub.f32 %v2470_v19, %v8476_v59  ;;  %v8482_v5 = vmax.f32 %v7589_v35, %v2484_v55   ;;  %6843 = vpow2.f32 %v2505_v57 }
 0x520   : >> { %v2509_v10 = vmul.f32 1.442695, %v2503_v2  ;;  %v2492_v38 = vsub.f32 %v7589_v35, %v8482_v5  ;;  %v2504_v44 = vsub.f32 %v2471_v58, %v8482_v5  ;;  %v2497_v39 = vmul.f32 1.442695, %v2491_v26 }
 0x522   : >> { %v2511_v11 = vmul.f32 1.442695, %v2504_v44  ;;  %6845 = vpow2.f32 %v2509_v10  ;;  %v2499_v42 = vmul.f32 1.442695, %v2492_v38 }
 0x523   : >> { %v2478_v4 = vpop.xlane.xlu1 %2477 }
 0x524   : >> { %v8488_v54 = vmax.f32 %v7597_v37, %v2478_v4   ;;  %v6844_v12 = vpop.eup %6843  ;;  %6847 = vpow2.f32 %v2511_v11 }
 0x525   : >> { %v2517_v19 = vsel %vm2472_vm3, %v6844_v12, 0.0  ;;  %v2537_v20 = vpack.c.bf16 %v6844_v12, %v6844_v12 }
 0x526   : >> { %v2490_v36 = vsub.f32 %v7597_v37, %v8488_v54  ;;  %v2502_v15 = vsub.f32 %v2469_v7, %v8488_v54  ;;  %2518 = vadd.xlane.f32.xlu1 %v2517_v19 }
 0x527   : >> { %6097 = vmatmul.msk.bf16.vlgmr.msrb.gmra.mxu0 %vm2472_vm3, %v2537_v20 }
 0x528   : >> { %v2507_v35 = vmul.f32 1.442695, %v2502_v15  ;;  %v6846_v53 = vpop.eup %6845  ;;  %v2495_v21 = vmul.f32 1.442695, %v2490_v36  ;;  %v9656_v36 = vmov %v8476_v59 }
 0x529   : >> { %v2523_v24 = vsel %vm2472_vm3, %v6846_v53, 0.0  ;;  %v2539_v51 = vpack.c.bf16 %v6846_v53, %v6846_v53 }
 0x52a   : >> { %v6848_v45 = vpop.eup %6847  ;;  %6849 = vpow2.f32 %v2507_v35  ;;  %2524 = vadd.xlane.f32.xlu2 %v2523_v24  ;;  %v9655_v35 = vmov %v8482_v5 }
 0x52b   : >> { %6099 = vmatmul.msk.bf16.vlgmr.msrb.gmra.mxu2 %vm2472_vm3, %v2539_v51  ;;  %v2540_v22 = vpack.c.bf16 %v6848_v45, %v6848_v45  ;;  %v2526_v37 = vsel %vm2472_vm3, %v6848_v45, 0.0  ;;  %6851 = vpow2.f32 %v2493_v61 }
 0x52c   : >> { %6853 = vpow2.f32 %v2497_v39 }
 0x52d   : >> { %6100 = vmatmul.msk.bf16.vlgmr.msrb.gmra.mxu3 %vm2472_vm3, %v2540_v22  ;;  %6855 = vpow2.f32 %v2499_v42 }
 0x52e   : >> { %2527 = vadd.xlane.f32.xlu1 %v2526_v37  ;;  %6857 = vpow2.f32 %v2495_v21  ;;  %v9657_v37 = vmov %v8488_v54 }
 0x530   : >> { %v6850_v58 = vpop.eup %6849 }
 0x531   : >> { %v2520_v6 = vsel %vm2472_vm3, %v6850_v58, 0.0  ;;  %v2538_v23 = vpack.c.bf16 %v6850_v58, %v6850_v58  ;;  %v6852_v7 = vpop.eup %6851 }
 0x532   : >> { %2521 = vadd.xlane.f32.xlu0 %v2520_v6  ;;  %v2513_v3 = vmul.f32 %v7585_v34, %v6852_v7  ;;  %v6854_v60 = vpop.eup %6853  ;;  %v2533_v62 = vmul.f32 %v7569_v30, %v6852_v7 }
 0x533   : >> { %6098 = vmatmul.msk.bf16.vlgmr.msrb.gmra.mxu1 %vm2472_vm3, %v2538_v23  ;;  %v2515_v46 = vmul.f32 %v7577_v32, %v6854_v60  ;;  %v6856_v47 = vpop.eup %6855  ;;  %v2535_v57 = vmul.f32 %v7561_v28, %v6854_v60 }
 0x534   : >> { %v2516_v0 = vmul.f32 %v7573_v31, %v6856_v47  ;;  %v6858_v43 = vpop.eup %6857  ;;  %v2536_v31 = vmul.f32 %v7557_v27, %v6856_v47 }
 0x535   : >> { %v2514_v49 = vmul.f32 %v7581_v33, %v6858_v43  ;;  %v2534_v26 = vmul.f32 %v7565_v29, %v6858_v43 }
 0x599   : >> { %v2519_v1 = vpop.xlane.xlu1 %2518 }
 0x59a   : >> { %v2529_v9 = vadd.f32 %v2519_v1, %v2513_v3  }
 0x59d   : >> { %v2525_v48 = vpop.xlane.xlu2 %2524 }
 0x59e   : >> { %v2531_v63 = vadd.f32 %v2525_v48, %v2515_v46  }
 0x5a0   : > { %v9664_v24 = vmov (%p8512_p3), %v2531_v63 }
 0x5a1   : >> { %v2528_v41 = vpop.xlane.xlu1 %2527 }
 0x5a2   : >> { %v2532_v50 = vadd.f32 %v2528_v41, %v2516_v0  }
 0x5a4   : >> { %v2607_v25 = vpop.f32.mrf.mxu0  ;;  %v9663_v23 = vmov (%p8512_p3), %v2532_v50 }
 0x5a5   : >> { %v2668_v40 = vadd.f32 %v2607_v25, %v2533_v62   ;;  %v2522_v34 = vpop.xlane.xlu0 %2521 }
 0x5a6   : >> { %v2530_v52 = vadd.f32 %v2522_v34, %v2514_v49   ;;  %v9654_v34 = vmov %v2529_v9 }
 0x5a7   : > { %v9662_v22 = vmov (%p8512_p3), %v2668_v40 }
 0x5a8   : >> { %v9653_v33 = vmov %v2530_v52  ;;  %v9665_v25 = vmov (%p8512_p3), %v2530_v52 }
 0x5ac   : >> { %v2609_v56 = vpop.f32.mrf.mxu0 }
 0x5ae   : >> { %v2645_v32 = vpop.f32.mrf.mxu2 }
 0x5af   : >> { %v2670_v55 = vadd.f32 %v2645_v32, %v2535_v57   ;;  %v9652_v32 = vmov %v2531_v63 }
 0x5b0   : >> { %v2626_v2 = vpop.f32.mrf.mxu1  ;;  %v2664_v10 = vpop.f32.mrf.mxu3 }
 0x5b1   : >> { %v2669_v44 = vadd.f32 %v2626_v2, %v2534_v26   ;;  %v2671_v11 = vadd.f32 %v2664_v10, %v2536_v31   ;;  %v9648_v28 = vmov %v2670_v55  ;;  %v9651_v31 = vmov %v2532_v50 }
 0x5b2   : > { %v9660_v20 = vmov (%p8512_p3), %v2670_v55  ;;  %v9666_v26 = vmov (%p8512_p3), %v2529_v9 }
 0x5b3   : >> { %v9647_v27 = vmov %v2671_v11  ;;  %v9649_v29 = vmov %v2669_v44  ;;  %v9659_v19 = vmov (%p8512_p3), %v2671_v11  ;;  %v9661_v21 = vmov (%p8512_p3), %v2669_v44 }
 0x5b5   : > { %1107 = sbr.rel (!%p8512_p3) target bundleno = 436 (0x1b4), region = 238 }
 0x5b6   : >> { %v2647_v30 = vpop.f32.mrf.mxu2 }
 0x5b7   : >> { %v9650_v30 = vmov %v2668_v40 }
 0x5b8   : >> { %v2628_v38 = vpop.f32.mrf.mxu1  ;;  %v2666_v4 = vpop.f32.mrf.mxu3 }
 0x5b9   : >> { %v9658_v38 = vmov %v8470_v13 }
 0x5ba PF: > { %6957 = vrcp.f32 %v7637_v26  ;;  %v7657_v16 = vmov 1983009808   ;;  %vm2681_vm5 = vcmask 1047556   ;;  %v7658_v35 = vmov 1934713408   ;;  %s9669_s20 = sld [smem:[#allocation59_spill]]  ;;  %v7637_v26 = vphi %v8115_v26, %v9666_v26   ;;  %v7633_v25 = vphi %v8113_v25, %v9665_v25   ;;  %v7629_v24 = vphi %v8111_v24, %v9664_v24   ;;  %v7625_v23 = vphi %v8109_v23, %v9663_v23   ;;  %v7621_v22 = vphi %v8107_v22, %v9662_v22   ;;  %v7617_v21 = vphi %v8105_v21, %v9661_v21   ;;  %v7613_v20 = vphi %v8103_v20, %v9660_v20   ;;  %v7609_v19 = vphi %v8101_v19, %v9659_v19  }
 0x5bb   : > { %6959 = vrcp.f32 %v7633_v25  ;;  %v2686_v17 = vunpack.c.l.s4 %v7657_v16  ;;  %v2710_v53 = vunpack.c.l.s4 %v7658_v35  ;;  %v8615_v16 = vld [vmem:[%s883_s4 + $0x4] sm:$0xf]  ;;  %v6356_v35 = vld [vmem:[#allocation13 + $0x30] sm:$0xff]  ;;  %vm2803_vm6 = vcmask 261120   ;;  %s9670_s12 = sld [smem:[#allocation60_spill]]  ;;  %s5728_s28 = scalar_lea.sflag [#allocation4], %s8031_s15 }
 0x5bc   : > { %6961 = vrcp.f32 %v7629_v24  ;;  %vm2805_vm7 = vcmask 523264   ;;  %vm2807_vm8 = vcmask 785408   ;;  %s9683_s19 = sld [smem:[#allocation52_spill]]  ;;  %vm4909_vm13 = vcmask 130048  }
 0x5bd   : > { %6963 = vrcp.f32 %v7625_v23  ;;  %v8572_v54 = vunpack.c.0.s8 %v2686_v17  ;;  %v8588_v61 = vunpack.c.0.s8 %v2710_v53  ;;  %v6355_v53 = vld [vmem:[#allocation13 + $0x28] sm:$0xff]  ;;  %s9686_s3 = sld [smem:[#allocation61_spill]] }
 0x5be   : > { %s9687_s25 = sld [smem:[#allocation62_spill]] }
 0x5bf   : > { %s9688_s9 = sld [smem:[#allocation56_spill]] }
 0x5c0   : > { %v6958_v14 = vpop.eup %6957  ;;  %s9689_s30 = sld [smem:[#allocation58_spill]] }
 0x5c1   : > { %v6960_v18 = vpop.eup %6959  ;;  %v2676_v27 = vmul.f32 %v7621_v22, %v6958_v14  ;;  %s9690_s16 = sld [smem:[#allocation31_spill]] }
 0x5c2   : > { %v6962_v28 = vpop.eup %6961  ;;  %v2677_v29 = vmul.f32 %v7617_v21, %v6960_v18  ;;  %s9695_s10 = sld [smem:[#allocation64_spill]] }
 0x5c3   : > { %v6964_v33 = vpop.eup %6963  ;;  %v2678_v13 = vmul.f32 %v7613_v20, %v6962_v28  ;;  %v2683_v59 = vrot.slane %v2676_v27, 4 }
 0x5c4   : > { %v2679_v5 = vmul.f32 %v7609_v19, %v6964_v33  ;;  %v2695_v12 = vrot.slane %v2677_v29, 4  ;;  %v8581_v19 = vld [vmem:[%s883_s4] sm:$0xf]  ;;  %s9667_s4 = sld [smem:[#allocation50_spill]] }
 0x5c5   : > { %v2680_v36 = vrot.slane %v2678_v13, 4  ;;  %v2684_v15 = vsel %vm2681_vm5, %v2678_v13, %v2683_v59  ;;  %3028 = vrot.lane.b32.xlu2 %v8581_v19, %s7651_s6 }
 0x5c6   : > { %v2692_v24 = vperm.slane %v2684_v15, %v8572_v54  ;;  %v2693_v51 = vrot.slane %v2679_v5, 4  ;;  %v2696_v45 = vsel %vm2681_vm5, %v2679_v5, %v2695_v12  ;;  %v6357_v15 = vld [vmem:[#allocation13 + $0x38] sm:$0xff] }
 0x5c7   : > { %v2682_v22 = vsel %vm2681_vm5, %v2680_v36, %v2676_v27  ;;  %v2704_v20 = vperm.slane %v2696_v45, %v8572_v54  ;;  %2878 = vmatpush.bf16.msra.mxu0 %v6357_v15  ;;  %v6352_v45 = vld [vmem:[#allocation13 + $0x10] sm:$0xff]  ;;  %s6334_s27 = sshll.u32 %s9690_s16, 1 }
 0x5c8   : > { %v2688_v37 = vperm.slane %v2682_v22, %v8572_v54  ;;  %v2694_v58 = vsel %vm2681_vm5, %v2693_v51, %v2677_v29  ;;  %v2719_v6 = vrot.slane %v2692_v24, 4  ;;  %v6353_v51 = vld [vmem:[#allocation13 + $0x18] sm:$0xff]  ;;  %v6351_v22 = vld [vmem:[#allocation13 + $0x8] sm:$0xff] }
 0x5c9   : > { %v2700_v23 = vperm.slane %v2694_v58, %v8572_v54  ;;  %v2717_v39 = vrot.slane %v2704_v20, 4 }
 0x5ca   : > { %v2707_v42 = vrot.slane %v2688_v37, 4  ;;  %v2720_v7 = vsel %vm2681_vm5, %v2704_v20, %v2719_v6  ;;  %v6350_v20 = vld [vmem:[#allocation13] sm:$0xff] }
 0x5cb   : > { %v2705_v21 = vrot.slane %v2700_v23, 4  ;;  %v2718_v3 = vsel %vm2681_vm5, %v2717_v39, %v2692_v24  ;;  %v2728_v60 = vperm.slane %v2720_v7, %v8588_v61  ;;  %2879 = vmatpush.bf16.msra.mxu0 %v6356_v35  ;;  %v6354_v24 = vld [vmem:[#allocation13 + $0x20] sm:$0xff] }
 0x5cc   : > { %v2708_v1 = vsel %vm2681_vm5, %v2700_v23, %v2707_v42  ;;  %v2724_v9 = vperm.slane %v2718_v3, %v8588_v61 }
 0x5cd   : > { %v2706_v46 = vsel %vm2681_vm5, %v2705_v21, %v2688_v37  ;;  %v2716_v47 = vperm.slane %v2708_v1, %v8588_v61  ;;  %v2735_v48 = vrot.slane %v2728_v60, 4  ;;  %3034 = vrot.lane.b32.xlu2 %v8615_v16, %s7649_s0 }
 0x5ce   : > { %v2712_v63 = vperm.slane %v2706_v46, %v8588_v61  ;;  %v2733_v0 = vrot.slane %v2724_v9, 4 }
 0x5cf   : > { %v2731_v43 = vrot.slane %v2716_v47, 4  ;;  %v2736_v41 = vsel %vm2681_vm5, 0.0, %v2735_v48  ;;  %v2748_v50 = vsel %vm2681_vm5, %v2735_v48, %v2724_v9  ;;  %2880 = vmatpush.bf16.msra.mxu0 %v6355_v53 }
 0x5d0   : > { %v2729_v62 = vrot.slane %v2712_v63, 4  ;;  %v2734_v25 = vsel %vm2681_vm5, 0.0, %v2733_v0  ;;  %v2753_v49 = vrot.slane %v2736_v41, 4  ;;  %v2752_v52 = vperm.slane %v2748_v50, %v8572_v54 }
 0x5d1   : > { %v2732_v40 = vsel %vm2681_vm5, 0.0, %v2731_v43  ;;  %v2737_v34 = vsel %vm2681_vm5, %v2731_v43, %v2712_v63  ;;  %v3039_v43 = vshrl.u32 %v8581_v19, 16 }
 0x5d2   : > { %v2730_v56 = vsel %vm2681_vm5, 0.0, %v2729_v62  ;;  %v2741_v57 = vperm.slane %v2737_v34, %v8572_v54  ;;  %v2742_v32 = vrot.slane %v2732_v40, 4  ;;  %v2754_v55 = vsel %vm2681_vm5, %v2753_v49, %v2734_v25 }
 0x5d3   : > { %v2758_v26 = vperm.slane %v2754_v55, %v8572_v54  ;;  %v2773_v31 = vrot.slane %v2752_v52, 4  ;;  %2881 = vmatpush.bf16.msra.mxu0 %v6354_v24 }
 0x5d4   : > { %v2743_v2 = vsel %vm2681_vm5, %v2742_v32, %v2730_v56  ;;  %v2761_v10 = vrot.slane %v2741_v57, 4 }
 0x5d5   : > { %v2747_v44 = vperm.slane %v2743_v2, %v8572_v54  ;;  %v2771_v11 = vrot.slane %v2758_v26, 4  ;;  %v2774_v14 = vsel %vm2681_vm5, %v2758_v26, %v2773_v31 }
 0x5d6   : > { %v2782_v29 = vperm.slane %v2774_v14, %v8588_v61 }
 0x5d7   : > { %v2759_v30 = vrot.slane %v2747_v44, 4  ;;  %v2772_v38 = vsel %vm2681_vm5, %v2771_v11, %v2752_v52  ;;  %v2762_v4 = vsel %vm2681_vm5, %v2747_v44, %v2761_v10  ;;  %2882 = vmatpush.bf16.msra.mxu0 %v6353_v51 }
 0x5d8   : > { %v2770_v17 = vperm.slane %v2762_v4, %v8588_v61  ;;  %v2778_v28 = vperm.slane %v2772_v38, %v8588_v61  ;;  %v2787_v12 = vrot.slane %v2782_v29, 4 }
 0x5d9   : > { %v2760_v18 = vsel %vm2681_vm5, %v2759_v30, %v2741_v57 }
 0x5da   : > { %v2766_v27 = vperm.slane %v2760_v18, %v8588_v61  ;;  %v2789_v33 = vrot.slane %v2770_v17, 4  ;;  %v2788_v36 = vsel %vm2681_vm5, %v2787_v12, %v2770_v17  ;;  %v2783_v58 = vrot.slane %v2778_v28, 4 }
 0x5db   : > { %2883 = vmatpush.bf16.msra.mxu0 %v6352_v45  ;;  %v3051_v17 = vshrl.u32 %v8615_v16, 16 }
 0x5dc   : > { %v2785_v13 = vrot.slane %v2766_v27, 4  ;;  %v2790_v59 = vsel %vm2681_vm5, %v2782_v29, %v2789_v33  ;;  %v2784_v6 = vsel %vm2681_vm5, %v2783_v58, %v2766_v27 }
 0x5dd   : > { %2800 = vrot.lane.b32.xlu1 %v2790_v59, %s7650_s29 }
 0x5de   : > { %v2786_v5 = vsel %vm2681_vm5, %v2778_v28, %v2785_v13 }
 0x5df   : > { %2792 = vrot.lane.b32.xlu0 %v2786_v5, %s7649_s0  ;;  %2884 = vmatpush.bf16.msra.mxu0 %v6351_v22 }
 0x5e3   : > { %2885 = vmatpush.bf16.msra.mxu0 %v6350_v20 }
 0x5e7   : > { %2796 = vrot.lane.b32.xlu0 %v2788_v36, %s7651_s6 }
 0x5ef   : > { %3032 = vrot.lane.b32.xlu0 %v8581_v19, %s7649_s0 }
 0x5f7   : > { %3024 = vrot.lane.b32.xlu0 %v8581_v19, %s7650_s29 }
 0x5ff   : > { %3030 = vrot.lane.b32.xlu0 %v8615_v16, %s7651_s6 }
 0x607   : > { %3026 = vrot.lane.b32.xlu0 %v8615_v16, %s7650_s29 }
 0x61f   : > { %v3029_v60 = vpop.permute.xlu2 %3028 }
 0x620   : > { %v3045_v1 = vshrl.u32 %v3029_v60, 16 }
 0x627   : > { %v3035_v44 = vpop.permute.xlu2 %3034 }
 0x628   : > { %v3058_v30 = vshrl.u32 %v3035_v44, 16 }
 0x64f   : > { %v2801_v23 = vpop.permute.xlu1 %2800 }
 0x651   : > { %v2793_v37 = vpop.permute.xlu0 %2792 }
 0x652   : > { %v2804_v39 = vsel %vm2803_vm6, %v2784_v6, %v2793_v37 }
 0x659   : > { %v2797_v42 = vpop.permute.xlu0 %2796 }
 0x65a   : > { %v2806_v7 = vsel %vm2805_vm7, %v2804_v39, %v2797_v42 }
 0x65b   : > { %v2808_v21 = vsel %vm2807_vm8, %v2806_v7, %v2801_v23 }
 0x65c   : > { %v2809_v3 = vpack.c.bf16 %v2808_v21, %v2808_v21 }
 0x65e   : > { %2886 = vmatmul.bf16.vlgmr.msra.gmra.mxu0 %v2809_v3 }
 0x661   : > { %v3033_v9 = vpop.permute.xlu0 %3032 }
 0x662   : > { %v3046_v46 = vshrl.u32 %v3033_v9, 16  ;;  %v3044_v47 = vpack.i.b16 %v3033_v9, %v3029_v60 }
 0x664   : > { %v3047_v48 = vpack.i.b16 %v3046_v46, %v3045_v1  ;;  %v3069_v63 = vperm.slane %v3044_v47, %v8572_v54  ;;  %v6947_v1 = vld [vmem:[%s9667_s4] ss:$0 sm:$0xff] }
 0x666   : > { %v3096_v0 = vperm.slane %v3047_v48, %v8572_v54  ;;  %v3070_v50 = vrot.slane %v3069_v63, 4 }
 0x668   : > { %v3097_v49 = vrot.slane %v3096_v0, 4 }
 0x669   : > { %v3025_v41 = vpop.permute.xlu0 %3024 }
 0x66a   : > { %v3038_v62 = vpack.i.b16 %v3025_v41, %v8581_v19  ;;  %v3040_v25 = vshrl.u32 %v3025_v41, 16 }
 0x66c   : > { %v3041_v40 = vpack.i.b16 %v3040_v25, %v3039_v43  ;;  %v3064_v34 = vperm.slane %v3038_v62, %v8572_v54  ;;  %v7659_v25 = vmov 128.0  }
 0x66d   : > { %6965 = vrcp.f32 %v7659_v25 }
 0x66e   : > { %v3091_v52 = vperm.slane %v3041_v40, %v8572_v54  ;;  %v3072_v56 = vsel %vm2681_vm5, %v3070_v50, %v3064_v34  ;;  %v3073_v37 = vrot.slane %v3064_v34, 4 }
 0x66f   : > { %v3078_v57 = vperm.slane %v3072_v56, %v8588_v61 }
 0x670   : > { %v3098_v32 = vsel %vm2681_vm5, %v3097_v49, %v3091_v52  ;;  %v3099_v58 = vrot.slane %v3091_v52, 4  ;;  %v3074_v6 = vsel %vm2681_vm5, %v3069_v63, %v3073_v37 }
 0x671   : > { %v3104_v55 = vperm.slane %v3098_v32, %v8588_v61  ;;  %v3031_v26 = vpop.permute.xlu0 %3030  ;;  %v3083_v31 = vrot.slane %v3078_v57, 4  ;;  %v3082_v39 = vperm.slane %v3074_v6, %v8588_v61 }
 0x672   : > { %v3057_v11 = vshrl.u32 %v3031_v26, 16  ;;  %v3056_v4 = vpack.i.b16 %v3035_v44, %v3031_v26  ;;  %v3100_v23 = vsel %vm2681_vm5, %v3096_v0, %v3099_v58 }
 0x673   : > { %6859 = vxpose.binary.xlu2.c.b16.start.end [1/2] (short) (narrow) %v3104_v55, %v3078_v57, 32  ;;  %v3109_v2 = vrot.slane %v3104_v55, 4  ;;  %v3084_v19 = vsel %vm2681_vm5, 0, %v3083_v31  ;;  %v3108_v42 = vperm.slane %v3100_v23, %v8588_v61  ;;  %v3085_v7 = vrot.slane %v3082_v39, 4  ;;  %v6966_v34 = vpop.eup %6965 }
 0x674   : > { %v3059_v14 = vpack.i.b16 %v3058_v30, %v3057_v11  ;;  %v3122_v27 = vperm.slane %v3056_v4, %v8572_v54  ;;  %v2897_v52 = vmul.f32 128.0, %v6966_v34  ;;  %vm2901_vm9 = vweird.f32 %v6966_v34 }
 0x675   : > { %v3110_v10 = vsel %vm2681_vm5, 0, %v3109_v2  ;;  %v3111_v21 = vrot.slane %v3108_v42, 4  ;;  %v3086_v3 = vsel %vm2681_vm5, 0, %v3085_v7 }
 0x676   : > { %6864 = vxpose.binary.xlu0.c.b16.start.end [1/2] (short) (narrow) %v3110_v10, %v3084_v19, 32  ;;  %v3148_v28 = vperm.slane %v3059_v14, %v8572_v54  ;;  %v3123_v13 = vrot.slane %v3122_v27, 4  ;;  %v2898_v57 = vsub.f32 1.0, %v2897_v52 }
 0x677   : > { %v3112_v60 = vsel %vm2681_vm5, 0, %v3111_v21  ;;  %v6365_v21 = vld [vmem:[#allocation14 + $0x38] sm:$0xff] }
 0x678   : > { %v3149_v59 = vrot.slane %v3148_v28, 4  ;;  %v2899_v32 = vmul.f32 %v6966_v34, %v2898_v57  ;;  %2998 = vmatpush.bf16.msra.mxu1 %v6365_v21 }
 0x679   : > { %v3027_v38 = vpop.permute.xlu0 %3026 }
 0x67a   : > { %v3052_v18 = vshrl.u32 %v3027_v38, 16  ;;  %v3050_v29 = vpack.i.b16 %v3027_v38, %v8615_v16  ;;  %v2900_v26 = vadd.f32 %v6966_v34, %v2899_v32 }
 0x67c   : > { %v3053_v33 = vpack.i.b16 %v3052_v18, %v3051_v17  ;;  %v3117_v5 = vperm.slane %v3050_v29, %v8572_v54  ;;  %v8688_v2 = vsel %vm2901_vm9, %v6966_v34, %v2900_v26 }
 0x67d   : > { %9668 = vst [vmem:[#allocation41_spill] sm:$0xff] %v8688_v2 }
 0x67e   : > { %v3143_v12 = vperm.slane %v3053_v33, %v8572_v54  ;;  %v3124_v36 = vsel %vm2681_vm5, %v3123_v13, %v3117_v5  ;;  %v3125_v24 = vrot.slane %v3117_v5, 4 }
 0x67f   : > { %v3130_v35 = vperm.slane %v3124_v36, %v8588_v61 }
 0x680   : > { %v3150_v15 = vsel %vm2681_vm5, %v3149_v59, %v3143_v12  ;;  %v3151_v51 = vrot.slane %v3143_v12, 4  ;;  %v3126_v16 = vsel %vm2681_vm5, %v3122_v27, %v3125_v24 }
 0x681   : > { %v3156_v53 = vperm.slane %v3150_v15, %v8588_v61  ;;  %v3134_v22 = vperm.slane %v3126_v16, %v8588_v61  ;;  %v3135_v50 = vrot.slane %v3130_v35, 4 }
 0x682   : > { %v3152_v45 = vsel %vm2681_vm5, %v3148_v28, %v3151_v51 }
 0x683   : > { %v3160_v20 = vperm.slane %v3152_v45, %v8588_v61  ;;  %v3137_v48 = vrot.slane %v3134_v22, 4  ;;  %v3161_v62 = vrot.slane %v3156_v53, 4  ;;  %v3136_v49 = vsel %vm2681_vm5, 0, %v3135_v50 }
 0x685   : > { %v3163_v63 = vrot.slane %v3160_v20, 4  ;;  %v3138_v43 = vsel %vm2681_vm5, 0, %v3137_v48  ;;  %v3162_v40 = vsel %vm2681_vm5, 0, %v3161_v62  ;;  %v6360_v48 = vld [vmem:[#allocation14 + $0x10] sm:$0xff] }
 0x687   : > { %v3164_v41 = vsel %vm2681_vm5, 0, %v3163_v63 }
 0x693   : > { %6874 = vxpose.binary.xlu2.c.b16.start.end [1/2] (short) (narrow) %v3156_v53, %v3130_v35, 32 }
 0x696   : > { %6879 = vxpose.binary.xlu0.c.b16.start.end [1/2] (short) (narrow) %v3112_v60, %v3086_v3, 32  ;;  %v6364_v3 = vld [vmem:[#allocation14 + $0x30] sm:$0xff]  ;;  %v6363_v60 = vld [vmem:[#allocation14 + $0x28] sm:$0xff] }
 0x697   : > { %2999 = vmatpush.bf16.msra.mxu1 %v6364_v3 }
 0x69b   : > { %3000 = vmatpush.bf16.msra.mxu1 %v6363_v60 }
 0x6b3   : > { %6889 = vxpose.binary.xlu2.c.b16.start.end [1/2] (short) (narrow) %v3160_v20, %v3134_v22, 32 }
 0x6b6   : > { %6894 = vxpose.binary.xlu0.c.b16.start.end [1/2] (short) (narrow) %v3164_v41, %v3138_v43, 32  ;;  %v6359_v43 = vld [vmem:[#allocation14 + $0x8] sm:$0xff] }
 0x6db   : > { %v2887_v9 = vpop.f32.mrf.mxu0 }
 0x6dc   : > { %v2888_v46 = vadd.f32 %v6947_v1, %v2887_v9  ;;  %v6362_v9 = vld [vmem:[#allocation14 + $0x20] sm:$0xff] }
 0x6dd   : > { %3001 = vmatpush.bf16.msra.mxu1 %v6362_v9 }
 0x6de   : > { %v2891_v47 = vadd.f32 %v2888_v46, %v8073_v8  ;;  %v6361_v46 = vld [vmem:[#allocation14 + $0x18] sm:$0xff] }
 0x6e0   : > { %2894 = vadd.xlane.f32.xlu1 %v2891_v47 }
 0x6e1   : > { %3002 = vmatpush.bf16.msra.mxu1 %v6361_v46 }
 0x6e3   : > { %v2889_v0 = vpop.f32.mrf.mxu0 }
 0x6e5   : > { %3003 = vmatpush.bf16.msra.mxu1 %v6360_v48 }
 0x6e9   : > { %3004 = vmatpush.bf16.msra.mxu1 %v6359_v43 }
 0x714   : > { %v8682_v8 = vpop.trf.xlu2 }
 0x715   : > { %v3567_v41 = vrot.slane %v8682_v8, 4 }
 0x71a   : > { %6869 = vxpose.binary.xlu1.c.b16.start.end [1/2] (short) (narrow) %v3108_v42, %v3082_v39, 32 }
 0x71c   : > { %v8684_v56 = vpop.trf.xlu2 }
 0x71d   : > { %v3679_v25 = vrot.slane %v8684_v56, 4 }
 0x722   : > { %v6865_v31 = vpop.trf.xlu0 }
 0x723   : > { %v3579_v28 = vrot.slane %v6865_v31, 4 }
 0x724   : > { %v8686_v55 = vpop.trf.xlu2 }
 0x725   : > { %v3791_v52 = vrot.slane %v8686_v55, 4 }
 0x72a   : > { %v6866_v30 = vpop.trf.xlu0 }
 0x72b   : > { %v3691_v36 = vrot.slane %v6866_v30, 4 }
 0x72c   : > { %v8690_v19 = vpop.trf.xlu2 }
 0x732   : > { %v8697_v14 = vpop.trf.xlu0 }
 0x734   : > { %v6875_v4 = vpop.trf.xlu2 }
 0x735   : > { %v3591_v5 = vrot.slane %v6875_v4, 4 }
 0x73a   : > { %6884 = vxpose.binary.xlu1.c.b16.start.end [1/2] (short) (narrow) %v3162_v40, %v3136_v49, 32  ;;  %v8701_v27 = vpop.trf.xlu0 }
 0x73c   : > { %v6876_v17 = vpop.trf.xlu2 }
 0x73d   : > { %v3703_v22 = vrot.slane %v6876_v17, 4 }
 0x742   : > { %v6880_v33 = vpop.trf.xlu0 }
 0x743   : > { %v3577_v13 = vrot.slane %v6880_v33, 4  ;;  %v3580_v59 = vsel %vm2681_vm5, %v6880_v33, %v3579_v28 }
 0x744   : > { %v8699_v18 = vpop.trf.xlu2  ;;  %v3588_v0 = vperm.slane %v3580_v59, %v8572_v54  ;;  %v3915_v59 = vrot.slane %v8701_v27, 4 }
 0x745   : > { %v3578_v12 = vsel %vm2681_vm5, %v3577_v13, %v6865_v31  ;;  %v3815_v39 = vrot.slane %v8699_v18, 4  ;;  %v6358_v31 = vld [vmem:[#allocation14] sm:$0xff]  ;;  %v3903_v13 = vrot.slane %v8690_v19, 4 }
 0x746   : > { %v3584_v50 = vperm.slane %v3578_v12, %v8572_v54  ;;  %v3625_v57 = vrot.slane %v3588_v0, 4  ;;  %3005 = vmatpush.bf16.msra.mxu1 %v6358_v31 }
 0x74a   : > { %v6881_v51 = vpop.trf.xlu0 }
 0x74b   : > { %v3689_v16 = vrot.slane %v6881_v51, 4  ;;  %v3692_v45 = vsel %vm2681_vm5, %v6881_v51, %v3691_v36 }
 0x74c   : > { %v8703_v29 = vpop.trf.xlu2  ;;  %v8748_v12 = vperm.slane %v3692_v45, %v8572_v54 }
 0x74d   : > { %v3690_v20 = vsel %vm2681_vm5, %v3689_v16, %v6866_v30 }
 0x74e   : > { %v3737_v3 = vrot.slane %v8748_v12, 4 }
 0x752   : > { %v6882_v1 = vpop.trf.xlu0 }
 0x753   : > { %v2895_v10 = vpop.xlane.xlu1 %2894 }
 0x754   : > { %v2903_v44 = vmul.f32 %v8688_v2, %v2895_v10  ;;  %v6890_v15 = vpop.trf.xlu2  ;;  %v3803_v10 = vrot.slane %v8697_v14, 4 }
 0x755   : > { %v3589_v35 = vrot.slane %v6890_v15, 4  ;;  %v3592_v53 = vsel %vm2681_vm5, %v6890_v15, %v3591_v5  ;;  %v3927_v5 = vrot.slane %v8703_v29, 4 }
 0x756   : > { %v8693_v11 = vsub.f32 %v2891_v47, %v2903_v44  ;;  %v8733_v32 = vperm.slane %v3592_v53, %v8572_v54  ;;  %v3613_v44 = vrot.slane %v3584_v50, 4  ;;  %v3804_v51 = vsel %vm2681_vm5, %v6882_v1, %v3803_v10 }
 0x757   : > { %v3590_v24 = vsel %vm2681_vm5, %v3589_v35, %v6875_v4  ;;  %v3801_v4 = vrot.slane %v6882_v1, 4  ;;  %v8770_v1 = vperm.slane %v3804_v51, %v8572_v54 }
 0x758   : > { %v2905_v38 = vmul.f32 %v8693_v11, %v8693_v11  ;;  %v8738_v30 = vperm.slane %v3590_v24, %v8572_v54  ;;  %v3651_v36 = vrot.slane %v8733_v32, 4  ;;  %v3696_v24 = vperm.slane %v3690_v20, %v8572_v54 }
 0x759   : > { %v3802_v45 = vsel %vm2681_vm5, %v3801_v4, %v8697_v14 }
 0x75a   : > { %2906 = vadd.xlane.f32.xlu2 %v2905_v38  ;;  %v8720_v47 = vpop.trf.xlu0  ;;  %v3639_v53 = vrot.slane %v8738_v30, 4  ;;  %v8777_v46 = vperm.slane %v3802_v45, %v8572_v54 }
 0x75b   : > { %v3913_v60 = vrot.slane %v8720_v47, 4 }
 0x75c   : > { %v6891_v37 = vpop.trf.xlu2 }
 0x75d   : > { %v3701_v58 = vrot.slane %v6891_v37, 4  ;;  %v3704_v6 = vsel %vm2681_vm5, %v6891_v37, %v3703_v22 }
 0x75e   : > { %v8758_v37 = vperm.slane %v3704_v6, %v8572_v54 }
 0x75f   : > { %v3702_v23 = vsel %vm2681_vm5, %v3701_v58, %v6876_v17 }
 0x760   : > { %v8766_v20 = vperm.slane %v3702_v23, %v8572_v54 }
 0x762   : > { %v8729_v34 = vpop.trf.xlu0  ;;  %v3751_v31 = vrot.slane %v8766_v20, 4 }
 0x764   : > { %v8714_v42 = vpop.trf.xlu2 }
 0x765   : > { %v8718_v7 = vsel %vm2681_vm5, %v8714_v42, %v3815_v39  ;;  %v3813_v16 = vrot.slane %v8714_v42, 4 }
 0x766   : > { %v8783_v23 = vperm.slane %v8718_v7, %v8572_v54 }
 0x767   : > { %v3814_v48 = vsel %vm2681_vm5, %v3813_v16, %v8699_v18  ;;  %v3916_v18 = vsel %vm2681_vm5, %v8720_v47, %v3915_v59  ;;  %v3849_v47 = vrot.slane %v8770_v1, 4 }
 0x768   : > { %v3875_v10 = vrot.slane %v8783_v23, 4 }
 0x76a   : > { %v8787_v43 = vpop.trf.xlu0 }
 0x76c   : > { %v8722_v63 = vpop.trf.xlu2 }
 0x76d   : > { %v3925_v6 = vrot.slane %v8722_v63, 4  ;;  %v3928_v7 = vsel %vm2681_vm5, %v8722_v63, %v3927_v5 }
 0x7c6   : > { %v6870_v62 = vpop.trf.xlu1 }
 0x7c7   : > { %v3565_v49 = vrot.slane %v6870_v62, 4  ;;  %v3568_v40 = vsel %vm2681_vm5, %v6870_v62, %v3567_v41  ;;  %v3725_v41 = vrot.slane %v3696_v24, 4 }
 0x7c8   : > { %v3576_v26 = vperm.slane %v3568_v40, %v8572_v54  ;;  %v3926_v40 = vsel %vm2681_vm5, %v3925_v6, %v8703_v29 }
 0x7c9   : > { %v3566_v38 = vsel %vm2681_vm5, %v3565_v49, %v8682_v8  ;;  %v8800_v49 = vperm.slane %v3814_v48, %v8572_v54 }
 0x7ca   : > { %v3572_v17 = vperm.slane %v3566_v38, %v8572_v54  ;;  %v3626_v28 = vsel %vm2681_vm5, %v3625_v57, %v3576_v26  ;;  %v3627_v33 = vrot.slane %v3576_v26, 4  ;;  %v8816_v38 = vperm.slane %v3928_v7, %v8572_v54 }
 0x7cb   : > { %v3863_v51 = vrot.slane %v8800_v49, 4  ;;  %v8827_v16 = vperm.slane %v3626_v28, %v8588_v61 }
 0x7cc   : > { %v3614_v8 = vsel %vm2681_vm5, %v3613_v44, %v3572_v17  ;;  %v3615_v15 = vrot.slane %v3572_v17, 4  ;;  %v3628_v35 = vsel %vm2681_vm5, %v3588_v0, %v3627_v33  ;;  %v8813_v44 = vperm.slane %v3916_v18, %v8572_v54 }
 0x7cd   : > { %v2907_v22 = vpop.xlane.xlu2 %2906  ;;  %v8820_v17 = vperm.slane %v3926_v40, %v8572_v54 }
 0x7ce   : > { %v2908_v58 = vmul.f32 %v2907_v22, %v8688_v2  ;;  %v6871_v39 = vpop.trf.xlu1  ;;  %v3616_v21 = vsel %vm2681_vm5, %v3584_v50, %v3615_v15  ;;  %v3763_v50 = vrot.slane %v8758_v37, 4  ;;  %v8830_v22 = vperm.slane %v3628_v35, %v8588_v61 }
 0x7cf   : > { %v3677_v42 = vrot.slane %v6871_v39, 4  ;;  %v3680_v14 = vsel %vm2681_vm5, %v6871_v39, %v3679_v25  ;;  %v3914_v25 = vsel %vm2681_vm5, %v3913_v60, %v8701_v27  ;;  %v3837_v27 = vrot.slane %v8777_v46, 4 }
 0x7d0   : > { %v8773_v9 = vadd.f32 1e-05, %v2908_v58  ;;  %v8810_v63 = vperm.slane %v3914_v25, %v8572_v54  ;;  %v3961_v28 = vrot.slane %v8813_v44, 4  ;;  %v3675_v25 = vrot.slane %v8830_v22, 4 }
 0x7d1   : > { %v3678_v0 = vsel %vm2681_vm5, %v3677_v42, %v8684_v56  ;;  %v3688_v56 = vperm.slane %v3680_v14, %v8572_v54  ;;  %v3601_v14 = vrot.slane %v8729_v34, 4 }
 0x7d2   : > { %6967 = vrsqrt.f32 %v8773_v9  ;;  %v3684_v62 = vperm.slane %v3678_v0, %v8572_v54  ;;  %v3949_v60 = vrot.slane %v8810_v63, 4  ;;  %v3713_v0 = vrot.slane %v8787_v43, 4 }
 0x7d3   : > { %v3739_v33 = vrot.slane %v3688_v56, 4  ;;  %v3738_v58 = vsel %vm2681_vm5, %v3737_v3, %v3688_v56  ;;  %vm2916_vm11 = vweird.f32 %v8773_v9 }
 0x7d4   : > { %v3726_v57 = vsel %vm2681_vm5, %v3725_v41, %v3684_v62  ;;  %v3727_v26 = vrot.slane %v3684_v62, 4  ;;  %v3671_v41 = vrot.slane %v8827_v16, 4 }
 0x7d5   : > { %v3740_v3 = vsel %vm2681_vm5, %v8748_v12, %v3739_v33 }
 0x7d6   : > { %v6872_v29 = vpop.trf.xlu1  ;;  %v3728_v4 = vsel %vm2681_vm5, %v3696_v24, %v3727_v26  ;;  %v8833_v24 = vperm.slane %v3614_v8, %v8588_v61  ;;  %v3975_v8 = vrot.slane %v8820_v17, 4  ;;  %v8862_v7 = vperm.slane %v3740_v3, %v8588_v61 }
 0x7d7   : > { %v3789_v59 = vrot.slane %v6872_v29, 4  ;;  %v3792_v5 = vsel %vm2681_vm5, %v6872_v29, %v3791_v52  ;;  %v8840_v52 = vperm.slane %v3616_v21, %v8588_v61  ;;  %v8853_v21 = vperm.slane %v3738_v58, %v8588_v61 }
 0x7d8   : > { %v6968_v15 = vpop.eup %6967  ;;  %v3800_v42 = vperm.slane %v3792_v5, %v8572_v54  ;;  %v3663_v12 = vrot.slane %v8833_v24, 4  ;;  %v8866_v29 = vperm.slane %v3726_v57, %v8588_v61 }
 0x7d9   : > { %v2911_v45 = vmul.f32 %v6968_v15, %v8773_v9  ;;  %v3790_v39 = vsel %vm2681_vm5, %v3789_v59, %v8686_v55  ;;  %v8850_v55 = vpop.trf.xlu0  ;;  %v3667_v18 = vrot.slane %v8840_v52, 4  ;;  %vm2917_vm10 = vweird.f32 %v6968_v15 }
 0x7da   : > { %v3796_v48 = vperm.slane %v3790_v39, %v8572_v54  ;;  %v3850_v56 = vsel %vm2681_vm5, %v3849_v47, %v3800_v42  ;;  %v3851_v40 = vrot.slane %v3800_v42, 4  ;;  %v3783_v39 = vrot.slane %v8853_v21, 4  ;;  %vm2918_vm12 = vmor %vm2916_vm11, %vm2917_vm10 }
 0x7db   : > { %v2912_v6 = vmul.f32 %v6968_v15, %v2911_v45  ;;  %v8875_v42 = vperm.slane %v3850_v56, %v8588_v61  ;;  %v3825_v56 = vrot.slane %v8850_v55, 4 }
 0x7dc   : > { %v3839_v45 = vrot.slane %v3796_v48, 4 }
 0x7dd   : > { %v2913_v62 = vmul.f32 0.5, %v2912_v6  ;;  %v8880_v6 = vperm.slane %v3728_v4, %v8588_v61 }
 0x7de   : > { %v6873_v26 = vpop.trf.xlu1 }
 0x7df   : > { %v2914_v33 = vsub.f32 1.5, %v2913_v62  ;;  %v3901_v59 = vrot.slane %v6873_v26, 4  ;;  %v3904_v5 = vsel %vm2681_vm5, %v6873_v26, %v3903_v13  ;;  %v3852_v13 = vsel %vm2681_vm5, %v8770_v1, %v3851_v40  ;;  %v6948_v62 = vld [vmem:[%s9669_s20] ss:$0 sm:$0xff]  ;;  %s9691_s20 = sld [smem:[#allocation30_spill]] }
 0x7e0   : > { %v3912_v58 = vperm.slane %v3904_v5, %v8572_v54  ;;  %v3838_v26 = vsel %vm2681_vm5, %v3837_v27, %v3796_v48  ;;  %v8900_v35 = vperm.slane %v3852_v13, %v8588_v61  ;;  %v3895_v48 = vrot.slane %v8875_v42, 4 }
 0x7e1   : > { %v2915_v47 = vmul.f32 %v6968_v15, %v2914_v33  ;;  %v3902_v57 = vsel %vm2681_vm5, %v3901_v59, %v8690_v19  ;;  %v3787_v19 = vrot.slane %v8862_v7, 4  ;;  %v3840_v59 = vsel %vm2681_vm5, %v8777_v46, %v3839_v45 }
 0x7e2   : > { %v3908_v9 = vperm.slane %v3902_v57, %v8572_v54  ;;  %v3963_v3 = vrot.slane %v3912_v58, 4  ;;  %v3962_v40 = vsel %vm2681_vm5, %v3961_v28, %v3912_v58  ;;  %v6949_v57 = vld [vmem:[%s9670_s12] ss:$0 sm:$0xff]  ;;  %v3779_v46 = vrot.slane %v8880_v6, 4 }
 0x7e3   : > { %v2919_v33 = vsel %vm2918_vm12, %v6968_v15, %v2915_v47  ;;  %v8904_v15 = vpop.trf.xlu0  ;;  %v8912_v47 = vperm.slane %v3838_v26, %v8588_v61  ;;  %v8915_v13 = vperm.slane %v3840_v59, %v8588_v61  ;;  %v3899_v59 = vrot.slane %v8900_v35, 4 }
 0x7e4   : > { %v3951_v1 = vrot.slane %v3908_v9, 4  ;;  %v2920_v5 = vmul.f32 %v2919_v33, %v8693_v11  ;;  %v3964_v27 = vsel %vm2681_vm5, %v8813_v44, %v3963_v3  ;;  %v3950_v28 = vsel %vm2681_vm5, %v3949_v60, %v3908_v9 }
 0x7e5   : > { %v8918_v44 = vperm.slane %v3962_v40, %v8588_v61  ;;  %v8922_v4 = vperm.slane %v3964_v27, %v8588_v61  ;;  %v3937_v9 = vrot.slane %v8904_v15, 4  ;;  %s5738_s22 = sadd.s32 %s9691_s20, %s6334_s27 }
 0x7e6   : > { %v3952_v11 = vsel %vm2681_vm5, %v8810_v63, %v3951_v1  ;;  %v6885_v45 = vpop.trf.xlu1  ;;  %v2924_v58 = vmul.f32 %v6948_v62, %v2920_v5  ;;  %s6335_s12 = sshll.u32 %s5738_s22, 3 }
 0x7e7   : > { %v3602_v3 = vsel %vm2681_vm5, %v3601_v14, %v6885_v45  ;;  %v3603_v33 = vrot.slane %v6885_v45, 4  ;;  %v8929_v62 = vperm.slane %v3952_v11, %v8588_v61  ;;  %v8935_v14 = vperm.slane %v3950_v28, %v8588_v61 }
 0x7e8   : > { %v3608_v60 = vperm.slane %v3602_v3, %v8572_v54  ;;  %v8925_v63 = vadd.f32 %v6949_v57, %v2924_v58  ;;  %v3891_v11 = vrot.slane %v8915_v13, 4  ;;  %v3887_v45 = vrot.slane %v8912_v47, 4 }
 0x7e9   : > { %v3604_v26 = vsel %vm2681_vm5, %v8729_v34, %v3603_v33 }
 0x7ea   : > { %v3612_v1 = vperm.slane %v3604_v26, %v8572_v54  ;;  %v3637_v40 = vrot.slane %v3608_v60, 4  ;;  %v3640_v5 = vsel %vm2681_vm5, %v3608_v60, %v3639_v53  ;;  %v2929_v57 = vpack.c.bf16 %v8925_v63, %v8925_v63 }
 0x7eb   : > { %v3648_v27 = vperm.slane %v3640_v5, %v8588_v61 }
 0x7ec   : > { %v3638_v28 = vsel %vm2681_vm5, %v3637_v40, %v8738_v30  ;;  %v3649_v58 = vrot.slane %v3612_v1, 4  ;;  %3006 = vmatmul.bf16.vlgmr.msra.gmra.mxu1 %v2929_v57  ;;  %v3652_v53 = vsel %vm2681_vm5, %v3612_v1, %v3651_v36  ;;  %v4003_v40 = vrot.slane %v8929_v62, 4 }
 0x7ed   : > { %v3660_v33 = vperm.slane %v3652_v53, %v8588_v61  ;;  %v8957_v60 = vsel %vm2681_vm5, %v3648_v27, %v3667_v18  ;;  %v3665_v26 = vrot.slane %v3648_v27, 4  ;;  %v8960_v5 = vperm.slane %v3638_v28, %v8588_v61 }
 0x7ee   : > { %v6886_v30 = vpop.trf.xlu1  ;;  %v4041_v34 = vshrl.u32 %v8957_v60, 16  ;;  %v3650_v36 = vsel %vm2681_vm5, %v3649_v58, %v8733_v32 }
 0x7ef   : > { %v3714_v1 = vsel %vm2681_vm5, %v3713_v0, %v6886_v30  ;;  %v3715_v18 = vrot.slane %v6886_v30, 4  ;;  %v8973_v27 = vsel %vm2681_vm5, %v3660_v33, %v3675_v25  ;;  %v3673_v28 = vrot.slane %v3660_v33, 4 }
 0x7f0   : > { %v3720_v53 = vperm.slane %v3714_v1, %v8572_v54  ;;  %v4073_v57 = vshrl.u32 %v8973_v27, 16  ;;  %v3656_v3 = vperm.slane %v3650_v36, %v8588_v61  ;;  %v8980_v32 = vsel %vm2681_vm5, %v3665_v26, %v8840_v52 }
 0x7f1   : > { %v3716_v0 = vsel %vm2681_vm5, %v8787_v43, %v3715_v18  ;;  %v8986_v58 = vsel %vm2681_vm5, %v3673_v28, %v8830_v22  ;;  %v8993_v33 = vsel %vm2681_vm5, %v8960_v5, %v3663_v12 }
 0x7f2   : > { %v3724_v30 = vperm.slane %v3716_v0, %v8572_v54  ;;  %v3749_v36 = vrot.slane %v3720_v53, 4  ;;  %v3752_v52 = vsel %vm2681_vm5, %v3720_v53, %v3751_v31  ;;  %v4065_v43 = vshrl.u32 %v8986_v58, 16 }
 0x7f3   : > { %v3760_v22 = vperm.slane %v3752_v52, %v8588_v61  ;;  %v9004_v26 = vsel %vm2681_vm5, %v3656_v3, %v3671_v41  ;;  %v3669_v12 = vrot.slane %v3656_v3, 4 }
 0x7f4   : > { %v3750_v18 = vsel %vm2681_vm5, %v3749_v36, %v8766_v20  ;;  %v3761_v28 = vrot.slane %v3724_v30, 4  ;;  %v3764_v31 = vsel %vm2681_vm5, %v3724_v30, %v3763_v50 }
 0x7f5   : > { %v3772_v0 = vperm.slane %v3764_v31, %v8588_v61  ;;  %v9017_v41 = vsel %vm2681_vm5, %v3760_v22, %v3779_v46  ;;  %v3777_v52 = vrot.slane %v3760_v22, 4  ;;  %v9020_v3 = vperm.slane %v3750_v18, %v8588_v61 }
 0x7f6   : > { %v6887_v1 = vpop.trf.xlu1  ;;  %v4042_v36 = vshrl.u32 %v9017_v41, 16  ;;  %v3762_v50 = vsel %vm2681_vm5, %v3761_v28, %v8758_v37  ;;  %v9029_v30 = vsel %vm2681_vm5, %v3669_v12, %v8827_v16 }
 0x7f7   : > { %v3826_v46 = vsel %vm2681_vm5, %v3825_v56, %v6887_v1  ;;  %v3827_v22 = vrot.slane %v6887_v1, 4  ;;  %v9037_v18 = vsel %vm2681_vm5, %v3772_v0, %v3787_v19  ;;  %v3785_v31 = vrot.slane %v3772_v0, 4 }
 0x7f8   : > { %v3832_v20 = vperm.slane %v3826_v46, %v8572_v54  ;;  %v4074_v28 = vshrl.u32 %v9037_v18, 16  ;;  %v9043_v16 = vpack.i.b16 %v4042_v36, %v4041_v34  ;;  %v9052_v19 = vperm.slane %v3762_v50, %v8588_v61 }
 0x7f9   : > { %v3828_v12 = vsel %vm2681_vm5, %v8850_v55, %v3827_v22  ;;  %v9049_v56 = vsel %vm2681_vm5, %v3785_v31, %v8862_v7  ;;  %v9056_v1 = vsel %vm2681_vm5, %v3777_v52, %v8880_v6 }
 0x7fa   : > { %v3836_v0 = vperm.slane %v3828_v12, %v8572_v54  ;;  %v3861_v46 = vrot.slane %v3832_v20, 4  ;;  %v3864_v34 = vsel %vm2681_vm5, %v3832_v20, %v3863_v51  ;;  %v9062_v36 = vpack.i.b16 %v4074_v28, %v4073_v57 }
 0x7fb   : > { %v3872_v55 = vperm.slane %v3864_v34, %v8588_v61  ;;  %v4066_v50 = vshrl.u32 %v9049_v56, 16  ;;  %v9072_v6 = vsel %vm2681_vm5, %v9052_v19, %v3783_v39 }
 0x7fc   : > { %v3862_v52 = vsel %vm2681_vm5, %v3861_v46, %v8800_v49  ;;  %v3873_v22 = vrot.slane %v3836_v0, 4  ;;  %v3876_v51 = vsel %vm2681_vm5, %v3836_v0, %v3875_v10  ;;  %v4058_v10 = vshrl.u32 %v9072_v6, 16 }
 0x7fd   : > { %v3892_v20 = vsel %vm2681_vm5, %v3872_v55, %v3891_v11  ;;  %v3884_v31 = vperm.slane %v3876_v51, %v8588_v61  ;;  %v9086_v39 = vperm.slane %v3862_v52, %v8588_v61  ;;  %v3889_v28 = vrot.slane %v3872_v55, 4 }
 0x7fe   : > { %v6888_v12 = vpop.trf.xlu1  ;;  %v4105_v49 = vshrl.u32 %v3892_v20, 16  ;;  %v3874_v46 = vsel %vm2681_vm5, %v3873_v22, %v8783_v23  ;;  %v9090_v34 = vpack.i.b16 %v4066_v50, %v4065_v43 }
 0x7ff   : > { %v3938_v0 = vsel %vm2681_vm5, %v3937_v9, %v6888_v12  ;;  %v3939_v11 = vrot.slane %v6888_v12, 4  ;;  %v3900_v52 = vsel %vm2681_vm5, %v3884_v31, %v3899_v59  ;;  %v3880_v55 = vperm.slane %v3874_v46, %v8588_v61 }
 0x800   : > { %v3944_v51 = vperm.slane %v3938_v0, %v8572_v54  ;;  %v4137_v57 = vshrl.u32 %v3900_v52, 16  ;;  %v3897_v7 = vrot.slane %v3884_v31, 4  ;;  %v9105_v23 = vsel %vm2681_vm5, %v9086_v39, %v3887_v45 }
 0x801   : > { %v3940_v9 = vsel %vm2681_vm5, %v8904_v15, %v3939_v11  ;;  %v3896_v43 = vsel %vm2681_vm5, %v3880_v55, %v3895_v48  ;;  %v4089_v59 = vshrl.u32 %v9105_v23, 16  ;;  %v3893_v50 = vrot.slane %v3880_v55, 4 }
 0x802   : > { %v3948_v22 = vperm.slane %v3940_v9, %v8572_v54  ;;  %v3973_v12 = vrot.slane %v3944_v51, 4  ;;  %v3976_v31 = vsel %vm2681_vm5, %v3944_v51, %v3975_v8  ;;  %v4121_v46 = vshrl.u32 %v3896_v43, 16 }
 0x803   : > { %v3984_v45 = vperm.slane %v3976_v31, %v8588_v61  ;;  %v9120_v15 = vsel %vm2681_vm5, %v3897_v7, %v8900_v35  ;;  %v9124_v48 = vsel %vm2681_vm5, %v3893_v50, %v8875_v42  ;;  %v9128_v0 = vsel %vm2681_vm5, %v3889_v28, %v8915_v13 }
 0x804   : > { %v3974_v11 = vsel %vm2681_vm5, %v3973_v12, %v8820_v17  ;;  %v3985_v55 = vrot.slane %v3948_v22, 4  ;;  %v9671_v8 = vrot.slane %v8816_v38, 4  ;;  %v4129_v9 = vshrl.u32 %v9120_v15, 16 }
 0x805   : > { %v4004_v35 = vsel %vm2681_vm5, %v3984_v45, %v4003_v40  ;;  %v3980_v7 = vperm.slane %v3974_v11, %v8588_v61  ;;  %v4113_v13 = vshrl.u32 %v9124_v48, 16  ;;  %v4001_v12 = vrot.slane %v3984_v45, 4 }
 0x806   : > { %v3988_v51 = vsel %vm2681_vm5, %v3948_v22, %v9671_v8  ;;  %v4103_v28 = vpack.i.b16 %v4004_v35, %v3892_v20  ;;  %v4106_v50 = vshrl.u32 %v4004_v35, 16  ;;  %v3986_v17 = vsel %vm2681_vm5, %v3985_v55, %v8816_v38 }
 0x807   : > { %v3996_v42 = vperm.slane %v3988_v51, %v8588_v61  ;;  %v9672_v22 = vrot.slane %v8922_v4, 4  ;;  %v3992_v8 = vperm.slane %v3986_v17, %v8588_v61  ;;  %v9673_v40 = vrot.slane %v8935_v14, 4 }
 0x808   : > { %v4107_v11 = vpack.i.b16 %v4106_v50, %v4105_v49  ;;  %v9674_v35 = vrot.slane %v8918_v44, 4  ;;  %v4002_v50 = vsel %vm2681_vm5, %v4001_v12, %v8929_v62 }
 0x809   : > { %v4012_v31 = vsel %vm2681_vm5, %v3996_v42, %v9672_v22  ;;  %v4009_v37 = vrot.slane %v3996_v42, 4  ;;  %v4000_v51 = vsel %vm2681_vm5, %v3980_v7, %v9673_v40  ;;  %v4005_v22 = vrot.slane %v3992_v8, 4 }
 0x80a   : > { %v4135_v25 = vpack.i.b16 %v4012_v31, %v3900_v52  ;;  %v4138_v53 = vshrl.u32 %v4012_v31, 16  ;;  %v4087_v20 = vpack.i.b16 %v4000_v51, %v9105_v23  ;;  %v4008_v38 = vsel %vm2681_vm5, %v3992_v8, %v9674_v35  ;;  %6902 = vxpose.binary.xlu2.c.b16.start.end [1/2] (short) (narrow) %v4107_v11, %v4103_v28, 16 }
 0x80b   : > { %v4010_v45 = vsel %vm2681_vm5, %v4009_v37, %v8922_v4  ;;  %v4090_v55 = vshrl.u32 %v4000_v51, 16  ;;  %v4119_v17 = vpack.i.b16 %v4008_v38, %v3896_v43  ;;  %v4122_v2 = vshrl.u32 %v4008_v38, 16 }
 0x80c   : > { %v4139_v42 = vpack.i.b16 %v4138_v53, %v4137_v57  ;;  %v4127_v40 = vpack.i.b16 %v4010_v45, %v9120_v15  ;;  %v4130_v49 = vshrl.u32 %v4010_v45, 16  ;;  %v4006_v23 = vsel %vm2681_vm5, %v4005_v22, %v8918_v44 }
 0x80d   : > { %v4091_v52 = vpack.i.b16 %v4090_v55, %v4089_v59  ;;  %v4123_v31 = vpack.i.b16 %v4122_v2, %v4121_v46  ;;  %v4111_v4 = vpack.i.b16 %v4006_v23, %v9124_v48  ;;  %v4114_v37 = vshrl.u32 %v4006_v23, 16 }
 0x80e   : > { %6899 = vxpose.binary.xlu1.c.b16.start.end [1/2] (short) (narrow) %v4139_v42, %v4135_v25, 16  ;;  %v4095_v28 = vpack.i.b16 %v4002_v50, %v9128_v0  ;;  %v4131_v53 = vpack.i.b16 %v4130_v49, %v4129_v9  ;;  %v4097_v57 = vshrl.u32 %v9128_v0, 16  ;;  %v4098_v43 = vshrl.u32 %v4002_v50, 16 }
 0x80f   : > { %v9675_v15 = vshrl.u32 %v9004_v26, 16  ;;  %6905 = vxpose.binary.xlu0.c.b16.start.end [1/2] (short) (narrow) %v4123_v31, %v4119_v17, 16  ;;  %v4115_v8 = vpack.i.b16 %v4114_v37, %v4113_v13  ;;  %v3885_v44 = vrot.slane %v9086_v39, 4  ;;  %v3997_v51 = vrot.slane %v3980_v7, 4 }
 0x810   : > { %v4031_v2 = vpack.i.b16 %v9056_v1, %v8980_v32  ;;  %v4099_v62 = vpack.i.b16 %v4098_v43, %v4097_v57  ;;  %v4034_v25 = vshrl.u32 %v9056_v1, 16  ;;  %v9676_v46 = vrot.slane %v8866_v29, 4 }
 0x811   : > { %v4059_v59 = vpack.i.b16 %v4058_v10, %v9675_v15  ;;  %v3781_v0 = vrot.slane %v9052_v19, 4  ;;  %v3886_v10 = vsel %vm2681_vm5, %v3885_v44, %v8912_v47  ;;  %v3998_v39 = vsel %vm2681_vm5, %v3997_v51, %v8935_v14 }
 0x812   : > { %v3776_v48 = vsel %vm2681_vm5, %v9020_v3, %v9676_v46  ;;  %v4079_v13 = vpack.i.b16 %v3998_v39, %v3886_v10  ;;  %v4081_v12 = vshrl.u32 %v3886_v10, 16  ;;  %v4082_v11 = vshrl.u32 %v3998_v39, 16 }
 0x813   : > { %v4023_v9 = vpack.i.b16 %v3776_v48, %v8993_v33  ;;  %v4026_v7 = vshrl.u32 %v3776_v48, 16  ;;  %v9677_v1 = vshrl.u32 %v8980_v32, 16  ;;  %v9678_v38 = vshrl.u32 %v8993_v33, 16 }
 0x814   : > { %v3782_v19 = vsel %vm2681_vm5, %v3781_v0, %v8853_v21  ;;  %v4049_v47 = vshrl.u32 %v9029_v30, 16  ;;  %v3661_v55 = vrot.slane %v8960_v5, 4  ;;  %v4083_v14 = vpack.i.b16 %v4082_v11, %v4081_v12 }
 0x815   : > { %v4035_v35 = vpack.i.b16 %v4034_v25, %v9677_v1  ;;  %v4027_v45 = vpack.i.b16 %v4026_v7, %v9678_v38  ;;  %v4047_v22 = vpack.i.b16 %v3782_v19, %v9029_v30  ;;  %v4050_v42 = vshrl.u32 %v3782_v19, 16 }
 0x816   : > { %v3773_v17 = vrot.slane %v9020_v3, 4  ;;  %v3662_v32 = vsel %vm2681_vm5, %v3661_v55, %v8833_v24  ;;  %v9679_v5 = vpack.i.b16 %v9037_v18, %v8973_v27  ;;  %v9680_v24 = vpack.i.b16 %v9017_v41, %v8957_v60  ;;  %v6950_v60 = vld [vmem:[%s9683_s19] ss:$0 sm:$0xff]  ;;  %s9692_s19 = sld [smem:[#allocation63_spill]] }
 0x817   : > { %v4051_v49 = vpack.i.b16 %v4050_v42, %v4049_v47  ;;  %v4017_v50 = vshrl.u32 %v3662_v32, 16  ;;  %v9682_v3 = vpack.i.b16 %v9072_v6, %v9004_v26 }
 0x818   : > { %v3774_v33 = vsel %vm2681_vm5, %v3773_v17, %v8866_v29  ;;  %v9681_v29 = vpack.i.b16 %v9049_v56, %v8986_v58 }
 0x819   : > { %v4015_v23 = vpack.i.b16 %v3774_v33, %v3662_v32  ;;  %v4018_v21 = vshrl.u32 %v3774_v33, 16 }
 0x81a   : > { %6911 = vxpose.binary.xlu2.c.b16.start.end [1/2] (short) (narrow) %v9062_v36, %v9679_v5, 16 }
 0x81b   : > { %v4019_v31 = vpack.i.b16 %v4018_v21, %v4017_v50 }
 0x81e   : > { %6908 = vxpose.binary.xlu1.c.b16.start.end [1/2] (short) (narrow) %v4131_v53, %v4127_v40, 16 }
 0x81f   : > { %6914 = vxpose.binary.xlu0.c.b16.start.end [1/2] (short) (narrow) %v4091_v52, %v4087_v20, 16 }
 0x82a   : > { %6920 = vxpose.binary.xlu2.c.b16.start.end [1/2] (short) (narrow) %v4115_v8, %v4111_v4, 16 }
 0x82e   : > { %6917 = vxpose.binary.xlu1.c.b16.start.end [1/2] (short) (narrow) %v4099_v62, %v4095_v28, 16 }
 0x82f   : > { %6923 = vxpose.binary.xlu0.c.b16.start.end [1/2] (short) (narrow) %v9043_v16, %v9680_v24, 16 }
 0x83a   : > { %6929 = vxpose.binary.xlu2.c.b16.start.end [1/2] (short) (narrow) %v9090_v34, %v9681_v29, 16 }
 0x83e   : > { %6926 = vxpose.binary.xlu1.c.b16.start.end [1/2] (short) (narrow) %v4059_v59, %v9682_v3, 16 }
 0x83f   : > { %6932 = vxpose.binary.xlu0.c.b16.start.end [1/2] (short) (narrow) %v4083_v14, %v4079_v13, 16 }
 0x84a   : > { %6938 = vxpose.binary.xlu2.c.b16.start.end [1/2] (short) (narrow) %v4035_v35, %v4031_v2, 16 }
 0x84e   : > { %6935 = vxpose.binary.xlu1.c.b16.start.end [1/2] (short) (narrow) %v4027_v45, %v4023_v9, 16 }
 0x84f   : > { %6941 = vxpose.binary.xlu0.c.b16.start.end [1/2] (short) (narrow) %v4051_v49, %v4047_v22, 16 }
 0x85e   : > { %6944 = vxpose.binary.xlu1.c.b16.start.end [1/2] (short) (narrow) %v4019_v31, %v4015_v23, 16 }
 0x869   : > { %v3007_v27 = vpop.f32.mrf.mxu1 }
 0x86a   : > { %v3008_v41 = vadd.f32 %v6950_v60, %v3007_v27 }
 0x86c   : > { %v3011_v18 = vmul.f32 0.17677669, %v3008_v41 }
 0x86e   : > { %v9213_v58 = vpack.c.bf16 %v3011_v18, %v3011_v18 }
 0x871   : > { %v3009_v30 = vpop.f32.mrf.mxu1 }
 0x8ab   : > { %v6903_v26 = vpop.trf.xlu2 }
 0x8ac   : > { %v4739_v51 = vrot.slane %v6903_v26, 4 }
 0x8b3   : > { %3014 = vrot.lane.b32.xlu2 %v9213_v58, %s7650_s29  ;;  %v6904_v36 = vpop.trf.xlu2 }
 0x8b4   : > { %v4779_v35 = vrot.slane %v6904_v36, 4 }
 0x8b8   : > { %3018 = vrot.lane.b32.xlu1 %v9213_v58, %s7649_s0 }
 0x8ba   : > { %v6900_v16 = vpop.trf.xlu1 }
 0x8bb   : > { %v6906_v56 = vpop.trf.xlu0  ;;  %v9221_v20 = vpop.trf.xlu2  ;;  %v4751_v8 = vrot.slane %v6900_v16, 4 }
 0x8bd   : > { %3016 = vrot.lane.b32.xlu0 %v9213_v58, %s7651_s6  ;;  %v4752_v46 = vsel %vm2681_vm5, %v4751_v8, %v6906_v56 }
 0x8be   : > { %v4756_v13 = vperm.slane %v4752_v46, %v8572_v54 }
 0x8c0   : > { %v4763_v14 = vrot.slane %v4756_v13, 4 }
 0x8c2   : > { %v6901_v6 = vpop.trf.xlu1 }
 0x8c3   : > { %v6907_v34 = vpop.trf.xlu0  ;;  %v9223_v37 = vpop.trf.xlu2  ;;  %v4791_v44 = vrot.slane %v6901_v6, 4 }
 0x8c5   : > { %v4792_v48 = vsel %vm2681_vm5, %v4791_v44, %v6907_v34  ;;  %v4671_v44 = vrot.slane %v9221_v20, 4 }
 0x8c6   : > { %v4796_v12 = vperm.slane %v4792_v48, %v8572_v54 }
 0x8c8   : > { %v4803_v22 = vrot.slane %v4796_v12, 4 }
 0x8ca   : > { %v6909_v40 = vpop.trf.xlu1 }
 0x8cb   : > { %v6915_v52 = vpop.trf.xlu0  ;;  %v6921_v43 = vpop.trf.xlu2  ;;  %v4745_v2 = vrot.slane %v6909_v40, 4 }
 0x8cc   : > { %v4740_v0 = vsel %vm2681_vm5, %v4739_v51, %v6915_v52  ;;  %v4711_v51 = vrot.slane %v9223_v37, 4 }
 0x8cd   : > { %v4746_v39 = vsel %vm2681_vm5, %v4745_v2, %v6921_v43  ;;  %v4744_v11 = vperm.slane %v4740_v0, %v8572_v54 }
 0x8ce   : > { %v4750_v45 = vperm.slane %v4746_v39, %v8572_v54 }
 0x8cf   : > { %v4757_v42 = vrot.slane %v4744_v11, 4 }
 0x8d0   : > { %v4764_v32 = vsel %vm2681_vm5, %v4763_v14, %v4750_v45 }
 0x8d1   : > { %v4768_v29 = vperm.slane %v4764_v32, %v8588_v61 }
 0x8d2   : > { %v6910_v4 = vpop.trf.xlu1 }
 0x8d3   : > { %v6916_v28 = vpop.trf.xlu0  ;;  %v4785_v62 = vrot.slane %v6910_v4, 4  ;;  %v6922_v25 = vpop.trf.xlu2  ;;  %v4769_v41 = vrot.slane %v4768_v29, 4 }
 0x8d4   : > { %v4780_v55 = vsel %vm2681_vm5, %v4779_v35, %v6916_v28 }
 0x8d5   : > { %v4786_v9 = vsel %vm2681_vm5, %v4785_v62, %v6922_v25  ;;  %v4784_v49 = vperm.slane %v4780_v55, %v8572_v54 }
 0x8d6   : > { %v4790_v19 = vperm.slane %v4786_v9, %v8572_v54 }
 0x8d7   : > { %v4797_v27 = vrot.slane %v4784_v49, 4 }
 0x8d8   : > { %v4804_v33 = vsel %vm2681_vm5, %v4803_v22, %v4790_v19 }
 0x8d9   : > { %v4808_v3 = vperm.slane %v4804_v33, %v8588_v61 }
 0x8da   : > { %v6918_v53 = vpop.trf.xlu1 }
 0x8db   : > { %v9225_v57 = vpop.trf.xlu0  ;;  %v4733_v7 = vrot.slane %v6918_v53, 4  ;;  %v6930_v17 = vpop.trf.xlu2  ;;  %v4809_v26 = vrot.slane %v4808_v3, 4 }
 0x8dc   : > { %v4659_v2 = vrot.slane %v9225_v57, 4  ;;  %v4665_v62 = vrot.slane %v6930_v17, 4 }
 0x8e2   : > { %v6919_v15 = vpop.trf.xlu1 }
 0x8e3   : > { %v9227_v59 = vpop.trf.xlu0  ;;  %v4773_v21 = vrot.slane %v6919_v15, 4  ;;  %v6931_v56 = vpop.trf.xlu2 }
 0x8e4   : > { %v4705_v25 = vrot.slane %v6931_v56, 4  ;;  %v4699_v11 = vrot.slane %v9227_v59, 4 }
 0x8ea   : > { %v6927_v10 = vpop.trf.xlu1 }
 0x8eb   : > { %v6933_v1 = vpop.trf.xlu0  ;;  %v6939_v8 = vpop.trf.xlu2  ;;  %v4672_v48 = vsel %vm2681_vm5, %v4671_v44, %v6927_v10  ;;  %v3165_v44 = vld [vmem:[%s893_s2] sm:$0xf] }
 0x8ec   : > { %v4734_v38 = vsel %vm2681_vm5, %v4733_v7, %v6933_v1  ;;  %v4653_v9 = vrot.slane %v6939_v8, 4  ;;  %v4676_v20 = vperm.slane %v4672_v48, %v8572_v54  ;;  %3169 = vrot.lane.b32.xlu1 %v3165_v44, %s7650_s29  ;;  %3177 = vrot.lane.b32.xlu0 %v3165_v44, %s7649_s0 }
 0x8ed   : > { %v4738_v47 = vperm.slane %v4734_v38, %v8572_v54 }
 0x8ee   : > { %v4683_v19 = vrot.slane %v4676_v20, 4 }
 0x8ef   : > { %v4758_v50 = vsel %vm2681_vm5, %v4757_v42, %v4738_v47 }
 0x8f0   : > { %v4762_v24 = vperm.slane %v4758_v50, %v8588_v61 }
 0x8f2   : > { %v6928_v23 = vpop.trf.xlu1  ;;  %v4771_v16 = vrot.slane %v4762_v24, 4  ;;  %v4770_v6 = vsel %vm2681_vm5, %v4769_v41, %v4762_v24 }
 0x8f3   : > { %v6934_v31 = vpop.trf.xlu0  ;;  %v4712_v0 = vsel %vm2681_vm5, %v4711_v51, %v6928_v23  ;;  %v6940_v14 = vpop.trf.xlu2  ;;  %v4833_v41 = vshrl.u32 %v4770_v6, 16 }
 0x8f4   : > { %v4774_v5 = vsel %vm2681_vm5, %v4773_v21, %v6934_v31  ;;  %v9256_v28 = vsel %vm2681_vm5, %v4768_v29, %v4771_v16  ;;  %v4716_v37 = vperm.slane %v4712_v0, %v8572_v54  ;;  %v4693_v22 = vrot.slane %v6940_v14, 4  ;;  %3173 = vrot.lane.b32.xlu1 %v3165_v44, %s7651_s6 }
 0x8f5   : > { %v4778_v30 = vperm.slane %v4774_v5, %v8572_v54 }
 0x8f6   : > { %v4723_v47 = vrot.slane %v4716_v37, 4 }
 0x8f7   : > { %v4798_v60 = vsel %vm2681_vm5, %v4797_v27, %v4778_v30 }
 0x8f8   : > { %v4802_v18 = vperm.slane %v4798_v60, %v8588_v61 }
 0x8fa   : > { %v6936_v36 = vpop.trf.xlu1  ;;  %v4810_v34 = vsel %vm2681_vm5, %v4809_v26, %v4802_v18  ;;  %v4811_v40 = vrot.slane %v4802_v18, 4 }
 0x8fb   : > { %v6942_v52 = vpop.trf.xlu0  ;;  %v4831_v4 = vpack.i.b16 %v4810_v34, %v4770_v6  ;;  %v4660_v39 = vsel %vm2681_vm5, %v4659_v2, %v6936_v36  ;;  %v4834_v24 = vshrl.u32 %v4810_v34, 16 }
 0x8fc   : > { %v9259_v53 = vsel %vm2681_vm5, %v4808_v3, %v4811_v40  ;;  %v4666_v7 = vsel %vm2681_vm5, %v4665_v62, %v6942_v52  ;;  %v4664_v57 = vperm.slane %v4660_v39, %v8572_v54  ;;  %v3166_v62 = vld [vmem:[%s893_s2 + $0x4] sm:$0xf] }
 0x8fd   : > { %4854 = vmatpush.bf16.msra.mxu3 %v4831_v4  ;;  %v4839_v43 = vpack.i.b16 %v9259_v53, %v9256_v28  ;;  %v4670_v1 = vperm.slane %v4666_v7, %v8572_v54  ;;  %v4835_v36 = vpack.i.b16 %v4834_v24, %v4833_v41  ;;  %v4842_v4 = vshrl.u32 %v9259_v53, 16  ;;  %3171 = vrot.lane.b32.xlu2 %v3166_v62, %s7650_s29 }
 0x8fe   : > { %v4677_v55 = vrot.slane %v4664_v57, 4  ;;  %3179 = vrot.lane.b32.xlu1 %v3166_v62, %s7649_s0 }
 0x8ff   : > { %4886 = vmatpush.bf16.msra.mxu2 %v4839_v43  ;;  %v4684_v42 = vsel %vm2681_vm5, %v4683_v19, %v4670_v1 }
 0x900   : > { %v4688_v33 = vperm.slane %v4684_v42, %v8588_v61 }
 0x902   : > { %v6937_v15 = vpop.trf.xlu1  ;;  %v4689_v3 = vrot.slane %v4688_v33, 4 }
 0x903   : > { %v6943_v46 = vpop.trf.xlu0  ;;  %v4700_v45 = vsel %vm2681_vm5, %v4699_v11, %v6937_v15  ;;  %v4841_v15 = vshrl.u32 %v9256_v28, 16 }
 0x904   : > { %v4706_v13 = vsel %vm2681_vm5, %v4705_v25, %v6943_v46  ;;  %v4704_v17 = vperm.slane %v4700_v45, %v8572_v54 }
 0x905   : > { %v4710_v35 = vperm.slane %v4706_v13, %v8572_v54  ;;  %v4843_v51 = vpack.i.b16 %v4842_v4, %v4841_v15  ;;  %3175 = vrot.lane.b32.xlu2 %v3166_v62, %s7651_s6 }
 0x906   : > { %v4717_v31 = vrot.slane %v4704_v17, 4 }
 0x907   : > { %v4724_v59 = vsel %vm2681_vm5, %v4723_v47, %v4710_v35 }
 0x908   : > { %v4728_v23 = vperm.slane %v4724_v59, %v8588_v61 }
 0x90a   : > { %v6945_v12 = vpop.trf.xlu1  ;;  %v4729_v30 = vrot.slane %v4728_v23, 4 }
 0x90b   : > { %v4654_v10 = vsel %vm2681_vm5, %v4653_v9, %v6945_v12  ;;  %v3184_v9 = vshrl.u32 %v3165_v44, 16  ;;  %v3196_v12 = vshrl.u32 %v3166_v62, 16 }
 0x90c   : > { %v4658_v38 = vperm.slane %v4654_v10, %v8572_v54 }
 0x90e   : > { %v4678_v32 = vsel %vm2681_vm5, %v4677_v55, %v4658_v38 }
 0x90f   : > { %v4682_v21 = vperm.slane %v4678_v32, %v8588_v61 }
 0x911   : > { %v4691_v60 = vrot.slane %v4682_v21, 4  ;;  %v4690_v18 = vsel %vm2681_vm5, %v4689_v3, %v4682_v21 }
 0x912   : > { %v6946_v49 = vpop.trf.xlu1  ;;  %v4817_v6 = vshrl.u32 %v4690_v18, 16 }
 0x913   : > { %v4694_v50 = vsel %vm2681_vm5, %v4693_v22, %v6946_v49  ;;  %v4692_v40 = vsel %vm2681_vm5, %v4688_v33, %v4691_v60 }
 0x914   : > { %v4698_v5 = vperm.slane %v4694_v50, %v8572_v54  ;;  %v4825_v53 = vshrl.u32 %v4692_v40, 16 }
 0x916   : > { %v4718_v29 = vsel %vm2681_vm5, %v4717_v31, %v4698_v5 }
 0x917   : > { %v4722_v27 = vperm.slane %v4718_v29, %v8588_v61 }
 0x919   : > { %v4730_v26 = vsel %vm2681_vm5, %v4729_v30, %v4722_v27  ;;  %v4731_v16 = vrot.slane %v4722_v27, 4 }
 0x91a   : > { %v4815_v56 = vpack.i.b16 %v4730_v26, %v4690_v18  ;;  %v4818_v52 = vshrl.u32 %v4730_v26, 16 }
 0x91b   : > { %v4732_v34 = vsel %vm2681_vm5, %v4728_v23, %v4731_v16 }
 0x91c   : > { %4855 = vmatpush.bf16.msra.mxu3 %v4815_v56  ;;  %v4823_v43 = vpack.i.b16 %v4732_v34, %v4692_v40  ;;  %v4819_v8 = vpack.i.b16 %v4818_v52, %v4817_v6  ;;  %v4826_v2 = vshrl.u32 %v4732_v34, 16 }
 0x91e   : > { %4887 = vmatpush.bf16.msra.mxu2 %v4823_v43  ;;  %v4827_v28 = vpack.i.b16 %v4826_v2, %v4825_v53 }
 0x91f   : > { %6165 = vmatmul.msk.bf16.vlgmr.msra.gmra.mxu3 %vm2803_vm6, %v9213_v58  ;;  %v3015_v58 = vpop.permute.xlu2 %3014 }
 0x920   : > { %4870 = vmatpush.bf16.msrb.mxu3 %v4835_v36 }
 0x924   : > { %4871 = vmatpush.bf16.msrb.mxu3 %v4819_v8 }
 0x928   : > { %4902 = vmatpush.bf16.msra.mxu3 %v4843_v51 }
 0x92a   : > { %v3019_v46 = vpop.permute.xlu1 %3018 }
 0x92c   : > { %4903 = vmatpush.bf16.msra.mxu3 %v4827_v28 }
 0x92f   : > { %6166 = vmatmul.msk.bf16.vlgmr.msrb.gmra.mxu3 %vm2803_vm6, %v3015_v58  ;;  %v3017_v25 = vpop.permute.xlu0 %3016 }
 0x930   : > { %6167 = vmatmul.msk.bf16.vlgmr.msra.gmra.mxu2 %vm2803_vm6, %v3017_v25 }
 0x93f   : > { %6168 = vmatmul.msk.bf16.vlgmr.msra.gmra.mxu3 %vm2803_vm6, %v3019_v46 }
 0x957   : > { %v3172_v37 = vpop.permute.xlu2 %3171 }
 0x958   : > { %v3197_v11 = vshrl.u32 %v3172_v37, 16  ;;  %v3195_v19 = vpack.i.b16 %v3172_v37, %v3166_v62 }
 0x95a   : > { %v3198_v47 = vpack.i.b16 %v3197_v11, %v3196_v12  ;;  %v3261_v50 = vperm.slane %v3195_v19, %v8572_v54 }
 0x95c   : > { %v3287_v31 = vperm.slane %v3198_v47, %v8572_v54  ;;  %v3269_v26 = vrot.slane %v3261_v50, 4 }
 0x95e   : > { %v3170_v7 = vpop.permute.xlu1 %3169  ;;  %v3178_v10 = vpop.permute.xlu0 %3177  ;;  %v3295_v34 = vrot.slane %v3287_v31, 4 }
 0x95f   : > { %v3183_v13 = vpack.i.b16 %v3170_v7, %v3165_v44  ;;  %v3185_v20 = vshrl.u32 %v3170_v7, 16  ;;  %v3191_v38 = vshrl.u32 %v3178_v10, 16  ;;  %v3176_v21 = vpop.permute.xlu2 %3175 }
 0x960   : > { %v3202_v27 = vshrl.u32 %v3176_v21, 16 }
 0x961   : > { %v3186_v57 = vpack.i.b16 %v3185_v20, %v3184_v9  ;;  %v3209_v1 = vperm.slane %v3183_v13, %v8572_v54 }
 0x963   : > { %v3235_v35 = vperm.slane %v3186_v57, %v8572_v54  ;;  %v3217_v22 = vrot.slane %v3209_v1, 4 }
 0x965   : > { %v3243_v49 = vrot.slane %v3235_v35, 4 }
 0x966   : > { %v3174_v55 = vpop.permute.xlu1 %3173 }
 0x967   : > { %v3190_v42 = vshrl.u32 %v3174_v55, 16  ;;  %v3189_v17 = vpack.i.b16 %v3178_v10, %v3174_v55 }
 0x969   : > { %v3192_v33 = vpack.i.b16 %v3191_v38, %v3190_v42  ;;  %v3214_v23 = vperm.slane %v3189_v17, %v8572_v54 }
 0x96b   : > { %v3215_v5 = vrot.slane %v3214_v23, 4  ;;  %v3218_v24 = vsel %vm2681_vm5, %v3214_v23, %v3217_v22  ;;  %v3240_v29 = vperm.slane %v3192_v33, %v8572_v54 }
 0x96c   : > { %v3226_v3 = vperm.slane %v3218_v24, %v8588_v61 }
 0x96d   : > { %v3216_v30 = vsel %vm2681_vm5, %v3215_v5, %v3209_v1  ;;  %v3241_v60 = vrot.slane %v3240_v29, 4  ;;  %v3244_v41 = vsel %vm2681_vm5, %v3240_v29, %v3243_v49 }
 0x96e   : > { %v3222_v56 = vperm.slane %v3216_v30, %v8588_v61  ;;  %v3229_v36 = vrot.slane %v3226_v3, 4  ;;  %v3252_v40 = vperm.slane %v3244_v41, %v8588_v61 }
 0x96f   : > { %v3242_v43 = vsel %vm2681_vm5, %v3241_v60, %v3235_v35 }
 0x970   : > { %v3180_v16 = vpop.permute.xlu1 %3179  ;;  %v3227_v15 = vrot.slane %v3222_v56, 4  ;;  %v3230_v8 = vsel %vm2681_vm5, 0, %v3229_v36  ;;  %v3248_v44 = vperm.slane %v3242_v43, %v8588_v61  ;;  %v3255_v51 = vrot.slane %v3252_v40, 4 }
 0x971   : > { %v3201_v52 = vpack.i.b16 %v3180_v16, %v3176_v21  ;;  %v3203_v4 = vshrl.u32 %v3180_v16, 16  ;;  %v4974_v53 = vsel %vm2681_vm5, %v3229_v36, %v3222_v56  ;;  %v4979_v28 = vrot.slane %v3230_v8, 4 }
 0x972   : > { %v3228_v58 = vsel %vm2681_vm5, 0, %v3227_v15  ;;  %v3253_v25 = vrot.slane %v3248_v44, 4  ;;  %v3256_v46 = vsel %vm2681_vm5, 0, %v3255_v51  ;;  %v4993_v12 = vsel %vm2681_vm5, %v3255_v51, %v3248_v44 }
 0x973   : > { %v3204_v2 = vpack.i.b16 %v3203_v4, %v3202_v27  ;;  %v3266_v62 = vperm.slane %v3201_v52, %v8572_v54  ;;  %v4998_v13 = vrot.slane %v3256_v46, 4  ;;  %v4980_v57 = vsel %vm2681_vm5, %v4979_v28, %v3228_v58 }
 0x974   : > { %v3254_v37 = vsel %vm2681_vm5, 0, %v3253_v25  ;;  %v4984_v35 = vperm.slane %v4980_v57, %v8572_v54 }
 0x975   : > { %v3270_v9 = vsel %vm2681_vm5, %v3266_v62, %v3269_v26  ;;  %v3292_v7 = vperm.slane %v3204_v2, %v8572_v54 }
 0x976   : > { %v3278_v20 = vperm.slane %v3270_v9, %v8588_v61  ;;  %v4985_v17 = vrot.slane %v4984_v35, 4 }
 0x977   : > { %v3293_v10 = vrot.slane %v3292_v7, 4  ;;  %v3296_v1 = vsel %vm2681_vm5, %v3292_v7, %v3295_v34 }
 0x978   : > { %v3281_v47 = vrot.slane %v3278_v20, 4  ;;  %v3304_v55 = vperm.slane %v3296_v1, %v8588_v61 }
 0x979   : > { %v3294_v42 = vsel %vm2681_vm5, %v3293_v10, %v3287_v31 }
 0x97a   : > { %v3282_v33 = vsel %vm2681_vm5, 0, %v3281_v47  ;;  %v3300_v23 = vperm.slane %v3294_v42, %v8588_v61 }
 0x97b   : > { %v5017_v5 = vrot.slane %v3282_v33, 4 }
 0x97c   : > { %v3305_v31 = vrot.slane %v3300_v23, 4 }
 0x97e   : > { %v3306_v26 = vsel %vm2681_vm5, 0, %v3305_v31 }
 0x9a2   : > { %v9312_v48 = vpop.f32.mrf.mxu3 }
 0x9a3   : > { %v4910_v0 = vsel %vm4909_vm13, %v9312_v48, -inf }
 0x9a4   : > { %4911 = vmax.xlane.f32.xlu2 %v4910_v0  ;;  %v4978_v0 = vperm.slane %v4974_v53, %v8572_v54 }
 0x9a6   : > { %v4986_v24 = vsel %vm2681_vm5, %v4985_v17, %v4978_v0 }
 0x9a7   : > { %v4990_v30 = vperm.slane %v4986_v24, %v8588_v61 }
 0x9a9   : > { %v5053_v52 = vshrl.u32 %v4990_v30, 16  ;;  %v4991_v4 = vrot.slane %v4990_v30, 4 }
 0x9aa   : > { %v4859_v39 = vpop.f32.mrf.mxu3 }
 0x9ab   : > { %v3267_v39 = vrot.slane %v3266_v62, 4  ;;  %v4992_v51 = vsel %vm2681_vm5, 0, %v4991_v4 }
 0x9ad   : > { %v3268_v11 = vsel %vm2681_vm5, %v3267_v39, %v3261_v50  ;;  %v3307_v50 = vrot.slane %v3304_v55, 4  ;;  %v5059_v39 = vshrl.u32 %v4992_v51, 16 }
 0x9ae   : > { %v3274_v19 = vperm.slane %v3268_v11, %v8588_v61 }
 0x9af   : > { %v3308_v27 = vsel %vm2681_vm5, 0, %v3307_v50  ;;  %v5031_v36 = vsel %vm2681_vm5, %v3307_v50, %v3300_v23 }
 0x9b0   : > { %v3279_v49 = vrot.slane %v3274_v19, 4  ;;  %v5012_v21 = vsel %vm2681_vm5, %v3281_v47, %v3274_v19  ;;  %v5036_v60 = vrot.slane %v3308_v27, 4  ;;  %v5035_v8 = vperm.slane %v5031_v36, %v8572_v54 }
 0x9b1   : > { %v5016_v16 = vperm.slane %v5012_v21, %v8572_v54 }
 0x9b2   : > { %v9318_v45 = vpop.f32.mrf.mxu3  ;;  %v3280_v3 = vsel %vm2681_vm5, 0, %v3279_v49  ;;  %v5037_v34 = vsel %vm2681_vm5, %v5036_v60, %v3306_v26 }
 0x9b3   : > { %v4913_v14 = vsel %vm4909_vm13, %v9318_v45, -inf  ;;  %v9322_v59 = vpop.f32.mrf.mxu2  ;;  %v5041_v44 = vperm.slane %v5037_v34, %v8572_v54 }
 0x9b4   : > { %4914 = vmax.xlane.f32.xlu0 %v4913_v14  ;;  %v4916_v32 = vsel %vm4909_vm13, %v9322_v59, -inf  ;;  %v4997_v14 = vperm.slane %v4993_v12, %v8572_v54 }
 0x9b5   : > { %4917 = vmax.xlane.f32.xlu1 %v4916_v32  ;;  %v4999_v32 = vsel %vm2681_vm5, %v4998_v13, %v3254_v37  ;;  %v5042_v62 = vrot.slane %v5041_v44, 4 }
 0x9b6   : > { %v5003_v29 = vperm.slane %v4999_v32, %v8572_v54 }
 0x9b7   : > { %v5043_v46 = vsel %vm2681_vm5, %v5042_v62, %v5035_v8 }
 0x9b8   : > { %v5004_v41 = vrot.slane %v5003_v29, 4  ;;  %v5047_v9 = vperm.slane %v5043_v46, %v8588_v61 }
 0x9ba   : > { %v4875_v18 = vpop.f32.mrf.mxu3  ;;  %v5005_v40 = vsel %vm2681_vm5, %v5004_v41, %v4997_v14  ;;  %v5066_v10 = vshrl.u32 %v5047_v9, 16  ;;  %v5048_v35 = vrot.slane %v5047_v9, 4 }
 0x9bb   : > { %v4891_v6 = vpop.f32.mrf.mxu2  ;;  %v5018_v18 = vsel %vm2681_vm5, %v5017_v5, %v3280_v3 }
 0x9bc   : > { %v5022_v56 = vperm.slane %v5018_v18, %v8572_v54  ;;  %v5009_v6 = vperm.slane %v5005_v40, %v8588_v61  ;;  %v5049_v42 = vsel %vm2681_vm5, 0, %v5048_v35 }
 0x9bd   : > { %v5072_v49 = vshrl.u32 %v5049_v42, 16 }
 0x9be   : > { %v5023_v15 = vrot.slane %v5022_v56, 4  ;;  %v5052_v53 = vpack.i.b16 %v5009_v6, %v4990_v30  ;;  %v5054_v28 = vshrl.u32 %v5009_v6, 16  ;;  %v5010_v25 = vrot.slane %v5009_v6, 4 }
 0x9c0   : > { %v5024_v2 = vsel %vm2681_vm5, %v5023_v15, %v5016_v16  ;;  %v5055_v0 = vpack.i.b16 %v5054_v28, %v5053_v52  ;;  %v5011_v13 = vsel %vm2681_vm5, 0, %v5010_v25  ;;  %v5074_v37 = vunpack.c.l.b16 %v5052_v53 }
 0x9c1   : > { %v5028_v58 = vperm.slane %v5024_v2, %v8588_v61  ;;  %v5058_v57 = vpack.i.b16 %v5011_v13, %v4992_v51  ;;  %v5060_v12 = vshrl.u32 %v5011_v13, 16 }
 0x9c2   : > { %v9353_v38 = vpop.f32.mrf.mxu3 }
 0x9c3   : > { %v4919_v22 = vsel %vm4909_vm13, %v9353_v38, -inf  ;;  %v5065_v7 = vshrl.u32 %v5028_v58, 16  ;;  %v5029_v20 = vrot.slane %v5028_v58, 4  ;;  %v5064_v11 = vpack.i.b16 %v5047_v9, %v5028_v58 }
 0x9c4   : > { %4920 = vmax.xlane.f32.xlu2 %v4919_v22  ;;  %v5061_v19 = vpack.i.b16 %v5060_v12, %v5059_v39  ;;  %v5094_v22 = vunpack.c.l.b16 %v5055_v0  ;;  %v5114_v32 = vunpack.c.l.b16 %v5058_v57 }
 0x9c5   : > { %v5030_v1 = vsel %vm2681_vm5, 0, %v5029_v20  ;;  %v5075_v55 = vunpack.c.l.b16 %v5064_v11  ;;  %v5067_v14 = vpack.i.b16 %v5066_v10, %v5065_v7 }
 0x9c6   : > { %v5071_v47 = vshrl.u32 %v5030_v1, 16  ;;  %v5070_v17 = vpack.i.b16 %v5049_v42, %v5030_v1  ;;  %v5134_v5 = vunpack.c.l.b16 %v5061_v19 }
 0x9c7   : > { %v5076_v33 = vpack.c.b16 %v5075_v55, %v5074_v37  ;;  %v5095_v23 = vunpack.c.l.b16 %v5067_v14 }
 0x9c8   : > { %v5115_v50 = vunpack.c.l.b16 %v5070_v17  ;;  %v5073_v21 = vpack.i.b16 %v5072_v49, %v5071_v47 }
 0x9c9   : > { %5088 = vmatpush.bf16.msrb.mxu2 %v5076_v33  ;;  %v5096_v24 = vpack.c.b16 %v5095_v23, %v5094_v22 }
 0x9ca   : > { %v4907_v43 = vpop.f32.mrf.mxu3  ;;  %v5116_v29 = vpack.c.b16 %v5115_v50, %v5114_v32  ;;  %v5135_v3 = vunpack.c.l.b16 %v5073_v21 }
 0x9cb   : > { %5108 = vmatpush.bf16.msrb.mxu3 %v5096_v24 }
 0x9cc   : > { %5128 = vmatpush.bf16.msrb.mxu0 %v5116_v29  ;;  %v5136_v31 = vpack.c.b16 %v5135_v3, %v5134_v5 }
 0x9ce   : > { %5148 = vmatpush.bf16.msrb.mxu1 %v5136_v31 }
 0xa17   : > { %v4912_v27 = vpop.xlane.xlu2 %4911 }
 0xa18   : > { %v4922_v30 = vmax.f32 %v4912_v27, -1e+30 }
 0xa1a   : > { %v4938_v60 = vsub.f32 %v9312_v48, %v4922_v30  ;;  %v4926_v46 = vsub.f32 -1e+30, %v4922_v30 }
 0xa1c   : > { %v4942_v41 = vmul.f32 1.442695, %v4938_v60  ;;  %v4930_v0 = vmul.f32 1.442695, %v4926_v46 }
 0xa1e   : > { %6969 = vpow2.f32 %v4942_v41 }
 0xa24   : > { %v6970_v18 = vpop.eup %6969 }
 0xa25   : > { %v4954_v26 = vsel %vm4909_vm13, %v6970_v18, 0.0  ;;  %v4970_v16 = vpack.c.bf16 %v6970_v18, %v6970_v18 }
 0xa26   : > { %4955 = vadd.xlane.f32.xlu1 %v4954_v26 }
 0xa27   : > { %v4915_v56 = vpop.xlane.xlu0 %4914  ;;  %6169 = vmatmul.msk.bf16.vlgmr.msrb.gmra.mxu2 %vm4909_vm13, %v4970_v16 }
 0xa28   : > { %v4923_v36 = vmax.f32 %v4915_v56, -1e+30  ;;  %v4918_v40 = vpop.xlane.xlu1 %4917 }
 0xa29   : > { %v4924_v52 = vmax.f32 %v4918_v40, -1e+30 }
 0xa2a   : > { %v4939_v34 = vsub.f32 %v9318_v45, %v4923_v36 }
 0xa2b   : > { %v4940_v43 = vsub.f32 %v9322_v59, %v4924_v52  ;;  %v4928_v39 = vsub.f32 -1e+30, %v4924_v52 }
 0xa2c   : > { %v4944_v4 = vmul.f32 1.442695, %v4939_v34 }
 0xa2d   : > { %v4946_v6 = vmul.f32 1.442695, %v4940_v43  ;;  %v4934_v9 = vmul.f32 1.442695, %v4928_v39 }
 0xa2e   : > { %6971 = vpow2.f32 %v4944_v4 }
 0xa2f   : > { %6973 = vpow2.f32 %v4946_v6 }
 0xa34   : > { %v6972_v48 = vpop.eup %6971 }
 0xa35   : > { %v4971_v15 = vpack.c.bf16 %v6972_v48, %v6972_v48  ;;  %v6974_v8 = vpop.eup %6973  ;;  %v4957_v59 = vsel %vm4909_vm13, %v6972_v48, 0.0 }
 0xa36   : > { %v4960_v2 = vsel %vm4909_vm13, %v6974_v8, 0.0  ;;  %v4972_v62 = vpack.c.bf16 %v6974_v8, %v6974_v8 }
 0xa37   : > { %v4921_v44 = vpop.xlane.xlu2 %4920  ;;  %6170 = vmatmul.msk.bf16.vlgmr.msrb.gmra.mxu3 %vm4909_vm13, %v4971_v15  ;;  %4961 = vadd.xlane.f32.xlu0 %v4960_v2 }
 0xa38   : > { %v4925_v51 = vmax.f32 %v4921_v44, -1e+30  ;;  %6171 = vmatmul.msk.bf16.vlgmr.msrb.gmra.mxu0 %vm4909_vm13, %v4972_v62 }
 0xa3a   : > { %v4941_v45 = vsub.f32 %v9353_v38, %v4925_v51  ;;  %v4927_v38 = vsub.f32 -1e+30, %v4923_v36  ;;  %v4929_v12 = vsub.f32 -1e+30, %v4925_v51 }
 0xa3c   : > { %v4948_v53 = vmul.f32 1.442695, %v4941_v45  ;;  %v4932_v13 = vmul.f32 1.442695, %v4927_v38  ;;  %v4936_v19 = vmul.f32 1.442695, %v4929_v12 }
 0xa3e   : > { %6975 = vpow2.f32 %v4948_v53 }
 0xa3f   : > { %4958 = vadd.xlane.f32.xlu0 %v4957_v59  ;;  %6977 = vpow2.f32 %v4930_v0 }
 0xa40   : > { %6979 = vpow2.f32 %v4934_v9 }
 0xa41   : > { %6981 = vpow2.f32 %v4932_v13 }
 0xa44   : > { %v6976_v28 = vpop.eup %6975 }
 0xa45   : > { %v4963_v58 = vsel %vm4909_vm13, %v6976_v28, 0.0  ;;  %v4973_v25 = vpack.c.bf16 %v6976_v28, %v6976_v28  ;;  %v6978_v7 = vpop.eup %6977 }
 0xa46   : > { %4964 = vadd.xlane.f32.xlu2 %v4963_v58  ;;  %v4950_v37 = vmul.f32 0.0, %v6978_v7  ;;  %v6980_v57 = vpop.eup %6979 }
 0xa47   : > { %6172 = vmatmul.msk.bf16.vlgmr.msrb.gmra.mxu1 %vm4909_vm13, %v4973_v25  ;;  %v4952_v35 = vmul.f32 0.0, %v6980_v57  ;;  %v6982_v55 = vpop.eup %6981 }
 0xa48   : > { %v4951_v32 = vmul.f32 0.0, %v6982_v55 }
 0xa99   : > { %v4956_v20 = vpop.xlane.xlu1 %4955 }
 0xa9a   : > { %v4966_v11 = vadd.f32 %v4956_v20, %v4950_v37 }
 0xa9c   : > { %6983 = vrcp.f32 %v4966_v11 }
 0xa9d   : > { %6985 = vpow2.f32 %v4936_v19 }
 0xaa2   : > { %v6984_v17 = vpop.eup %6983 }
 0xaa3   : > { %v6986_v50 = vpop.eup %6985 }
 0xaa4   : > { %v4953_v31 = vmul.f32 0.0, %v6986_v50 }
 0xaaa   : > { %v5090_v10 = vpop.f32.mrf.mxu2  ;;  %v4962_v1 = vpop.xlane.xlu0 %4961 }
 0xaab   : > { %v4968_v47 = vadd.f32 %v4962_v1, %v4952_v35  ;;  %v5154_v14 = vadd.f32 %v5090_v10, %v4950_v37 }
 0xaad   : > { %6987 = vrcp.f32 %v4968_v47  ;;  %v5162_v49 = vmul.f32 %v6984_v17, %v5154_v14 }
 0xaaf   : > { %v5168_v24 = vrot.slane %v5162_v49, 4 }
 0xab2   : > { %v5092_v22 = vpop.f32.mrf.mxu2  ;;  %v4959_v42 = vpop.xlane.xlu0 %4958 }
 0xab3   : > { %v4967_v33 = vadd.f32 %v4959_v42, %v4951_v32  ;;  %v6988_v5 = vpop.eup %6987 }
 0xab5   : > { %v5130_v23 = vpop.f32.mrf.mxu0  ;;  %6989 = vrcp.f32 %v4967_v33 }
 0xab6   : > { %v5156_v21 = vadd.f32 %v5130_v23, %v4952_v35 }
 0xab8   : > { %v5164_v29 = vmul.f32 %v6988_v5, %v5156_v21 }
 0xab9   : > { %v4965_v3 = vpop.xlane.xlu2 %4964 }
 0xaba   : > { %v5110_v27 = vpop.f32.mrf.mxu3  ;;  %v5166_v30 = vrot.slane %v5164_v29, 4  ;;  %v5169_v60 = vsel %vm2681_vm5, %v5164_v29, %v5168_v24  ;;  %v4969_v41 = vadd.f32 %v4965_v3, %v4953_v31 }
 0xabb   : > { %v5155_v16 = vadd.f32 %v5110_v27, %v4951_v32  ;;  %v6990_v56 = vpop.eup %6989  ;;  %v5177_v43 = vperm.slane %v5169_v60, %v8572_v54 }
 0xabc   : > { %v5167_v18 = vsel %vm2681_vm5, %v5166_v30, %v5162_v49  ;;  %6991 = vrcp.f32 %v4969_v41 }
 0xabd   : > { %v5132_v26 = vpop.f32.mrf.mxu0  ;;  %v5163_v40 = vmul.f32 %v6990_v56, %v5155_v16  ;;  %v5173_v15 = vperm.slane %v5167_v18, %v8572_v54  ;;  %v5204_v51 = vrot.slane %v5177_v43, 4 }
 0xabf   : > { %v5180_v6 = vrot.slane %v5163_v40, 4  ;;  %v5192_v45 = vrot.slane %v5173_v15, 4 }
 0xac2   : > { %v5112_v36 = vpop.f32.mrf.mxu3  ;;  %v6992_v4 = vpop.eup %6991 }
 0xac4   : > { %v5150_v34 = vpop.f32.mrf.mxu1 }
 0xac5   : > { %v5157_v52 = vadd.f32 %v5150_v34, %v4953_v31 }
 0xac7   : > { %v5165_v48 = vmul.f32 %v6992_v4, %v5157_v52  ;;  %v6373_v52 = vld [vmem:[#allocation16 + $0x38] sm:$0xff]  ;;  %v6372_v4 = vld [vmem:[#allocation16 + $0x30] sm:$0xff] }
 0xac8   : > { %5360 = vmatpush.bf16.msra.mxu2 %v6373_v52  ;;  %v6225_v52 = vld [vmem:[#allocation17 + $0x28] sm:$0xf0] }
 0xac9   : > { %v5178_v8 = vrot.slane %v5165_v48, 4  ;;  %v5181_v44 = vsel %vm2681_vm5, %v5165_v48, %v5180_v6  ;;  %v6369_v6 = vld [vmem:[#allocation16 + $0x18] sm:$0xff]  ;;  %v6368_v48 = vld [vmem:[#allocation16 + $0x10] sm:$0xff] }
 0xaca   : > { %v5189_v2 = vperm.slane %v5181_v44, %v8572_v54 }
 0xacb   : > { %v5179_v62 = vsel %vm2681_vm5, %v5178_v8, %v5163_v40  ;;  %v6366_v8 = vld [vmem:[#allocation16] sm:$0xff] }
 0xacc   : > { %v5185_v53 = vperm.slane %v5179_v62, %v8572_v54  ;;  %v5202_v59 = vrot.slane %v5189_v2, 4  ;;  %v5205_v28 = vsel %vm2681_vm5, %v5189_v2, %v5204_v51  ;;  %v5152_v58 = vpop.f32.mrf.mxu1  ;;  %5361 = vmatpush.bf16.msra.mxu2 %v6372_v4  ;;  %v6396_v4 = vld [vmem:[#allocation19 + $0x30] sm:$0xff] }
 0xacd   : > { %v5213_v25 = vperm.slane %v5205_v28, %v8588_v61 }
 0xace   : > { %v5190_v46 = vrot.slane %v5185_v53, 4  ;;  %v5193_v0 = vsel %vm2681_vm5, %v5185_v53, %v5192_v45  ;;  %v5203_v39 = vsel %vm2681_vm5, %v5202_v59, %v5177_v43  ;;  %v6370_v43 = vld [vmem:[#allocation16 + $0x20] sm:$0xff] }
 0xacf   : > { %v5201_v9 = vperm.slane %v5193_v0, %v8588_v61  ;;  %v5209_v38 = vperm.slane %v5203_v39, %v8588_v61  ;;  %v5220_v7 = vrot.slane %v5213_v25, 4  ;;  %v6263_v39 = vld [vmem:[#allocation17 + $0x70] sm:$0xf] }
 0xad0   : > { %v5191_v13 = vsel %vm2681_vm5, %v5190_v46, %v5173_v15  ;;  %v6367_v15 = vld [vmem:[#allocation16 + $0x8] sm:$0xff] }
 0xad1   : > { %v5197_v20 = vperm.slane %v5191_v13, %v8588_v61  ;;  %v5216_v37 = vrot.slane %v5201_v9, 4  ;;  %v5218_v57 = vrot.slane %v5209_v38, 4  ;;  %v5221_v12 = vsel %vm2681_vm5, 0.0, %v5220_v7  ;;  %v6389_v9 = vld [vmem:[#allocation17 + $0x74] sm:$0xf0] }
 0xad2   : > { %v5238_v11 = vrot.slane %v5221_v12, 4  ;;  %v5233_v10 = vsel %vm2681_vm5, %v5220_v7, %v5209_v38  ;;  %v6388_v38 = vld [vmem:[#allocation17 + $0x74] sm:$0xf]  ;;  %v6264_v7 = vor.u32 %v6389_v9, %v6263_v39  ;;  %v6265_v13 = vld [vmem:[#allocation17 + $0x78] sm:$0xf0] }
 0xad3   : > { %v5214_v1 = vrot.slane %v5197_v20, 4  ;;  %v5217_v35 = vsel %vm2681_vm5, 0.0, %v5216_v37  ;;  %v5219_v19 = vsel %vm2681_vm5, 0.0, %v5218_v57  ;;  %v5222_v47 = vsel %vm2681_vm5, %v5216_v37, %v5197_v20  ;;  %v9685_v57 = vld [vmem:[#allocation41_spill] sm:$0xff] }
 0xad4   : > { %v5226_v55 = vperm.slane %v5222_v47, %v8572_v54  ;;  %v5227_v14 = vrot.slane %v5217_v35, 4  ;;  %v5237_v22 = vperm.slane %v5233_v10, %v8572_v54  ;;  %v5239_v42 = vsel %vm2681_vm5, %v5238_v11, %v5219_v19  ;;  %5507 = vmatpush.bf16.msra.mxu3 %v6264_v7  ;;  %v6386_v35 = vld [vmem:[#allocation17 + $0x64] sm:$0xf]  ;;  %v6257_v47 = vld [vmem:[#allocation17 + $0x68] sm:$0xf0]  ;;  %v6401_v7 = vld [vmem:[#allocation19 + $0x58] sm:$0xff] }
 0xad5   : > { %v5215_v17 = vsel %vm2681_vm5, 0.0, %v5214_v1  ;;  %v5243_v32 = vperm.slane %v5239_v42, %v8572_v54  ;;  %v6268_v20 = vor.u32 %v6388_v38, %v6265_v13  ;;  %v6387_v1 = vld [vmem:[#allocation17 + $0x64] sm:$0xf0]  ;;  %v6384_v42 = vld [vmem:[#allocation17 + $0x54] sm:$0xf] }
 0xad6   : > { %v5228_v49 = vsel %vm2681_vm5, %v5227_v14, %v5215_v17  ;;  %v5246_v33 = vrot.slane %v5226_v55, 4  ;;  %v5258_v23 = vrot.slane %v5237_v22, 4  ;;  %v6385_v14 = vld [vmem:[#allocation17 + $0x54] sm:$0xf0]  ;;  %v6249_v17 = vld [vmem:[#allocation17 + $0x58] sm:$0xf0] }
 0xad7   : > { %v5232_v50 = vperm.slane %v5228_v49, %v8572_v54  ;;  %v5256_v21 = vrot.slane %v5243_v32, 4  ;;  %5520 = vmatpush.bf16.msra.mxu0 %v6268_v20  ;;  %v6252_v49 = vor.u32 %v6384_v42, %v6249_v17  ;;  %v6393_v20 = vld [vmem:[#allocation19 + $0x18] sm:$0xff]  ;;  %v6392_v42 = vld [vmem:[#allocation19 + $0x10] sm:$0xff]  ;;  %v6398_v17 = vld [vmem:[#allocation19 + $0x40] sm:$0xff] }
 0xad8   : > { %v5259_v5 = vsel %vm2681_vm5, %v5243_v32, %v5258_v23  ;;  %v6383_v23 = vld [vmem:[#allocation17 + $0x44] sm:$0xf0] }
 0xad9   : > { %v5247_v24 = vsel %vm2681_vm5, %v5232_v50, %v5246_v33  ;;  %v5267_v29 = vperm.slane %v5259_v5, %v8588_v61  ;;  %v5244_v3 = vrot.slane %v5232_v50, 4  ;;  %v5257_v31 = vsel %vm2681_vm5, %v5256_v21, %v5237_v22  ;;  %v6239_v33 = vld [vmem:[#allocation17 + $0x40] sm:$0xf]  ;;  %v6382_v50 = vld [vmem:[#allocation17 + $0x44] sm:$0xf] }
 0xada   : > { %v5255_v27 = vperm.slane %v5247_v24, %v8588_v61  ;;  %v5263_v30 = vperm.slane %v5257_v31, %v8588_v61  ;;  %v6260_v22 = vor.u32 %v6386_v35, %v6257_v47  ;;  %v6241_v21 = vld [vmem:[#allocation17 + $0x48] sm:$0xf0]  ;;  %v6240_v5 = vor.u32 %v6383_v23, %v6239_v33 }
 0xadb   : > { %v5272_v60 = vrot.slane %v5267_v29, 4  ;;  %v5245_v41 = vsel %vm2681_vm5, %v5244_v3, %v5226_v55  ;;  %v6247_v55 = vld [vmem:[#allocation17 + $0x50] sm:$0xf]  ;;  %v6244_v24 = vor.u32 %v6382_v50, %v6241_v21  ;;  %v6381_v3 = vld [vmem:[#allocation17 + $0x34] sm:$0xf0] }
 0xadc   : > { %v5274_v18 = vrot.slane %v5255_v27, 4  ;;  %v5251_v54 = vperm.slane %v5245_v41, %v8588_v61  ;;  %v5268_v26 = vrot.slane %v5263_v30, 4  ;;  %v6371_v61 = vld [vmem:[#allocation16 + $0x28] sm:$0xff]  ;;  %v6248_v32 = vor.u32 %v6385_v14, %v6247_v55  ;;  %5521 = vmatpush.bf16.msra.mxu0 %v6260_v22  ;;  %v6405_v41 = vld [vmem:[#allocation19 + $0x78] sm:$0xff] }
 0xadd   : > { %v5273_v16 = vsel %vm2681_vm5, %v5272_v60, %v5255_v27  ;;  %5362 = vmatpush.bf16.msra.mxu2 %v6371_v61  ;;  %v6380_v27 = vld [vmem:[#allocation17 + $0x34] sm:$0xf]  ;;  %v6399_v22 = vld [vmem:[#allocation19 + $0x48] sm:$0xff] }
 0xade   : > { %5281 = vrot.lane.b32.xlu2 %v5273_v16, %s7651_s6  ;;  %v5275_v56 = vsel %vm2681_vm5, %v5267_v29, %v5274_v18  ;;  %v5270_v36 = vrot.slane %v5251_v54, 4  ;;  %v5269_v34 = vsel %vm2681_vm5, %v5268_v26, %v5251_v54  ;;  %v6231_v29 = vld [vmem:[#allocation17 + $0x30] sm:$0xf]  ;;  %v6397_v18 = vld [vmem:[#allocation19 + $0x38] sm:$0xff]  ;;  %v6223_v26 = vld [vmem:[#allocation17 + $0x20] sm:$0xf] }
 0xadf   : > { %5285 = vrot.lane.b32.xlu0 %v5275_v56, %s7650_s29  ;;  %v6232_v54 = vor.u32 %v6381_v3, %v6231_v29  ;;  %5669 = vmatpush.bf16.msra.mxu1 %v6397_v18 }
 0xae0   : > { %v5271_v40 = vsel %vm2681_vm5, %v5263_v30, %v5270_v36  ;;  %5522 = vmatpush.bf16.msra.mxu0 %v6252_v49  ;;  %v6233_v30 = vld [vmem:[#allocation17 + $0x38] sm:$0xf0]  ;;  %v6379_v36 = vld [vmem:[#allocation17 + $0x24] sm:$0xf0]  ;;  %v6390_v49 = vld [vmem:[#allocation19] sm:$0xff] }
 0xae1   : > { %5277 = vrot.lane.b32.xlu1 %v5271_v40, %s7649_s0  ;;  %5363 = vmatpush.bf16.msra.mxu2 %v6370_v43  ;;  %s9684_s0 = sld [smem:[#allocation54_spill]]  ;;  %v6236_v56 = vor.u32 %v6380_v27, %v6233_v30  ;;  %v6404_v40 = vld [vmem:[#allocation19 + $0x70] sm:$0xff]  ;;  %v6224_v61 = vor.u32 %v6379_v36, %v6223_v26 }
 0xae3   : > { %5670 = vmatpush.bf16.msra.mxu1 %v6396_v4 }
 0xae4   : > { %5523 = vmatpush.bf16.msra.mxu0 %v6244_v24 }
 0xae5   : > { %5364 = vmatpush.bf16.msra.mxu2 %v6369_v6  ;;  %v6215_v6 = vld [vmem:[#allocation17 + $0x10] sm:$0xf] }
 0xae7   : > { %v6951_v28 = vld [vmem:[%s9684_s0] ss:$0 sm:$0xff]  ;;  %s9693_s0 = sld [smem:[#allocation65_spill]] }
 0xae8   : > { %5524 = vmatpush.bf16.msra.mxu0 %v6236_v56 }
 0xae9   : > { %5365 = vmatpush.bf16.msra.mxu2 %v6368_v48  ;;  %v6377_v48 = vld [vmem:[#allocation17 + $0x14] sm:$0xf0] }
 0xaed   : > { %5366 = vmatpush.bf16.msra.mxu2 %v6367_v15  ;;  %v6403_v15 = vld [vmem:[#allocation19 + $0x68] sm:$0xff]  ;;  %s5740_s29 = scalar_lea.hbm %s9693_s0, %s6335_s12  ;;  %s7347_s16 = scalar_lea.hbm %s9693_s0, 32 }
 0xaee   : > { %s5744_s26 = sshll.u32 %s5740_s29, 4  ;;  %s5745_s26 = int_to_ptr.hbm [resolvable:$true] %s5744_s26 }
 0xaf1   : > { %5367 = vmatpush.bf16.msra.mxu2 %v6366_v8  ;;  %v6376_v8 = vld [vmem:[#allocation17 + $0x14] sm:$0xf] }
 0xaf5   : > { %5682 = vmatpush.bf16.msrb.mxu2 %v6405_v41  ;;  %v6954_v41 = vld [vmem:[%s9689_s30] ss:$0 sm:$0xff] }
 0xaf9   : > { %5683 = vmatpush.bf16.msrb.mxu2 %v6404_v40 }
 0xafd   : > { %5684 = vmatpush.bf16.msrb.mxu2 %v6403_v15 }
 0xb38   : > { %v5282_v51 = vpop.permute.xlu2 %5281 }
 0xb51   : > { %v5286_v62 = vpop.permute.xlu0 %5285 }
 0xb53   : > { %v5278_v44 = vpop.permute.xlu1 %5277 }
 0xb54   : > { %v5288_v2 = vsel %vm2803_vm6, %v5269_v34, %v5278_v44  ;;  %v6378_v34 = vld [vmem:[#allocation17 + $0x24] sm:$0xf]  ;;  %v6217_v44 = vld [vmem:[#allocation17 + $0x18] sm:$0xf0] }
 0xb55   : > { %v5289_v45 = vsel %vm2805_vm7, %v5288_v2, %v5282_v51  ;;  %v6228_v43 = vor.u32 %v6378_v34, %v6225_v52  ;;  %v6395_v51 = vld [vmem:[#allocation19 + $0x28] sm:$0xff]  ;;  %v6216_v2 = vor.u32 %v6377_v48, %v6215_v6 }
 0xb56   : > { %v5290_v53 = vsel %vm2807_vm8, %v5289_v45, %v5286_v62  ;;  %v6220_v45 = vor.u32 %v6376_v8, %v6217_v44  ;;  %5671 = vmatpush.bf16.msra.mxu1 %v6395_v51 }
 0xb57   : > { %v5291_v59 = vpack.c.bf16 %v5290_v53, %v5290_v53  ;;  %5525 = vmatpush.bf16.msra.mxu0 %v6228_v43  ;;  %v6207_v53 = vld [vmem:[#allocation17] sm:$0xf] }
 0xb59   : > { %5368 = vmatmul.bf16.vlgmr.msra.gmra.mxu2 %v5291_v59  ;;  %v6375_v59 = vld [vmem:[#allocation17 + $0x4] sm:$0xf0] }
 0xb5a   : > { %v6208_v9 = vor.u32 %v6375_v59, %v6207_v53  ;;  %v6956_v59 = vld [vmem:[%s9695_s10] ss:$0 sm:$0xff] }
 0xb5b   : > { %5526 = vmatpush.bf16.msra.mxu0 %v6220_v45 }
 0xbdc   : > { %v5369_v58 = vpop.f32.mrf.mxu2 }
 0xbdd   : > { %v5370_v25 = vadd.f32 %v6951_v28, %v5369_v58  ;;  %v6402_v28 = vld [vmem:[#allocation19 + $0x60] sm:$0xff] }
 0xbde   : > { %5685 = vmatpush.bf16.msrb.mxu2 %v6402_v28 }
 0xbdf   : > { %v5373_v46 = vadd.f32 %v5370_v25, %v8925_v63  ;;  %v6255_v63 = vld [vmem:[#allocation17 + $0x60] sm:$0xf]  ;;  %v6374_v25 = vld [vmem:[#allocation17 + $0x4] sm:$0xf] }
 0xbe0   : > { %v6256_v19 = vor.u32 %v6387_v1, %v6255_v63  ;;  %v6952_v63 = vld [vmem:[%s9686_s3] ss:$0 sm:$0xff] }
 0xbe1   : > { %5376 = vadd.xlane.f32.xlu0 %v5373_v46 }
 0xbe2   : > { %5508 = vmatpush.bf16.msra.mxu3 %v6256_v19  ;;  %5686 = vmatpush.bf16.msrb.mxu2 %v6401_v7  ;;  %v6953_v19 = vld [vmem:[%s9687_s25] ss:$0 sm:$0xff]  ;;  %s5742_s25 = sshll.u32 %s8097_s14, 4  ;;  %s5743_s25 = int_to_ptr.vmem [resolvable:$true] %s5742_s25 }
 0xbe4   : > { %v5371_v0 = vpop.f32.mrf.mxu2 }
 0xbe5   : > { %v6394_v0 = vld [vmem:[#allocation19 + $0x20] sm:$0xff] }
 0xbe6   : > { %5509 = vmatpush.bf16.msra.mxu3 %v6248_v32  ;;  %5672 = vmatpush.bf16.msra.mxu1 %v6394_v0  ;;  %v6391_v32 = vld [vmem:[#allocation19 + $0x8] sm:$0xff] }
 0xbea   : > { %5510 = vmatpush.bf16.msra.mxu3 %v6240_v5  ;;  %5673 = vmatpush.bf16.msra.mxu1 %v6393_v20 }
 0xbee   : > { %5511 = vmatpush.bf16.msra.mxu3 %v6232_v54  ;;  %5674 = vmatpush.bf16.msra.mxu1 %v6392_v42 }
 0xbf2   : > { %5512 = vmatpush.bf16.msra.mxu3 %v6224_v61  ;;  %5675 = vmatpush.bf16.msra.mxu1 %v6391_v32 }
 0xbf6   : > { %5513 = vmatpush.bf16.msra.mxu3 %v6216_v2  ;;  %5676 = vmatpush.bf16.msra.mxu1 %v6390_v49 }
 0xbfa   : > { %5514 = vmatpush.bf16.msra.mxu3 %v6208_v9 }
 0xc54   : > { %v5377_v37 = vpop.xlane.xlu0 %5376 }
 0xc55   : > { %v5378_v12 = vmul.f32 %v5377_v37, %v9685_v57 }
 0xc57   : > { %v9451_v11 = vsub.f32 %v5373_v46, %v5378_v12  ;;  %v6209_v46 = vld [vmem:[#allocation17 + $0x8] sm:$0xf0]  ;;  %v6400_v12 = vld [vmem:[#allocation19 + $0x50] sm:$0xff] }
 0xc58   : > { %v6212_v38 = vor.u32 %v6374_v25, %v6209_v46  ;;  %5687 = vmatpush.bf16.msrb.mxu2 %v6400_v12 }
 0xc59   : > { %v5380_v10 = vmul.f32 %v9451_v11, %v9451_v11 }
 0xc5a   : > { %5527 = vmatpush.bf16.msra.mxu0 %v6212_v38 }
 0xc5b   : > { %5381 = vadd.xlane.f32.xlu2 %v5380_v10 }
 0xc5c   : > { %5688 = vmatpush.bf16.msrb.mxu2 %v6399_v22 }
 0xc60   : > { %5689 = vmatpush.bf16.msrb.mxu2 %v6398_v17 }
 0xcce   : > { %v5382_v31 = vpop.xlane.xlu2 %5381 }
 0xccf   : > { %v5383_v60 = vmul.f32 %v5382_v31, %v9685_v57 }
 0xcd1   : > { %v5384_v16 = vadd.f32 1e-05, %v5383_v60 }
 0xcd3   : > { %6993 = vrsqrt.f32 %v5384_v16  ;;  %vm5391_vm15 = vweird.f32 %v5384_v16 }
 0xcd9   : > { %v6994_v62 = vpop.eup %6993 }
 0xcda   : > { %v5386_v58 = vmul.f32 %v6994_v62, %v5384_v16  ;;  %vm5392_vm14 = vweird.f32 %v6994_v62 }
 0xcdb   : > { %vm5393_vm0 = vmor %vm5391_vm15, %vm5392_vm14 }
 0xcdc   : > { %v5387_v39 = vmul.f32 %v6994_v62, %v5386_v58 }
 0xcde   : > { %v5388_v13 = vmul.f32 0.5, %v5387_v39 }
 0xce0   : > { %v5389_v37 = vsub.f32 1.5, %v5388_v13 }
 0xce2   : > { %v5390_v10 = vmul.f32 %v6994_v62, %v5389_v37 }
 0xce4   : > { %v5394_v1 = vsel %vm5393_vm0, %v6994_v62, %v5390_v10 }
 0xce5   : > { %v5395_v35 = vmul.f32 %v5394_v1, %v9451_v11  ;;  %v5421_v11 = vld [vmem:[%s9688_s9] sm:$0x3]  ;;  %s7341_s9 = sshra.s32 %s5745_s26, 4  ;;  %s7342_s9 = int_to_ptr.hbm [resolvable:$true] %s7341_s9 }
 0xce6   : > { %v5424_v33 = vperm.slane %v5421_v11, 1  ;;  %v5423_v5 = vperm.slane %v5421_v11, 0  ;;  %s7343_s8 = scalar_lea.hbm %s7342_s9, 8  ;;  %p7348_p5 = scmp.lt.s32.totalorder %s7342_s9, %s9693_s0 }
 0xce7   : > { %v5399_v47 = vmul.f32 %v6952_v63, %v5395_v35  ;;  %p7344_p11 = scmp.ne.s32.totalorder %s7342_s9, %s7343_s8  ;;  %p7349_p7 = scmp.lt.s32.totalorder %s7347_s16, %s7343_s8 }
 0xce9   : > { %v5403_v55 = vadd.f32 %v6953_v19, %v5399_v47  ;;  %p7345_p12 = pnand %p7344_p11, %p7980_p10  ;;  %p7350_p8 = por %p7349_p7, %p7348_p5 }
 0xceb   : > { %v5404_v14 = vpack.c.bf16 %v5403_v55, %v5403_v55  ;;  %p7346_p2 = pneg %p7345_p12 }
 0xced   : > { %5515 = vmatmul.bf16.vlgmr.msra.gmra.mxu3 %v5404_v14  ;;  %5528 = vmatmul.bf16.vlgmr.msra.gmra.mxu0 %v5404_v14  ;;  %p7351_p6 = pnand %p7350_p8, %p7346_p2 }
 0xd6a   : > { %v5529_v23 = vpop.f32.mrf.mxu0 }
 0xd6b   : > { %v5530_v50 = vadd.f32 %v5529_v23, %v5424_v33 }
 0xd6d   : > { %v5534_v21 = vmax.f32 %v5530_v50, 0.0 }
 0xd6f   : > { %v5536_v24 = vpack.c.bf16 %v5534_v21, %v5534_v21 }
 0xd70   : > { %v5516_v29 = vpop.f32.mrf.mxu3 }
 0xd71   : > { %v5517_v3 = vadd.f32 %v5516_v29, %v5423_v5  ;;  %5690 = vmatmul.bf16.vlgmr.msrb.gmra.mxu2 %v5536_v24 }
 0xd72   : > { %v5531_v31 = vpop.f32.mrf.mxu0 }
 0xd73   : > { %v5533_v27 = vmax.f32 %v5517_v3, 0.0 }
 0xd75   : > { %v5535_v30 = vpack.c.bf16 %v5533_v27, %v5533_v27 }
 0xd77   : > { %5677 = vmatmul.bf16.vlgmr.msra.gmra.mxu1 %v5535_v30 }
 0xd78   : > { %v5518_v60 = vpop.f32.mrf.mxu3 }
 0xdf4   : > { %v5678_v18 = vpop.f32.mrf.mxu1  ;;  %v5691_v54 = vpop.f32.mrf.mxu2 }
 0xdf5   : > { %v5679_v26 = vadd.f32 %v6954_v41, %v5678_v18 }
 0xdf7   : > { %v5692_v16 = vadd.f32 %v5691_v54, %v5679_v26 }
 0xdf9   : > { %v5695_v56 = vadd.f32 %v5692_v16, %v5403_v55 }
 0xdfb   : > { %5698 = vadd.xlane.f32.xlu1 %v5695_v56 }
 0xdfc   : > { %v5680_v36 = vpop.f32.mrf.mxu1  ;;  %v5693_v40 = vpop.f32.mrf.mxu2 }
 0xe6e   : > { %v5699_v34 = vpop.xlane.xlu1 %5698 }
 0xe6f   : > { %v5700_v52 = vmul.f32 %v5699_v34, %v9685_v57 }
 0xe71   : > { %v5701_v4 = vsub.f32 %v5695_v56, %v5700_v52 }
 0xe73   : > { %v5702_v61 = vmul.f32 %v5701_v4, %v5701_v4 }
 0xe75   : > { %5703 = vadd.xlane.f32.xlu0 %v5702_v61 }
 0xee8   : > { %v5704_v43 = vpop.xlane.xlu0 %5703 }
 0xee9   : > { %v5705_v6 = vmul.f32 %v5704_v43, %v9685_v57  ;;  %v6955_v57 = vld [vmem:[%s9692_s19] ss:$0 sm:$0xff] }
 0xeeb   : > { %v5706_v48 = vadd.f32 1e-05, %v5705_v6 }
 0xeed   : > { %6995 = vrsqrt.f32 %v5706_v48  ;;  %vm5713_vm2 = vweird.f32 %v5706_v48 }
 0xef3   : > { %v6996_v15 = vpop.eup %6995 }
 0xef4   : > { %v5708_v8 = vmul.f32 %v6996_v15, %v5706_v48  ;;  %vm5714_vm1 = vweird.f32 %v6996_v15 }
 0xef5   : > { %vm5715_vm3 = vmor %vm5713_vm2, %vm5714_vm1 }
 0xef6   : > { %v5709_v44 = vmul.f32 %v6996_v15, %v5708_v8 }
 0xef8   : > { %v5710_v51 = vmul.f32 0.5, %v5709_v44 }
 0xefa   : > { %v5711_v2 = vsub.f32 1.5, %v5710_v51 }
 0xefc   : > { %v5712_v62 = vmul.f32 %v6996_v15, %v5711_v2 }
 0xefe   : > { %v5716_v45 = vsel %vm5715_vm3, %v6996_v15, %v5712_v62 }
 0xeff   : > { %v5717_v53 = vmul.f32 %v5716_v45, %v5701_v4 }
 0xf01   : > { %v5721_v28 = vmul.f32 %v6955_v57, %v5717_v53 }
 0xf03   : > { %v5725_v58 = vadd.f32 %v6956_v59, %v5721_v28 }
 0xf05   : > { %5726 = vst [vmem:[%s8097_s14] sm:$0xff] %v5725_v58 }
 0xf06   : > { %7354 = shalt.err (!%p7351_p6)
}
 0xf07   : > { %6440 = dma.vmem_to_hbm [thread:$0]  (%p7980_p10), %s5743_s25, 128, %s5745_s26, %s5728_s28  }
 0xf08 PF: > { %s9696_s15 = sld [smem:[#allocation29_spill]]  ;;  %p6494_p13 = scmp.ge.s32.totalorder %s7553_s7, 2 }
 0xf0a   : > { %p6478_p9 = pnand %p6494_p13, %p7986_p4 }
 0xf0c   : > { %p6479_p0 = pneg %p6478_p9 }
 0xf0e   : > { %s5756_s14 = sand.u32 1, %s9696_s15  }
 0xf0f   : > { %s5757_s22 = scalar_lea.sflag [#allocation4], %s5756_s14 }
 0xf10   : > { %7508 = dma.done.wait (%p6479_p0), %s5757_s22, 128  }
 0xf11   : > { %7510 = vsyncadd (%p6479_p0), %s5757_s22, 4294967168  ;;  %s48_s7 = sadd.s32 1, %s7553_s7   ;;  %s9697_s4 = sld [smem:[#allocation28_spill]] }
 0xf12   : > { %p45_p1 = scmp.ge.s32.totalorder %s48_s7, 6   ;;  %s9698_s12 = sld [smem:[#allocation40_spill]] }
 0xf13   : > { %s9699_s26 = sld [smem:[#allocation32_spill]]  ;;  %s9703_s30 = smov %s7521_s24 }
 0xf14   : > { %s9700_s2 = sld [smem:[#allocation33_spill]]  ;;  %s9704_s24 = smov %s7991_s11 }
 0xf15   : > { %s9701_s6 = sld [smem:[#allocation36_spill]]  ;;  %s9705_s25 = smov %s7529_s5 }
 0xf16   : > { %s9702_s27 = sld [smem:[#allocation37_spill]]  ;;  %s9706_s5 = smov %s7533_s1 }
 0xf17   :  { %47 = sbr.rel (!%p45_p1) target bundleno = 41 (0x29), region = 249 }
 0xf18   : > { %s9707_s1 = smov %s9698_s12 }
 0xf1c   :  { %5763 = vsyncpa [#allocation3], 1 }
 0xf1d   :  { %5765 = vsyncpa [#allocation3 + $0x1], 1 }
 0xf1e   :  { %5766 = vsyncpa [#allocation6], 1 }
 0xf1f   :  { %5768 = vsyncpa [#allocation6 + $0x1], 1 }
 0xf20   :  { %5769 = vsyncpa [#allocation9], 1 }
 0xf21   :  { %5771 = vsyncpa [#allocation9 + $0x1], 1 }
 0xf22   :  { %5772 = vsyncpa [#allocation12], 1 }
 0xf23   :  { %5773 = vsyncpa [#allocation15], 1 }
 0xf24   :  { %5774 = vsyncpa [#allocation18], 1 }
 0xf25   :  { %5775 = vsyncpa [#allocation4], 1 }
 0xf26   :  { %5777 = vsyncpa [#allocation4 + $0x1], 1 }

// kernel: tpu_custom_call.1
= control target key start
LH: loop header
LB: loop body
LE: loop exit
PB: predicated region body
PF: predicated region fallthrough
CT: control target
= control target key end

     0   :  { %s9532_s0 = inlined_call_operand.hbm [shape: f32[2,16,128], index: 0, kind: input, shape index: {}]   ;;  %s9533_s1 = inlined_call_operand.hbm [shape: bf16[2,16,128], index: 1, kind: input, shape index: {}]   ;;  %s9534_s2 = inlined_call_operand.hbm [shape: bf16[2,16,128], index: 2, kind: input, shape index: {}]   ;;  %s9535_s3 = inlined_call_operand.hbm [shape: bf16[2,16,128], index: 3, kind: input, shape index: {}]   ;;  %s9536_s4 = inlined_call_operand.hbm [shape: bf16[2,16,128], index: 4, kind: input, shape index: {}]   ;;  %s9537_s5 = inlined_call_operand.hbm [shape: bf16[128,128], index: 5, kind: input, shape index: {}]   ;;  %s9538_s6 = inlined_call_operand.vmem [shape: f32[1,128], index: 6, kind: input, shape index: {}]   ;;  %s9539_s7 = inlined_call_operand.hbm [shape: bf16[128,128], index: 7, kind: input, shape index: {}]   ;;  %s9540_s8 = inlined_call_operand.vmem [shape: f32[1,128], index: 8, kind: input, shape index: {}]   ;;  %s9541_s9 = inlined_call_operand.hbm [shape: bf16[128,128], index: 9, kind: input, shape index: {}]   ;;  %s9542_s10 = inlined_call_operand.vmem [shape: f32[1,128], index: 10, kind: input, shape index: {}]   ;;  %s9543_s11 = inlined_call_operand.hbm [shape: bf16[128,128], index: 11, kind: input, shape index: {}]   ;;  %s9544_s12 = inlined_call_operand.vmem [shape: f32[1,128], index: 12, kind: input, shape index: {}]   ;;  %s9545_s13 = inlined_call_operand.hbm [shape: bf16[128,256], index: 13, kind: input, shape index: {}]   ;;  %s9546_s14 = inlined_call_operand.vmem [shape: f32[1,256], index: 14, kind: input, shape index: {}]   ;;  %s9547_s15 = inlined_call_operand.hbm [shape: bf16[256,128], index: 15, kind: input, shape index: {}]   ;;  %s9548_s16 = inlined_call_operand.vmem [shape: f32[1,128], index: 16, kind: input, shape index: {}]   ;;  %s9549_s17 = inlined_call_operand.vmem [shape: f32[1,128], index: 17, kind: input, shape index: {}]   ;;  %s9550_s18 = inlined_call_operand.vmem [shape: f32[1,128], index: 18, kind: input, shape index: {}]   ;;  %s9551_s19 = inlined_call_operand.vmem [shape: f32[1,128], index: 19, kind: input, shape index: {}]   ;;  %s9552_s20 = inlined_call_operand.vmem [shape: f32[1,128], index: 20, kind: input, shape index: {}]   ;;  %s9553_s21 = inlined_call_operand.vmem [shape: f32[1,128], index: 21, kind: input, shape index: {}]   ;;  %s9554_s22 = inlined_call_operand.vmem [shape: f32[1,128], index: 22, kind: input, shape index: {}]   ;;  %s9555_s23 = inlined_call_operand.hbm [shape: f32[2,16,128], index: 23, kind: output, shape index: {}]  }
   0x1   :  { %9580 = sst [smem:[#allocation42_spill]] %s9532_s0 }
   0x2   :  { %9581 = sst [smem:[#allocation43_spill]] %s9533_s1 }
   0x3   :  { %9582 = sst [smem:[#allocation44_spill]] %s9534_s2 }
   0x4   :  { %9583 = sst [smem:[#allocation45_spill]] %s9535_s3 }
   0x5   :  { %9584 = sst [smem:[#allocation46_spill]] %s9536_s4 }
   0x6   :  { %9585 = sst [smem:[#allocation47_spill]] %s9537_s5 }
   0x7   :  { %9586 = sst [smem:[#allocation48_spill]] %s9538_s6 }
   0x8   :  { %9587 = sst [smem:[#allocation49_spill]] %s9539_s7 }
   0x9   :  { %9588 = sst [smem:[#allocation50_spill]] %s9540_s8 }
   0xa   :  { %9589 = sst [smem:[#allocation51_spill]] %s9541_s9 }
   0xb   :  { %9590 = sst [smem:[#allocation52_spill]] %s9542_s10 }
   0xc   :  { %9591 = sst [smem:[#allocation53_spill]] %s9543_s11 }
   0xd   :  { %9592 = sst [smem:[#allocation54_spill]] %s9544_s12 }
   0xe   :  { %9593 = sst [smem:[#allocation55_spill]] %s9545_s13 }
   0xf   :  { %9594 = sst [smem:[#allocation56_spill]] %s9546_s14 }
  0x10   :  { %9595 = sst [smem:[#allocation57_spill]] %s9547_s15 }
  0x11   :  { %9596 = sst [smem:[#allocation58_spill]] %s9548_s16 }
  0x12   :  { %9597 = sst [smem:[#allocation59_spill]] %s9549_s17 }
  0x13   :  { %9598 = sst [smem:[#allocation60_spill]] %s9550_s18 }
  0x14   :  { %9599 = sst [smem:[#allocation61_spill]] %s9551_s19 }
  0x15   :  { %9600 = sst [smem:[#allocation62_spill]] %s9552_s20 }
  0x16   :  { %9601 = sst [smem:[#allocation63_spill]] %s9553_s21 }
  0x17   :  { %9602 = sst [smem:[#allocation64_spill]] %s9554_s22 }
  0x18   :  { %9603 = sst [smem:[#allocation65_spill]] %s9555_s23 }
  0x19   :  { %28 = vsyncpa [#allocation3], 0 }
  0x1a   :  { %30 = vsyncpa [#allocation3 + $0x1], 0 }
  0x1b   :  { %31 = vsyncpa [#allocation6], 0 }
  0x1c   :  { %33 = vsyncpa [#allocation6 + $0x1], 0 }
  0x1d   :  { %34 = vsyncpa [#allocation9], 0 }
  0x1e   :  { %36 = vsyncpa [#allocation9 + $0x1], 0 }
  0x1f   :  { %37 = vsyncpa [#allocation12], 0 }
  0x20   :  { %38 = vsyncpa [#allocation15], 0 }
  0x21   :  { %39 = vsyncpa [#allocation18], 0 }
  0x22   :  { %40 = vsyncpa [#allocation4], 0 }
  0x23   :  { %42 = vsyncpa [#allocation4 + $0x1], 0  ;;  %s7780_s4 = smov 0   ;;  %s7782_s30 = smov 0  }
  0x24   :  { %s7784_s24 = smov 0   ;;  %s7786_s25 = smov 0  }
  0x25   :  { %s7788_s5 = smov 0   ;;  %s7790_s1 = smov 0  }
  0x26   :  { %s7792_s26 = smov 0   ;;  %s7794_s2 = smov 0  }
  0x27   :  { %s7796_s6 = smov 0   ;;  %s7798_s27 = smov 0  }
  0x28   :  { %s7800_s7 = smov 0  }
  0x29 LB: > { %9604 = sst [smem:[#allocation28_spill]] %s7517_s30  ;;  %s7836_s28 = sadd.s32 4294967295, %s7553_s7   ;;  %s7553_s7 = sphi %s7800_s7, %s48_s7   ;;  %s7549_s27 = sphi %s7798_s27, %s9702_s27   ;;  %s7545_s6 = sphi %s7796_s6, %s9701_s6   ;;  %s7541_s2 = sphi %s7794_s2, %s9700_s2   ;;  %s7537_s26 = sphi %s7792_s26, %s9699_s26   ;;  %s7533_s1 = sphi %s7790_s1, %s9707_s1   ;;  %s7529_s5 = sphi %s7788_s5, %s9706_s5   ;;  %s7525_s25 = sphi %s7786_s25, %s9705_s25   ;;  %s7521_s24 = sphi %s7784_s24, %s9704_s24   ;;  %s7517_s30 = sphi %s7782_s30, %s9703_s30   ;;  %s7513_s4 = sphi %s7780_s4, %s9697_s4  }
  0x2a   : > { %9605 = sst [smem:[#allocation29_spill]] %s7525_s25  ;;  %p6020_p0 = scmp.ge.s32.totalorder %s7553_s7, 1 }
  0x2b   : > { %9606 = sst [smem:[#allocation30_spill]] %s7537_s26  ;;  %p83_p1 = scmp.eq.s32.totalorder %s7836_s28, 0 }
  0x2c   : > { %9607 = sst [smem:[#allocation31_spill]] %s7541_s2  ;;  %p603_p2 = scmp.lt.s32.totalorder %s7553_s7, 5 }
  0x2d   : > { %9608 = sst [smem:[#allocation32_spill]] %s7545_s6  ;;  %s7639_s21 = smov [#allocation11]  }
  0x2e   : > { %9609 = sst [smem:[#allocation33_spill]] %s7549_s27  ;;  %p7844_p3 = pnand %p6020_p0, %p603_p2 }
  0x2f   : > { %9610 = sst [smem:[#allocation34_spill]] %s7836_s28  ;;  %s616_s2 = sshll.u32 %s7639_s21, 4  ;;  %s617_s2 = int_to_ptr.vmem [resolvable:$true] %s616_s2 }
  0x30   : > { %s9611_s0 = sld [smem:[#allocation47_spill]]  ;;  %p6442_p4 = pneg %p7844_p3 }
  0x31   : > { %s9614_s9 = sld [smem:[#allocation51_spill]]  ;;  %s9557_s3 = smov 64  }
  0x32   : > { %p7852_p5 = pnand %p6442_p4, %p83_p1  ;;  %s7642_s21 = smov [#allocation14]  }
  0x33   : > { %s650_s14 = sshll.u32 %s7642_s21, 4  ;;  %s9615_s13 = sld [smem:[#allocation55_spill]]  ;;  %s651_s14 = int_to_ptr.vmem [resolvable:$true] %s650_s14 }
  0x34   : > { %s7644_s12 = smov 128   ;;  %s7645_s21 = smov 8  }
  0x35   : > { %p77_p6 = scmp.eq.s32.totalorder %s7553_s7, 0  ;;  %p102_p7 = scmp.ne.s32.totalorder %s7521_s24, %s7517_s30 }
  0x36   : > { %s614_s22 = sshll.u32 %s9611_s0, 4  ;;  %s9559_s0 = smov 4   ;;  %s615_s22 = int_to_ptr.hbm [resolvable:$true] %s614_s22 }
  0x37   : > { %s648_s29 = sshll.u32 %s9614_s9, 4  ;;  %p108_p8 = scmp.ne.s32.totalorder %s7517_s30, %s7513_s4  ;;  %s649_s29 = int_to_ptr.hbm [resolvable:$true] %s648_s29 }
  0x38   : > { %6445 = dma.hbm_to_vmem [thread:$0]  (!%p7852_p5), %s615_s22, 1024, %s617_s2, [#allocation12], %s9557_s3, %s9557_s3, %s9559_s0  }
  0x39   : > { %s682_s19 = sshll.u32 %s9615_s13, 4  ;;  %s7643_s22 = smov [#allocation17]   ;;  %s683_s19 = int_to_ptr.hbm [resolvable:$true] %s682_s19 }
  0x3a   : > { %6451 = dma.hbm_to_vmem [thread:$0]  (!%p7852_p5), %s649_s29, 1024, %s651_s14, [#allocation15], %s9557_s3, %s9557_s3, %s9559_s0  }
  0x3b   : > { %s684_s2 = sshll.u32 %s7643_s22, 4  ;;  %p9565_p9 = scmp.lt.s32.totalorder %s7553_s7, 4  ;;  %s685_s2 = int_to_ptr.vmem [resolvable:$true] %s684_s2 }
  0x3c   : > { %6457 = dma.hbm_to_vmem [thread:$0]  (!%p7852_p5), %s683_s19, 2048, %s685_s2, [#allocation18], %s7644_s12, %s7644_s12, %s7645_s21  }
  0x3d   : > { %s757_s9 = sand.u32 1, %s7553_s7   ;;  %p104_p10 = por %p102_p7, %p77_p6 }
  0x3e   : > { %p7885_p11 = por %p108_p8, %p83_p1  ;;  %s759_s29 = sand.u32 1, %s7521_s24  }
  0x3f   : > { %s7890_s14 = sshll.u32 %s759_s29, 3  ;;  %s7893_s22 = sshll.u32 %s7549_s27, 3 }
  0x40   : > { %s9616_s20 = scalar_select %p7885_p11, 1, 0 }
  0x41   : > { %s9618_s4 = sld [smem:[#allocation43_spill]]  ;;  %s761_s3 = scalar_lea.vmem [#allocation5], %s7890_s14 }
  0x42   : > { %9617 = sst [smem:[#allocation35_spill]] %s9616_s20  ;;  %s769_s0 = sshll.u32 %s761_s3, 4  ;;  %s770_s0 = int_to_ptr.vmem [resolvable:$true] %s769_s0 }
  0x43   : > { %p7902_p12 = pnand %p9565_p9, %p104_p10  ;;  %s9620_s18 = sld [smem:[#allocation45_spill]] }
  0x44   : > { %s7910_s12 = scalar_lea.sflag [#allocation6], %s757_s9  ;;  %s9621_s19 = smov 4  }
  0x45   : > { %s9622_s3 = smov 64   ;;  %s9623_s10 = sld [smem:[#allocation49_spill]] }
  0x46   : > { %s9624_s11 = sld [smem:[#allocation53_spill]]  ;;  %p76_p0 = scmp.ne.s32.totalorder %s7533_s1, %s7529_s5 }
  0x47   : > { %s766_s2 = scalar_lea.hbm %s9618_s4, %s7893_s22  ;;  %s805_s4 = scalar_lea.vmem [#allocation8], %s7890_s14 }
  0x48   : > { %s767_s21 = sshll.u32 %s766_s2, 4  ;;  %s813_s2 = sshll.u32 %s805_s4, 4  ;;  %s768_s21 = int_to_ptr.hbm [resolvable:$true] %s767_s21  ;;  %s814_s2 = int_to_ptr.vmem [resolvable:$true] %s813_s2 }
  0x49   : > { %s810_s17 = scalar_lea.hbm %s9620_s18, %s7893_s22  ;;  %s7922_s18 = scalar_lea.sflag [#allocation9], %s757_s9 }
  0x4a   : > { %s811_s8 = sshll.u32 %s810_s17, 4  ;;  %s7646_s17 = smov [#allocation13]   ;;  %s812_s8 = int_to_ptr.hbm [resolvable:$true] %s811_s8 }
  0x4b   : > { %6467 = dma.hbm_to_vmem [thread:$0]  (!%p7902_p12), %s768_s21, 128, %s770_s0, %s7910_s12, %s9622_s3, %s9622_s3, %s9621_s19  }
  0x4c   : > { %s631_s29 = sshll.u32 %s9623_s10, 4  ;;  %s633_s0 = sshll.u32 %s7646_s17, 4  ;;  %s632_s29 = int_to_ptr.hbm [resolvable:$true] %s631_s29  ;;  %s634_s0 = int_to_ptr.vmem [resolvable:$true] %s633_s0 }
  0x4d   : > { %6473 = dma.hbm_to_vmem [thread:$0]  (!%p7902_p12), %s812_s8, 128, %s814_s2, %s7922_s18, %s9622_s3, %s9622_s3, %s9621_s19  }
  0x4e   : > { %s665_s26 = sshll.u32 %s9624_s11, 4  ;;  %s9625_s15 = sld [smem:[#allocation57_spill]]  ;;  %s666_s26 = int_to_ptr.hbm [resolvable:$true] %s665_s26 }
  0x4f   : > { %6448 = dma.hbm_to_vmem [thread:$0]  (!%p7852_p5), %s632_s29, 1024, %s634_s0, [#allocation12], %s9622_s3, %s9622_s3, %s9621_s19  }
  0x50   : > { %s7647_s2 = smov [#allocation16]   ;;  %s7648_s29 = smov [#allocation19]  }
  0x51   : > { %s667_s10 = sshll.u32 %s7647_s2, 4  ;;  %s701_s17 = sshll.u32 %s7648_s29, 4  ;;  %s668_s10 = int_to_ptr.vmem [resolvable:$true] %s667_s10  ;;  %s702_s17 = int_to_ptr.vmem [resolvable:$true] %s701_s17 }
  0x52   : > { %6454 = dma.hbm_to_vmem [thread:$0]  (!%p7852_p5), %s666_s26, 1024, %s668_s10, [#allocation15], %s9622_s3, %s9622_s3, %s9621_s19  }
  0x53   : > { %s6019_s0 = sadd.s32 4294967294, %s7553_s7   ;;  %s57_s21 = sadd.s32 1, %s7545_s6 }
  0x54   : > { %s699_s20 = sshll.u32 %s9625_s15, 4  ;;  %p58_p13 = scmp.ge.s32.totalorder %s57_s21, 2  ;;  %s700_s20 = int_to_ptr.hbm [resolvable:$true] %s699_s20 }
  0x55   : > { %6460 = dma.hbm_to_vmem [thread:$0]  (!%p7852_p5), %s700_s20, 2048, %s702_s17, [#allocation18], %s9622_s3, %s9622_s3, %s9621_s19  }
  0x56   : > { %s60_s4 = sadd.s32 1, %s7549_s27  ;;  %s69_s8 = sadd.s32 1, %s7533_s1 }
  0x57   : > { %s9709_s21 = smov (%p58_p13, %s57_s21), 0  ;;  %s9711_s4 = smov (!%p58_p13, %s60_s4), %s7549_s27 }
  0x58   : > { %9626 = sst [smem:[#allocation36_spill]] %s9709_s21  ;;  %s65_s26 = ssub.s32 %s7545_s6, %s9709_s21 }
  0x59   : > { %p7964_p2 = por %p77_p6, %p76_p0  ;;  %p62_p4 = scmp.ge.s32.totalorder %s9711_s4, 2 }
  0x5a   : > { %p82_p5 = scmp.ne.s32.totalorder %s7529_s5, %s7525_s25  ;;  %s95_s9 = sadd.s32 1, %s7521_s24 }
  0x5b   : > { %p590_p7 = scmp.eq.s32.totalorder %s7836_s28, 3  ;;  %s9713_s4 = smov (%p62_p4, %s9711_s4), 0 }
  0x5c   : > { %9628 = sst [smem:[#allocation37_spill]] %s9713_s4  ;;  %p7976_p8 = por %p83_p1, %p82_p5 }
  0x5d   : > { %p7980_p10 = por %p590_p7, %p76_p0  ;;  %s64_s10 = ssub.s32 %s7549_s27, %s9713_s4 }
  0x5e   : > { %s9629_s20 = scalar_select %p7976_p8, 1, 0 }
  0x5f   : > { %s9631_s2 = scalar_select %p7980_p10, 1, 0 }
  0x60   : > { %9630 = sst [smem:[#allocation38_spill]] %s9629_s20  ;;  %p596_p6 = scmp.eq.s32.totalorder %s6019_s0, 3 }
  0x61   : > { %9632 = sst [smem:[#allocation39_spill]] %s9631_s2  ;;  %s66_s29 = sor.u32 %s65_s26, %s64_s10 }
  0x62   : > { %p93_p13 = scmp.eq.s32.totalorder %s64_s10, 0  ;;  %p67_p9 = scmp.eq.s32.totalorder %s66_s29, 0 }
  0x63   : > { %p7986_p4 = por %p596_p6, %p82_p5  ;;  %s736_s21 = sand.u32 1, %s7533_s1  }
  0x64   : > { %s7991_s11 = scalar_select %p93_p13, %s7521_s24, %s95_s9  }
  0x65   : > { %s7994_s15 = scalar_select %p67_p9, %s7533_s1, %s69_s8  }
  0x66   : > { %s6029_s25 = sshll.u32 %s7549_s27, 1  ;;  %s6028_s2 = sshll.u32 %s736_s21, 3 }
  0x67   : > { %9634 = sst [smem:[#allocation40_spill]] %s7994_s15  ;;  %s744_s4 = sadd.s32 %s7545_s6, %s6029_s25 }
  0x68   : > { %s6030_s0 = sshll.u32 %s744_s4, 3  ;;  %s740_s26 = scalar_lea.vmem [#allocation2], %s6028_s2 }
  0x69   : > { %s750_s10 = sshll.u32 %s740_s26, 4  ;;  %s9635_s28 = sld [smem:[#allocation42_spill]]  ;;  %s751_s10 = int_to_ptr.vmem [resolvable:$true] %s750_s10 }
  0x6a   : > { %p9636_p9 = scmp.lt.s32.totalorder %s7553_s7, 4  ;;  %s9637_s25 = sld [smem:[#allocation44_spill]] }
  0x6b   : > { %s737_s2 = scalar_lea.sflag [#allocation3], %s736_s21  ;;  %s783_s6 = scalar_lea.vmem [#allocation7], %s7890_s14 }
  0x6c   : > { %p6462_p0 = pnand %p9636_p9, %p7964_p2  ;;  %s791_s15 = sshll.u32 %s783_s6, 4  ;;  %s792_s15 = int_to_ptr.vmem [resolvable:$true] %s791_s15 }
  0x6d   : > { %s9638_s16 = sld [smem:[#allocation46_spill]] }
  0x6f   : > { %s746_s20 = scalar_lea.hbm %s9635_s28, %s6030_s0  ;;  %s827_s0 = scalar_lea.vmem [#allocation10], %s7890_s14 }
  0x70   : > { %s748_s9 = sshll.u32 %s746_s20, 4  ;;  %s788_s4 = scalar_lea.hbm %s9637_s25, %s7893_s22  ;;  %s749_s9 = int_to_ptr.hbm [resolvable:$true] %s748_s9 }
  0x71   : > { %6464 = dma.hbm_to_vmem [thread:$0]  (!%p6462_p0), %s749_s9, 128, %s751_s10, %s737_s2  }
  0x72   : > { %s789_s26 = sshll.u32 %s788_s4, 4  ;;  %s835_s29 = sshll.u32 %s827_s0, 4  ;;  %s790_s26 = int_to_ptr.hbm [resolvable:$true] %s789_s26  ;;  %s836_s29 = int_to_ptr.vmem [resolvable:$true] %s835_s29 }
  0x73   : > { %6470 = dma.hbm_to_vmem [thread:$0]  (!%p7902_p12), %s790_s26, 128, %s792_s15, %s7910_s12, %s9622_s3, %s9622_s3, %s9621_s19  }
  0x74   : > { %s832_s20 = scalar_lea.hbm %s9638_s16, %s7893_s22  ;;  %847 = sbr.rel (%p7844_p3) target bundleno = 3848 (0xf08), region = 112 }
  0x75   : > { %s833_s27 = sshll.u32 %s832_s20, 4  ;;  %s834_s27 = int_to_ptr.hbm [resolvable:$true] %s833_s27 }
  0x76   : > { %6476 = dma.hbm_to_vmem [thread:$0]  (!%p7902_p12), %s834_s27, 128, %s836_s29, %s7922_s18, %s9622_s3, %s9622_s3, %s9621_s19  }
  0x79   : > { %s8031_s15 = sand.u32 1, %s7529_s5  }
  0x7a   : > { %s6044_s22 = sshll.u32 %s8031_s15, 3  ;;  %s850_s14 = scalar_lea.sflag [#allocation3], %s8031_s15 }
  0x7b   : > { %s8037_s12 = scalar_lea.vmem [#allocation2], %s6044_s22 }
  0x7c   : > { %7484 = dma.done.wait (%p7976_p8), %s850_s14, 128  }
  0x7d   : > { %7486 = vsyncadd (%p7976_p8), %s850_s14, 4294967168  ;;  %s9640_s13 = sld [smem:[#allocation34_spill]] }
  0x7e   : > { %s9641_s23 = sld [smem:[#allocation28_spill]] }
  0x83   : > { %s859_s3 = sand.u32 1, %s9640_s13  }
  0x84   : > { %s861_s18 = sand.u32 1, %s9641_s23   ;;  %s860_s10 = scalar_lea.sflag [#allocation6], %s859_s3 }
  0x85   : > { %s8045_s21 = sshll.u32 %s861_s18, 3 }
  0x86   : > { %s863_s9 = scalar_lea.vmem [#allocation5], %s8045_s21 }
  0x87   : > { %7488 = dma.done.wait (%p7885_p11), %s860_s10, 256  }
  0x88   : > { %7490 = vsyncadd (%p7885_p11), %s860_s10, 4294967040  ;;  %s873_s8 = scalar_lea.vmem [#allocation7], %s8045_s21  ;;  %s880_s25 = scalar_lea.sflag [#allocation9], %s859_s3 }
  0x89   : > { %s883_s4 = scalar_lea.vmem [#allocation8], %s8045_s21 }
  0x8a   : > { %7492 = dma.done.wait (%p7885_p11), %s880_s25, 256  }
  0x8b   : > { %7494 = vsyncadd (%p7885_p11), %s880_s25, 4294967040  ;;  %s893_s2 = scalar_lea.vmem [#allocation10], %s8045_s21 }
  0x8c   : > { %7496 = dma.done.wait (%p83_p1), [#allocation12], 2048  }
  0x8d   : > { %7498 = vsyncadd (%p83_p1), [#allocation12], 4294965248 }
  0x8e   : > { %7500 = dma.done.wait (%p83_p1), [#allocation15], 2048  }
  0x8f   : > { %7502 = vsyncadd (%p83_p1), [#allocation15], 4294965248 }
  0x90   : > { %7504 = dma.done.wait (%p83_p1), [#allocation18], 4096  }
  0x91   : > { %7506 = vsyncadd (%p83_p1), [#allocation18], 4294963200  ;;  %s9643_s26 = sld [smem:[#allocation30_spill]]  ;;  %v6349_v0 = vld [vmem:[#allocation11 + $0x38] sm:$0xff]  ;;  %v6348_v1 = vld [vmem:[#allocation11 + $0x30] sm:$0xff]  ;;  %s7649_s0 = smov 32  }
  0x92   : > { %1079 = vmatpush.bf16.msra.mxu0 %v6349_v0  ;;  %v6347_v2 = vld [vmem:[#allocation11 + $0x28] sm:$0xff]  ;;  %v6346_v3 = vld [vmem:[#allocation11 + $0x20] sm:$0xff]  ;;  %v6345_v4 = vld [vmem:[#allocation11 + $0x18] sm:$0xff]  ;;  %s9644_s20 = sld [smem:[#allocation48_spill]]  ;;  %s7650_s29 = smov 96   ;;  %v8101_v19 = vmov 0.0  }
  0x93   : > { %v6344_v5 = vld [vmem:[#allocation11 + $0x10] sm:$0xff]  ;;  %v6343_v6 = vld [vmem:[#allocation11 + $0x8] sm:$0xff]  ;;  %v6342_v7 = vld [vmem:[#allocation11] sm:$0xff]  ;;  %s7651_s6 = smov 64   ;;  %s8097_s14 = scalar_lea.vmem [#allocation20], %s6044_s22  ;;  %v8103_v20 = vmov 0.0  }
  0x94   : > { %v8073_v8 = vld [vmem:[%s8037_s12] sm:$0xff]  ;;  %v8105_v21 = vmov 0.0   ;;  %v8107_v22 = vmov 0.0   ;;  %v8109_v23 = vmov 0.0   ;;  %v8111_v24 = vmov 0.0  }
  0x95   : > { %v1010_v9 = vpack.c.bf16 %v8073_v8, %v8073_v8  ;;  %v8113_v25 = vmov 0.0   ;;  %v8115_v26 = vmov 0.0  }
  0x96   : > { %1080 = vmatpush.bf16.msra.mxu0 %v6348_v1 }
  0x97   : > { %s6056_s30 = sshll.u32 %s9643_s26, 3  ;;  %s1101_s27 = sadd.s32 1, %s9643_s26 }
  0x98   : > { %v6774_v10 = vld [vmem:[%s9644_s20] ss:$0 sm:$0xff]  ;;  %p6089_p1 = scmp.le.s32.totalorder %s1101_s27, 0 }
  0x99   : > { %s8141_s22 = smov (!%p6089_p1), 0  }
  0x9a   : > { %1081 = vmatpush.bf16.msra.mxu0 %v6347_v2 }
  0x9e   : > { %1082 = vmatpush.bf16.msra.mxu0 %v6346_v3 }
  0xa2   : > { %1083 = vmatpush.bf16.msra.mxu0 %v6345_v4 }
  0xa6   : > { %1084 = vmatpush.bf16.msra.mxu0 %v6344_v5 }
  0xaa   : > { %1085 = vmatpush.bf16.msra.mxu0 %v6343_v6 }
  0xae   : > { %1086 = vmatpush.bf16.msra.mxu0 %v6342_v7 }
  0xb1   : > { %1087 = vmatmul.bf16.vlgmr.msra.gmra.mxu0 %v1010_v9 }
 0x12e   : > { %v1088_v11 = vpop.f32.mrf.mxu0 }
 0x12f   : > { %v1089_v12 = vadd.f32 %v6774_v10, %v1088_v11 }
 0x131   : > { %v1092_v13 = vmul.f32 0.17677669, %v1089_v12 }
 0x133   : > { %v8081_v14 = vpack.c.bf16 %v1092_v13, %v1092_v13 }
 0x135   : > { %1099 = vrot.lane.b32.xlu1 %v8081_v14, %s7649_s0  ;;  %1095 = vrot.lane.b32.xlu0 %v8081_v14, %s7650_s29 }
 0x136   : > { %v1090_v15 = vpop.f32.mrf.mxu0 }
 0x13d   : > { %1097 = vrot.lane.b32.xlu0 %v8081_v14, %s7651_s6 }
 0x1a7   : > { %v8089_v16 = vpop.permute.xlu1 %1099  ;;  %v8091_v17 = vpop.permute.xlu0 %1095 }
 0x1ab   : > { %5866 = sbr.rel (%p6089_p1) target bundleno = 1466 (0x5ba), region = 232 }
 0x1af   : > { %v8093_v18 = vpop.permute.xlu0 %1097 }
 0x1b0   : > { %v8117_v27 = vmov 0.0   ;;  %v8119_v28 = vmov 0.0   ;;  %v8121_v29 = vmov 0.0   ;;  %v8123_v30 = vmov 0.0  }
 0x1b1   : > { %v8125_v31 = vmov 0.0   ;;  %v8127_v32 = vmov 0.0   ;;  %v8129_v33 = vmov 0.0   ;;  %v8131_v34 = vmov 0.0  }
 0x1b2   : > { %v8133_v35 = vmov -1e+30   ;;  %v8135_v36 = vmov -1e+30   ;;  %v8137_v37 = vmov -1e+30  }
 0x1b3   : > { %v8139_v38 = vmov -1e+30  }
 0x1b4 LB: >> { %s6090_s12 = sshll.u32 %s7605_s22, 3  ;;  %s7652_s3 = smov 96   ;;  %v7655_v40 = vmov 1983009808   ;;  %v7656_v52 = vmov 1934713408   ;;  %s7605_s22 = sphi %s8141_s22, %s1105_s22   ;;  %v7601_v38 = vphi %v8139_v38, %v9658_v38   ;;  %v7597_v37 = vphi %v8137_v37, %v9657_v37   ;;  %v7593_v36 = vphi %v8135_v36, %v9656_v36   ;;  %v7589_v35 = vphi %v8133_v35, %v9655_v35   ;;  %v7585_v34 = vphi %v8131_v34, %v9654_v34   ;;  %v7581_v33 = vphi %v8129_v33, %v9653_v33   ;;  %v7577_v32 = vphi %v8127_v32, %v9652_v32   ;;  %v7573_v31 = vphi %v8125_v31, %v9651_v31   ;;  %v7569_v30 = vphi %v8123_v30, %v9650_v30   ;;  %v7565_v29 = vphi %v8121_v29, %v9649_v29   ;;  %v7561_v28 = vphi %v8119_v28, %v9648_v28   ;;  %v7557_v27 = vphi %v8117_v27, %v9647_v27  }
 0x1b5   : >> { %s8185_s13 = sshra.s32 %s6090_s12, 3  ;;  %s7653_s18 = smov 32   ;;  %v1147_v41 = vunpack.c.l.s4 %v7655_v40  ;;  %v1161_v53 = vunpack.c.l.s4 %v7656_v52  ;;  %vm1156_vm0 = vcmask 1047556   ;;  %vm2392_vm1 = vcmask 261120  }
 0x1b6   : >> { %s6091_s23 = sshll.u32 %s8185_s13, 2  ;;  %s7654_s10 = smov 64   ;;  %vm2472_vm3 = vcmask 64512   ;;  %vm2594_vm4 = vcmask 1043456  }
 0x1b7   : >> { %s1124_s19 = scalar_lea.vmem %s863_s9, %s6091_s23 [#allocation5]  ;;  %v8195_v45 = vunpack.c.0.s8 %v1147_v41  ;;  %v8200_v60 = vunpack.c.0.s8 %v1161_v53  ;;  %s1199_s25 = scalar_lea.vmem %s873_s8, %s6091_s23 [#allocation7] }
 0x1b8   : >> { %v1125_v39 = vld [vmem:[%s1124_s19] sm:$0xf]  ;;  %s1105_s22 = sadd.s32 1, %s7605_s22  }
 0x1b9   : >> { %1127 = vrot.lane.b32.xlu0 %v1125_v39, %s7652_s3  ;;  %1131 = vrot.lane.b32.xlu1 %v1125_v39, %s7653_s18  ;;  %v1136_v43 = vshrl.u32 %v1125_v39, 16  ;;  %p8512_p3 = scmp.ge.s32.totalorder %s1105_s22, %s1101_s27 }
 0x1c1   : >> { %1129 = vrot.lane.b32.xlu0 %v1125_v39, %s7654_s10 }
 0x22b   : >> { %v1128_v42 = vpop.permute.xlu0 %1127  ;;  %v1132_v47 = vpop.permute.xlu1 %1131 }
 0x22c   : >> { %v1137_v44 = vshrl.u32 %v1128_v42, 16  ;;  %v1135_v46 = vpack.i.b16 %v1128_v42, %v1125_v39  ;;  %v1143_v50 = vshrl.u32 %v1132_v47, 16 }
 0x22e   : >> { %v1138_v48 = vpack.i.b16 %v1137_v44, %v1136_v43  ;;  %v1149_v49 = vperm.slane %v1135_v46, %v8195_v45 }
 0x230   : >> { %v1176_v54 = vperm.slane %v1138_v48, %v8195_v45  ;;  %v1158_v57 = vrot.slane %v1149_v49, 4 }
 0x232   : >> { %v1184_v61 = vrot.slane %v1176_v54, 4 }
 0x233   : >> { %v1130_v51 = vpop.permute.xlu0 %1129 }
 0x234   : >> { %v1141_v55 = vpack.i.b16 %v1132_v47, %v1130_v51  ;;  %v1142_v56 = vshrl.u32 %v1130_v51, 16 }
 0x236   : >> { %v1144_v58 = vpack.i.b16 %v1143_v50, %v1142_v56  ;;  %v1154_v59 = vperm.slane %v1141_v55, %v8195_v45 }
 0x238   : >> { %v1155_v62 = vrot.slane %v1154_v59, 4  ;;  %v1181_v63 = vperm.slane %v1144_v58, %v8195_v45  ;;  %v1159_v0 = vsel %vm1156_vm0, %v1154_v59, %v1158_v57 }
 0x239   : >> { %v1167_v4 = vperm.slane %v1159_v0, %v8200_v60 }
 0x23a   : >> { %v1185_v1 = vsel %vm1156_vm0, %v1181_v63, %v1184_v61  ;;  %v1157_v2 = vsel %vm1156_vm0, %v1155_v62, %v1149_v49  ;;  %v1182_v3 = vrot.slane %v1181_v63, 4 }
 0x23b   : >> { %v1193_v5 = vperm.slane %v1185_v1, %v8200_v60  ;;  %v1163_v6 = vperm.slane %v1157_v2, %v8200_v60  ;;  %v1170_v15 = vrot.slane %v1167_v4, 4 }
 0x23c   : >> { %v1183_v7 = vsel %vm1156_vm0, %v1182_v3, %v1176_v54 }
 0x23d   : >> { %6775 = vxpose.binary.xlu1.c.b16.start.end [1/2] (short) (narrow) %v1193_v5, %v1167_v4, 32  ;;  %v1168_v9 = vrot.slane %v1163_v6, 4  ;;  %v1189_v10 = vperm.slane %v1183_v7, %v8200_v60  ;;  %v1196_v19 = vrot.slane %v1193_v5, 4  ;;  %v1171_v20 = vsel %vm1156_vm0, 0, %v1170_v15 }
 0x23f   : >> { %6780 = vxpose.binary.xlu2.c.b16.start.end [1/2] (short) (narrow) %v1189_v10, %v1163_v6, 32  ;;  %v1194_v11 = vrot.slane %v1189_v10, 4  ;;  %v1169_v12 = vsel %vm1156_vm0, 0, %v1168_v9  ;;  %v1197_v21 = vsel %vm1156_vm0, 0, %v1196_v19 }
 0x241   : >> { %v1195_v13 = vsel %vm1156_vm0, 0, %v1194_v11 }
 0x242   : >> { %6790 = vxpose.binary.xlu0.c.b16.start.end [1/2] (short) (narrow) %v1195_v13, %v1169_v12, 32 }
 0x25f   : >> { %6785 = vxpose.binary.xlu2.c.b16.start.end [1/2] (short) (narrow) %v1197_v21, %v1171_v20, 32 }
 0x2e0   : >> { %v6781_v22 = vpop.trf.xlu2 }
 0x2e1   : >> { %v1404_v50 = vshrl.u32 %v6781_v22, 16 }
 0x2e8   : >> { %v6782_v23 = vpop.trf.xlu2 }
 0x2e9   : >> { %v6776_v24 = vpop.trf.xlu1  ;;  %v1405_v47 = vshrl.u32 %v6782_v23, 16  ;;  %v1402_v52 = vpack.i.b16 %v6782_v23, %v6781_v22 }
 0x2ea   : >> { %v1420_v41 = vshrl.u32 %v6776_v24, 16 }
 0x2eb   : >> { %v1406_v53 = vpack.i.b16 %v1405_v47, %v1404_v50  ;;  %v1466_v6 = vrot.slane %v1402_v52, 4 }
 0x2ed   : >> { %v1522_v13 = vrot.slane %v1406_v53, 4 }
 0x2ee   : >> { %v6791_v40 = vpop.trf.xlu0 }
 0x2ef   : >> { %v1412_v57 = vshrl.u32 %v6791_v40, 16 }
 0x2f0   : >> { %v8215_v25 = vpop.trf.xlu2 }
 0x2f1   : >> { %v6777_v39 = vpop.trf.xlu1 }
 0x2f2   : >> { %v1421_v42 = vshrl.u32 %v6777_v39, 16  ;;  %v1418_v43 = vpack.i.b16 %v6777_v39, %v6776_v24 }
 0x2f4   : >> { %v1422_v44 = vpack.i.b16 %v1421_v42, %v1420_v41  ;;  %v1464_v48 = vrot.slane %v1418_v43, 4  ;;  %v1467_v15 = vsel %vm1156_vm0, %v1418_v43, %v1466_v6 }
 0x2f6   : >> { %v6792_v49 = vpop.trf.xlu0  ;;  %v1520_v51 = vrot.slane %v1422_v44, 4  ;;  %v1465_v55 = vsel %vm1156_vm0, %v1464_v48, %v1402_v52 }
 0x2f7   : >> { %v1413_v61 = vshrl.u32 %v6792_v49, 16  ;;  %v1471_v0 = vperm.slane %v1465_v55, %v8195_v45  ;;  %v1410_v1 = vpack.i.b16 %v6792_v49, %v6791_v40  ;;  %v1523_v40 = vsel %vm1156_vm0, %v1422_v44, %v1522_v13 }
 0x2f8   : >> { %v8217_v26 = vpop.trf.xlu2  ;;  %v1521_v56 = vsel %vm1156_vm0, %v1520_v51, %v1406_v53 }
 0x2f9   : >> { %v6778_v54 = vpop.trf.xlu1  ;;  %v1527_v5 = vperm.slane %v1521_v56, %v8195_v45  ;;  %v1414_v7 = vpack.i.b16 %v1413_v61, %v1412_v57  ;;  %v1490_v12 = vrot.slane %v1471_v0, 4  ;;  %v1478_v42 = vrot.slane %v1410_v1, 4 }
 0x2fa   : >> { %v1452_v41 = vshrl.u32 %v6778_v54, 16 }
 0x2fb   : >> { %v1546_v24 = vrot.slane %v1527_v5, 4  ;;  %v1534_v47 = vrot.slane %v1414_v7, 4 }
 0x2fe   : >> { %v8222_v4 = vpop.trf.xlu0 }
 0x300   : >> { %v6786_v46 = vpop.trf.xlu2 }
 0x301   : >> { %v1428_v59 = vshrl.u32 %v6786_v46, 16  ;;  %v6779_v20 = vpop.trf.xlu1 }
 0x302   : >> { %v1453_v50 = vshrl.u32 %v6779_v20, 16 }
 0x306   : >> { %v6794_v57 = vpop.trf.xlu0 }
 0x308   : >> { %v6787_v58 = vpop.trf.xlu2 }
 0x309   : >> { %v1426_v62 = vpack.i.b16 %v6787_v58, %v6786_v46  ;;  %v1429_v63 = vshrl.u32 %v6787_v58, 16 }
 0x30b   : >> { %v1430_v2 = vpack.i.b16 %v1429_v63, %v1428_v59  ;;  %v1476_v3 = vrot.slane %v1426_v62, 4  ;;  %v1479_v55 = vsel %vm1156_vm0, %v1426_v62, %v1478_v42  ;;  %v8242_v63 = vperm.slane %v1467_v15, %v8195_v45 }
 0x30c   : >> { %v1454_v62 = vpack.i.b16 %v1453_v50, %v1452_v41  ;;  %v1434_v50 = vpack.i.b16 %v8217_v26, %v8215_v25 }
 0x30d   : >> { %v1477_v9 = vsel %vm1156_vm0, %v1476_v3, %v1410_v1  ;;  %v1532_v10 = vrot.slane %v1430_v2, 4  ;;  %v1535_v56 = vsel %vm1156_vm0, %v1430_v2, %v1534_v47  ;;  %v1450_v1 = vpack.i.b16 %v6779_v20, %v6778_v54 }
 0x30e   : >> { %v1483_v11 = vperm.slane %v1477_v9, %v8195_v45  ;;  %v1444_v3 = vshrl.u32 %v8222_v4, 16  ;;  %v8254_v9 = vperm.slane %v1535_v56, %v8195_v45  ;;  %v1502_v20 = vrot.slane %v8242_v63, 4 }
 0x30f   : >> { %v1533_v19 = vsel %vm1156_vm0, %v1532_v10, %v1414_v7  ;;  %v8251_v7 = vperm.slane %v1479_v55, %v8195_v45  ;;  %v1576_v42 = vrot.slane %v1450_v1, 4 }
 0x310   : >> { %v6788_v21 = vpop.trf.xlu2  ;;  %v1491_v22 = vsel %vm1156_vm0, %v1483_v11, %v1490_v12  ;;  %v1539_v23 = vperm.slane %v1533_v19, %v8195_v45  ;;  %v1488_v39 = vrot.slane %v1483_v11, 4  ;;  %v1445_v11 = vshrl.u32 %v6794_v57, 16 }
 0x311   : >> { %v1499_v46 = vperm.slane %v1491_v22, %v8200_v60  ;;  %v1460_v10 = vshrl.u32 %v6788_v21, 16  ;;  %v1437_v22 = vshrl.u32 %v8217_v26, 16  ;;  %v1577_v56 = vsel %vm1156_vm0, %v1576_v42, %v1434_v50 }
 0x312   : >> { %v1547_v48 = vsel %vm1156_vm0, %v1539_v23, %v1546_v24  ;;  %v1489_v43 = vsel %vm1156_vm0, %v1488_v39, %v1471_v0  ;;  %v1544_v49 = vrot.slane %v1539_v23, 4  ;;  %v8245_v0 = vperm.slane %v1523_v40, %v8195_v45 }
 0x313   : >> { %v1555_v51 = vperm.slane %v1547_v48, %v8200_v60  ;;  %v1514_v52 = vrot.slane %v1499_v46, 4  ;;  %v1495_v53 = vperm.slane %v1489_v43, %v8200_v60  ;;  %v1436_v24 = vshrl.u32 %v8215_v25, 16 }
 0x314   : >> { %v1545_v44 = vsel %vm1156_vm0, %v1544_v49, %v1527_v5  ;;  %v1558_v23 = vrot.slane %v8245_v0, 4  ;;  %v1442_v39 = vpack.i.b16 %v6794_v57, %v8222_v4  ;;  %v1446_v48 = vpack.i.b16 %v1445_v11, %v1444_v3 }
 0x315   : >> { %6795 = vxpose.binary.xlu1.c.b16.start.end [1/2] (short) (narrow) %v1555_v51, %v1499_v46, 16  ;;  %v1570_v58 = vrot.slane %v1555_v51, 4  ;;  %v1512_v59 = vrot.slane %v1495_v53, 4  ;;  %v1551_v61 = vperm.slane %v1545_v44, %v8200_v60  ;;  %v1515_v5 = vsel %vm1156_vm0, 0, %v1514_v52 }
 0x316   : >> { %v1503_v46 = vsel %vm1156_vm0, %v8251_v7, %v1502_v20  ;;  %v1559_v47 = vsel %vm1156_vm0, %v8254_v9, %v1558_v23  ;;  %v1438_v51 = vpack.i.b16 %v1437_v22, %v1436_v24  ;;  %v1583_v25 = vperm.slane %v1577_v56, %v8195_v45 }
 0x317   : >> { %v1571_v2 = vsel %vm1156_vm0, 0, %v1570_v58  ;;  %v1568_v6 = vrot.slane %v1551_v61, 4  ;;  %v1513_v15 = vsel %vm1156_vm0, 0, %v1512_v59  ;;  %v8273_v55 = vperm.slane %v1503_v46, %v8200_v60 }
 0x318   : >> { %v6789_v12 = vpop.trf.xlu2  ;;  %6801 = vxpose.binary.xlu0.c.b16.start.end [1/2] (short) (narrow) %v1571_v2, %v1515_v5, 16  ;;  %v8276_v44 = vperm.slane %v1559_v47, %v8200_v60  ;;  %v1590_v11 = vrot.slane %v1442_v39, 4  ;;  %v1634_v20 = vrot.slane %v1438_v51, 4  ;;  %v1602_v47 = vrot.slane %v1583_v25, 4 }
 0x319   : >> { %v1458_v13 = vpack.i.b16 %v6789_v12, %v6788_v21  ;;  %v1461_v54 = vshrl.u32 %v6789_v12, 16  ;;  %v1569_v19 = vsel %vm1156_vm0, 0, %v1568_v6  ;;  %v1632_v21 = vrot.slane %v1454_v62, 4 }
 0x31a   : >> { %6807 = vxpose.binary.xlu2.c.b16.start.end [1/2] (short) (narrow) %v1569_v19, %v1513_v15, 16  ;;  %v1518_v26 = vrot.slane %v8273_v55, 4  ;;  %v1574_v5 = vrot.slane %v8276_v44, 4  ;;  %v1646_v12 = vrot.slane %v1446_v48, 4 }
 0x31b   : >> { %v1462_v40 = vpack.i.b16 %v1461_v54, %v1460_v10  ;;  %v1588_v41 = vrot.slane %v1458_v13, 4  ;;  %v1633_v57 = vsel %vm1156_vm0, %v1632_v21, %v1438_v51  ;;  %v1578_v54 = vrot.slane %v1434_v50, 4 }
 0x31c   : >> { %v1639_v2 = vperm.slane %v1633_v57, %v8195_v45  ;;  %v1519_v15 = vsel %vm1156_vm0, 0, %v1518_v26  ;;  %v1575_v19 = vsel %vm1156_vm0, 0, %v1574_v5 }
 0x31d   : >> { %v1589_v43 = vsel %vm1156_vm0, %v1588_v41, %v1442_v39  ;;  %v1644_v49 = vrot.slane %v1462_v40, 4  ;;  %v1579_v24 = vsel %vm1156_vm0, %v1450_v1, %v1578_v54  ;;  %v1647_v39 = vsel %vm1156_vm0, %v1462_v40, %v1646_v12 }
 0x31e   : >> { %v1595_v4 = vperm.slane %v1589_v43, %v8195_v45  ;;  %v1587_v41 = vperm.slane %v1579_v24, %v8195_v45  ;;  %v1655_v46 = vperm.slane %v1647_v39, %v8195_v45  ;;  %v1556_v24 = vrot.slane %v8254_v9, 4 }
 0x31f   : >> { %v1645_v52 = vsel %vm1156_vm0, %v1644_v49, %v1446_v48  ;;  %v1658_v48 = vrot.slane %v1639_v2, 4 }
 0x320   : >> { %v1651_v58 = vperm.slane %v1645_v52, %v8195_v45  ;;  %v1600_v59 = vrot.slane %v1595_v4, 4  ;;  %v1603_v43 = vsel %vm1156_vm0, %v1595_v4, %v1602_v47  ;;  %v1668_v50 = vrot.slane %v1655_v46, 4 }
 0x321   : >> { %v1611_v40 = vperm.slane %v1603_v43, %v8200_v60 }
 0x322   : >> { %v1656_v3 = vrot.slane %v1651_v58, 4  ;;  %v1601_v6 = vsel %vm1156_vm0, %v1600_v59, %v1583_v25  ;;  %v1659_v1 = vsel %vm1156_vm0, %v1651_v58, %v1658_v48 }
 0x323   : >> { %v1607_v22 = vperm.slane %v1601_v6, %v8200_v60  ;;  %v1667_v51 = vperm.slane %v1659_v1, %v8200_v60  ;;  %v1626_v12 = vrot.slane %v1611_v40, 4 }
 0x324   : >> { %v1657_v10 = vsel %vm1156_vm0, %v1656_v3, %v1639_v2 }
 0x325   : >> { %6798 = vxpose.binary.xlu1.c.b16.start.end [1/2] (short) (narrow) %v1551_v61, %v1495_v53, 16  ;;  %v1663_v23 = vperm.slane %v1657_v10, %v8200_v60  ;;  %v1635_v53 = vsel %vm1156_vm0, %v1454_v62, %v1634_v20  ;;  %v1591_v61 = vsel %vm1156_vm0, %v1458_v13, %v1590_v11  ;;  %v1614_v62 = vrot.slane %v1587_v41, 4 }
 0x326   : >> { %v1643_v42 = vperm.slane %v1635_v53, %v8195_v45  ;;  %v1599_v21 = vperm.slane %v1591_v61, %v8195_v45  ;;  %v1624_v2 = vrot.slane %v1607_v22, 4  ;;  %v1682_v54 = vrot.slane %v1667_v51, 4 }
 0x327   : >> { %v1680_v6 = vrot.slane %v1663_v23, 4  ;;  %v1500_v20 = vrot.slane %v8251_v7, 4  ;;  %v1627_v53 = vsel %vm1156_vm0, 0, %v1626_v12  ;;  %v1557_v61 = vsel %vm1156_vm0, %v1556_v24, %v8245_v0 }
 0x328   : >> { %6804 = vxpose.binary.xlu0.c.b16.start.end [1/2] (short) (narrow) %v1575_v19, %v1519_v15, 16  ;;  %v1612_v49 = vrot.slane %v1599_v21, 4  ;;  %v1670_v13 = vrot.slane %v1643_v42, 4  ;;  %v1615_v52 = vsel %vm1156_vm0, %v1599_v21, %v1614_v62  ;;  %v1669_v59 = vsel %vm1156_vm0, %v1668_v50, %v1643_v42 }
 0x329   : >> { %v1623_v4 = vperm.slane %v1615_v52, %v8200_v60  ;;  %v1675_v25 = vperm.slane %v1669_v59, %v8200_v60  ;;  %v1625_v15 = vsel %vm1156_vm0, 0, %v1624_v2  ;;  %v1681_v19 = vsel %vm1156_vm0, 0, %v1680_v6 }
 0x32a   : >> { %6816 = vxpose.binary.xlu2.c.b16.start.end [1/2] (short) (narrow) %v1663_v23, %v1607_v22, 16  ;;  %v1671_v56 = vsel %vm1156_vm0, %v1655_v46, %v1670_v13  ;;  %v1613_v57 = vsel %vm1156_vm0, %v1612_v49, %v1587_v41  ;;  %v1683_v22 = vsel %vm1156_vm0, 0, %v1682_v54  ;;  %v1501_v23 = vsel %vm1156_vm0, %v1500_v20, %v8242_v63 }
 0x32b   : >> { %v1679_v58 = vperm.slane %v1671_v56, %v8200_v60  ;;  %v1619_v3 = vperm.slane %v1613_v57, %v8200_v60  ;;  %v1684_v5 = vrot.slane %v1675_v25, 4  ;;  %v1507_v39 = vperm.slane %v1501_v23, %v8200_v60 }
 0x32c   : >> { %v1563_v41 = vperm.slane %v1557_v61, %v8200_v60  ;;  %v1630_v21 = vrot.slane %v1623_v4, 4 }
 0x32d   : >> { %v1628_v26 = vrot.slane %v1619_v3, 4  ;;  %v1685_v11 = vsel %vm1156_vm0, 0, %v1684_v5  ;;  %v1516_v42 = vrot.slane %v1507_v39, 4  ;;  %v1686_v9 = vrot.slane %v1679_v58, 4 }
 0x32e   : >> { %v1572_v7 = vrot.slane %v1563_v41, 4  ;;  %v1631_v48 = vsel %vm1156_vm0, 0, %v1630_v21 }
 0x32f   : >> { %v1629_v10 = vsel %vm1156_vm0, 0, %v1628_v26  ;;  %v1517_v46 = vsel %vm1156_vm0, 0, %v1516_v42  ;;  %v1687_v63 = vsel %vm1156_vm0, 0, %v1686_v9 }
 0x330   : >> { %v1573_v47 = vsel %vm1156_vm0, 0, %v1572_v7 }
 0x335   : >> { %6810 = vxpose.binary.xlu1.c.b16.start.end [1/2] (short) (narrow) %v1667_v51, %v1611_v40, 16 }
 0x338   : >> { %6813 = vxpose.binary.xlu0.c.b16.start.end [1/2] (short) (narrow) %v1679_v58, %v1623_v4, 16 }
 0x33a   : >> { %6819 = vxpose.binary.xlu2.c.b16.start.end [1/2] (short) (narrow) %v1675_v25, %v1619_v3, 16 }
 0x345   : >> { %6837 = vxpose.binary.xlu1.c.b16.start.end [1/2] (short) (narrow) %v1685_v11, %v1629_v10, 16 }
 0x348   : >> { %6828 = vxpose.binary.xlu0.c.b16.start.end [1/2] (short) (narrow) %v1681_v19, %v1625_v15, 16 }
 0x34a   : >> { %6822 = vxpose.binary.xlu2.c.b16.start.end [1/2] (short) (narrow) %v1683_v22, %v1627_v53, 16 }
 0x355   : >> { %6840 = vxpose.binary.xlu1.c.b16.start.end [1/2] (short) (narrow) %v1563_v41, %v1507_v39, 16 }
 0x358   : >> { %6831 = vxpose.binary.xlu0.c.b16.start.end [1/2] (short) (narrow) %v1573_v47, %v1517_v46, 16 }
 0x35a   : >> { %6825 = vxpose.binary.xlu2.c.b16.start.end [1/2] (short) (narrow) %v1687_v63, %v1631_v48, 16 }
 0x36a   : >> { %6834 = vxpose.binary.xlu2.c.b16.start.end [1/2] (short) (narrow) %v8276_v44, %v8273_v55, 16 }
 0x3bb   : >> { %v6808_v0 = vpop.trf.xlu2 }
 0x3c1   : >> { %v6796_v43 = vpop.trf.xlu1 }
 0x3c2   : >> { %v2200_v56 = vrot.slane %v6796_v43, 4 }
 0x3c3   : >> { %v8331_v1 = vpop.trf.xlu2 }
 0x3c4   : >> { %v6802_v62 = vpop.trf.xlu0 }
 0x3c5   : >> { %v2206_v49 = vrot.slane %v6802_v62, 4 }
 0x3c7   : >> { %v2207_v13 = vsel %vm1156_vm0, %v2206_v49, %v6808_v0 }
 0x3c8   : >> { %v2211_v52 = vperm.slane %v2207_v13, %v8195_v45 }
 0x3c9   : >> { %v8334_v50 = vpop.trf.xlu1 }
 0x3ca   : >> { %v2224_v55 = vrot.slane %v2211_v52, 4 }
 0x3cb   : >> { %v6817_v40 = vpop.trf.xlu2 }
 0x3cc   : >> { %v8336_v51 = vpop.trf.xlu0 }
 0x3d1   : >> { %v6799_v57 = vpop.trf.xlu1 }
 0x3d2   : >> { %v2201_v59 = vsel %vm1156_vm0, %v2200_v56, %v6799_v57 }
 0x3d3   : >> { %v2205_v44 = vperm.slane %v2201_v59, %v8195_v45  ;;  %v6818_v4 = vpop.trf.xlu2 }
 0x3d4   : >> { %v6805_v58 = vpop.trf.xlu0 }
 0x3d5   : >> { %v8342_v3 = vsel %vm1156_vm0, %v2224_v55, %v2205_v44 }
 0x3d9   : >> { %v8344_v25 = vpop.trf.xlu1 }
 0x3db   : >> { %v6820_v26 = vpop.trf.xlu2 }
 0x3dc   : >> { %v8346_v5 = vpop.trf.xlu0 }
 0x3e1   : >> { %v6811_v2 = vpop.trf.xlu1 }
 0x3e2   : >> { %v2280_v22 = vrot.slane %v6811_v2, 4  ;;  %v2246_v2 = vrot.slane %v8336_v51, 4  ;;  %v2240_v51 = vrot.slane %v8334_v50, 4 }
 0x3e3   : >> { %v6821_v6 = vpop.trf.xlu2 }
 0x3e4   : >> { %v6814_v10 = vpop.trf.xlu0  ;;  %v2281_v9 = vsel %vm1156_vm0, %v2280_v22, %v6817_v40  ;;  %v2247_v22 = vsel %vm1156_vm0, %v2246_v2, %v8331_v1 }
 0x3e5   : >> { %v2292_v23 = vrot.slane %v6814_v10, 4  ;;  %v2285_v49 = vperm.slane %v2281_v9, %v8195_v45 }
 0x3e7   : >> { %v2293_v47 = vsel %vm1156_vm0, %v2292_v23, %v6820_v26 }
 0x3e8   : >> { %v2297_v40 = vperm.slane %v2293_v47, %v8195_v45 }
 0x3e9   : >> { %v6812_v54 = vpop.trf.xlu1 }
 0x3ea   : >> { %v2320_v42 = vrot.slane %v6812_v54, 4 }
 0x3eb   : >> { %v6823_v11 = vpop.trf.xlu2 }
 0x3ec   : >> { %v6815_v12 = vpop.trf.xlu0  ;;  %v2286_v20 = vrot.slane %v6823_v11, 4  ;;  %v2321_v13 = vsel %vm1156_vm0, %v2320_v42, %v6818_v4 }
 0x3ed   : >> { %v2332_v57 = vrot.slane %v6815_v12, 4  ;;  %v2325_v55 = vperm.slane %v2321_v13, %v8195_v45 }
 0x3f1   : >> { %v6838_v24 = vpop.trf.xlu1 }
 0x3f3   : >> { %v6824_v15 = vpop.trf.xlu2 }
 0x3f4   : >> { %v6829_v19 = vpop.trf.xlu0  ;;  %v2326_v39 = vrot.slane %v6824_v15, 4  ;;  %v2218_v15 = vrot.slane %v6805_v58, 4 }
 0x3f5   : >> { %v2287_v53 = vsel %vm1156_vm0, %v2286_v20, %v6829_v19  ;;  %v2333_v19 = vsel %vm1156_vm0, %v2332_v57, %v6821_v6 }
 0x3f6   : >> { %v2291_v61 = vperm.slane %v2287_v53, %v8195_v45  ;;  %v2337_v23 = vperm.slane %v2333_v19, %v8195_v45 }
 0x3f8   : >> { %v2304_v48 = vrot.slane %v2291_v61, 4 }
 0x3f9   : >> { %v6839_v62 = vpop.trf.xlu1 }
 0x3fa   : >> { %v2305_v59 = vsel %vm1156_vm0, %v2304_v48, %v2285_v49 }
 0x3fb   : >> { %v6826_v41 = vpop.trf.xlu2  ;;  %v2309_v54 = vperm.slane %v2305_v59, %v8200_v60 }
 0x3fc   : >> { %v2298_v7 = vrot.slane %v6826_v41, 4  ;;  %v6830_v21 = vpop.trf.xlu0 }
 0x3fd   : >> { %v2327_v46 = vsel %vm1156_vm0, %v2326_v39, %v6830_v21  ;;  %v2318_v41 = vrot.slane %v2309_v54, 4 }
 0x3fe   : >> { %v2331_v63 = vperm.slane %v2327_v46, %v8195_v45  ;;  %v2299_v0 = vsel %vm1156_vm0, %v2298_v7, %v6838_v24  ;;  %v8372_v24 = vld [vmem:[%s1199_s25] sm:$0xf]  ;;  %v2241_v7 = vsel %vm1156_vm0, %v2240_v51, %v8344_v25  ;;  %v2251_v46 = vperm.slane %v2247_v22, %v8195_v45 }
 0x3ff   : >> { %v2303_v43 = vperm.slane %v2299_v0, %v8195_v45  ;;  %1202 = vrot.lane.b32.xlu0 %v8372_v24, %s7652_s3  ;;  %1206 = vrot.lane.b32.xlu1 %v8372_v24, %s7653_s18  ;;  %v2245_v0 = vperm.slane %v2241_v7, %v8195_v45  ;;  %v2229_v51 = vperm.slane %v8342_v3, %v8200_v60 }
 0x400   : >> { %v2344_v52 = vrot.slane %v2331_v63, 4  ;;  %1204 = vrot.lane.b32.xlu2 %v8372_v24, %s7654_s10 }
 0x401   : >> { %v2310_v56 = vrot.slane %v2303_v43, 4  ;;  %v6841_v39 = vpop.trf.xlu1  ;;  %v2258_v43 = vrot.slane %v8346_v5, 4 }
 0x402   : >> { %v2345_v4 = vsel %vm1156_vm0, %v2344_v52, %v2325_v55 }
 0x403   : >> { %v6827_v44 = vpop.trf.xlu2  ;;  %v2311_v26 = vsel %vm1156_vm0, %v2310_v56, %v2297_v40  ;;  %v2349_v6 = vperm.slane %v2345_v4, %v8200_v60 }
 0x404   : >> { %v2338_v10 = vrot.slane %v6827_v44, 4  ;;  %v6832_v11 = vpop.trf.xlu0  ;;  %v2315_v12 = vperm.slane %v2311_v26, %v8200_v60  ;;  %v2264_v44 = vrot.slane %v2251_v46, 4 }
 0x405   : >> { %v2219_v58 = vsel %vm1156_vm0, %v2218_v15, %v6832_v11  ;;  %v2358_v63 = vrot.slane %v2349_v6, 4 }
 0x406   : >> { %v2339_v20 = vsel %vm1156_vm0, %v2338_v10, %v6839_v62  ;;  %v2316_v42 = vrot.slane %v2315_v12, 4  ;;  %v2223_v50 = vperm.slane %v2219_v58, %v8195_v45  ;;  %v2319_v1 = vsel %vm1156_vm0, %v2315_v12, %v2318_v41 }
 0x407   : >> { %v2343_v53 = vperm.slane %v2339_v20, %v8195_v45  ;;  %v2388_v52 = vshrl.u32 %v2319_v1, 16  ;;  %v2265_v12 = vsel %vm1156_vm0, %v2264_v44, %v2245_v0  ;;  %v2238_v41 = vrot.slane %v2229_v51, 4 }
 0x408   : >> { %v2317_v25 = vsel %vm1156_vm0, %v2316_v42, %v2309_v54  ;;  %v2230_v56 = vrot.slane %v2223_v50, 4 }
 0x409   : >> { %v2350_v61 = vrot.slane %v2343_v53, 4  ;;  %v2380_v5 = vshrl.u32 %v2317_v25, 16  ;;  %v6842_v20 = vpop.trf.xlu1 }
 0x40b   : >> { %v6835_v21 = vpop.trf.xlu2  ;;  %v2351_v9 = vsel %vm1156_vm0, %v2350_v61, %v2337_v23 }
 0x40c   : >> { %v2212_v47 = vrot.slane %v6835_v21, 4  ;;  %v2355_v48 = vperm.slane %v2351_v9, %v8200_v60  ;;  %v6833_v62 = vpop.trf.xlu0 }
 0x40d   : >> { %v2259_v26 = vsel %vm1156_vm0, %v2258_v43, %v6833_v62 }
 0x40e   : >> { %v2213_v49 = vsel %vm1156_vm0, %v2212_v47, %v6841_v39  ;;  %v2359_v13 = vsel %vm1156_vm0, %v2355_v48, %v2358_v63  ;;  %v2356_v40 = vrot.slane %v2355_v48, 4  ;;  %v2263_v15 = vperm.slane %v2259_v26, %v8195_v45 }
 0x40f   : >> { %v2217_v57 = vperm.slane %v2213_v49, %v8195_v45  ;;  %v2386_v59 = vpack.i.b16 %v2359_v13, %v2319_v1  ;;  %v2389_v55 = vshrl.u32 %v2359_v13, 16 }
 0x410   : >> { %v2357_v2 = vsel %vm1156_vm0, %v2356_v40, %v2349_v6  ;;  %v2269_v6 = vperm.slane %v2265_v12, %v8200_v60  ;;  %v2270_v61 = vrot.slane %v2263_v15, 4  ;;  %v1211_v40 = vshrl.u32 %v8372_v24, 16 }
 0x411   : >> { %v2231_v10 = vsel %vm1156_vm0, %v2230_v56, %v2217_v57  ;;  %2434 = vmatpush.bf16.msra.mxu2 %v2386_v59  ;;  %v2378_v11 = vpack.i.b16 %v2357_v2, %v2317_v25  ;;  %v2390_v4 = vpack.i.b16 %v2389_v55, %v2388_v52  ;;  %v2381_v54 = vshrl.u32 %v2357_v2, 16 }
 0x412   : >> { %v2235_v58 = vperm.slane %v2231_v10, %v8200_v60  ;;  %v2278_v3 = vrot.slane %v2269_v6, 4  ;;  %v2457_v57 = vlaneseq }
 0x413   : >> { %v6836_v19 = vpop.trf.xlu2  ;;  %2402 = vmatpush.bf16.msra.mxu0 %v2378_v11  ;;  %2450 = vmatpush.bf16.msra.mxu3 %v2390_v4  ;;  %v2382_v53 = vpack.i.b16 %v2381_v54, %v2380_v5 }
 0x414   : >> { %v2252_v22 = vrot.slane %v6836_v19, 4  ;;  %v2236_v42 = vrot.slane %v2235_v58, 4  ;;  %v2239_v50 = vsel %vm1156_vm0, %v2235_v58, %v2238_v41  ;;  %v2458_v12 = vshrl.u32 %v2457_v57, 7 }
 0x415   : >> { %2418 = vmatpush.bf16.msra.mxu1 %v2382_v53  ;;  %v2372_v48 = vshrl.u32 %v2239_v50, 16  ;;  %v2462_v53 = vand.u32 127, %v2457_v57 }
 0x416   : >> { %v2253_v23 = vsel %vm1156_vm0, %v2252_v22, %v6842_v20  ;;  %v2237_v9 = vsel %vm1156_vm0, %v2236_v42, %v2229_v51  ;;  %v2459_v20 = vstv %s6056_s30  ;;  %v2463_v22 = vstv %s6090_s12 }
 0x417   : >> { %v2257_v39 = vperm.slane %v2253_v23, %v8195_v45  ;;  %v2364_v25 = vshrl.u32 %v2237_v9, 16  ;;  %v2460_v41 = vadd.s32 %v2459_v20, %v2458_v12 }
 0x419   : >> { %v2271_v7 = vsel %vm1156_vm0, %v2270_v61, %v2257_v39 }
 0x41a   : >> { %v2275_v21 = vperm.slane %v2271_v7, %v8200_v60 }
 0x41c   : >> { %v2279_v1 = vsel %vm1156_vm0, %v2275_v21, %v2278_v3  ;;  %v2276_v46 = vrot.slane %v2275_v21, 4 }
 0x41d   : >> { %v2370_v47 = vpack.i.b16 %v2279_v1, %v2239_v50  ;;  %v2373_v63 = vshrl.u32 %v2279_v1, 16  ;;  %v2464_v50 = vadd.s32 %v2463_v22, %v2462_v53 }
 0x41e   : >> { %v2277_v0 = vsel %vm1156_vm0, %v2276_v46, %v2269_v6 }
 0x41f   : >> { %2435 = vmatpush.bf16.msra.mxu2 %v2370_v47  ;;  %v2362_v43 = vpack.i.b16 %v2277_v0, %v2237_v9  ;;  %v2374_v62 = vpack.i.b16 %v2373_v63, %v2372_v48  ;;  %v2365_v49 = vshrl.u32 %v2277_v0, 16  ;;  %vm2465_vm2 = vcmp.le.s32.totalorder %v2464_v50, %v2460_v41 }
 0x421   : >> { %2403 = vmatpush.bf16.msra.mxu0 %v2362_v43  ;;  %2451 = vmatpush.bf16.msra.mxu3 %v2374_v62  ;;  %v2366_v13 = vpack.i.b16 %v2365_v49, %v2364_v25 }
 0x422   : >> { %6095 = vmatmul.msk.bf16.vlgmr.msra.gmra.mxu2 %vm2392_vm1, %v8093_v18 }
 0x423   : >> { %2419 = vmatpush.bf16.msra.mxu1 %v2366_v13 }
 0x424   : >> { %6093 = vmatmul.msk.bf16.vlgmr.msra.gmra.mxu0 %vm2392_vm1, %v8081_v14  ;;  %6096 = vmatmul.msk.bf16.vlgmr.msra.gmra.mxu3 %vm2392_vm1, %v8089_v16 }
 0x426   : >> { %6094 = vmatmul.msk.bf16.vlgmr.msra.gmra.mxu1 %vm2392_vm1, %v8091_v17 }
 0x45a   : >> { %v1205_v26 = vpop.permute.xlu2 %1204 }
 0x45b   : >> { %v1217_v5 = vshrl.u32 %v1205_v26, 16 }
 0x471   : >> { %v1203_v52 = vpop.permute.xlu0 %1202  ;;  %v1207_v56 = vpop.permute.xlu1 %1206 }
 0x472   : >> { %v1210_v59 = vpack.i.b16 %v1203_v52, %v8372_v24  ;;  %v1212_v55 = vshrl.u32 %v1203_v52, 16  ;;  %v1218_v44 = vshrl.u32 %v1207_v56, 16  ;;  %v1216_v2 = vpack.i.b16 %v1207_v56, %v1205_v26 }
 0x474   : >> { %v1213_v10 = vpack.i.b16 %v1212_v55, %v1211_v40  ;;  %v1224_v11 = vperm.slane %v1210_v59, %v8195_v45  ;;  %v1219_v4 = vpack.i.b16 %v1218_v44, %v1217_v5  ;;  %v1229_v54 = vperm.slane %v1216_v2, %v8195_v45 }
 0x476   : >> { %v1232_v15 = vrot.slane %v1224_v11, 4  ;;  %v1250_v19 = vperm.slane %v1213_v10, %v8195_v45  ;;  %v1230_v24 = vrot.slane %v1229_v54, 4  ;;  %v1255_v51 = vperm.slane %v1219_v4, %v8195_v45 }
 0x478   : >> { %v1258_v58 = vrot.slane %v1250_v19, 4  ;;  %v1233_v6 = vsel %vm1156_vm0, %v1229_v54, %v1232_v15  ;;  %v1231_v23 = vsel %vm1156_vm0, %v1230_v24, %v1224_v11  ;;  %v1256_v39 = vrot.slane %v1255_v51, 4 }
 0x479   : >> { %v1241_v61 = vperm.slane %v1233_v6, %v8200_v60  ;;  %v1237_v42 = vperm.slane %v1231_v23, %v8200_v60 }
 0x47a   : >> { %v1259_v7 = vsel %vm1156_vm0, %v1255_v51, %v1258_v58  ;;  %v1257_v3 = vsel %vm1156_vm0, %v1256_v39, %v1250_v19 }
 0x47b   : >> { %v1244_v21 = vrot.slane %v1241_v61, 4  ;;  %v1267_v1 = vperm.slane %v1259_v7, %v8200_v60  ;;  %v1242_v9 = vrot.slane %v1237_v42, 4  ;;  %v1263_v46 = vperm.slane %v1257_v3, %v8200_v60 }
 0x47d   : >> { %v1245_v47 = vsel %vm1156_vm0, 0, %v1244_v21  ;;  %v1270_v48 = vrot.slane %v1267_v1, 4  ;;  %v1243_v63 = vsel %vm1156_vm0, 0, %v1242_v9  ;;  %v1268_v0 = vrot.slane %v1263_v46, 4 }
 0x47e   : >> { %v2546_v43 = vrot.slane %v1245_v47, 4  ;;  %v2541_v62 = vsel %vm1156_vm0, %v1244_v21, %v1237_v42 }
 0x47f   : >> { %v1271_v25 = vsel %vm1156_vm0, 0, %v1270_v48  ;;  %v1269_v13 = vsel %vm1156_vm0, 0, %v1268_v0  ;;  %v2560_v52 = vsel %vm1156_vm0, %v1270_v48, %v1263_v46  ;;  %v2545_v56 = vperm.slane %v2541_v62, %v8195_v45 }
 0x480   : >> { %v2565_v49 = vrot.slane %v1271_v25, 4  ;;  %v2547_v40 = vsel %vm1156_vm0, %v2546_v43, %v1243_v63  ;;  %v2564_v2 = vperm.slane %v2560_v52, %v8195_v45 }
 0x481   : >> { %v2551_v57 = vperm.slane %v2547_v40, %v8195_v45 }
 0x482   : >> { %v2566_v55 = vsel %vm1156_vm0, %v2565_v49, %v1269_v13 }
 0x483   : >> { %v2552_v26 = vrot.slane %v2551_v57, 4  ;;  %v2570_v5 = vperm.slane %v2566_v55, %v8195_v45 }
 0x485   : >> { %v2553_v4 = vsel %vm1156_vm0, %v2552_v26, %v2545_v56  ;;  %v2571_v54 = vrot.slane %v2570_v5, 4 }
 0x486   : >> { %v2557_v15 = vperm.slane %v2553_v4, %v8200_v60 }
 0x487   : >> { %v2572_v20 = vsel %vm1156_vm0, %v2571_v54, %v2564_v2 }
 0x488   : >> { %v2576_v51 = vperm.slane %v2572_v20, %v8200_v60  ;;  %v2582_v45 = vshrl.u32 %v2557_v15, 16  ;;  %v2558_v22 = vrot.slane %v2557_v15, 4 }
 0x48a   : >> { %v2581_v61 = vpack.i.b16 %v2576_v51, %v2557_v15  ;;  %v2583_v39 = vshrl.u32 %v2576_v51, 16  ;;  %v2559_v42 = vsel %vm1156_vm0, 0, %v2558_v22  ;;  %v2577_v21 = vrot.slane %v2576_v51, 4 }
 0x48b   : >> { %v2588_v9 = vshrl.u32 %v2559_v42, 16 }
 0x48c   : >> { %v2596_v60 = vsel %vm2594_vm4, %v2581_v61, 0  ;;  %v2584_v1 = vpack.i.b16 %v2583_v39, %v2582_v45  ;;  %v2578_v46 = vsel %vm1156_vm0, 0, %v2577_v21 }
 0x48d   : >> { %2605 = vmatpush.bf16.msrb.mxu0 %v2596_v60  ;;  %v2587_v0 = vpack.i.b16 %v2578_v46, %v2559_v42  ;;  %v2589_v43 = vshrl.u32 %v2578_v46, 16 }
 0x48e   : >> { %v2615_v63 = vsel %vm2594_vm4, %v2584_v1, 0 }
 0x48f   : >> { %2624 = vmatpush.bf16.msrb.mxu1 %v2615_v63  ;;  %v2634_v50 = vsel %vm2594_vm4, %v2587_v0, 0  ;;  %v2590_v62 = vpack.i.b16 %v2589_v43, %v2588_v9 }
 0x490   : >> { %2643 = vmatpush.bf16.msrb.mxu2 %v2634_v50 }
 0x491   : >> { %v2653_v25 = vsel %vm2594_vm4, %v2590_v62, 0 }
 0x492   : >> { %2662 = vmatpush.bf16.msrb.mxu3 %v2653_v25 }
 0x4a1   : >> { %v2405_v59 = vpop.f32.mrf.mxu0 }
 0x4a2   : >> { %v2468_v44 = vsel %vm2465_vm2, %v2405_v59, -1e+30 }
 0x4a3   : >> { %v2473_v10 = vsel %vm2472_vm3, %v2468_v44, -inf  ;;  %v2421_v11 = vpop.f32.mrf.mxu1 }
 0x4a4   : >> { %2474 = vmax.xlane.f32.xlu2 %v2473_v10  ;;  %v2469_v7 = vsel %vm2465_vm2, %v2421_v11, -1e+30 }
 0x4a5   : >> { %v2437_v12 = vpop.f32.mrf.mxu2  ;;  %v2476_v48 = vsel %vm2472_vm3, %v2469_v7, -inf }
 0x4a6   : >> { %v2470_v19 = vsel %vm2465_vm2, %v2437_v12, -1e+30 }
 0x4a7   : >> { %v2453_v53 = vpop.f32.mrf.mxu3  ;;  %v2479_v24 = vsel %vm2472_vm3, %v2470_v19, -inf }
 0x4a8   : >> { %v2471_v58 = vsel %vm2465_vm2, %v2453_v53, -1e+30  ;;  %2480 = vmax.xlane.f32.xlu1 %v2479_v24 }
 0x4a9   : >> { %v2482_v6 = vsel %vm2472_vm3, %v2471_v58, -inf  ;;  %v2407_v23 = vpop.f32.mrf.mxu0 }
 0x4aa   : >> { %2483 = vmax.xlane.f32.xlu0 %v2482_v6 }
 0x4ab   : >> { %v2423_v3 = vpop.f32.mrf.mxu1 }
 0x4ad   : >> { %v2439_v47 = vpop.f32.mrf.mxu2 }
 0x4af   : >> { %v2455_v41 = vpop.f32.mrf.mxu3 }
 0x4b0   : >> { %2477 = vmax.xlane.f32.xlu1 %v2476_v48 }
 0x517   : >> { %v2475_v49 = vpop.xlane.xlu2 %2474 }
 0x518   : >> { %v8470_v13 = vmax.f32 %v7601_v38, %v2475_v49  }
 0x51a   : >> { %v2489_v40 = vsub.f32 %v7601_v38, %v8470_v13  ;;  %v2501_v52 = vsub.f32 %v2468_v44, %v8470_v13 }
 0x51b   : >> { %v2481_v56 = vpop.xlane.xlu1 %2480 }
 0x51c   : >> { %v2505_v57 = vmul.f32 1.442695, %v2501_v52  ;;  %v8476_v59 = vmax.f32 %v7593_v36, %v2481_v56   ;;  %v2493_v61 = vmul.f32 1.442695, %v2489_v40 }
 0x51d   : >> { %v2484_v55 = vpop.xlane.xlu0 %2483 }
 0x51e   : >> { %v2491_v26 = vsub.f32 %v7593_v36, %v8476_v59  ;;  %v2503_v2 = vsub.f32 %v2470_v19, %v8476_v59  ;;  %v8482_v5 = vmax.f32 %v7589_v35, %v2484_v55   ;;  %6843 = vpow2.f32 %v2505_v57 }
 0x520   : >> { %v2509_v10 = vmul.f32 1.442695, %v2503_v2  ;;  %v2492_v38 = vsub.f32 %v7589_v35, %v8482_v5  ;;  %v2504_v44 = vsub.f32 %v2471_v58, %v8482_v5  ;;  %v2497_v39 = vmul.f32 1.442695, %v2491_v26 }
 0x522   : >> { %v2511_v11 = vmul.f32 1.442695, %v2504_v44  ;;  %6845 = vpow2.f32 %v2509_v10  ;;  %v2499_v42 = vmul.f32 1.442695, %v2492_v38 }
 0x523   : >> { %v2478_v4 = vpop.xlane.xlu1 %2477 }
 0x524   : >> { %v8488_v54 = vmax.f32 %v7597_v37, %v2478_v4   ;;  %v6844_v12 = vpop.eup %6843  ;;  %6847 = vpow2.f32 %v2511_v11 }
 0x525   : >> { %v2517_v19 = vsel %vm2472_vm3, %v6844_v12, 0.0  ;;  %v2537_v20 = vpack.c.bf16 %v6844_v12, %v6844_v12 }
 0x526   : >> { %v2490_v36 = vsub.f32 %v7597_v37, %v8488_v54  ;;  %v2502_v15 = vsub.f32 %v2469_v7, %v8488_v54  ;;  %2518 = vadd.xlane.f32.xlu1 %v2517_v19 }
 0x527   : >> { %6097 = vmatmul.msk.bf16.vlgmr.msrb.gmra.mxu0 %vm2472_vm3, %v2537_v20 }
 0x528   : >> { %v2507_v35 = vmul.f32 1.442695, %v2502_v15  ;;  %v6846_v53 = vpop.eup %6845  ;;  %v2495_v21 = vmul.f32 1.442695, %v2490_v36  ;;  %v9656_v36 = vmov %v8476_v59 }
 0x529   : >> { %v2523_v24 = vsel %vm2472_vm3, %v6846_v53, 0.0  ;;  %v2539_v51 = vpack.c.bf16 %v6846_v53, %v6846_v53 }
 0x52a   : >> { %v6848_v45 = vpop.eup %6847  ;;  %6849 = vpow2.f32 %v2507_v35  ;;  %2524 = vadd.xlane.f32.xlu2 %v2523_v24  ;;  %v9655_v35 = vmov %v8482_v5 }
 0x52b   : >> { %6099 = vmatmul.msk.bf16.vlgmr.msrb.gmra.mxu2 %vm2472_vm3, %v2539_v51  ;;  %v2540_v22 = vpack.c.bf16 %v6848_v45, %v6848_v45  ;;  %v2526_v37 = vsel %vm2472_vm3, %v6848_v45, 0.0  ;;  %6851 = vpow2.f32 %v2493_v61 }
 0x52c   : >> { %6853 = vpow2.f32 %v2497_v39 }
 0x52d   : >> { %6100 = vmatmul.msk.bf16.vlgmr.msrb.gmra.mxu3 %vm2472_vm3, %v2540_v22  ;;  %6855 = vpow2.f32 %v2499_v42 }
 0x52e   : >> { %2527 = vadd.xlane.f32.xlu1 %v2526_v37  ;;  %6857 = vpow2.f32 %v2495_v21  ;;  %v9657_v37 = vmov %v8488_v54 }
 0x530   : >> { %v6850_v58 = vpop.eup %6849 }
 0x531   : >> { %v2520_v6 = vsel %vm2472_vm3, %v6850_v58, 0.0  ;;  %v2538_v23 = vpack.c.bf16 %v6850_v58, %v6850_v58  ;;  %v6852_v7 = vpop.eup %6851 }
 0x532   : >> { %2521 = vadd.xlane.f32.xlu0 %v2520_v6  ;;  %v2513_v3 = vmul.f32 %v7585_v34, %v6852_v7  ;;  %v6854_v60 = vpop.eup %6853  ;;  %v2533_v62 = vmul.f32 %v7569_v30, %v6852_v7 }
 0x533   : >> { %6098 = vmatmul.msk.bf16.vlgmr.msrb.gmra.mxu1 %vm2472_vm3, %v2538_v23  ;;  %v2515_v46 = vmul.f32 %v7577_v32, %v6854_v60  ;;  %v6856_v47 = vpop.eup %6855  ;;  %v2535_v57 = vmul.f32 %v7561_v28, %v6854_v60 }
 0x534   : >> { %v2516_v0 = vmul.f32 %v7573_v31, %v6856_v47  ;;  %v6858_v43 = vpop.eup %6857  ;;  %v2536_v31 = vmul.f32 %v7557_v27, %v6856_v47 }
 0x535   : >> { %v2514_v49 = vmul.f32 %v7581_v33, %v6858_v43  ;;  %v2534_v26 = vmul.f32 %v7565_v29, %v6858_v43 }
 0x599   : >> { %v2519_v1 = vpop.xlane.xlu1 %2518 }
 0x59a   : >> { %v2529_v9 = vadd.f32 %v2519_v1, %v2513_v3  }
 0x59d   : >> { %v2525_v48 = vpop.xlane.xlu2 %2524 }
 0x59e   : >> { %v2531_v63 = vadd.f32 %v2525_v48, %v2515_v46  }
 0x5a0   : > { %v9664_v24 = vmov (%p8512_p3), %v2531_v63 }
 0x5a1   : >> { %v2528_v41 = vpop.xlane.xlu1 %2527 }
 0x5a2   : >> { %v2532_v50 = vadd.f32 %v2528_v41, %v2516_v0  }
 0x5a4   : >> { %v2607_v25 = vpop.f32.mrf.mxu0  ;;  %v9663_v23 = vmov (%p8512_p3), %v2532_v50 }
 0x5a5   : >> { %v2668_v40 = vadd.f32 %v2607_v25, %v2533_v62   ;;  %v2522_v34 = vpop.xlane.xlu0 %2521 }
 0x5a6   : >> { %v2530_v52 = vadd.f32 %v2522_v34, %v2514_v49   ;;  %v9654_v34 = vmov %v2529_v9 }
 0x5a7   : > { %v9662_v22 = vmov (%p8512_p3), %v2668_v40 }
 0x5a8   : >> { %v9653_v33 = vmov %v2530_v52  ;;  %v9665_v25 = vmov (%p8512_p3), %v2530_v52 }
 0x5ac   : >> { %v2609_v56 = vpop.f32.mrf.mxu0 }
 0x5ae   : >> { %v2645_v32 = vpop.f32.mrf.mxu2 }
 0x5af   : >> { %v2670_v55 = vadd.f32 %v2645_v32, %v2535_v57   ;;  %v9652_v32 = vmov %v2531_v63 }
 0x5b0   : >> { %v2626_v2 = vpop.f32.mrf.mxu1  ;;  %v2664_v10 = vpop.f32.mrf.mxu3 }
 0x5b1   : >> { %v2669_v44 = vadd.f32 %v2626_v2, %v2534_v26   ;;  %v2671_v11 = vadd.f32 %v2664_v10, %v2536_v31   ;;  %v9648_v28 = vmov %v2670_v55  ;;  %v9651_v31 = vmov %v2532_v50 }
 0x5b2   : > { %v9660_v20 = vmov (%p8512_p3), %v2670_v55  ;;  %v9666_v26 = vmov (%p8512_p3), %v2529_v9 }
 0x5b3   : >> { %v9647_v27 = vmov %v2671_v11  ;;  %v9649_v29 = vmov %v2669_v44  ;;  %v9659_v19 = vmov (%p8512_p3), %v2671_v11  ;;  %v9661_v21 = vmov (%p8512_p3), %v2669_v44 }
 0x5b5   : > { %1107 = sbr.rel (!%p8512_p3) target bundleno = 436 (0x1b4), region = 238 }
 0x5b6   : >> { %v2647_v30 = vpop.f32.mrf.mxu2 }
 0x5b7   : >> { %v9650_v30 = vmov %v2668_v40 }
 0x5b8   : >> { %v2628_v38 = vpop.f32.mrf.mxu1  ;;  %v2666_v4 = vpop.f32.mrf.mxu3 }
 0x5b9   : >> { %v9658_v38 = vmov %v8470_v13 }
 0x5ba PF: > { %6957 = vrcp.f32 %v7637_v26  ;;  %v7657_v16 = vmov 1983009808   ;;  %vm2681_vm5 = vcmask 1047556   ;;  %v7658_v35 = vmov 1934713408   ;;  %s9669_s20 = sld [smem:[#allocation59_spill]]  ;;  %v7637_v26 = vphi %v8115_v26, %v9666_v26   ;;  %v7633_v25 = vphi %v8113_v25, %v9665_v25   ;;  %v7629_v24 = vphi %v8111_v24, %v9664_v24   ;;  %v7625_v23 = vphi %v8109_v23, %v9663_v23   ;;  %v7621_v22 = vphi %v8107_v22, %v9662_v22   ;;  %v7617_v21 = vphi %v8105_v21, %v9661_v21   ;;  %v7613_v20 = vphi %v8103_v20, %v9660_v20   ;;  %v7609_v19 = vphi %v8101_v19, %v9659_v19  }
 0x5bb   : > { %6959 = vrcp.f32 %v7633_v25  ;;  %v2686_v17 = vunpack.c.l.s4 %v7657_v16  ;;  %v2710_v53 = vunpack.c.l.s4 %v7658_v35  ;;  %v8615_v16 = vld [vmem:[%s883_s4 + $0x4] sm:$0xf]  ;;  %v6356_v35 = vld [vmem:[#allocation13 + $0x30] sm:$0xff]  ;;  %vm2803_vm6 = vcmask 261120   ;;  %s9670_s12 = sld [smem:[#allocation60_spill]]  ;;  %s5728_s28 = scalar_lea.sflag [#allocation4], %s8031_s15 }
 0x5bc   : > { %6961 = vrcp.f32 %v7629_v24  ;;  %vm2805_vm7 = vcmask 523264   ;;  %vm2807_vm8 = vcmask 785408   ;;  %s9683_s19 = sld [smem:[#allocation52_spill]]  ;;  %vm4909_vm13 = vcmask 130048  }
 0x5bd   : > { %6963 = vrcp.f32 %v7625_v23  ;;  %v8572_v54 = vunpack.c.0.s8 %v2686_v17  ;;  %v8588_v61 = vunpack.c.0.s8 %v2710_v53  ;;  %v6355_v53 = vld [vmem:[#allocation13 + $0x28] sm:$0xff]  ;;  %s9686_s3 = sld [smem:[#allocation61_spill]] }
 0x5be   : > { %s9687_s25 = sld [smem:[#allocation62_spill]] }
 0x5bf   : > { %s9688_s9 = sld [smem:[#allocation56_spill]] }
 0x5c0   : > { %v6958_v14 = vpop.eup %6957  ;;  %s9689_s30 = sld [smem:[#allocation58_spill]] }
 0x5c1   : > { %v6960_v18 = vpop.eup %6959  ;;  %v2676_v27 = vmul.f32 %v7621_v22, %v6958_v14  ;;  %s9690_s16 = sld [smem:[#allocation31_spill]] }
 0x5c2   : > { %v6962_v28 = vpop.eup %6961  ;;  %v2677_v29 = vmul.f32 %v7617_v21, %v6960_v18  ;;  %s9695_s10 = sld [smem:[#allocation64_spill]] }
 0x5c3   : > { %v6964_v33 = vpop.eup %6963  ;;  %v2678_v13 = vmul.f32 %v7613_v20, %v6962_v28  ;;  %v2683_v59 = vrot.slane %v2676_v27, 4 }
 0x5c4   : > { %v2679_v5 = vmul.f32 %v7609_v19, %v6964_v33  ;;  %v2695_v12 = vrot.slane %v2677_v29, 4  ;;  %v8581_v19 = vld [vmem:[%s883_s4] sm:$0xf]  ;;  %s9667_s4 = sld [smem:[#allocation50_spill]] }
 0x5c5   : > { %v2680_v36 = vrot.slane %v2678_v13, 4  ;;  %v2684_v15 = vsel %vm2681_vm5, %v2678_v13, %v2683_v59  ;;  %3028 = vrot.lane.b32.xlu2 %v8581_v19, %s7651_s6 }
 0x5c6   : > { %v2692_v24 = vperm.slane %v2684_v15, %v8572_v54  ;;  %v2693_v51 = vrot.slane %v2679_v5, 4  ;;  %v2696_v45 = vsel %vm2681_vm5, %v2679_v5, %v2695_v12  ;;  %v6357_v15 = vld [vmem:[#allocation13 + $0x38] sm:$0xff] }
 0x5c7   : > { %v2682_v22 = vsel %vm2681_vm5, %v2680_v36, %v2676_v27  ;;  %v2704_v20 = vperm.slane %v2696_v45, %v8572_v54  ;;  %2878 = vmatpush.bf16.msra.mxu0 %v6357_v15  ;;  %v6352_v45 = vld [vmem:[#allocation13 + $0x10] sm:$0xff]  ;;  %s6334_s27 = sshll.u32 %s9690_s16, 1 }
 0x5c8   : > { %v2688_v37 = vperm.slane %v2682_v22, %v8572_v54  ;;  %v2694_v58 = vsel %vm2681_vm5, %v2693_v51, %v2677_v29  ;;  %v2719_v6 = vrot.slane %v2692_v24, 4  ;;  %v6353_v51 = vld [vmem:[#allocation13 + $0x18] sm:$0xff]  ;;  %v6351_v22 = vld [vmem:[#allocation13 + $0x8] sm:$0xff] }
 0x5c9   : > { %v2700_v23 = vperm.slane %v2694_v58, %v8572_v54  ;;  %v2717_v39 = vrot.slane %v2704_v20, 4 }
 0x5ca   : > { %v2707_v42 = vrot.slane %v2688_v37, 4  ;;  %v2720_v7 = vsel %vm2681_vm5, %v2704_v20, %v2719_v6  ;;  %v6350_v20 = vld [vmem:[#allocation13] sm:$0xff] }
 0x5cb   : > { %v2705_v21 = vrot.slane %v2700_v23, 4  ;;  %v2718_v3 = vsel %vm2681_vm5, %v2717_v39, %v2692_v24  ;;  %v2728_v60 = vperm.slane %v2720_v7, %v8588_v61  ;;  %2879 = vmatpush.bf16.msra.mxu0 %v6356_v35  ;;  %v6354_v24 = vld [vmem:[#allocation13 + $0x20] sm:$0xff] }
 0x5cc   : > { %v2708_v1 = vsel %vm2681_vm5, %v2700_v23, %v2707_v42  ;;  %v2724_v9 = vperm.slane %v2718_v3, %v8588_v61 }
 0x5cd   : > { %v2706_v46 = vsel %vm2681_vm5, %v2705_v21, %v2688_v37  ;;  %v2716_v47 = vperm.slane %v2708_v1, %v8588_v61  ;;  %v2735_v48 = vrot.slane %v2728_v60, 4  ;;  %3034 = vrot.lane.b32.xlu2 %v8615_v16, %s7649_s0 }
 0x5ce   : > { %v2712_v63 = vperm.slane %v2706_v46, %v8588_v61  ;;  %v2733_v0 = vrot.slane %v2724_v9, 4 }
 0x5cf   : > { %v2731_v43 = vrot.slane %v2716_v47, 4  ;;  %v2736_v41 = vsel %vm2681_vm5, 0.0, %v2735_v48  ;;  %v2748_v50 = vsel %vm2681_vm5, %v2735_v48, %v2724_v9  ;;  %2880 = vmatpush.bf16.msra.mxu0 %v6355_v53 }
 0x5d0   : > { %v2729_v62 = vrot.slane %v2712_v63, 4  ;;  %v2734_v25 = vsel %vm2681_vm5, 0.0, %v2733_v0  ;;  %v2753_v49 = vrot.slane %v2736_v41, 4  ;;  %v2752_v52 = vperm.slane %v2748_v50, %v8572_v54 }
 0x5d1   : > { %v2732_v40 = vsel %vm2681_vm5, 0.0, %v2731_v43  ;;  %v2737_v34 = vsel %vm2681_vm5, %v2731_v43, %v2712_v63  ;;  %v3039_v43 = vshrl.u32 %v8581_v19, 16 }
 0x5d2   : > { %v2730_v56 = vsel %vm2681_vm5, 0.0, %v2729_v62  ;;  %v2741_v57 = vperm.slane %v2737_v34, %v8572_v54  ;;  %v2742_v32 = vrot.slane %v2732_v40, 4  ;;  %v2754_v55 = vsel %vm2681_vm5, %v2753_v49, %v2734_v25 }
 0x5d3   : > { %v2758_v26 = vperm.slane %v2754_v55, %v8572_v54  ;;  %v2773_v31 = vrot.slane %v2752_v52, 4  ;;  %2881 = vmatpush.bf16.msra.mxu0 %v6354_v24 }
 0x5d4   : > { %v2743_v2 = vsel %vm2681_vm5, %v2742_v32, %v2730_v56  ;;  %v2761_v10 = vrot.slane %v2741_v57, 4 }
 0x5d5   : > { %v2747_v44 = vperm.slane %v2743_v2, %v8572_v54  ;;  %v2771_v11 = vrot.slane %v2758_v26, 4  ;;  %v2774_v14 = vsel %vm2681_vm5, %v2758_v26, %v2773_v31 }
 0x5d6   : > { %v2782_v29 = vperm.slane %v2774_v14, %v8588_v61 }
 0x5d7   : > { %v2759_v30 = vrot.slane %v2747_v44, 4  ;;  %v2772_v38 = vsel %vm2681_vm5, %v2771_v11, %v2752_v52  ;;  %v2762_v4 = vsel %vm2681_vm5, %v2747_v44, %v2761_v10  ;;  %2882 = vmatpush.bf16.msra.mxu0 %v6353_v51 }
 0x5d8   : > { %v2770_v17 = vperm.slane %v2762_v4, %v8588_v61  ;;  %v2778_v28 = vperm.slane %v2772_v38, %v8588_v61  ;;  %v2787_v12 = vrot.slane %v2782_v29, 4 }
 0x5d9   : > { %v2760_v18 = vsel %vm2681_vm5, %v2759_v30, %v2741_v57 }
 0x5da   : > { %v2766_v27 = vperm.slane %v2760_v18, %v8588_v61  ;;  %v2789_v33 = vrot.slane %v2770_v17, 4  ;;  %v2788_v36 = vsel %vm2681_vm5, %v2787_v12, %v2770_v17  ;;  %v2783_v58 = vrot.slane %v2778_v28, 4 }
 0x5db   : > { %2883 = vmatpush.bf16.msra.mxu0 %v6352_v45  ;;  %v3051_v17 = vshrl.u32 %v8615_v16, 16 }
 0x5dc   : > { %v2785_v13 = vrot.slane %v2766_v27, 4  ;;  %v2790_v59 = vsel %vm2681_vm5, %v2782_v29, %v2789_v33  ;;  %v2784_v6 = vsel %vm2681_vm5, %v2783_v58, %v2766_v27 }
 0x5dd   : > { %2800 = vrot.lane.b32.xlu1 %v2790_v59, %s7650_s29 }
 0x5de   : > { %v2786_v5 = vsel %vm2681_vm5, %v2778_v28, %v2785_v13 }
 0x5df   : > { %2792 = vrot.lane.b32.xlu0 %v2786_v5, %s7649_s0  ;;  %2884 = vmatpush.bf16.msra.mxu0 %v6351_v22 }
 0x5e3   : > { %2885 = vmatpush.bf16.msra.mxu0 %v6350_v20 }
 0x5e7   : > { %2796 = vrot.lane.b32.xlu0 %v2788_v36, %s7651_s6 }
 0x5ef   : > { %3032 = vrot.lane.b32.xlu0 %v8581_v19, %s7649_s0 }
 0x5f7   : > { %3024 = vrot.lane.b32.xlu0 %v8581_v19, %s7650_s29 }
 0x5ff   : > { %3030 = vrot.lane.b32.xlu0 %v8615_v16, %s7651_s6 }
 0x607   : > { %3026 = vrot.lane.b32.xlu0 %v8615_v16, %s7650_s29 }
 0x61f   : > { %v3029_v60 = vpop.permute.xlu2 %3028 }
 0x620   : > { %v3045_v1 = vshrl.u32 %v3029_v60, 16 }
 0x627   : > { %v3035_v44 = vpop.permute.xlu2 %3034 }
 0x628   : > { %v3058_v30 = vshrl.u32 %v3035_v44, 16 }
 0x64f   : > { %v2801_v23 = vpop.permute.xlu1 %2800 }
 0x651   : > { %v2793_v37 = vpop.permute.xlu0 %2792 }
 0x652   : > { %v2804_v39 = vsel %vm2803_vm6, %v2784_v6, %v2793_v37 }
 0x659   : > { %v2797_v42 = vpop.permute.xlu0 %2796 }
 0x65a   : > { %v2806_v7 = vsel %vm2805_vm7, %v2804_v39, %v2797_v42 }
 0x65b   : > { %v2808_v21 = vsel %vm2807_vm8, %v2806_v7, %v2801_v23 }
 0x65c   : > { %v2809_v3 = vpack.c.bf16 %v2808_v21, %v2808_v21 }
 0x65e   : > { %2886 = vmatmul.bf16.vlgmr.msra.gmra.mxu0 %v2809_v3 }
 0x661   : > { %v3033_v9 = vpop.permute.xlu0 %3032 }
 0x662   : > { %v3046_v46 = vshrl.u32 %v3033_v9, 16  ;;  %v3044_v47 = vpack.i.b16 %v3033_v9, %v3029_v60 }
 0x664   : > { %v3047_v48 = vpack.i.b16 %v3046_v46, %v3045_v1  ;;  %v3069_v63 = vperm.slane %v3044_v47, %v8572_v54  ;;  %v6947_v1 = vld [vmem:[%s9667_s4] ss:$0 sm:$0xff] }
 0x666   : > { %v3096_v0 = vperm.slane %v3047_v48, %v8572_v54  ;;  %v3070_v50 = vrot.slane %v3069_v63, 4 }
 0x668   : > { %v3097_v49 = vrot.slane %v3096_v0, 4 }
 0x669   : > { %v3025_v41 = vpop.permute.xlu0 %3024 }
 0x66a   : > { %v3038_v62 = vpack.i.b16 %v3025_v41, %v8581_v19  ;;  %v3040_v25 = vshrl.u32 %v3025_v41, 16 }
 0x66c   : > { %v3041_v40 = vpack.i.b16 %v3040_v25, %v3039_v43  ;;  %v3064_v34 = vperm.slane %v3038_v62, %v8572_v54  ;;  %v7659_v25 = vmov 128.0  }
 0x66d   : > { %6965 = vrcp.f32 %v7659_v25 }
 0x66e   : > { %v3091_v52 = vperm.slane %v3041_v40, %v8572_v54  ;;  %v3072_v56 = vsel %vm2681_vm5, %v3070_v50, %v3064_v34  ;;  %v3073_v37 = vrot.slane %v3064_v34, 4 }
 0x66f   : > { %v3078_v57 = vperm.slane %v3072_v56, %v8588_v61 }
 0x670   : > { %v3098_v32 = vsel %vm2681_vm5, %v3097_v49, %v3091_v52  ;;  %v3099_v58 = vrot.slane %v3091_v52, 4  ;;  %v3074_v6 = vsel %vm2681_vm5, %v3069_v63, %v3073_v37 }
 0x671   : > { %v3104_v55 = vperm.slane %v3098_v32, %v8588_v61  ;;  %v3031_v26 = vpop.permute.xlu0 %3030  ;;  %v3083_v31 = vrot.slane %v3078_v57, 4  ;;  %v3082_v39 = vperm.slane %v3074_v6, %v8588_v61 }
 0x672   : > { %v3057_v11 = vshrl.u32 %v3031_v26, 16  ;;  %v3056_v4 = vpack.i.b16 %v3035_v44, %v3031_v26  ;;  %v3100_v23 = vsel %vm2681_vm5, %v3096_v0, %v3099_v58 }
 0x673   : > { %6859 = vxpose.binary.xlu2.c.b16.start.end [1/2] (short) (narrow) %v3104_v55, %v3078_v57, 32  ;;  %v3109_v2 = vrot.slane %v3104_v55, 4  ;;  %v3084_v19 = vsel %vm2681_vm5, 0, %v3083_v31  ;;  %v3108_v42 = vperm.slane %v3100_v23, %v8588_v61  ;;  %v3085_v7 = vrot.slane %v3082_v39, 4  ;;  %v6966_v34 = vpop.eup %6965 }
 0x674   : > { %v3059_v14 = vpack.i.b16 %v3058_v30, %v3057_v11  ;;  %v3122_v27 = vperm.slane %v3056_v4, %v8572_v54  ;;  %v2897_v52 = vmul.f32 128.0, %v6966_v34  ;;  %vm2901_vm9 = vweird.f32 %v6966_v34 }
 0x675   : > { %v3110_v10 = vsel %vm2681_vm5, 0, %v3109_v2  ;;  %v3111_v21 = vrot.slane %v3108_v42, 4  ;;  %v3086_v3 = vsel %vm2681_vm5, 0, %v3085_v7 }
 0x676   : > { %6864 = vxpose.binary.xlu0.c.b16.start.end [1/2] (short) (narrow) %v3110_v10, %v3084_v19, 32  ;;  %v3148_v28 = vperm.slane %v3059_v14, %v8572_v54  ;;  %v3123_v13 = vrot.slane %v3122_v27, 4  ;;  %v2898_v57 = vsub.f32 1.0, %v2897_v52 }
 0x677   : > { %v3112_v60 = vsel %vm2681_vm5, 0, %v3111_v21  ;;  %v6365_v21 = vld [vmem:[#allocation14 + $0x38] sm:$0xff] }
 0x678   : > { %v3149_v59 = vrot.slane %v3148_v28, 4  ;;  %v2899_v32 = vmul.f32 %v6966_v34, %v2898_v57  ;;  %2998 = vmatpush.bf16.msra.mxu1 %v6365_v21 }
 0x679   : > { %v3027_v38 = vpop.permute.xlu0 %3026 }
 0x67a   : > { %v3052_v18 = vshrl.u32 %v3027_v38, 16  ;;  %v3050_v29 = vpack.i.b16 %v3027_v38, %v8615_v16  ;;  %v2900_v26 = vadd.f32 %v6966_v34, %v2899_v32 }
 0x67c   : > { %v3053_v33 = vpack.i.b16 %v3052_v18, %v3051_v17  ;;  %v3117_v5 = vperm.slane %v3050_v29, %v8572_v54  ;;  %v8688_v2 = vsel %vm2901_vm9, %v6966_v34, %v2900_v26 }
 0x67d   : > { %9668 = vst [vmem:[#allocation41_spill] sm:$0xff] %v8688_v2 }
 0x67e   : > { %v3143_v12 = vperm.slane %v3053_v33, %v8572_v54  ;;  %v3124_v36 = vsel %vm2681_vm5, %v3123_v13, %v3117_v5  ;;  %v3125_v24 = vrot.slane %v3117_v5, 4 }
 0x67f   : > { %v3130_v35 = vperm.slane %v3124_v36, %v8588_v61 }
 0x680   : > { %v3150_v15 = vsel %vm2681_vm5, %v3149_v59, %v3143_v12  ;;  %v3151_v51 = vrot.slane %v3143_v12, 4  ;;  %v3126_v16 = vsel %vm2681_vm5, %v3122_v27, %v3125_v24 }
 0x681   : > { %v3156_v53 = vperm.slane %v3150_v15, %v8588_v61  ;;  %v3134_v22 = vperm.slane %v3126_v16, %v8588_v61  ;;  %v3135_v50 = vrot.slane %v3130_v35, 4 }
 0x682   : > { %v3152_v45 = vsel %vm2681_vm5, %v3148_v28, %v3151_v51 }
 0x683   : > { %v3160_v20 = vperm.slane %v3152_v45, %v8588_v61  ;;  %v3137_v48 = vrot.slane %v3134_v22, 4  ;;  %v3161_v62 = vrot.slane %v3156_v53, 4  ;;  %v3136_v49 = vsel %vm2681_vm5, 0, %v3135_v50 }
 0x685   : > { %v3163_v63 = vrot.slane %v3160_v20, 4  ;;  %v3138_v43 = vsel %vm2681_vm5, 0, %v3137_v48  ;;  %v3162_v40 = vsel %vm2681_vm5, 0, %v3161_v62  ;;  %v6360_v48 = vld [vmem:[#allocation14 + $0x10] sm:$0xff] }
 0x687   : > { %v3164_v41 = vsel %vm2681_vm5, 0, %v3163_v63 }
 0x693   : > { %6874 = vxpose.binary.xlu2.c.b16.start.end [1/2] (short) (narrow) %v3156_v53, %v3130_v35, 32 }
 0x696   : > { %6879 = vxpose.binary.xlu0.c.b16.start.end [1/2] (short) (narrow) %v3112_v60, %v3086_v3, 32  ;;  %v6364_v3 = vld [vmem:[#allocation14 + $0x30] sm:$0xff]  ;;  %v6363_v60 = vld [vmem:[#allocation14 + $0x28] sm:$0xff] }
 0x697   : > { %2999 = vmatpush.bf16.msra.mxu1 %v6364_v3 }
 0x69b   : > { %3000 = vmatpush.bf16.msra.mxu1 %v6363_v60 }
 0x6b3   : > { %6889 = vxpose.binary.xlu2.c.b16.start.end [1/2] (short) (narrow) %v3160_v20, %v3134_v22, 32 }
 0x6b6   : > { %6894 = vxpose.binary.xlu0.c.b16.start.end [1/2] (short) (narrow) %v3164_v41, %v3138_v43, 32  ;;  %v6359_v43 = vld [vmem:[#allocation14 + $0x8] sm:$0xff] }
 0x6db   : > { %v2887_v9 = vpop.f32.mrf.mxu0 }
 0x6dc   : > { %v2888_v46 = vadd.f32 %v6947_v1, %v2887_v9  ;;  %v6362_v9 = vld [vmem:[#allocation14 + $0x20] sm:$0xff] }
 0x6dd   : > { %3001 = vmatpush.bf16.msra.mxu1 %v6362_v9 }
 0x6de   : > { %v2891_v47 = vadd.f32 %v2888_v46, %v8073_v8  ;;  %v6361_v46 = vld [vmem:[#allocation14 + $0x18] sm:$0xff] }
 0x6e0   : > { %2894 = vadd.xlane.f32.xlu1 %v2891_v47 }
 0x6e1   : > { %3002 = vmatpush.bf16.msra.mxu1 %v6361_v46 }
 0x6e3   : > { %v2889_v0 = vpop.f32.mrf.mxu0 }
 0x6e5   : > { %3003 = vmatpush.bf16.msra.mxu1 %v6360_v48 }
 0x6e9   : > { %3004 = vmatpush.bf16.msra.mxu1 %v6359_v43 }
 0x714   : > { %v8682_v8 = vpop.trf.xlu2 }
 0x715   : > { %v3567_v41 = vrot.slane %v8682_v8, 4 }
 0x71a   : > { %6869 = vxpose.binary.xlu1.c.b16.start.end [1/2] (short) (narrow) %v3108_v42, %v3082_v39, 32 }
 0x71c   : > { %v8684_v56 = vpop.trf.xlu2 }
 0x71d   : > { %v3679_v25 = vrot.slane %v8684_v56, 4 }
 0x722   : > { %v6865_v31 = vpop.trf.xlu0 }
 0x723   : > { %v3579_v28 = vrot.slane %v6865_v31, 4 }
 0x724   : > { %v8686_v55 = vpop.trf.xlu2 }
 0x725   : > { %v3791_v52 = vrot.slane %v8686_v55, 4 }
 0x72a   : > { %v6866_v30 = vpop.trf.xlu0 }
 0x72b   : > { %v3691_v36 = vrot.slane %v6866_v30, 4 }
 0x72c   : > { %v8690_v19 = vpop.trf.xlu2 }
 0x732   : > { %v8697_v14 = vpop.trf.xlu0 }
 0x734   : > { %v6875_v4 = vpop.trf.xlu2 }
 0x735   : > { %v3591_v5 = vrot.slane %v6875_v4, 4 }
 0x73a   : > { %6884 = vxpose.binary.xlu1.c.b16.start.end [1/2] (short) (narrow) %v3162_v40, %v3136_v49, 32  ;;  %v8701_v27 = vpop.trf.xlu0 }
 0x73c   : > { %v6876_v17 = vpop.trf.xlu2 }
 0x73d   : > { %v3703_v22 = vrot.slane %v6876_v17, 4 }
 0x742   : > { %v6880_v33 = vpop.trf.xlu0 }
 0x743   : > { %v3577_v13 = vrot.slane %v6880_v33, 4  ;;  %v3580_v59 = vsel %vm2681_vm5, %v6880_v33, %v3579_v28 }
 0x744   : > { %v8699_v18 = vpop.trf.xlu2  ;;  %v3588_v0 = vperm.slane %v3580_v59, %v8572_v54  ;;  %v3915_v59 = vrot.slane %v8701_v27, 4 }
 0x745   : > { %v3578_v12 = vsel %vm2681_vm5, %v3577_v13, %v6865_v31  ;;  %v3815_v39 = vrot.slane %v8699_v18, 4  ;;  %v6358_v31 = vld [vmem:[#allocation14] sm:$0xff]  ;;  %v3903_v13 = vrot.slane %v8690_v19, 4 }
 0x746   : > { %v3584_v50 = vperm.slane %v3578_v12, %v8572_v54  ;;  %v3625_v57 = vrot.slane %v3588_v0, 4  ;;  %3005 = vmatpush.bf16.msra.mxu1 %v6358_v31 }
 0x74a   : > { %v6881_v51 = vpop.trf.xlu0 }
 0x74b   : > { %v3689_v16 = vrot.slane %v6881_v51, 4  ;;  %v3692_v45 = vsel %vm2681_vm5, %v6881_v51, %v3691_v36 }
 0x74c   : > { %v8703_v29 = vpop.trf.xlu2  ;;  %v8748_v12 = vperm.slane %v3692_v45, %v8572_v54 }
 0x74d   : > { %v3690_v20 = vsel %vm2681_vm5, %v3689_v16, %v6866_v30 }
 0x74e   : > { %v3737_v3 = vrot.slane %v8748_v12, 4 }
 0x752   : > { %v6882_v1 = vpop.trf.xlu0 }
 0x753   : > { %v2895_v10 = vpop.xlane.xlu1 %2894 }
 0x754   : > { %v2903_v44 = vmul.f32 %v8688_v2, %v2895_v10  ;;  %v6890_v15 = vpop.trf.xlu2  ;;  %v3803_v10 = vrot.slane %v8697_v14, 4 }
 0x755   : > { %v3589_v35 = vrot.slane %v6890_v15, 4  ;;  %v3592_v53 = vsel %vm2681_vm5, %v6890_v15, %v3591_v5  ;;  %v3927_v5 = vrot.slane %v8703_v29, 4 }
 0x756   : > { %v8693_v11 = vsub.f32 %v2891_v47, %v2903_v44  ;;  %v8733_v32 = vperm.slane %v3592_v53, %v8572_v54  ;;  %v3613_v44 = vrot.slane %v3584_v50, 4  ;;  %v3804_v51 = vsel %vm2681_vm5, %v6882_v1, %v3803_v10 }
 0x757   : > { %v3590_v24 = vsel %vm2681_vm5, %v3589_v35, %v6875_v4  ;;  %v3801_v4 = vrot.slane %v6882_v1, 4  ;;  %v8770_v1 = vperm.slane %v3804_v51, %v8572_v54 }
 0x758   : > { %v2905_v38 = vmul.f32 %v8693_v11, %v8693_v11  ;;  %v8738_v30 = vperm.slane %v3590_v24, %v8572_v54  ;;  %v3651_v36 = vrot.slane %v8733_v32, 4  ;;  %v3696_v24 = vperm.slane %v3690_v20, %v8572_v54 }
 0x759   : > { %v3802_v45 = vsel %vm2681_vm5, %v3801_v4, %v8697_v14 }
 0x75a   : > { %2906 = vadd.xlane.f32.xlu2 %v2905_v38  ;;  %v8720_v47 = vpop.trf.xlu0  ;;  %v3639_v53 = vrot.slane %v8738_v30, 4  ;;  %v8777_v46 = vperm.slane %v3802_v45, %v8572_v54 }
 0x75b   : > { %v3913_v60 = vrot.slane %v8720_v47, 4 }
 0x75c   : > { %v6891_v37 = vpop.trf.xlu2 }
 0x75d   : > { %v3701_v58 = vrot.slane %v6891_v37, 4  ;;  %v3704_v6 = vsel %vm2681_vm5, %v6891_v37, %v3703_v22 }
 0x75e   : > { %v8758_v37 = vperm.slane %v3704_v6, %v8572_v54 }
 0x75f   : > { %v3702_v23 = vsel %vm2681_vm5, %v3701_v58, %v6876_v17 }
 0x760   : > { %v8766_v20 = vperm.slane %v3702_v23, %v8572_v54 }
 0x762   : > { %v8729_v34 = vpop.trf.xlu0  ;;  %v3751_v31 = vrot.slane %v8766_v20, 4 }
 0x764   : > { %v8714_v42 = vpop.trf.xlu2 }
 0x765   : > { %v8718_v7 = vsel %vm2681_vm5, %v8714_v42, %v3815_v39  ;;  %v3813_v16 = vrot.slane %v8714_v42, 4 }
 0x766   : > { %v8783_v23 = vperm.slane %v8718_v7, %v8572_v54 }
 0x767   : > { %v3814_v48 = vsel %vm2681_vm5, %v3813_v16, %v8699_v18  ;;  %v3916_v18 = vsel %vm2681_vm5, %v8720_v47, %v3915_v59  ;;  %v3849_v47 = vrot.slane %v8770_v1, 4 }
 0x768   : > { %v3875_v10 = vrot.slane %v8783_v23, 4 }
 0x76a   : > { %v8787_v43 = vpop.trf.xlu0 }
 0x76c   : > { %v8722_v63 = vpop.trf.xlu2 }
 0x76d   : > { %v3925_v6 = vrot.slane %v8722_v63, 4  ;;  %v3928_v7 = vsel %vm2681_vm5, %v8722_v63, %v3927_v5 }
 0x7c6   : > { %v6870_v62 = vpop.trf.xlu1 }
 0x7c7   : > { %v3565_v49 = vrot.slane %v6870_v62, 4  ;;  %v3568_v40 = vsel %vm2681_vm5, %v6870_v62, %v3567_v41  ;;  %v3725_v41 = vrot.slane %v3696_v24, 4 }
 0x7c8   : > { %v3576_v26 = vperm.slane %v3568_v40, %v8572_v54  ;;  %v3926_v40 = vsel %vm2681_vm5, %v3925_v6, %v8703_v29 }
 0x7c9   : > { %v3566_v38 = vsel %vm2681_vm5, %v3565_v49, %v8682_v8  ;;  %v8800_v49 = vperm.slane %v3814_v48, %v8572_v54 }
 0x7ca   : > { %v3572_v17 = vperm.slane %v3566_v38, %v8572_v54  ;;  %v3626_v28 = vsel %vm2681_vm5, %v3625_v57, %v3576_v26  ;;  %v3627_v33 = vrot.slane %v3576_v26, 4  ;;  %v8816_v38 = vperm.slane %v3928_v7, %v8572_v54 }
 0x7cb   : > { %v3863_v51 = vrot.slane %v8800_v49, 4  ;;  %v8827_v16 = vperm.slane %v3626_v28, %v8588_v61 }
 0x7cc   : > { %v3614_v8 = vsel %vm2681_vm5, %v3613_v44, %v3572_v17  ;;  %v3615_v15 = vrot.slane %v3572_v17, 4  ;;  %v3628_v35 = vsel %vm2681_vm5, %v3588_v0, %v3627_v33  ;;  %v8813_v44 = vperm.slane %v3916_v18, %v8572_v54 }
 0x7cd   : > { %v2907_v22 = vpop.xlane.xlu2 %2906  ;;  %v8820_v17 = vperm.slane %v3926_v40, %v8572_v54 }
 0x7ce   : > { %v2908_v58 = vmul.f32 %v2907_v22, %v8688_v2  ;;  %v6871_v39 = vpop.trf.xlu1  ;;  %v3616_v21 = vsel %vm2681_vm5, %v3584_v50, %v3615_v15  ;;  %v3763_v50 = vrot.slane %v8758_v37, 4  ;;  %v8830_v22 = vperm.slane %v3628_v35, %v8588_v61 }
 0x7cf   : > { %v3677_v42 = vrot.slane %v6871_v39, 4  ;;  %v3680_v14 = vsel %vm2681_vm5, %v6871_v39, %v3679_v25  ;;  %v3914_v25 = vsel %vm2681_vm5, %v3913_v60, %v8701_v27  ;;  %v3837_v27 = vrot.slane %v8777_v46, 4 }
 0x7d0   : > { %v8773_v9 = vadd.f32 1e-05, %v2908_v58  ;;  %v8810_v63 = vperm.slane %v3914_v25, %v8572_v54  ;;  %v3961_v28 = vrot.slane %v8813_v44, 4  ;;  %v3675_v25 = vrot.slane %v8830_v22, 4 }
 0x7d1   : > { %v3678_v0 = vsel %vm2681_vm5, %v3677_v42, %v8684_v56  ;;  %v3688_v56 = vperm.slane %v3680_v14, %v8572_v54  ;;  %v3601_v14 = vrot.slane %v8729_v34, 4 }
 0x7d2   : > { %6967 = vrsqrt.f32 %v8773_v9  ;;  %v3684_v62 = vperm.slane %v3678_v0, %v8572_v54  ;;  %v3949_v60 = vrot.slane %v8810_v63, 4  ;;  %v3713_v0 = vrot.slane %v8787_v43, 4 }
 0x7d3   : > { %v3739_v33 = vrot.slane %v3688_v56, 4  ;;  %v3738_v58 = vsel %vm2681_vm5, %v3737_v3, %v3688_v56  ;;  %vm2916_vm11 = vweird.f32 %v8773_v9 }
 0x7d4   : > { %v3726_v57 = vsel %vm2681_vm5, %v3725_v41, %v3684_v62  ;;  %v3727_v26 = vrot.slane %v3684_v62, 4  ;;  %v3671_v41 = vrot.slane %v8827_v16, 4 }
 0x7d5   : > { %v3740_v3 = vsel %vm2681_vm5, %v8748_v12, %v3739_v33 }
 0x7d6   : > { %v6872_v29 = vpop.trf.xlu1  ;;  %v3728_v4 = vsel %vm2681_vm5, %v3696_v24, %v3727_v26  ;;  %v8833_v24 = vperm.slane %v3614_v8, %v8588_v61  ;;  %v3975_v8 = vrot.slane %v8820_v17, 4  ;;  %v8862_v7 = vperm.slane %v3740_v3, %v8588_v61 }
 0x7d7   : > { %v3789_v59 = vrot.slane %v6872_v29, 4  ;;  %v3792_v5 = vsel %vm2681_vm5, %v6872_v29, %v3791_v52  ;;  %v8840_v52 = vperm.slane %v3616_v21, %v8588_v61  ;;  %v8853_v21 = vperm.slane %v3738_v58, %v8588_v61 }
 0x7d8   : > { %v6968_v15 = vpop.eup %6967  ;;  %v3800_v42 = vperm.slane %v3792_v5, %v8572_v54  ;;  %v3663_v12 = vrot.slane %v8833_v24, 4  ;;  %v8866_v29 = vperm.slane %v3726_v57, %v8588_v61 }
 0x7d9   : > { %v2911_v45 = vmul.f32 %v6968_v15, %v8773_v9  ;;  %v3790_v39 = vsel %vm2681_vm5, %v3789_v59, %v8686_v55  ;;  %v8850_v55 = vpop.trf.xlu0  ;;  %v3667_v18 = vrot.slane %v8840_v52, 4  ;;  %vm2917_vm10 = vweird.f32 %v6968_v15 }
 0x7da   : > { %v3796_v48 = vperm.slane %v3790_v39, %v8572_v54  ;;  %v3850_v56 = vsel %vm2681_vm5, %v3849_v47, %v3800_v42  ;;  %v3851_v40 = vrot.slane %v3800_v42, 4  ;;  %v3783_v39 = vrot.slane %v8853_v21, 4  ;;  %vm2918_vm12 = vmor %vm2916_vm11, %vm2917_vm10 }
 0x7db   : > { %v2912_v6 = vmul.f32 %v6968_v15, %v2911_v45  ;;  %v8875_v42 = vperm.slane %v3850_v56, %v8588_v61  ;;  %v3825_v56 = vrot.slane %v8850_v55, 4 }
 0x7dc   : > { %v3839_v45 = vrot.slane %v3796_v48, 4 }
 0x7dd   : > { %v2913_v62 = vmul.f32 0.5, %v2912_v6  ;;  %v8880_v6 = vperm.slane %v3728_v4, %v8588_v61 }
 0x7de   : > { %v6873_v26 = vpop.trf.xlu1 }
 0x7df   : > { %v2914_v33 = vsub.f32 1.5, %v2913_v62  ;;  %v3901_v59 = vrot.slane %v6873_v26, 4  ;;  %v3904_v5 = vsel %vm2681_vm5, %v6873_v26, %v3903_v13  ;;  %v3852_v13 = vsel %vm2681_vm5, %v8770_v1, %v3851_v40  ;;  %v6948_v62 = vld [vmem:[%s9669_s20] ss:$0 sm:$0xff]  ;;  %s9691_s20 = sld [smem:[#allocation30_spill]] }
 0x7e0   : > { %v3912_v58 = vperm.slane %v3904_v5, %v8572_v54  ;;  %v3838_v26 = vsel %vm2681_vm5, %v3837_v27, %v3796_v48  ;;  %v8900_v35 = vperm.slane %v3852_v13, %v8588_v61  ;;  %v3895_v48 = vrot.slane %v8875_v42, 4 }
 0x7e1   : > { %v2915_v47 = vmul.f32 %v6968_v15, %v2914_v33  ;;  %v3902_v57 = vsel %vm2681_vm5, %v3901_v59, %v8690_v19  ;;  %v3787_v19 = vrot.slane %v8862_v7, 4  ;;  %v3840_v59 = vsel %vm2681_vm5, %v8777_v46, %v3839_v45 }
 0x7e2   : > { %v3908_v9 = vperm.slane %v3902_v57, %v8572_v54  ;;  %v3963_v3 = vrot.slane %v3912_v58, 4  ;;  %v3962_v40 = vsel %vm2681_vm5, %v3961_v28, %v3912_v58  ;;  %v6949_v57 = vld [vmem:[%s9670_s12] ss:$0 sm:$0xff]  ;;  %v3779_v46 = vrot.slane %v8880_v6, 4 }
 0x7e3   : > { %v2919_v33 = vsel %vm2918_vm12, %v6968_v15, %v2915_v47  ;;  %v8904_v15 = vpop.trf.xlu0  ;;  %v8912_v47 = vperm.slane %v3838_v26, %v8588_v61  ;;  %v8915_v13 = vperm.slane %v3840_v59, %v8588_v61  ;;  %v3899_v59 = vrot.slane %v8900_v35, 4 }
 0x7e4   : > { %v3951_v1 = vrot.slane %v3908_v9, 4  ;;  %v2920_v5 = vmul.f32 %v2919_v33, %v8693_v11  ;;  %v3964_v27 = vsel %vm2681_vm5, %v8813_v44, %v3963_v3  ;;  %v3950_v28 = vsel %vm2681_vm5, %v3949_v60, %v3908_v9 }
 0x7e5   : > { %v8918_v44 = vperm.slane %v3962_v40, %v8588_v61  ;;  %v8922_v4 = vperm.slane %v3964_v27, %v8588_v61  ;;  %v3937_v9 = vrot.slane %v8904_v15, 4  ;;  %s5738_s22 = sadd.s32 %s9691_s20, %s6334_s27 }
 0x7e6   : > { %v3952_v11 = vsel %vm2681_vm5, %v8810_v63, %v3951_v1  ;;  %v6885_v45 = vpop.trf.xlu1  ;;  %v2924_v58 = vmul.f32 %v6948_v62, %v2920_v5  ;;  %s6335_s12 = sshll.u32 %s5738_s22, 3 }
 0x7e7   : > { %v3602_v3 = vsel %vm2681_vm5, %v3601_v14, %v6885_v45  ;;  %v3603_v33 = vrot.slane %v6885_v45, 4  ;;  %v8929_v62 = vperm.slane %v3952_v11, %v8588_v61  ;;  %v8935_v14 = vperm.slane %v3950_v28, %v8588_v61 }
 0x7e8   : > { %v3608_v60 = vperm.slane %v3602_v3, %v8572_v54  ;;  %v8925_v63 = vadd.f32 %v6949_v57, %v2924_v58  ;;  %v3891_v11 = vrot.slane %v8915_v13, 4  ;;  %v3887_v45 = vrot.slane %v8912_v47, 4 }
 0x7e9   : > { %v3604_v26 = vsel %vm2681_vm5, %v8729_v34, %v3603_v33 }
 0x7ea   : > { %v3612_v1 = vperm.slane %v3604_v26, %v8572_v54  ;;  %v3637_v40 = vrot.slane %v3608_v60, 4  ;;  %v3640_v5 = vsel %vm2681_vm5, %v3608_v60, %v3639_v53  ;;  %v2929_v57 = vpack.c.bf16 %v8925_v63, %v8925_v63 }
 0x7eb   : > { %v3648_v27 = vperm.slane %v3640_v5, %v8588_v61 }
 0x7ec   : > { %v3638_v28 = vsel %vm2681_vm5, %v3637_v40, %v8738_v30  ;;  %v3649_v58 = vrot.slane %v3612_v1, 4  ;;  %3006 = vmatmul.bf16.vlgmr.msra.gmra.mxu1 %v2929_v57  ;;  %v3652_v53 = vsel %vm2681_vm5, %v3612_v1, %v3651_v36  ;;  %v4003_v40 = vrot.slane %v8929_v62, 4 }
 0x7ed   : > { %v3660_v33 = vperm.slane %v3652_v53, %v8588_v61  ;;  %v8957_v60 = vsel %vm2681_vm5, %v3648_v27, %v3667_v18  ;;  %v3665_v26 = vrot.slane %v3648_v27, 4  ;;  %v8960_v5 = vperm.slane %v3638_v28, %v8588_v61 }
 0x7ee   : > { %v6886_v30 = vpop.trf.xlu1  ;;  %v4041_v34 = vshrl.u32 %v8957_v60, 16  ;;  %v3650_v36 = vsel %vm2681_vm5, %v3649_v58, %v8733_v32 }
 0x7ef   : > { %v3714_v1 = vsel %vm2681_vm5, %v3713_v0, %v6886_v30  ;;  %v3715_v18 = vrot.slane %v6886_v30, 4  ;;  %v8973_v27 = vsel %vm2681_vm5, %v3660_v33, %v3675_v25  ;;  %v3673_v28 = vrot.slane %v3660_v33, 4 }
 0x7f0   : > { %v3720_v53 = vperm.slane %v3714_v1, %v8572_v54  ;;  %v4073_v57 = vshrl.u32 %v8973_v27, 16  ;;  %v3656_v3 = vperm.slane %v3650_v36, %v8588_v61  ;;  %v8980_v32 = vsel %vm2681_vm5, %v3665_v26, %v8840_v52 }
 0x7f1   : > { %v3716_v0 = vsel %vm2681_vm5, %v8787_v43, %v3715_v18  ;;  %v8986_v58 = vsel %vm2681_vm5, %v3673_v28, %v8830_v22  ;;  %v8993_v33 = vsel %vm2681_vm5, %v8960_v5, %v3663_v12 }
 0x7f2   : > { %v3724_v30 = vperm.slane %v3716_v0, %v8572_v54  ;;  %v3749_v36 = vrot.slane %v3720_v53, 4  ;;  %v3752_v52 = vsel %vm2681_vm5, %v3720_v53, %v3751_v31  ;;  %v4065_v43 = vshrl.u32 %v8986_v58, 16 }
 0x7f3   : > { %v3760_v22 = vperm.slane %v3752_v52, %v8588_v61  ;;  %v9004_v26 = vsel %vm2681_vm5, %v3656_v3, %v3671_v41  ;;  %v3669_v12 = vrot.slane %v3656_v3, 4 }
 0x7f4   : > { %v3750_v18 = vsel %vm2681_vm5, %v3749_v36, %v8766_v20  ;;  %v3761_v28 = vrot.slane %v3724_v30, 4  ;;  %v3764_v31 = vsel %vm2681_vm5, %v3724_v30, %v3763_v50 }
 0x7f5   : > { %v3772_v0 = vperm.slane %v3764_v31, %v8588_v61  ;;  %v9017_v41 = vsel %vm2681_vm5, %v3760_v22, %v3779_v46  ;;  %v3777_v52 = vrot.slane %v3760_v22, 4  ;;  %v9020_v3 = vperm.slane %v3750_v18, %v8588_v61 }
 0x7f6   : > { %v6887_v1 = vpop.trf.xlu1  ;;  %v4042_v36 = vshrl.u32 %v9017_v41, 16  ;;  %v3762_v50 = vsel %vm2681_vm5, %v3761_v28, %v8758_v37  ;;  %v9029_v30 = vsel %vm2681_vm5, %v3669_v12, %v8827_v16 }
 0x7f7   : > { %v3826_v46 = vsel %vm2681_vm5, %v3825_v56, %v6887_v1  ;;  %v3827_v22 = vrot.slane %v6887_v1, 4  ;;  %v9037_v18 = vsel %vm2681_vm5, %v3772_v0, %v3787_v19  ;;  %v3785_v31 = vrot.slane %v3772_v0, 4 }
 0x7f8   : > { %v3832_v20 = vperm.slane %v3826_v46, %v8572_v54  ;;  %v4074_v28 = vshrl.u32 %v9037_v18, 16  ;;  %v9043_v16 = vpack.i.b16 %v4042_v36, %v4041_v34  ;;  %v9052_v19 = vperm.slane %v3762_v50, %v8588_v61 }
 0x7f9   : > { %v3828_v12 = vsel %vm2681_vm5, %v8850_v55, %v3827_v22  ;;  %v9049_v56 = vsel %vm2681_vm5, %v3785_v31, %v8862_v7  ;;  %v9056_v1 = vsel %vm2681_vm5, %v3777_v52, %v8880_v6 }
 0x7fa   : > { %v3836_v0 = vperm.slane %v3828_v12, %v8572_v54  ;;  %v3861_v46 = vrot.slane %v3832_v20, 4  ;;  %v3864_v34 = vsel %vm2681_vm5, %v3832_v20, %v3863_v51  ;;  %v9062_v36 = vpack.i.b16 %v4074_v28, %v4073_v57 }
 0x7fb   : > { %v3872_v55 = vperm.slane %v3864_v34, %v8588_v61  ;;  %v4066_v50 = vshrl.u32 %v9049_v56, 16  ;;  %v9072_v6 = vsel %vm2681_vm5, %v9052_v19, %v3783_v39 }
 0x7fc   : > { %v3862_v52 = vsel %vm2681_vm5, %v3861_v46, %v8800_v49  ;;  %v3873_v22 = vrot.slane %v3836_v0, 4  ;;  %v3876_v51 = vsel %vm2681_vm5, %v3836_v0, %v3875_v10  ;;  %v4058_v10 = vshrl.u32 %v9072_v6, 16 }
 0x7fd   : > { %v3892_v20 = vsel %vm2681_vm5, %v3872_v55, %v3891_v11  ;;  %v3884_v31 = vperm.slane %v3876_v51, %v8588_v61  ;;  %v9086_v39 = vperm.slane %v3862_v52, %v8588_v61  ;;  %v3889_v28 = vrot.slane %v3872_v55, 4 }
 0x7fe   : > { %v6888_v12 = vpop.trf.xlu1  ;;  %v4105_v49 = vshrl.u32 %v3892_v20, 16  ;;  %v3874_v46 = vsel %vm2681_vm5, %v3873_v22, %v8783_v23  ;;  %v9090_v34 = vpack.i.b16 %v4066_v50, %v4065_v43 }
 0x7ff   : > { %v3938_v0 = vsel %vm2681_vm5, %v3937_v9, %v6888_v12  ;;  %v3939_v11 = vrot.slane %v6888_v12, 4  ;;  %v3900_v52 = vsel %vm2681_vm5, %v3884_v31, %v3899_v59  ;;  %v3880_v55 = vperm.slane %v3874_v46, %v8588_v61 }
 0x800   : > { %v3944_v51 = vperm.slane %v3938_v0, %v8572_v54  ;;  %v4137_v57 = vshrl.u32 %v3900_v52, 16  ;;  %v3897_v7 = vrot.slane %v3884_v31, 4  ;;  %v9105_v23 = vsel %vm2681_vm5, %v9086_v39, %v3887_v45 }
 0x801   : > { %v3940_v9 = vsel %vm2681_vm5, %v8904_v15, %v3939_v11  ;;  %v3896_v43 = vsel %vm2681_vm5, %v3880_v55, %v3895_v48  ;;  %v4089_v59 = vshrl.u32 %v9105_v23, 16  ;;  %v3893_v50 = vrot.slane %v3880_v55, 4 }
 0x802   : > { %v3948_v22 = vperm.slane %v3940_v9, %v8572_v54  ;;  %v3973_v12 = vrot.slane %v3944_v51, 4  ;;  %v3976_v31 = vsel %vm2681_vm5, %v3944_v51, %v3975_v8  ;;  %v4121_v46 = vshrl.u32 %v3896_v43, 16 }
 0x803   : > { %v3984_v45 = vperm.slane %v3976_v31, %v8588_v61  ;;  %v9120_v15 = vsel %vm2681_vm5, %v3897_v7, %v8900_v35  ;;  %v9124_v48 = vsel %vm2681_vm5, %v3893_v50, %v8875_v42  ;;  %v9128_v0 = vsel %vm2681_vm5, %v3889_v28, %v8915_v13 }
 0x804   : > { %v3974_v11 = vsel %vm2681_vm5, %v3973_v12, %v8820_v17  ;;  %v3985_v55 = vrot.slane %v3948_v22, 4  ;;  %v9671_v8 = vrot.slane %v8816_v38, 4  ;;  %v4129_v9 = vshrl.u32 %v9120_v15, 16 }
 0x805   : > { %v4004_v35 = vsel %vm2681_vm5, %v3984_v45, %v4003_v40  ;;  %v3980_v7 = vperm.slane %v3974_v11, %v8588_v61  ;;  %v4113_v13 = vshrl.u32 %v9124_v48, 16  ;;  %v4001_v12 = vrot.slane %v3984_v45, 4 }
 0x806   : > { %v3988_v51 = vsel %vm2681_vm5, %v3948_v22, %v9671_v8  ;;  %v4103_v28 = vpack.i.b16 %v4004_v35, %v3892_v20  ;;  %v4106_v50 = vshrl.u32 %v4004_v35, 16  ;;  %v3986_v17 = vsel %vm2681_vm5, %v3985_v55, %v8816_v38 }
 0x807   : > { %v3996_v42 = vperm.slane %v3988_v51, %v8588_v61  ;;  %v9672_v22 = vrot.slane %v8922_v4, 4  ;;  %v3992_v8 = vperm.slane %v3986_v17, %v8588_v61  ;;  %v9673_v40 = vrot.slane %v8935_v14, 4 }
 0x808   : > { %v4107_v11 = vpack.i.b16 %v4106_v50, %v4105_v49  ;;  %v9674_v35 = vrot.slane %v8918_v44, 4  ;;  %v4002_v50 = vsel %vm2681_vm5, %v4001_v12, %v8929_v62 }
 0x809   : > { %v4012_v31 = vsel %vm2681_vm5, %v3996_v42, %v9672_v22  ;;  %v4009_v37 = vrot.slane %v3996_v42, 4  ;;  %v4000_v51 = vsel %vm2681_vm5, %v3980_v7, %v9673_v40  ;;  %v4005_v22 = vrot.slane %v3992_v8, 4 }
 0x80a   : > { %v4135_v25 = vpack.i.b16 %v4012_v31, %v3900_v52  ;;  %v4138_v53 = vshrl.u32 %v4012_v31, 16  ;;  %v4087_v20 = vpack.i.b16 %v4000_v51, %v9105_v23  ;;  %v4008_v38 = vsel %vm2681_vm5, %v3992_v8, %v9674_v35  ;;  %6902 = vxpose.binary.xlu2.c.b16.start.end [1/2] (short) (narrow) %v4107_v11, %v4103_v28, 16 }
 0x80b   : > { %v4010_v45 = vsel %vm2681_vm5, %v4009_v37, %v8922_v4  ;;  %v4090_v55 = vshrl.u32 %v4000_v51, 16  ;;  %v4119_v17 = vpack.i.b16 %v4008_v38, %v3896_v43  ;;  %v4122_v2 = vshrl.u32 %v4008_v38, 16 }
 0x80c   : > { %v4139_v42 = vpack.i.b16 %v4138_v53, %v4137_v57  ;;  %v4127_v40 = vpack.i.b16 %v4010_v45, %v9120_v15  ;;  %v4130_v49 = vshrl.u32 %v4010_v45, 16  ;;  %v4006_v23 = vsel %vm2681_vm5, %v4005_v22, %v8918_v44 }
 0x80d   : > { %v4091_v52 = vpack.i.b16 %v4090_v55, %v4089_v59  ;;  %v4123_v31 = vpack.i.b16 %v4122_v2, %v4121_v46  ;;  %v4111_v4 = vpack.i.b16 %v4006_v23, %v9124_v48  ;;  %v4114_v37 = vshrl.u32 %v4006_v23, 16 }
 0x80e   : > { %6899 = vxpose.binary.xlu1.c.b16.start.end [1/2] (short) (narrow) %v4139_v42, %v4135_v25, 16  ;;  %v4095_v28 = vpack.i.b16 %v4002_v50, %v9128_v0  ;;  %v4131_v53 = vpack.i.b16 %v4130_v49, %v4129_v9  ;;  %v4097_v57 = vshrl.u32 %v9128_v0, 16  ;;  %v4098_v43 = vshrl.u32 %v4002_v50, 16 }
 0x80f   : > { %v9675_v15 = vshrl.u32 %v9004_v26, 16  ;;  %6905 = vxpose.binary.xlu0.c.b16.start.end [1/2] (short) (narrow) %v4123_v31, %v4119_v17, 16  ;;  %v4115_v8 = vpack.i.b16 %v4114_v37, %v4113_v13  ;;  %v3885_v44 = vrot.slane %v9086_v39, 4  ;;  %v3997_v51 = vrot.slane %v3980_v7, 4 }
 0x810   : > { %v4031_v2 = vpack.i.b16 %v9056_v1, %v8980_v32  ;;  %v4099_v62 = vpack.i.b16 %v4098_v43, %v4097_v57  ;;  %v4034_v25 = vshrl.u32 %v9056_v1, 16  ;;  %v9676_v46 = vrot.slane %v8866_v29, 4 }
 0x811   : > { %v4059_v59 = vpack.i.b16 %v4058_v10, %v9675_v15  ;;  %v3781_v0 = vrot.slane %v9052_v19, 4  ;;  %v3886_v10 = vsel %vm2681_vm5, %v3885_v44, %v8912_v47  ;;  %v3998_v39 = vsel %vm2681_vm5, %v3997_v51, %v8935_v14 }
 0x812   : > { %v3776_v48 = vsel %vm2681_vm5, %v9020_v3, %v9676_v46  ;;  %v4079_v13 = vpack.i.b16 %v3998_v39, %v3886_v10  ;;  %v4081_v12 = vshrl.u32 %v3886_v10, 16  ;;  %v4082_v11 = vshrl.u32 %v3998_v39, 16 }
 0x813   : > { %v4023_v9 = vpack.i.b16 %v3776_v48, %v8993_v33  ;;  %v4026_v7 = vshrl.u32 %v3776_v48, 16  ;;  %v9677_v1 = vshrl.u32 %v8980_v32, 16  ;;  %v9678_v38 = vshrl.u32 %v8993_v33, 16 }
 0x814   : > { %v3782_v19 = vsel %vm2681_vm5, %v3781_v0, %v8853_v21  ;;  %v4049_v47 = vshrl.u32 %v9029_v30, 16  ;;  %v3661_v55 = vrot.slane %v8960_v5, 4  ;;  %v4083_v14 = vpack.i.b16 %v4082_v11, %v4081_v12 }
 0x815   : > { %v4035_v35 = vpack.i.b16 %v4034_v25, %v9677_v1  ;;  %v4027_v45 = vpack.i.b16 %v4026_v7, %v9678_v38  ;;  %v4047_v22 = vpack.i.b16 %v3782_v19, %v9029_v30  ;;  %v4050_v42 = vshrl.u32 %v3782_v19, 16 }
 0x816   : > { %v3773_v17 = vrot.slane %v9020_v3, 4  ;;  %v3662_v32 = vsel %vm2681_vm5, %v3661_v55, %v8833_v24  ;;  %v9679_v5 = vpack.i.b16 %v9037_v18, %v8973_v27  ;;  %v9680_v24 = vpack.i.b16 %v9017_v41, %v8957_v60  ;;  %v6950_v60 = vld [vmem:[%s9683_s19] ss:$0 sm:$0xff]  ;;  %s9692_s19 = sld [smem:[#allocation63_spill]] }
 0x817   : > { %v4051_v49 = vpack.i.b16 %v4050_v42, %v4049_v47  ;;  %v4017_v50 = vshrl.u32 %v3662_v32, 16  ;;  %v9682_v3 = vpack.i.b16 %v9072_v6, %v9004_v26 }
 0x818   : > { %v3774_v33 = vsel %vm2681_vm5, %v3773_v17, %v8866_v29  ;;  %v9681_v29 = vpack.i.b16 %v9049_v56, %v8986_v58 }
 0x819   : > { %v4015_v23 = vpack.i.b16 %v3774_v33, %v3662_v32  ;;  %v4018_v21 = vshrl.u32 %v3774_v33, 16 }
 0x81a   : > { %6911 = vxpose.binary.xlu2.c.b16.start.end [1/2] (short) (narrow) %v9062_v36, %v9679_v5, 16 }
 0x81b   : > { %v4019_v31 = vpack.i.b16 %v4018_v21, %v4017_v50 }
 0x81e   : > { %6908 = vxpose.binary.xlu1.c.b16.start.end [1/2] (short) (narrow) %v4131_v53, %v4127_v40, 16 }
 0x81f   : > { %6914 = vxpose.binary.xlu0.c.b16.start.end [1/2] (short) (narrow) %v4091_v52, %v4087_v20, 16 }
 0x82a   : > { %6920 = vxpose.binary.xlu2.c.b16.start.end [1/2] (short) (narrow) %v4115_v8, %v4111_v4, 16 }
 0x82e   : > { %6917 = vxpose.binary.xlu1.c.b16.start.end [1/2] (short) (narrow) %v4099_v62, %v4095_v28, 16 }
 0x82f   : > { %6923 = vxpose.binary.xlu0.c.b16.start.end [1/2] (short) (narrow) %v9043_v16, %v9680_v24, 16 }
 0x83a   : > { %6929 = vxpose.binary.xlu2.c.b16.start.end [1/2] (short) (narrow) %v9090_v34, %v9681_v29, 16 }
 0x83e   : > { %6926 = vxpose.binary.xlu1.c.b16.start.end [1/2] (short) (narrow) %v4059_v59, %v9682_v3, 16 }
 0x83f   : > { %6932 = vxpose.binary.xlu0.c.b16.start.end [1/2] (short) (narrow) %v4083_v14, %v4079_v13, 16 }
 0x84a   : > { %6938 = vxpose.binary.xlu2.c.b16.start.end [1/2] (short) (narrow) %v4035_v35, %v4031_v2, 16 }
 0x84e   : > { %6935 = vxpose.binary.xlu1.c.b16.start.end [1/2] (short) (narrow) %v4027_v45, %v4023_v9, 16 }
 0x84f   : > { %6941 = vxpose.binary.xlu0.c.b16.start.end [1/2] (short) (narrow) %v4051_v49, %v4047_v22, 16 }
 0x85e   : > { %6944 = vxpose.binary.xlu1.c.b16.start.end [1/2] (short) (narrow) %v4019_v31, %v4015_v23, 16 }
 0x869   : > { %v3007_v27 = vpop.f32.mrf.mxu1 }
 0x86a   : > { %v3008_v41 = vadd.f32 %v6950_v60, %v3007_v27 }
 0x86c   : > { %v3011_v18 = vmul.f32 0.17677669, %v3008_v41 }
 0x86e   : > { %v9213_v58 = vpack.c.bf16 %v3011_v18, %v3011_v18 }
 0x871   : > { %v3009_v30 = vpop.f32.mrf.mxu1 }
 0x8ab   : > { %v6903_v26 = vpop.trf.xlu2 }
 0x8ac   : > { %v4739_v51 = vrot.slane %v6903_v26, 4 }
 0x8b3   : > { %3014 = vrot.lane.b32.xlu2 %v9213_v58, %s7650_s29  ;;  %v6904_v36 = vpop.trf.xlu2 }
 0x8b4   : > { %v4779_v35 = vrot.slane %v6904_v36, 4 }
 0x8b8   : > { %3018 = vrot.lane.b32.xlu1 %v9213_v58, %s7649_s0 }
 0x8ba   : > { %v6900_v16 = vpop.trf.xlu1 }
 0x8bb   : > { %v6906_v56 = vpop.trf.xlu0  ;;  %v9221_v20 = vpop.trf.xlu2  ;;  %v4751_v8 = vrot.slane %v6900_v16, 4 }
 0x8bd   : > { %3016 = vrot.lane.b32.xlu0 %v9213_v58, %s7651_s6  ;;  %v4752_v46 = vsel %vm2681_vm5, %v4751_v8, %v6906_v56 }
 0x8be   : > { %v4756_v13 = vperm.slane %v4752_v46, %v8572_v54 }
 0x8c0   : > { %v4763_v14 = vrot.slane %v4756_v13, 4 }
 0x8c2   : > { %v6901_v6 = vpop.trf.xlu1 }
 0x8c3   : > { %v6907_v34 = vpop.trf.xlu0  ;;  %v9223_v37 = vpop.trf.xlu2  ;;  %v4791_v44 = vrot.slane %v6901_v6, 4 }
 0x8c5   : > { %v4792_v48 = vsel %vm2681_vm5, %v4791_v44, %v6907_v34  ;;  %v4671_v44 = vrot.slane %v9221_v20, 4 }
 0x8c6   : > { %v4796_v12 = vperm.slane %v4792_v48, %v8572_v54 }
 0x8c8   : > { %v4803_v22 = vrot.slane %v4796_v12, 4 }
 0x8ca   : > { %v6909_v40 = vpop.trf.xlu1 }
 0x8cb   : > { %v6915_v52 = vpop.trf.xlu0  ;;  %v6921_v43 = vpop.trf.xlu2  ;;  %v4745_v2 = vrot.slane %v6909_v40, 4 }
 0x8cc   : > { %v4740_v0 = vsel %vm2681_vm5, %v4739_v51, %v6915_v52  ;;  %v4711_v51 = vrot.slane %v9223_v37, 4 }
 0x8cd   : > { %v4746_v39 = vsel %vm2681_vm5, %v4745_v2, %v6921_v43  ;;  %v4744_v11 = vperm.slane %v4740_v0, %v8572_v54 }
 0x8ce   : > { %v4750_v45 = vperm.slane %v4746_v39, %v8572_v54 }
 0x8cf   : > { %v4757_v42 = vrot.slane %v4744_v11, 4 }
 0x8d0   : > { %v4764_v32 = vsel %vm2681_vm5, %v4763_v14, %v4750_v45 }
 0x8d1   : > { %v4768_v29 = vperm.slane %v4764_v32, %v8588_v61 }
 0x8d2   : > { %v6910_v4 = vpop.trf.xlu1 }
 0x8d3   : > { %v6916_v28 = vpop.trf.xlu0  ;;  %v4785_v62 = vrot.slane %v6910_v4, 4  ;;  %v6922_v25 = vpop.trf.xlu2  ;;  %v4769_v41 = vrot.slane %v4768_v29, 4 }
 0x8d4   : > { %v4780_v55 = vsel %vm2681_vm5, %v4779_v35, %v6916_v28 }
 0x8d5   : > { %v4786_v9 = vsel %vm2681_vm5, %v4785_v62, %v6922_v25  ;;  %v4784_v49 = vperm.slane %v4780_v55, %v8572_v54 }
 0x8d6   : > { %v4790_v19 = vperm.slane %v4786_v9, %v8572_v54 }
 0x8d7   : > { %v4797_v27 = vrot.slane %v4784_v49, 4 }
 0x8d8   : > { %v4804_v33 = vsel %vm2681_vm5, %v4803_v22, %v4790_v19 }
 0x8d9   : > { %v4808_v3 = vperm.slane %v4804_v33, %v8588_v61 }
 0x8da   : > { %v6918_v53 = vpop.trf.xlu1 }
 0x8db   : > { %v9225_v57 = vpop.trf.xlu0  ;;  %v4733_v7 = vrot.slane %v6918_v53, 4  ;;  %v6930_v17 = vpop.trf.xlu2  ;;  %v4809_v26 = vrot.slane %v4808_v3, 4 }
 0x8dc   : > { %v4659_v2 = vrot.slane %v9225_v57, 4  ;;  %v4665_v62 = vrot.slane %v6930_v17, 4 }
 0x8e2   : > { %v6919_v15 = vpop.trf.xlu1 }
 0x8e3   : > { %v9227_v59 = vpop.trf.xlu0  ;;  %v4773_v21 = vrot.slane %v6919_v15, 4  ;;  %v6931_v56 = vpop.trf.xlu2 }
 0x8e4   : > { %v4705_v25 = vrot.slane %v6931_v56, 4  ;;  %v4699_v11 = vrot.slane %v9227_v59, 4 }
 0x8ea   : > { %v6927_v10 = vpop.trf.xlu1 }
 0x8eb   : > { %v6933_v1 = vpop.trf.xlu0  ;;  %v6939_v8 = vpop.trf.xlu2  ;;  %v4672_v48 = vsel %vm2681_vm5, %v4671_v44, %v6927_v10  ;;  %v3165_v44 = vld [vmem:[%s893_s2] sm:$0xf] }
 0x8ec   : > { %v4734_v38 = vsel %vm2681_vm5, %v4733_v7, %v6933_v1  ;;  %v4653_v9 = vrot.slane %v6939_v8, 4  ;;  %v4676_v20 = vperm.slane %v4672_v48, %v8572_v54  ;;  %3169 = vrot.lane.b32.xlu1 %v3165_v44, %s7650_s29  ;;  %3177 = vrot.lane.b32.xlu0 %v3165_v44, %s7649_s0 }
 0x8ed   : > { %v4738_v47 = vperm.slane %v4734_v38, %v8572_v54 }
 0x8ee   : > { %v4683_v19 = vrot.slane %v4676_v20, 4 }
 0x8ef   : > { %v4758_v50 = vsel %vm2681_vm5, %v4757_v42, %v4738_v47 }
 0x8f0   : > { %v4762_v24 = vperm.slane %v4758_v50, %v8588_v61 }
 0x8f2   : > { %v6928_v23 = vpop.trf.xlu1  ;;  %v4771_v16 = vrot.slane %v4762_v24, 4  ;;  %v4770_v6 = vsel %vm2681_vm5, %v4769_v41, %v4762_v24 }
 0x8f3   : > { %v6934_v31 = vpop.trf.xlu0  ;;  %v4712_v0 = vsel %vm2681_vm5, %v4711_v51, %v6928_v23  ;;  %v6940_v14 = vpop.trf.xlu2  ;;  %v4833_v41 = vshrl.u32 %v4770_v6, 16 }
 0x8f4   : > { %v4774_v5 = vsel %vm2681_vm5, %v4773_v21, %v6934_v31  ;;  %v9256_v28 = vsel %vm2681_vm5, %v4768_v29, %v4771_v16  ;;  %v4716_v37 = vperm.slane %v4712_v0, %v8572_v54  ;;  %v4693_v22 = vrot.slane %v6940_v14, 4  ;;  %3173 = vrot.lane.b32.xlu1 %v3165_v44, %s7651_s6 }
 0x8f5   : > { %v4778_v30 = vperm.slane %v4774_v5, %v8572_v54 }
 0x8f6   : > { %v4723_v47 = vrot.slane %v4716_v37, 4 }
 0x8f7   : > { %v4798_v60 = vsel %vm2681_vm5, %v4797_v27, %v4778_v30 }
 0x8f8   : > { %v4802_v18 = vperm.slane %v4798_v60, %v8588_v61 }
 0x8fa   : > { %v6936_v36 = vpop.trf.xlu1  ;;  %v4810_v34 = vsel %vm2681_vm5, %v4809_v26, %v4802_v18  ;;  %v4811_v40 = vrot.slane %v4802_v18, 4 }
 0x8fb   : > { %v6942_v52 = vpop.trf.xlu0  ;;  %v4831_v4 = vpack.i.b16 %v4810_v34, %v4770_v6  ;;  %v4660_v39 = vsel %vm2681_vm5, %v4659_v2, %v6936_v36  ;;  %v4834_v24 = vshrl.u32 %v4810_v34, 16 }
 0x8fc   : > { %v9259_v53 = vsel %vm2681_vm5, %v4808_v3, %v4811_v40  ;;  %v4666_v7 = vsel %vm2681_vm5, %v4665_v62, %v6942_v52  ;;  %v4664_v57 = vperm.slane %v4660_v39, %v8572_v54  ;;  %v3166_v62 = vld [vmem:[%s893_s2 + $0x4] sm:$0xf] }
 0x8fd   : > { %4854 = vmatpush.bf16.msra.mxu3 %v4831_v4  ;;  %v4839_v43 = vpack.i.b16 %v9259_v53, %v9256_v28  ;;  %v4670_v1 = vperm.slane %v4666_v7, %v8572_v54  ;;  %v4835_v36 = vpack.i.b16 %v4834_v24, %v4833_v41  ;;  %v4842_v4 = vshrl.u32 %v9259_v53, 16  ;;  %3171 = vrot.lane.b32.xlu2 %v3166_v62, %s7650_s29 }
 0x8fe   : > { %v4677_v55 = vrot.slane %v4664_v57, 4  ;;  %3179 = vrot.lane.b32.xlu1 %v3166_v62, %s7649_s0 }
 0x8ff   : > { %4886 = vmatpush.bf16.msra.mxu2 %v4839_v43  ;;  %v4684_v42 = vsel %vm2681_vm5, %v4683_v19, %v4670_v1 }
 0x900   : > { %v4688_v33 = vperm.slane %v4684_v42, %v8588_v61 }
 0x902   : > { %v6937_v15 = vpop.trf.xlu1  ;;  %v4689_v3 = vrot.slane %v4688_v33, 4 }
 0x903   : > { %v6943_v46 = vpop.trf.xlu0  ;;  %v4700_v45 = vsel %vm2681_vm5, %v4699_v11, %v6937_v15  ;;  %v4841_v15 = vshrl.u32 %v9256_v28, 16 }
 0x904   : > { %v4706_v13 = vsel %vm2681_vm5, %v4705_v25, %v6943_v46  ;;  %v4704_v17 = vperm.slane %v4700_v45, %v8572_v54 }
 0x905   : > { %v4710_v35 = vperm.slane %v4706_v13, %v8572_v54  ;;  %v4843_v51 = vpack.i.b16 %v4842_v4, %v4841_v15  ;;  %3175 = vrot.lane.b32.xlu2 %v3166_v62, %s7651_s6 }
 0x906   : > { %v4717_v31 = vrot.slane %v4704_v17, 4 }
 0x907   : > { %v4724_v59 = vsel %vm2681_vm5, %v4723_v47, %v4710_v35 }
 0x908   : > { %v4728_v23 = vperm.slane %v4724_v59, %v8588_v61 }
 0x90a   : > { %v6945_v12 = vpop.trf.xlu1  ;;  %v4729_v30 = vrot.slane %v4728_v23, 4 }
 0x90b   : > { %v4654_v10 = vsel %vm2681_vm5, %v4653_v9, %v6945_v12  ;;  %v3184_v9 = vshrl.u32 %v3165_v44, 16  ;;  %v3196_v12 = vshrl.u32 %v3166_v62, 16 }
 0x90c   : > { %v4658_v38 = vperm.slane %v4654_v10, %v8572_v54 }
 0x90e   : > { %v4678_v32 = vsel %vm2681_vm5, %v4677_v55, %v4658_v38 }
 0x90f   : > { %v4682_v21 = vperm.slane %v4678_v32, %v8588_v61 }
 0x911   : > { %v4691_v60 = vrot.slane %v4682_v21, 4  ;;  %v4690_v18 = vsel %vm2681_vm5, %v4689_v3, %v4682_v21 }
 0x912   : > { %v6946_v49 = vpop.trf.xlu1  ;;  %v4817_v6 = vshrl.u32 %v4690_v18, 16 }
 0x913   : > { %v4694_v50 = vsel %vm2681_vm5, %v4693_v22, %v6946_v49  ;;  %v4692_v40 = vsel %vm2681_vm5, %v4688_v33, %v4691_v60 }
 0x914   : > { %v4698_v5 = vperm.slane %v4694_v50, %v8572_v54  ;;  %v4825_v53 = vshrl.u32 %v4692_v40, 16 }
 0x916   : > { %v4718_v29 = vsel %vm2681_vm5, %v4717_v31, %v4698_v5 }
 0x917   : > { %v4722_v27 = vperm.slane %v4718_v29, %v8588_v61 }
 0x919   : > { %v4730_v26 = vsel %vm2681_vm5, %v4729_v30, %v4722_v27  ;;  %v4731_v16 = vrot.slane %v4722_v27, 4 }
 0x91a   : > { %v4815_v56 = vpack.i.b16 %v4730_v26, %v4690_v18  ;;  %v4818_v52 = vshrl.u32 %v4730_v26, 16 }
 0x91b   : > { %v4732_v34 = vsel %vm2681_vm5, %v4728_v23, %v4731_v16 }
 0x91c   : > { %4855 = vmatpush.bf16.msra.mxu3 %v4815_v56  ;;  %v4823_v43 = vpack.i.b16 %v4732_v34, %v4692_v40  ;;  %v4819_v8 = vpack.i.b16 %v4818_v52, %v4817_v6  ;;  %v4826_v2 = vshrl.u32 %v4732_v34, 16 }
 0x91e   : > { %4887 = vmatpush.bf16.msra.mxu2 %v4823_v43  ;;  %v4827_v28 = vpack.i.b16 %v4826_v2, %v4825_v53 }
 0x91f   : > { %6165 = vmatmul.msk.bf16.vlgmr.msra.gmra.mxu3 %vm2803_vm6, %v9213_v58  ;;  %v3015_v58 = vpop.permute.xlu2 %3014 }
 0x920   : > { %4870 = vmatpush.bf16.msrb.mxu3 %v4835_v36 }
 0x924   : > { %4871 = vmatpush.bf16.msrb.mxu3 %v4819_v8 }
 0x928   : > { %4902 = vmatpush.bf16.msra.mxu3 %v4843_v51 }
 0x92a   : > { %v3019_v46 = vpop.permute.xlu1 %3018 }
 0x92c   : > { %4903 = vmatpush.bf16.msra.mxu3 %v4827_v28 }
 0x92f   : > { %6166 = vmatmul.msk.bf16.vlgmr.msrb.gmra.mxu3 %vm2803_vm6, %v3015_v58  ;;  %v3017_v25 = vpop.permute.xlu0 %3016 }
 0x930   : > { %6167 = vmatmul.msk.bf16.vlgmr.msra.gmra.mxu2 %vm2803_vm6, %v3017_v25 }
 0x93f   : > { %6168 = vmatmul.msk.bf16.vlgmr.msra.gmra.mxu3 %vm2803_vm6, %v3019_v46 }
 0x957   : > { %v3172_v37 = vpop.permute.xlu2 %3171 }
 0x958   : > { %v3197_v11 = vshrl.u32 %v3172_v37, 16  ;;  %v3195_v19 = vpack.i.b16 %v3172_v37, %v3166_v62 }
 0x95a   : > { %v3198_v47 = vpack.i.b16 %v3197_v11, %v3196_v12  ;;  %v3261_v50 = vperm.slane %v3195_v19, %v8572_v54 }
 0x95c   : > { %v3287_v31 = vperm.slane %v3198_v47, %v8572_v54  ;;  %v3269_v26 = vrot.slane %v3261_v50, 4 }
 0x95e   : > { %v3170_v7 = vpop.permute.xlu1 %3169  ;;  %v3178_v10 = vpop.permute.xlu0 %3177  ;;  %v3295_v34 = vrot.slane %v3287_v31, 4 }
 0x95f   : > { %v3183_v13 = vpack.i.b16 %v3170_v7, %v3165_v44  ;;  %v3185_v20 = vshrl.u32 %v3170_v7, 16  ;;  %v3191_v38 = vshrl.u32 %v3178_v10, 16  ;;  %v3176_v21 = vpop.permute.xlu2 %3175 }
 0x960   : > { %v3202_v27 = vshrl.u32 %v3176_v21, 16 }
 0x961   : > { %v3186_v57 = vpack.i.b16 %v3185_v20, %v3184_v9  ;;  %v3209_v1 = vperm.slane %v3183_v13, %v8572_v54 }
 0x963   : > { %v3235_v35 = vperm.slane %v3186_v57, %v8572_v54  ;;  %v3217_v22 = vrot.slane %v3209_v1, 4 }
 0x965   : > { %v3243_v49 = vrot.slane %v3235_v35, 4 }
 0x966   : > { %v3174_v55 = vpop.permute.xlu1 %3173 }
 0x967   : > { %v3190_v42 = vshrl.u32 %v3174_v55, 16  ;;  %v3189_v17 = vpack.i.b16 %v3178_v10, %v3174_v55 }
 0x969   : > { %v3192_v33 = vpack.i.b16 %v3191_v38, %v3190_v42  ;;  %v3214_v23 = vperm.slane %v3189_v17, %v8572_v54 }
 0x96b   : > { %v3215_v5 = vrot.slane %v3214_v23, 4  ;;  %v3218_v24 = vsel %vm2681_vm5, %v3214_v23, %v3217_v22  ;;  %v3240_v29 = vperm.slane %v3192_v33, %v8572_v54 }
 0x96c   : > { %v3226_v3 = vperm.slane %v3218_v24, %v8588_v61 }
 0x96d   : > { %v3216_v30 = vsel %vm2681_vm5, %v3215_v5, %v3209_v1  ;;  %v3241_v60 = vrot.slane %v3240_v29, 4  ;;  %v3244_v41 = vsel %vm2681_vm5, %v3240_v29, %v3243_v49 }
 0x96e   : > { %v3222_v56 = vperm.slane %v3216_v30, %v8588_v61  ;;  %v3229_v36 = vrot.slane %v3226_v3, 4  ;;  %v3252_v40 = vperm.slane %v3244_v41, %v8588_v61 }
 0x96f   : > { %v3242_v43 = vsel %vm2681_vm5, %v3241_v60, %v3235_v35 }
 0x970   : > { %v3180_v16 = vpop.permute.xlu1 %3179  ;;  %v3227_v15 = vrot.slane %v3222_v56, 4  ;;  %v3230_v8 = vsel %vm2681_vm5, 0, %v3229_v36  ;;  %v3248_v44 = vperm.slane %v3242_v43, %v8588_v61  ;;  %v3255_v51 = vrot.slane %v3252_v40, 4 }
 0x971   : > { %v3201_v52 = vpack.i.b16 %v3180_v16, %v3176_v21  ;;  %v3203_v4 = vshrl.u32 %v3180_v16, 16  ;;  %v4974_v53 = vsel %vm2681_vm5, %v3229_v36, %v3222_v56  ;;  %v4979_v28 = vrot.slane %v3230_v8, 4 }
 0x972   : > { %v3228_v58 = vsel %vm2681_vm5, 0, %v3227_v15  ;;  %v3253_v25 = vrot.slane %v3248_v44, 4  ;;  %v3256_v46 = vsel %vm2681_vm5, 0, %v3255_v51  ;;  %v4993_v12 = vsel %vm2681_vm5, %v3255_v51, %v3248_v44 }
 0x973   : > { %v3204_v2 = vpack.i.b16 %v3203_v4, %v3202_v27  ;;  %v3266_v62 = vperm.slane %v3201_v52, %v8572_v54  ;;  %v4998_v13 = vrot.slane %v3256_v46, 4  ;;  %v4980_v57 = vsel %vm2681_vm5, %v4979_v28, %v3228_v58 }
 0x974   : > { %v3254_v37 = vsel %vm2681_vm5, 0, %v3253_v25  ;;  %v4984_v35 = vperm.slane %v4980_v57, %v8572_v54 }
 0x975   : > { %v3270_v9 = vsel %vm2681_vm5, %v3266_v62, %v3269_v26  ;;  %v3292_v7 = vperm.slane %v3204_v2, %v8572_v54 }
 0x976   : > { %v3278_v20 = vperm.slane %v3270_v9, %v8588_v61  ;;  %v4985_v17 = vrot.slane %v4984_v35, 4 }
 0x977   : > { %v3293_v10 = vrot.slane %v3292_v7, 4  ;;  %v3296_v1 = vsel %vm2681_vm5, %v3292_v7, %v3295_v34 }
 0x978   : > { %v3281_v47 = vrot.slane %v3278_v20, 4  ;;  %v3304_v55 = vperm.slane %v3296_v1, %v8588_v61 }
 0x979   : > { %v3294_v42 = vsel %vm2681_vm5, %v3293_v10, %v3287_v31 }
 0x97a   : > { %v3282_v33 = vsel %vm2681_vm5, 0, %v3281_v47  ;;  %v3300_v23 = vperm.slane %v3294_v42, %v8588_v61 }
 0x97b   : > { %v5017_v5 = vrot.slane %v3282_v33, 4 }
 0x97c   : > { %v3305_v31 = vrot.slane %v3300_v23, 4 }
 0x97e   : > { %v3306_v26 = vsel %vm2681_vm5, 0, %v3305_v31 }
 0x9a2   : > { %v9312_v48 = vpop.f32.mrf.mxu3 }
 0x9a3   : > { %v4910_v0 = vsel %vm4909_vm13, %v9312_v48, -inf }
 0x9a4   : > { %4911 = vmax.xlane.f32.xlu2 %v4910_v0  ;;  %v4978_v0 = vperm.slane %v4974_v53, %v8572_v54 }
 0x9a6   : > { %v4986_v24 = vsel %vm2681_vm5, %v4985_v17, %v4978_v0 }
 0x9a7   : > { %v4990_v30 = vperm.slane %v4986_v24, %v8588_v61 }
 0x9a9   : > { %v5053_v52 = vshrl.u32 %v4990_v30, 16  ;;  %v4991_v4 = vrot.slane %v4990_v30, 4 }
 0x9aa   : > { %v4859_v39 = vpop.f32.mrf.mxu3 }
 0x9ab   : > { %v3267_v39 = vrot.slane %v3266_v62, 4  ;;  %v4992_v51 = vsel %vm2681_vm5, 0, %v4991_v4 }
 0x9ad   : > { %v3268_v11 = vsel %vm2681_vm5, %v3267_v39, %v3261_v50  ;;  %v3307_v50 = vrot.slane %v3304_v55, 4  ;;  %v5059_v39 = vshrl.u32 %v4992_v51, 16 }
 0x9ae   : > { %v3274_v19 = vperm.slane %v3268_v11, %v8588_v61 }
 0x9af   : > { %v3308_v27 = vsel %vm2681_vm5, 0, %v3307_v50  ;;  %v5031_v36 = vsel %vm2681_vm5, %v3307_v50, %v3300_v23 }
 0x9b0   : > { %v3279_v49 = vrot.slane %v3274_v19, 4  ;;  %v5012_v21 = vsel %vm2681_vm5, %v3281_v47, %v3274_v19  ;;  %v5036_v60 = vrot.slane %v3308_v27, 4  ;;  %v5035_v8 = vperm.slane %v5031_v36, %v8572_v54 }
 0x9b1   : > { %v5016_v16 = vperm.slane %v5012_v21, %v8572_v54 }
 0x9b2   : > { %v9318_v45 = vpop.f32.mrf.mxu3  ;;  %v3280_v3 = vsel %vm2681_vm5, 0, %v3279_v49  ;;  %v5037_v34 = vsel %vm2681_vm5, %v5036_v60, %v3306_v26 }
 0x9b3   : > { %v4913_v14 = vsel %vm4909_vm13, %v9318_v45, -inf  ;;  %v9322_v59 = vpop.f32.mrf.mxu2  ;;  %v5041_v44 = vperm.slane %v5037_v34, %v8572_v54 }
 0x9b4   : > { %4914 = vmax.xlane.f32.xlu0 %v4913_v14  ;;  %v4916_v32 = vsel %vm4909_vm13, %v9322_v59, -inf  ;;  %v4997_v14 = vperm.slane %v4993_v12, %v8572_v54 }
 0x9b5   : > { %4917 = vmax.xlane.f32.xlu1 %v4916_v32  ;;  %v4999_v32 = vsel %vm2681_vm5, %v4998_v13, %v3254_v37  ;;  %v5042_v62 = vrot.slane %v5041_v44, 4 }
 0x9b6   : > { %v5003_v29 = vperm.slane %v4999_v32, %v8572_v54 }
 0x9b7   : > { %v5043_v46 = vsel %vm2681_vm5, %v5042_v62, %v5035_v8 }
 0x9b8   : > { %v5004_v41 = vrot.slane %v5003_v29, 4  ;;  %v5047_v9 = vperm.slane %v5043_v46, %v8588_v61 }
 0x9ba   : > { %v4875_v18 = vpop.f32.mrf.mxu3  ;;  %v5005_v40 = vsel %vm2681_vm5, %v5004_v41, %v4997_v14  ;;  %v5066_v10 = vshrl.u32 %v5047_v9, 16  ;;  %v5048_v35 = vrot.slane %v5047_v9, 4 }
 0x9bb   : > { %v4891_v6 = vpop.f32.mrf.mxu2  ;;  %v5018_v18 = vsel %vm2681_vm5, %v5017_v5, %v3280_v3 }
 0x9bc   : > { %v5022_v56 = vperm.slane %v5018_v18, %v8572_v54  ;;  %v5009_v6 = vperm.slane %v5005_v40, %v8588_v61  ;;  %v5049_v42 = vsel %vm2681_vm5, 0, %v5048_v35 }
 0x9bd   : > { %v5072_v49 = vshrl.u32 %v5049_v42, 16 }
 0x9be   : > { %v5023_v15 = vrot.slane %v5022_v56, 4  ;;  %v5052_v53 = vpack.i.b16 %v5009_v6, %v4990_v30  ;;  %v5054_v28 = vshrl.u32 %v5009_v6, 16  ;;  %v5010_v25 = vrot.slane %v5009_v6, 4 }
 0x9c0   : > { %v5024_v2 = vsel %vm2681_vm5, %v5023_v15, %v5016_v16  ;;  %v5055_v0 = vpack.i.b16 %v5054_v28, %v5053_v52  ;;  %v5011_v13 = vsel %vm2681_vm5, 0, %v5010_v25  ;;  %v5074_v37 = vunpack.c.l.b16 %v5052_v53 }
 0x9c1   : > { %v5028_v58 = vperm.slane %v5024_v2, %v8588_v61  ;;  %v5058_v57 = vpack.i.b16 %v5011_v13, %v4992_v51  ;;  %v5060_v12 = vshrl.u32 %v5011_v13, 16 }
 0x9c2   : > { %v9353_v38 = vpop.f32.mrf.mxu3 }
 0x9c3   : > { %v4919_v22 = vsel %vm4909_vm13, %v9353_v38, -inf  ;;  %v5065_v7 = vshrl.u32 %v5028_v58, 16  ;;  %v5029_v20 = vrot.slane %v5028_v58, 4  ;;  %v5064_v11 = vpack.i.b16 %v5047_v9, %v5028_v58 }
 0x9c4   : > { %4920 = vmax.xlane.f32.xlu2 %v4919_v22  ;;  %v5061_v19 = vpack.i.b16 %v5060_v12, %v5059_v39  ;;  %v5094_v22 = vunpack.c.l.b16 %v5055_v0  ;;  %v5114_v32 = vunpack.c.l.b16 %v5058_v57 }
 0x9c5   : > { %v5030_v1 = vsel %vm2681_vm5, 0, %v5029_v20  ;;  %v5075_v55 = vunpack.c.l.b16 %v5064_v11  ;;  %v5067_v14 = vpack.i.b16 %v5066_v10, %v5065_v7 }
 0x9c6   : > { %v5071_v47 = vshrl.u32 %v5030_v1, 16  ;;  %v5070_v17 = vpack.i.b16 %v5049_v42, %v5030_v1  ;;  %v5134_v5 = vunpack.c.l.b16 %v5061_v19 }
 0x9c7   : > { %v5076_v33 = vpack.c.b16 %v5075_v55, %v5074_v37  ;;  %v5095_v23 = vunpack.c.l.b16 %v5067_v14 }
 0x9c8   : > { %v5115_v50 = vunpack.c.l.b16 %v5070_v17  ;;  %v5073_v21 = vpack.i.b16 %v5072_v49, %v5071_v47 }
 0x9c9   : > { %5088 = vmatpush.bf16.msrb.mxu2 %v5076_v33  ;;  %v5096_v24 = vpack.c.b16 %v5095_v23, %v5094_v22 }
 0x9ca   : > { %v4907_v43 = vpop.f32.mrf.mxu3  ;;  %v5116_v29 = vpack.c.b16 %v5115_v50, %v5114_v32  ;;  %v5135_v3 = vunpack.c.l.b16 %v5073_v21 }
 0x9cb   : > { %5108 = vmatpush.bf16.msrb.mxu3 %v5096_v24 }
 0x9cc   : > { %5128 = vmatpush.bf16.msrb.mxu0 %v5116_v29  ;;  %v5136_v31 = vpack.c.b16 %v5135_v3, %v5134_v5 }
 0x9ce   : > { %5148 = vmatpush.bf16.msrb.mxu1 %v5136_v31 }
 0xa17   : > { %v4912_v27 = vpop.xlane.xlu2 %4911 }
 0xa18   : > { %v4922_v30 = vmax.f32 %v4912_v27, -1e+30 }
 0xa1a   : > { %v4938_v60 = vsub.f32 %v9312_v48, %v4922_v30  ;;  %v4926_v46 = vsub.f32 -1e+30, %v4922_v30 }
 0xa1c   : > { %v4942_v41 = vmul.f32 1.442695, %v4938_v60  ;;  %v4930_v0 = vmul.f32 1.442695, %v4926_v46 }
 0xa1e   : > { %6969 = vpow2.f32 %v4942_v41 }
 0xa24   : > { %v6970_v18 = vpop.eup %6969 }
 0xa25   : > { %v4954_v26 = vsel %vm4909_vm13, %v6970_v18, 0.0  ;;  %v4970_v16 = vpack.c.bf16 %v6970_v18, %v6970_v18 }
 0xa26   : > { %4955 = vadd.xlane.f32.xlu1 %v4954_v26 }
 0xa27   : > { %v4915_v56 = vpop.xlane.xlu0 %4914  ;;  %6169 = vmatmul.msk.bf16.vlgmr.msrb.gmra.mxu2 %vm4909_vm13, %v4970_v16 }
 0xa28   : > { %v4923_v36 = vmax.f32 %v4915_v56, -1e+30  ;;  %v4918_v40 = vpop.xlane.xlu1 %4917 }
 0xa29   : > { %v4924_v52 = vmax.f32 %v4918_v40, -1e+30 }
 0xa2a   : > { %v4939_v34 = vsub.f32 %v9318_v45, %v4923_v36 }
 0xa2b   : > { %v4940_v43 = vsub.f32 %v9322_v59, %v4924_v52  ;;  %v4928_v39 = vsub.f32 -1e+30, %v4924_v52 }
 0xa2c   : > { %v4944_v4 = vmul.f32 1.442695, %v4939_v34 }
 0xa2d   : > { %v4946_v6 = vmul.f32 1.442695, %v4940_v43  ;;  %v4934_v9 = vmul.f32 1.442695, %v4928_v39 }
 0xa2e   : > { %6971 = vpow2.f32 %v4944_v4 }
 0xa2f   : > { %6973 = vpow2.f32 %v4946_v6 }
 0xa34   : > { %v6972_v48 = vpop.eup %6971 }
 0xa35   : > { %v4971_v15 = vpack.c.bf16 %v6972_v48, %v6972_v48  ;;  %v6974_v8 = vpop.eup %6973  ;;  %v4957_v59 = vsel %vm4909_vm13, %v6972_v48, 0.0 }
 0xa36   : > { %v4960_v2 = vsel %vm4909_vm13, %v6974_v8, 0.0  ;;  %v4972_v62 = vpack.c.bf16 %v6974_v8, %v6974_v8 }
 0xa37   : > { %v4921_v44 = vpop.xlane.xlu2 %4920  ;;  %6170 = vmatmul.msk.bf16.vlgmr.msrb.gmra.mxu3 %vm4909_vm13, %v4971_v15  ;;  %4961 = vadd.xlane.f32.xlu0 %v4960_v2 }
 0xa38   : > { %v4925_v51 = vmax.f32 %v4921_v44, -1e+30  ;;  %6171 = vmatmul.msk.bf16.vlgmr.msrb.gmra.mxu0 %vm4909_vm13, %v4972_v62 }
 0xa3a   : > { %v4941_v45 = vsub.f32 %v9353_v38, %v4925_v51  ;;  %v4927_v38 = vsub.f32 -1e+30, %v4923_v36  ;;  %v4929_v12 = vsub.f32 -1e+30, %v4925_v51 }
 0xa3c   : > { %v4948_v53 = vmul.f32 1.442695, %v4941_v45  ;;  %v4932_v13 = vmul.f32 1.442695, %v4927_v38  ;;  %v4936_v19 = vmul.f32 1.442695, %v4929_v12 }
 0xa3e   : > { %6975 = vpow2.f32 %v4948_v53 }
 0xa3f   : > { %4958 = vadd.xlane.f32.xlu0 %v4957_v59  ;;  %6977 = vpow2.f32 %v4930_v0 }
 0xa40   : > { %6979 = vpow2.f32 %v4934_v9 }
 0xa41   : > { %6981 = vpow2.f32 %v4932_v13 }
 0xa44   : > { %v6976_v28 = vpop.eup %6975 }
 0xa45   : > { %v4963_v58 = vsel %vm4909_vm13, %v6976_v28, 0.0  ;;  %v4973_v25 = vpack.c.bf16 %v6976_v28, %v6976_v28  ;;  %v6978_v7 = vpop.eup %6977 }
 0xa46   : > { %4964 = vadd.xlane.f32.xlu2 %v4963_v58  ;;  %v4950_v37 = vmul.f32 0.0, %v6978_v7  ;;  %v6980_v57 = vpop.eup %6979 }
 0xa47   : > { %6172 = vmatmul.msk.bf16.vlgmr.msrb.gmra.mxu1 %vm4909_vm13, %v4973_v25  ;;  %v4952_v35 = vmul.f32 0.0, %v6980_v57  ;;  %v6982_v55 = vpop.eup %6981 }
 0xa48   : > { %v4951_v32 = vmul.f32 0.0, %v6982_v55 }
 0xa99   : > { %v4956_v20 = vpop.xlane.xlu1 %4955 }
 0xa9a   : > { %v4966_v11 = vadd.f32 %v4956_v20, %v4950_v37 }
 0xa9c   : > { %6983 = vrcp.f32 %v4966_v11 }
 0xa9d   : > { %6985 = vpow2.f32 %v4936_v19 }
 0xaa2   : > { %v6984_v17 = vpop.eup %6983 }
 0xaa3   : > { %v6986_v50 = vpop.eup %6985 }
 0xaa4   : > { %v4953_v31 = vmul.f32 0.0, %v6986_v50 }
 0xaaa   : > { %v5090_v10 = vpop.f32.mrf.mxu2  ;;  %v4962_v1 = vpop.xlane.xlu0 %4961 }
 0xaab   : > { %v4968_v47 = vadd.f32 %v4962_v1, %v4952_v35  ;;  %v5154_v14 = vadd.f32 %v5090_v10, %v4950_v37 }
 0xaad   : > { %6987 = vrcp.f32 %v4968_v47  ;;  %v5162_v49 = vmul.f32 %v6984_v17, %v5154_v14 }
 0xaaf   : > { %v5168_v24 = vrot.slane %v5162_v49, 4 }
 0xab2   : > { %v5092_v22 = vpop.f32.mrf.mxu2  ;;  %v4959_v42 = vpop.xlane.xlu0 %4958 }
 0xab3   : > { %v4967_v33 = vadd.f32 %v4959_v42, %v4951_v32  ;;  %v6988_v5 = vpop.eup %6987 }
 0xab5   : > { %v5130_v23 = vpop.f32.mrf.mxu0  ;;  %6989 = vrcp.f32 %v4967_v33 }
 0xab6   : > { %v5156_v21 = vadd.f32 %v5130_v23, %v4952_v35 }
 0xab8   : > { %v5164_v29 = vmul.f32 %v6988_v5, %v5156_v21 }
 0xab9   : > { %v4965_v3 = vpop.xlane.xlu2 %4964 }
 0xaba   : > { %v5110_v27 = vpop.f32.mrf.mxu3  ;;  %v5166_v30 = vrot.slane %v5164_v29, 4  ;;  %v5169_v60 = vsel %vm2681_vm5, %v5164_v29, %v5168_v24  ;;  %v4969_v41 = vadd.f32 %v4965_v3, %v4953_v31 }
 0xabb   : > { %v5155_v16 = vadd.f32 %v5110_v27, %v4951_v32  ;;  %v6990_v56 = vpop.eup %6989  ;;  %v5177_v43 = vperm.slane %v5169_v60, %v8572_v54 }
 0xabc   : > { %v5167_v18 = vsel %vm2681_vm5, %v5166_v30, %v5162_v49  ;;  %6991 = vrcp.f32 %v4969_v41 }
 0xabd   : > { %v5132_v26 = vpop.f32.mrf.mxu0  ;;  %v5163_v40 = vmul.f32 %v6990_v56, %v5155_v16  ;;  %v5173_v15 = vperm.slane %v5167_v18, %v8572_v54  ;;  %v5204_v51 = vrot.slane %v5177_v43, 4 }
 0xabf   : > { %v5180_v6 = vrot.slane %v5163_v40, 4  ;;  %v5192_v45 = vrot.slane %v5173_v15, 4 }
 0xac2   : > { %v5112_v36 = vpop.f32.mrf.mxu3  ;;  %v6992_v4 = vpop.eup %6991 }
 0xac4   : > { %v5150_v34 = vpop.f32.mrf.mxu1 }
 0xac5   : > { %v5157_v52 = vadd.f32 %v5150_v34, %v4953_v31 }
 0xac7   : > { %v5165_v48 = vmul.f32 %v6992_v4, %v5157_v52  ;;  %v6373_v52 = vld [vmem:[#allocation16 + $0x38] sm:$0xff]  ;;  %v6372_v4 = vld [vmem:[#allocation16 + $0x30] sm:$0xff] }
 0xac8   : > { %5360 = vmatpush.bf16.msra.mxu2 %v6373_v52  ;;  %v6225_v52 = vld [vmem:[#allocation17 + $0x28] sm:$0xf0] }
 0xac9   : > { %v5178_v8 = vrot.slane %v5165_v48, 4  ;;  %v5181_v44 = vsel %vm2681_vm5, %v5165_v48, %v5180_v6  ;;  %v6369_v6 = vld [vmem:[#allocation16 + $0x18] sm:$0xff]  ;;  %v6368_v48 = vld [vmem:[#allocation16 + $0x10] sm:$0xff] }
 0xaca   : > { %v5189_v2 = vperm.slane %v5181_v44, %v8572_v54 }
 0xacb   : > { %v5179_v62 = vsel %vm2681_vm5, %v5178_v8, %v5163_v40  ;;  %v6366_v8 = vld [vmem:[#allocation16] sm:$0xff] }
 0xacc   : > { %v5185_v53 = vperm.slane %v5179_v62, %v8572_v54  ;;  %v5202_v59 = vrot.slane %v5189_v2, 4  ;;  %v5205_v28 = vsel %vm2681_vm5, %v5189_v2, %v5204_v51  ;;  %v5152_v58 = vpop.f32.mrf.mxu1  ;;  %5361 = vmatpush.bf16.msra.mxu2 %v6372_v4  ;;  %v6396_v4 = vld [vmem:[#allocation19 + $0x30] sm:$0xff] }
 0xacd   : > { %v5213_v25 = vperm.slane %v5205_v28, %v8588_v61 }
 0xace   : > { %v5190_v46 = vrot.slane %v5185_v53, 4  ;;  %v5193_v0 = vsel %vm2681_vm5, %v5185_v53, %v5192_v45  ;;  %v5203_v39 = vsel %vm2681_vm5, %v5202_v59, %v5177_v43  ;;  %v6370_v43 = vld [vmem:[#allocation16 + $0x20] sm:$0xff] }
 0xacf   : > { %v5201_v9 = vperm.slane %v5193_v0, %v8588_v61  ;;  %v5209_v38 = vperm.slane %v5203_v39, %v8588_v61  ;;  %v5220_v7 = vrot.slane %v5213_v25, 4  ;;  %v6263_v39 = vld [vmem:[#allocation17 + $0x70] sm:$0xf] }
 0xad0   : > { %v5191_v13 = vsel %vm2681_vm5, %v5190_v46, %v5173_v15  ;;  %v6367_v15 = vld [vmem:[#allocation16 + $0x8] sm:$0xff] }
 0xad1   : > { %v5197_v20 = vperm.slane %v5191_v13, %v8588_v61  ;;  %v5216_v37 = vrot.slane %v5201_v9, 4  ;;  %v5218_v57 = vrot.slane %v5209_v38, 4  ;;  %v5221_v12 = vsel %vm2681_vm5, 0.0, %v5220_v7  ;;  %v6389_v9 = vld [vmem:[#allocation17 + $0x74] sm:$0xf0] }
 0xad2   : > { %v5238_v11 = vrot.slane %v5221_v12, 4  ;;  %v5233_v10 = vsel %vm2681_vm5, %v5220_v7, %v5209_v38  ;;  %v6388_v38 = vld [vmem:[#allocation17 + $0x74] sm:$0xf]  ;;  %v6264_v7 = vor.u32 %v6389_v9, %v6263_v39  ;;  %v6265_v13 = vld [vmem:[#allocation17 + $0x78] sm:$0xf0] }
 0xad3   : > { %v5214_v1 = vrot.slane %v5197_v20, 4  ;;  %v5217_v35 = vsel %vm2681_vm5, 0.0, %v5216_v37  ;;  %v5219_v19 = vsel %vm2681_vm5, 0.0, %v5218_v57  ;;  %v5222_v47 = vsel %vm2681_vm5, %v5216_v37, %v5197_v20  ;;  %v9685_v57 = vld [vmem:[#allocation41_spill] sm:$0xff] }
 0xad4   : > { %v5226_v55 = vperm.slane %v5222_v47, %v8572_v54  ;;  %v5227_v14 = vrot.slane %v5217_v35, 4  ;;  %v5237_v22 = vperm.slane %v5233_v10, %v8572_v54  ;;  %v5239_v42 = vsel %vm2681_vm5, %v5238_v11, %v5219_v19  ;;  %5507 = vmatpush.bf16.msra.mxu3 %v6264_v7  ;;  %v6386_v35 = vld [vmem:[#allocation17 + $0x64] sm:$0xf]  ;;  %v6257_v47 = vld [vmem:[#allocation17 + $0x68] sm:$0xf0]  ;;  %v6401_v7 = vld [vmem:[#allocation19 + $0x58] sm:$0xff] }
 0xad5   : > { %v5215_v17 = vsel %vm2681_vm5, 0.0, %v5214_v1  ;;  %v5243_v32 = vperm.slane %v5239_v42, %v8572_v54  ;;  %v6268_v20 = vor.u32 %v6388_v38, %v6265_v13  ;;  %v6387_v1 = vld [vmem:[#allocation17 + $0x64] sm:$0xf0]  ;;  %v6384_v42 = vld [vmem:[#allocation17 + $0x54] sm:$0xf] }
 0xad6   : > { %v5228_v49 = vsel %vm2681_vm5, %v5227_v14, %v5215_v17  ;;  %v5246_v33 = vrot.slane %v5226_v55, 4  ;;  %v5258_v23 = vrot.slane %v5237_v22, 4  ;;  %v6385_v14 = vld [vmem:[#allocation17 + $0x54] sm:$0xf0]  ;;  %v6249_v17 = vld [vmem:[#allocation17 + $0x58] sm:$0xf0] }
 0xad7   : > { %v5232_v50 = vperm.slane %v5228_v49, %v8572_v54  ;;  %v5256_v21 = vrot.slane %v5243_v32, 4  ;;  %5520 = vmatpush.bf16.msra.mxu0 %v6268_v20  ;;  %v6252_v49 = vor.u32 %v6384_v42, %v6249_v17  ;;  %v6393_v20 = vld [vmem:[#allocation19 + $0x18] sm:$0xff]  ;;  %v6392_v42 = vld [vmem:[#allocation19 + $0x10] sm:$0xff]  ;;  %v6398_v17 = vld [vmem:[#allocation19 + $0x40] sm:$0xff] }
 0xad8   : > { %v5259_v5 = vsel %vm2681_vm5, %v5243_v32, %v5258_v23  ;;  %v6383_v23 = vld [vmem:[#allocation17 + $0x44] sm:$0xf0] }
 0xad9   : > { %v5247_v24 = vsel %vm2681_vm5, %v5232_v50, %v5246_v33  ;;  %v5267_v29 = vperm.slane %v5259_v5, %v8588_v61  ;;  %v5244_v3 = vrot.slane %v5232_v50, 4  ;;  %v5257_v31 = vsel %vm2681_vm5, %v5256_v21, %v5237_v22  ;;  %v6239_v33 = vld [vmem:[#allocation17 + $0x40] sm:$0xf]  ;;  %v6382_v50 = vld [vmem:[#allocation17 + $0x44] sm:$0xf] }
 0xada   : > { %v5255_v27 = vperm.slane %v5247_v24, %v8588_v61  ;;  %v5263_v30 = vperm.slane %v5257_v31, %v8588_v61  ;;  %v6260_v22 = vor.u32 %v6386_v35, %v6257_v47  ;;  %v6241_v21 = vld [vmem:[#allocation17 + $0x48] sm:$0xf0]  ;;  %v6240_v5 = vor.u32 %v6383_v23, %v6239_v33 }
 0xadb   : > { %v5272_v60 = vrot.slane %v5267_v29, 4  ;;  %v5245_v41 = vsel %vm2681_vm5, %v5244_v3, %v5226_v55  ;;  %v6247_v55 = vld [vmem:[#allocation17 + $0x50] sm:$0xf]  ;;  %v6244_v24 = vor.u32 %v6382_v50, %v6241_v21  ;;  %v6381_v3 = vld [vmem:[#allocation17 + $0x34] sm:$0xf0] }
 0xadc   : > { %v5274_v18 = vrot.slane %v5255_v27, 4  ;;  %v5251_v54 = vperm.slane %v5245_v41, %v8588_v61  ;;  %v5268_v26 = vrot.slane %v5263_v30, 4  ;;  %v6371_v61 = vld [vmem:[#allocation16 + $0x28] sm:$0xff]  ;;  %v6248_v32 = vor.u32 %v6385_v14, %v6247_v55  ;;  %5521 = vmatpush.bf16.msra.mxu0 %v6260_v22  ;;  %v6405_v41 = vld [vmem:[#allocation19 + $0x78] sm:$0xff] }
 0xadd   : > { %v5273_v16 = vsel %vm2681_vm5, %v5272_v60, %v5255_v27  ;;  %5362 = vmatpush.bf16.msra.mxu2 %v6371_v61  ;;  %v6380_v27 = vld [vmem:[#allocation17 + $0x34] sm:$0xf]  ;;  %v6399_v22 = vld [vmem:[#allocation19 + $0x48] sm:$0xff] }
 0xade   : > { %5281 = vrot.lane.b32.xlu2 %v5273_v16, %s7651_s6  ;;  %v5275_v56 = vsel %vm2681_vm5, %v5267_v29, %v5274_v18  ;;  %v5270_v36 = vrot.slane %v5251_v54, 4  ;;  %v5269_v34 = vsel %vm2681_vm5, %v5268_v26, %v5251_v54  ;;  %v6231_v29 = vld [vmem:[#allocation17 + $0x30] sm:$0xf]  ;;  %v6397_v18 = vld [vmem:[#allocation19 + $0x38] sm:$0xff]  ;;  %v6223_v26 = vld [vmem:[#allocation17 + $0x20] sm:$0xf] }
 0xadf   : > { %5285 = vrot.lane.b32.xlu0 %v5275_v56, %s7650_s29  ;;  %v6232_v54 = vor.u32 %v6381_v3, %v6231_v29  ;;  %5669 = vmatpush.bf16.msra.mxu1 %v6397_v18 }
 0xae0   : > { %v5271_v40 = vsel %vm2681_vm5, %v5263_v30, %v5270_v36  ;;  %5522 = vmatpush.bf16.msra.mxu0 %v6252_v49  ;;  %v6233_v30 = vld [vmem:[#allocation17 + $0x38] sm:$0xf0]  ;;  %v6379_v36 = vld [vmem:[#allocation17 + $0x24] sm:$0xf0]  ;;  %v6390_v49 = vld [vmem:[#allocation19] sm:$0xff] }
 0xae1   : > { %5277 = vrot.lane.b32.xlu1 %v5271_v40, %s7649_s0  ;;  %5363 = vmatpush.bf16.msra.mxu2 %v6370_v43  ;;  %s9684_s0 = sld [smem:[#allocation54_spill]]  ;;  %v6236_v56 = vor.u32 %v6380_v27, %v6233_v30  ;;  %v6404_v40 = vld [vmem:[#allocation19 + $0x70] sm:$0xff]  ;;  %v6224_v61 = vor.u32 %v6379_v36, %v6223_v26 }
 0xae3   : > { %5670 = vmatpush.bf16.msra.mxu1 %v6396_v4 }
 0xae4   : > { %5523 = vmatpush.bf16.msra.mxu0 %v6244_v24 }
 0xae5   : > { %5364 = vmatpush.bf16.msra.mxu2 %v6369_v6  ;;  %v6215_v6 = vld [vmem:[#allocation17 + $0x10] sm:$0xf] }
 0xae7   : > { %v6951_v28 = vld [vmem:[%s9684_s0] ss:$0 sm:$0xff]  ;;  %s9693_s0 = sld [smem:[#allocation65_spill]] }
 0xae8   : > { %5524 = vmatpush.bf16.msra.mxu0 %v6236_v56 }
 0xae9   : > { %5365 = vmatpush.bf16.msra.mxu2 %v6368_v48  ;;  %v6377_v48 = vld [vmem:[#allocation17 + $0x14] sm:$0xf0] }
 0xaed   : > { %5366 = vmatpush.bf16.msra.mxu2 %v6367_v15  ;;  %v6403_v15 = vld [vmem:[#allocation19 + $0x68] sm:$0xff]  ;;  %s5740_s29 = scalar_lea.hbm %s9693_s0, %s6335_s12  ;;  %s7347_s16 = scalar_lea.hbm %s9693_s0, 32 }
 0xaee   : > { %s5744_s26 = sshll.u32 %s5740_s29, 4  ;;  %s5745_s26 = int_to_ptr.hbm [resolvable:$true] %s5744_s26 }
 0xaf1   : > { %5367 = vmatpush.bf16.msra.mxu2 %v6366_v8  ;;  %v6376_v8 = vld [vmem:[#allocation17 + $0x14] sm:$0xf] }
 0xaf5   : > { %5682 = vmatpush.bf16.msrb.mxu2 %v6405_v41  ;;  %v6954_v41 = vld [vmem:[%s9689_s30] ss:$0 sm:$0xff] }
 0xaf9   : > { %5683 = vmatpush.bf16.msrb.mxu2 %v6404_v40 }
 0xafd   : > { %5684 = vmatpush.bf16.msrb.mxu2 %v6403_v15 }
 0xb38   : > { %v5282_v51 = vpop.permute.xlu2 %5281 }
 0xb51   : > { %v5286_v62 = vpop.permute.xlu0 %5285 }
 0xb53   : > { %v5278_v44 = vpop.permute.xlu1 %5277 }
 0xb54   : > { %v5288_v2 = vsel %vm2803_vm6, %v5269_v34, %v5278_v44  ;;  %v6378_v34 = vld [vmem:[#allocation17 + $0x24] sm:$0xf]  ;;  %v6217_v44 = vld [vmem:[#allocation17 + $0x18] sm:$0xf0] }
 0xb55   : > { %v5289_v45 = vsel %vm2805_vm7, %v5288_v2, %v5282_v51  ;;  %v6228_v43 = vor.u32 %v6378_v34, %v6225_v52  ;;  %v6395_v51 = vld [vmem:[#allocation19 + $0x28] sm:$0xff]  ;;  %v6216_v2 = vor.u32 %v6377_v48, %v6215_v6 }
 0xb56   : > { %v5290_v53 = vsel %vm2807_vm8, %v5289_v45, %v5286_v62  ;;  %v6220_v45 = vor.u32 %v6376_v8, %v6217_v44  ;;  %5671 = vmatpush.bf16.msra.mxu1 %v6395_v51 }
 0xb57   : > { %v5291_v59 = vpack.c.bf16 %v5290_v53, %v5290_v53  ;;  %5525 = vmatpush.bf16.msra.mxu0 %v6228_v43  ;;  %v6207_v53 = vld [vmem:[#allocation17] sm:$0xf] }
 0xb59   : > { %5368 = vmatmul.bf16.vlgmr.msra.gmra.mxu2 %v5291_v59  ;;  %v6375_v59 = vld [vmem:[#allocation17 + $0x4] sm:$0xf0] }
 0xb5a   : > { %v6208_v9 = vor.u32 %v6375_v59, %v6207_v53  ;;  %v6956_v59 = vld [vmem:[%s9695_s10] ss:$0 sm:$0xff] }
 0xb5b   : > { %5526 = vmatpush.bf16.msra.mxu0 %v6220_v45 }
 0xbdc   : > { %v5369_v58 = vpop.f32.mrf.mxu2 }
 0xbdd   : > { %v5370_v25 = vadd.f32 %v6951_v28, %v5369_v58  ;;  %v6402_v28 = vld [vmem:[#allocation19 + $0x60] sm:$0xff] }
 0xbde   : > { %5685 = vmatpush.bf16.msrb.mxu2 %v6402_v28 }
 0xbdf   : > { %v5373_v46 = vadd.f32 %v5370_v25, %v8925_v63  ;;  %v6255_v63 = vld [vmem:[#allocation17 + $0x60] sm:$0xf]  ;;  %v6374_v25 = vld [vmem:[#allocation17 + $0x4] sm:$0xf] }
 0xbe0   : > { %v6256_v19 = vor.u32 %v6387_v1, %v6255_v63  ;;  %v6952_v63 = vld [vmem:[%s9686_s3] ss:$0 sm:$0xff] }
 0xbe1   : > { %5376 = vadd.xlane.f32.xlu0 %v5373_v46 }
 0xbe2   : > { %5508 = vmatpush.bf16.msra.mxu3 %v6256_v19  ;;  %5686 = vmatpush.bf16.msrb.mxu2 %v6401_v7  ;;  %v6953_v19 = vld [vmem:[%s9687_s25] ss:$0 sm:$0xff]  ;;  %s5742_s25 = sshll.u32 %s8097_s14, 4  ;;  %s5743_s25 = int_to_ptr.vmem [resolvable:$true] %s5742_s25 }
 0xbe4   : > { %v5371_v0 = vpop.f32.mrf.mxu2 }
 0xbe5   : > { %v6394_v0 = vld [vmem:[#allocation19 + $0x20] sm:$0xff] }
 0xbe6   : > { %5509 = vmatpush.bf16.msra.mxu3 %v6248_v32  ;;  %5672 = vmatpush.bf16.msra.mxu1 %v6394_v0  ;;  %v6391_v32 = vld [vmem:[#allocation19 + $0x8] sm:$0xff] }
 0xbea   : > { %5510 = vmatpush.bf16.msra.mxu3 %v6240_v5  ;;  %5673 = vmatpush.bf16.msra.mxu1 %v6393_v20 }
 0xbee   : > { %5511 = vmatpush.bf16.msra.mxu3 %v6232_v54  ;;  %5674 = vmatpush.bf16.msra.mxu1 %v6392_v42 }
 0xbf2   : > { %5512 = vmatpush.bf16.msra.mxu3 %v6224_v61  ;;  %5675 = vmatpush.bf16.msra.mxu1 %v6391_v32 }
 0xbf6   : > { %5513 = vmatpush.bf16.msra.mxu3 %v6216_v2  ;;  %5676 = vmatpush.bf16.msra.mxu1 %v6390_v49 }
 0xbfa   : > { %5514 = vmatpush.bf16.msra.mxu3 %v6208_v9 }
 0xc54   : > { %v5377_v37 = vpop.xlane.xlu0 %5376 }
 0xc55   : > { %v5378_v12 = vmul.f32 %v5377_v37, %v9685_v57 }
 0xc57   : > { %v9451_v11 = vsub.f32 %v5373_v46, %v5378_v12  ;;  %v6209_v46 = vld [vmem:[#allocation17 + $0x8] sm:$0xf0]  ;;  %v6400_v12 = vld [vmem:[#allocation19 + $0x50] sm:$0xff] }
 0xc58   : > { %v6212_v38 = vor.u32 %v6374_v25, %v6209_v46  ;;  %5687 = vmatpush.bf16.msrb.mxu2 %v6400_v12 }
 0xc59   : > { %v5380_v10 = vmul.f32 %v9451_v11, %v9451_v11 }
 0xc5a   : > { %5527 = vmatpush.bf16.msra.mxu0 %v6212_v38 }
 0xc5b   : > { %5381 = vadd.xlane.f32.xlu2 %v5380_v10 }
 0xc5c   : > { %5688 = vmatpush.bf16.msrb.mxu2 %v6399_v22 }
 0xc60   : > { %5689 = vmatpush.bf16.msrb.mxu2 %v6398_v17 }
 0xcce   : > { %v5382_v31 = vpop.xlane.xlu2 %5381 }
 0xccf   : > { %v5383_v60 = vmul.f32 %v5382_v31, %v9685_v57 }
 0xcd1   : > { %v5384_v16 = vadd.f32 1e-05, %v5383_v60 }
 0xcd3   : > { %6993 = vrsqrt.f32 %v5384_v16  ;;  %vm5391_vm15 = vweird.f32 %v5384_v16 }
 0xcd9   : > { %v6994_v62 = vpop.eup %6993 }
 0xcda   : > { %v5386_v58 = vmul.f32 %v6994_v62, %v5384_v16  ;;  %vm5392_vm14 = vweird.f32 %v6994_v62 }
 0xcdb   : > { %vm5393_vm0 = vmor %vm5391_vm15, %vm5392_vm14 }
 0xcdc   : > { %v5387_v39 = vmul.f32 %v6994_v62, %v5386_v58 }
 0xcde   : > { %v5388_v13 = vmul.f32 0.5, %v5387_v39 }
 0xce0   : > { %v5389_v37 = vsub.f32 1.5, %v5388_v13 }
 0xce2   : > { %v5390_v10 = vmul.f32 %v6994_v62, %v5389_v37 }
 0xce4   : > { %v5394_v1 = vsel %vm5393_vm0, %v6994_v62, %v5390_v10 }
 0xce5   : > { %v5395_v35 = vmul.f32 %v5394_v1, %v9451_v11  ;;  %v5421_v11 = vld [vmem:[%s9688_s9] sm:$0x3]  ;;  %s7341_s9 = sshra.s32 %s5745_s26, 4  ;;  %s7342_s9 = int_to_ptr.hbm [resolvable:$true] %s7341_s9 }
 0xce6   : > { %v5424_v33 = vperm.slane %v5421_v11, 1  ;;  %v5423_v5 = vperm.slane %v5421_v11, 0  ;;  %s7343_s8 = scalar_lea.hbm %s7342_s9, 8  ;;  %p7348_p5 = scmp.lt.s32.totalorder %s7342_s9, %s9693_s0 }
 0xce7   : > { %v5399_v47 = vmul.f32 %v6952_v63, %v5395_v35  ;;  %p7344_p11 = scmp.ne.s32.totalorder %s7342_s9, %s7343_s8  ;;  %p7349_p7 = scmp.lt.s32.totalorder %s7347_s16, %s7343_s8 }
 0xce9   : > { %v5403_v55 = vadd.f32 %v6953_v19, %v5399_v47  ;;  %p7345_p12 = pnand %p7344_p11, %p7980_p10  ;;  %p7350_p8 = por %p7349_p7, %p7348_p5 }
 0xceb   : > { %v5404_v14 = vpack.c.bf16 %v5403_v55, %v5403_v55  ;;  %p7346_p2 = pneg %p7345_p12 }
 0xced   : > { %5515 = vmatmul.bf16.vlgmr.msra.gmra.mxu3 %v5404_v14  ;;  %5528 = vmatmul.bf16.vlgmr.msra.gmra.mxu0 %v5404_v14  ;;  %p7351_p6 = pnand %p7350_p8, %p7346_p2 }
 0xd6a   : > { %v5529_v23 = vpop.f32.mrf.mxu0 }
 0xd6b   : > { %v5530_v50 = vadd.f32 %v5529_v23, %v5424_v33 }
 0xd6d   : > { %v5534_v21 = vmax.f32 %v5530_v50, 0.0 }
 0xd6f   : > { %v5536_v24 = vpack.c.bf16 %v5534_v21, %v5534_v21 }
 0xd70   : > { %v5516_v29 = vpop.f32.mrf.mxu3 }
 0xd71   : > { %v5517_v3 = vadd.f32 %v5516_v29, %v5423_v5  ;;  %5690 = vmatmul.bf16.vlgmr.msrb.gmra.mxu2 %v5536_v24 }
 0xd72   : > { %v5531_v31 = vpop.f32.mrf.mxu0 }
 0xd73   : > { %v5533_v27 = vmax.f32 %v5517_v3, 0.0 }
 0xd75   : > { %v5535_v30 = vpack.c.bf16 %v5533_v27, %v5533_v27 }
 0xd77   : > { %5677 = vmatmul.bf16.vlgmr.msra.gmra.mxu1 %v5535_v30 }
 0xd78   : > { %v5518_v60 = vpop.f32.mrf.mxu3 }
 0xdf4   : > { %v5678_v18 = vpop.f32.mrf.mxu1  ;;  %v5691_v54 = vpop.f32.mrf.mxu2 }
 0xdf5   : > { %v5679_v26 = vadd.f32 %v6954_v41, %v5678_v18 }
 0xdf7   : > { %v5692_v16 = vadd.f32 %v5691_v54, %v5679_v26 }
 0xdf9   : > { %v5695_v56 = vadd.f32 %v5692_v16, %v5403_v55 }
 0xdfb   : > { %5698 = vadd.xlane.f32.xlu1 %v5695_v56 }
 0xdfc   : > { %v5680_v36 = vpop.f32.mrf.mxu1  ;;  %v5693_v40 = vpop.f32.mrf.mxu2 }
 0xe6e   : > { %v5699_v34 = vpop.xlane.xlu1 %5698 }
 0xe6f   : > { %v5700_v52 = vmul.f32 %v5699_v34, %v9685_v57 }
 0xe71   : > { %v5701_v4 = vsub.f32 %v5695_v56, %v5700_v52 }
 0xe73   : > { %v5702_v61 = vmul.f32 %v5701_v4, %v5701_v4 }
 0xe75   : > { %5703 = vadd.xlane.f32.xlu0 %v5702_v61 }
 0xee8   : > { %v5704_v43 = vpop.xlane.xlu0 %5703 }
 0xee9   : > { %v5705_v6 = vmul.f32 %v5704_v43, %v9685_v57  ;;  %v6955_v57 = vld [vmem:[%s9692_s19] ss:$0 sm:$0xff] }
 0xeeb   : > { %v5706_v48 = vadd.f32 1e-05, %v5705_v6 }
 0xeed   : > { %6995 = vrsqrt.f32 %v5706_v48  ;;  %vm5713_vm2 = vweird.f32 %v5706_v48 }
 0xef3   : > { %v6996_v15 = vpop.eup %6995 }
 0xef4   : > { %v5708_v8 = vmul.f32 %v6996_v15, %v5706_v48  ;;  %vm5714_vm1 = vweird.f32 %v6996_v15 }
 0xef5   : > { %vm5715_vm3 = vmor %vm5713_vm2, %vm5714_vm1 }
 0xef6   : > { %v5709_v44 = vmul.f32 %v6996_v15, %v5708_v8 }
 0xef8   : > { %v5710_v51 = vmul.f32 0.5, %v5709_v44 }
 0xefa   : > { %v5711_v2 = vsub.f32 1.5, %v5710_v51 }
 0xefc   : > { %v5712_v62 = vmul.f32 %v6996_v15, %v5711_v2 }
 0xefe   : > { %v5716_v45 = vsel %vm5715_vm3, %v6996_v15, %v5712_v62 }
 0xeff   : > { %v5717_v53 = vmul.f32 %v5716_v45, %v5701_v4 }
 0xf01   : > { %v5721_v28 = vmul.f32 %v6955_v57, %v5717_v53 }
 0xf03   : > { %v5725_v58 = vadd.f32 %v6956_v59, %v5721_v28 }
 0xf05   : > { %5726 = vst [vmem:[%s8097_s14] sm:$0xff] %v5725_v58 }
 0xf06   : > { %7354 = shalt.err (!%p7351_p6)
}
 0xf07   : > { %6440 = dma.vmem_to_hbm [thread:$0]  (%p7980_p10), %s5743_s25, 128, %s5745_s26, %s5728_s28  }
 0xf08 PF: > { %s9696_s15 = sld [smem:[#allocation29_spill]]  ;;  %p6494_p13 = scmp.ge.s32.totalorder %s7553_s7, 2 }
 0xf0a   : > { %p6478_p9 = pnand %p6494_p13, %p7986_p4 }
 0xf0c   : > { %p6479_p0 = pneg %p6478_p9 }
 0xf0e   : > { %s5756_s14 = sand.u32 1, %s9696_s15  }
 0xf0f   : > { %s5757_s22 = scalar_lea.sflag [#allocation4], %s5756_s14 }
 0xf10   : > { %7508 = dma.done.wait (%p6479_p0), %s5757_s22, 128  }
 0xf11   : > { %7510 = vsyncadd (%p6479_p0), %s5757_s22, 4294967168  ;;  %s48_s7 = sadd.s32 1, %s7553_s7   ;;  %s9697_s4 = sld [smem:[#allocation28_spill]] }
 0xf12   : > { %p45_p1 = scmp.ge.s32.totalorder %s48_s7, 6   ;;  %s9698_s12 = sld [smem:[#allocation40_spill]] }
 0xf13   : > { %s9699_s26 = sld [smem:[#allocation32_spill]]  ;;  %s9703_s30 = smov %s7521_s24 }
 0xf14   : > { %s9700_s2 = sld [smem:[#allocation33_spill]]  ;;  %s9704_s24 = smov %s7991_s11 }
 0xf15   : > { %s9701_s6 = sld [smem:[#allocation36_spill]]  ;;  %s9705_s25 = smov %s7529_s5 }
 0xf16   : > { %s9702_s27 = sld [smem:[#allocation37_spill]]  ;;  %s9706_s5 = smov %s7533_s1 }
 0xf17   :  { %47 = sbr.rel (!%p45_p1) target bundleno = 41 (0x29), region = 249 }
 0xf18   : > { %s9707_s1 = smov %s9698_s12 }
 0xf1c   :  { %5763 = vsyncpa [#allocation3], 1 }
 0xf1d   :  { %5765 = vsyncpa [#allocation3 + $0x1], 1 }
 0xf1e   :  { %5766 = vsyncpa [#allocation6], 1 }
 0xf1f   :  { %5768 = vsyncpa [#allocation6 + $0x1], 1 }
 0xf20   :  { %5769 = vsyncpa [#allocation9], 1 }
 0xf21   :  { %5771 = vsyncpa [#allocation9 + $0x1], 1 }
 0xf22   :  { %5772 = vsyncpa [#allocation12], 1 }
 0xf23   :  { %5773 = vsyncpa [#allocation15], 1 }
 0xf24   :  { %5774 = vsyncpa [#allocation18], 1 }
 0xf25   :  { %5775 = vsyncpa [#allocation4], 1 }
 0xf26   :  { %5777 = vsyncpa [#allocation4 + $0x1], 1 }

</bundles_post_ra>
